<compile_context>
chip_gen: v7x
topology: tpu7x:2x2x1
jax: 0.10.0
libtpu: 0.0.40
codegen_flags: <defaults>
</compile_context>

<pallas_src>
import jax
import jax.numpy as jnp
from jax.experimental import pallas as pl
from jax.experimental.pallas import tpu as pltpu


def _round_up(x, m):
    return ((x + m - 1) // m) * m


def _make_kernel(n, c1, c2, c3, h):
    """Builds the fused discriminator kernel for (n, h, h) inputs (h == 32)."""
    ho1, ho2, ho3 = h // 2, h // 4, h // 8   # 16, 8, 4 for a 32x32 image

    def leaky(v):
        return jnp.where(v >= 0.0, v, 0.2 * v)

    def batchnorm(v, eps=1e-5):
        # PyTorch training-mode BatchNorm2d: biased batch stats, gamma=1, beta=0.
        m = jnp.mean(v, axis=0, keepdims=True)
        var = jnp.mean(jnp.square(v - m), axis=0, keepdims=True)
        return (v - m) * jax.lax.rsqrt(var + eps)

    def conv_taps(src_ref, w_ref, k, ho, cout):
        """Stride-2 conv as a sum of k*k tap GEMMs; f32 accumulation."""
        acc = jnp.zeros((n * ho * ho, cout), jnp.float32)
        for kh in range(k):
            for kw in range(k):
                a = src_ref[:, pl.ds(kh, ho, stride=2),
                            pl.ds(kw, ho, stride=2), :]
                a = a.reshape(n * ho * ho, a.shape[-1]).astype(jnp.bfloat16)
                acc = acc + jnp.dot(a, w_ref[kh * k + kw],
                                    preferred_element_type=jnp.float32)
        return acc

    def kernel(x_ref, w1_ref, w2_ref, w3_ref, w4_ref, out_ref, feat_ref,
               pad2_ref, pad3_ref):
        # ---- layer1: Conv(nc -> nf, 4, 2, 1) + LeakyReLU ------------------
        y1 = leaky(conv_taps(x_ref, w1_ref, 4, ho1, c1))

        # Hand the activation to layer2 through a zero-padded VMEM scratch
        # (spatial pad=1), never touching HBM.
        pad2_ref[...] = jnp.zeros(pad2_ref.shape, pad2_ref.dtype)
        pad2_ref[:, 1:1 + ho1, 1:1 + ho1, :] = y1.reshape(n, ho1, ho1, c1)

        # ---- layer2: Conv(nf -> 2nf, 4, 2, 1) + BatchNorm + LeakyReLU -----
        y2 = leaky(batchnorm(conv_taps(pad2_ref, w2_ref, 4, ho2, c2)))

        pad3_ref[...] = jnp.zeros(pad3_ref.shape, pad3_ref.dtype)
        pad3_ref[:, 1:1 + ho2, 1:1 + ho2, :] = y2.reshape(n, ho2, ho2, c2)

        # ---- layer3: Conv(2nf -> 4nf, 3, 2, 1) + BatchNorm + LeakyReLU ----
        y3 = leaky(batchnorm(conv_taps(pad3_ref, w3_ref, 3, ho3, c3)))

        y3r = y3.reshape(n, ho3 * ho3, c3)          # lane-dense (c3 % 128 == 0)
        feat_ref[...] = y3r

        # ---- layer4 folded into the epilogue: Conv(4nf->1, 4, 1, 0)+Sigmoid
        # Layer3's 4x4 output equals layer4's receptive field, so the conv is
        # a single per-sample dot: a cheap VPU multiply + reduction.
        prod = y3r * w4_ref[...]                    # (n, 16, c3) * (16, c3)
        logits = jnp.sum(jnp.sum(prod, axis=2), axis=1, keepdims=True)  # (n, 1)
        out_ref[...] = jax.nn.sigmoid(logits)

    return kernel


def init_params(key, num_feature_maps, num_color_channels):
    nf, nc = num_feature_maps, num_color_channels
    k1, k2, k3, k4 = jax.random.split(key, 4)
    return {
        "w1": 0.02 * jax.random.normal(k1, (nf, nc, 4, 4), jnp.float32),
        "w2": 0.02 * jax.random.normal(k2, (nf * 2, nf, 4, 4), jnp.float32),
        "w3": 0.02 * jax.random.normal(k3, (nf * 4, nf * 2, 3, 3), jnp.float32),
        "w4": 0.02 * jax.random.normal(k4, (1, nf * 4, 4, 4), jnp.float32),
    }


def _conv_w_to_taps(w, cin_pad, cout_pad):
    """(Cout, Cin, kh, kw) -> (kh*kw, Cin_pad, Cout_pad) bf16, zero padded."""
    cout, cin, kh, kw = w.shape
    t = jnp.transpose(w, (2, 3, 1, 0)).reshape(kh * kw, cin, cout)
    t = jnp.pad(t, ((0, 0), (0, cin_pad - cin), (0, cout_pad - cout)))
    return t.astype(jnp.bfloat16)


def discriminator_forward(x_nchw, params):
    n, nc, h, w = x_nchw.shape
    nf = params["w1"].shape[0]
    assert h == w and h // 8 == 4, (
        "layer4 fold assumes the canonical 32x32 DCGAN geometry")
    # TODO(synk): other image sizes need a separate layer4 conv path.

    c0p = _round_up(nc, 8)           # small input-channel pad for alignment
    c1 = _round_up(nf, 128)          # lane-dense conv output widths
    c2 = _round_up(2 * nf, 128)
    c3 = _round_up(4 * nf, 128)
    ho1, ho2, ho3 = h // 2, h // 4, h // 8

    # NCHW -> NHWC, spatial zero-pad for layer1 (pad=1), pad channels to c0p.
    x = jnp.transpose(x_nchw, (0, 2, 3, 1)).astype(jnp.float32)
    x = jnp.pad(x, ((0, 0), (1, 1), (1, 1), (0, c0p - nc)))

    w1g = _conv_w_to_taps(params["w1"], c0p, c1)
    w2g = _conv_w_to_taps(params["w2"], c1, c2)
    w3g = _conv_w_to_taps(params["w3"], c2, c3)
    # layer4 weight (1, 4nf, 4, 4) -> (kh*kw, Cin_pad) f32 for the folded epilogue.
    w4g = jnp.transpose(params["w4"][0], (1, 2, 0)).reshape(16, 4 * nf)
    w4g = jnp.pad(w4g, ((0, 0), (0, c3 - 4 * nf))).astype(jnp.float32)

    kernel = _make_kernel(n, c1, c2, c3, h)
    out2d, feat = pl.pallas_call(
        kernel,
        out_shape=(jax.ShapeDtypeStruct((n, 1), jnp.float32),
                   jax.ShapeDtypeStruct((n, ho3 * ho3, c3), jnp.float32)),
        in_specs=[pl.BlockSpec(memory_space=pltpu.MemorySpace.VMEM)
                  for _ in range(5)],
        out_specs=(pl.BlockSpec(memory_space=pltpu.MemorySpace.VMEM),
                   pl.BlockSpec(memory_space=pltpu.MemorySpace.VMEM)),
        scratch_shapes=[
            pltpu.VMEM((n, ho1 + 2, ho1 + 2, c1), jnp.float32),  # layer2 input
            pltpu.VMEM((n, ho2 + 2, ho2 + 2, c2), jnp.float32),  # layer3 input
        ],
        compiler_params=pltpu.CompilerParams(
            vmem_limit_bytes=32 * 1024 * 1024),
    )(x, w1g, w2g, w3g, w4g)

    out = out2d[:, 0]                                   # == view(-1,1).squeeze(1)
    feature = feat.reshape(n, ho3, ho3, c3)[..., :4 * nf]
    feature = jnp.transpose(feature, (0, 3, 1, 2))      # back to NCHW
    return out, feature


def _reference_forward(x_nchw, params):
    """Pure-JAX (XLA conv) reference with PyTorch training-mode semantics."""
    def conv(v, w_, s, p):
        return jax.lax.conv_general_dilated(
            v, w_, (s, s), [(p, p), (p, p)],
            dimension_numbers=("NCHW", "OIHW", "NCHW"))

    def bn(v, eps=1e-5):
        m = jnp.mean(v, axis=(0, 2, 3), keepdims=True)
        var = jnp.mean(jnp.square(v - m), axis=(0, 2, 3), keepdims=True)
        return (v - m) * jax.lax.rsqrt(var + eps)

    def lrelu(v):
        return jnp.where(v >= 0.0, v, 0.2 * v)

    y = lrelu(conv(x_nchw, params["w1"], 2, 1))
    y = lrelu(bn(conv(y, params["w2"], 2, 1)))
    y = lrelu(bn(conv(y, params["w3"], 2, 1)))
    feature = y
    out = jax.nn.sigmoid(conv(y, params["w4"], 1, 0))
    return out.reshape(-1), feature


if __name__ == "__main__":
    key = jax.random.PRNGKey(0)
    kx, kp = jax.random.split(key)

    num_feature_maps, num_color_channels = 8, 3
    batch, image_size = 2, 32          # 32 -> 16 -> 8 -> 4 -> 1 (DCGAN geometry)
    x = jax.random.normal(
        kx, (batch, num_color_channels, image_size, image_size), jnp.float32)
    params = init_params(kp, num_feature_maps, num_color_channels)

    fwd = jax.jit(discriminator_forward)
    out, feature = fwd(x, params)
    jax.block_until_ready((out, feature))

    assert out.shape == (batch,), out.shape
    assert feature.shape == (batch, num_feature_maps * 4, 4, 4), feature.shape
    assert bool(jnp.all((out >= 0.0) & (out <= 1.0)))

    # Numerical check vs. an XLA conv reference; tolerance covers the bf16
    # MXU operands used inside the Pallas kernel (f32 accumulation).
    out_ref, feat_ref = _reference_forward(x, params)
    assert bool(jnp.max(jnp.abs(out - out_ref)) < 5e-2), "out mismatch"
    assert bool(jnp.max(jnp.abs(feature - feat_ref)) < 1.5e-1), "feature mismatch"

    print("KERNEL_OK")
</pallas_src>

<mosaic_0001>
module attributes {stable_mosaic.version = 11 : i64} {
  func.func @kernel(%arg0: memref<2x34x34x8xf32, #tpu.memory_space<vmem>>, %arg1: memref<16x8x128xbf16, #tpu.memory_space<vmem>>, %arg2: memref<16x128x128xbf16, #tpu.memory_space<vmem>>, %arg3: memref<9x128x128xbf16, #tpu.memory_space<vmem>>, %arg4: memref<16x128xf32, #tpu.memory_space<vmem>>, %arg5: memref<2x1xf32, #tpu.memory_space<vmem>>, %arg6: memref<2x16x128xf32, #tpu.memory_space<vmem>>, %arg7: memref<2x18x18x128xf32, #tpu.memory_space<vmem>>, %arg8: memref<2x10x10x128xf32, #tpu.memory_space<vmem>>) attributes {dimension_semantics = [], scalar_prefetch = 0 : i64, scratch_operands = 2 : i64, tpu.core_type = #tpu.core_type<tc>} {
    %cst = arith.constant 0.000000e+00 : f32
    %0 = vector.broadcast %cst : f32 to vector<512x128xf32>
    %c0 = arith.constant 0 : index
    %c0_0 = arith.constant 0 : index
    %c0_1 = arith.constant 0 : index
    %c0_2 = arith.constant 0 : index
    %1 = tpu.strided_load %arg0[%c0, %c0_0, %c0_1, %c0_2] {strides = array<i32: 1, 2, 2, 1>} : memref<2x34x34x8xf32, #tpu.memory_space<vmem>>, vector<2x16x16x8xf32>
    %2 = vector.shape_cast %1 : vector<2x16x16x8xf32> to vector<512x8xf32>
    %3 = arith.truncf %2 : vector<512x8xf32> to vector<512x8xbf16>
    %c0_3 = arith.constant 0 : index
    %c0_4 = arith.constant 0 : index
    %c0_5 = arith.constant 0 : index
    %4 = vector.load %arg1[%c0_3, %c0_4, %c0_5] : memref<16x8x128xbf16, #tpu.memory_space<vmem>>, vector<1x8x128xbf16>
    %5 = vector.shape_cast %4 : vector<1x8x128xbf16> to vector<8x128xbf16>
    %cst_6 = arith.constant dense<0.000000e+00> : vector<512x128xf32>
    %6 = tpu.matmul %3, %5, %cst_6 {dimension_numbers = #tpu.dot_dimension_numbers<[1], [0], [0], [1], [0, 0, 1, 1], [], []>} : vector<512x8xbf16>, vector<8x128xbf16>, vector<512x128xf32> -> vector<512x128xf32>
    %7 = arith.addf %0, %6 : vector<512x128xf32>
    %c0_7 = arith.constant 0 : index
    %c0_8 = arith.constant 0 : index
    %c1 = arith.constant 1 : index
    %c0_9 = arith.constant 0 : index
    %8 = tpu.strided_load %arg0[%c0_7, %c0_8, %c1, %c0_9] {strides = array<i32: 1, 2, 2, 1>} : memref<2x34x34x8xf32, #tpu.memory_space<vmem>>, vector<2x16x16x8xf32>
    %9 = vector.shape_cast %8 : vector<2x16x16x8xf32> to vector<512x8xf32>
    %10 = arith.truncf %9 : vector<512x8xf32> to vector<512x8xbf16>
    %c1_10 = arith.constant 1 : index
    %c0_11 = arith.constant 0 : index
    %c0_12 = arith.constant 0 : index
    %11 = vector.load %arg1[%c1_10, %c0_11, %c0_12] : memref<16x8x128xbf16, #tpu.memory_space<vmem>>, vector<1x8x128xbf16>
    %12 = vector.shape_cast %11 : vector<1x8x128xbf16> to vector<8x128xbf16>
    %cst_13 = arith.constant dense<0.000000e+00> : vector<512x128xf32>
    %13 = tpu.matmul %10, %12, %cst_13 {dimension_numbers = #tpu.dot_dimension_numbers<[1], [0], [0], [1], [0, 0, 1, 1], [], []>} : vector<512x8xbf16>, vector<8x128xbf16>, vector<512x128xf32> -> vector<512x128xf32>
    %14 = arith.addf %7, %13 : vector<512x128xf32>
    %c0_14 = arith.constant 0 : index
    %c0_15 = arith.constant 0 : index
    %c2 = arith.constant 2 : index
    %c0_16 = arith.constant 0 : index
    %15 = tpu.strided_load %arg0[%c0_14, %c0_15, %c2, %c0_16] {strides = array<i32: 1, 2, 2, 1>} : memref<2x34x34x8xf32, #tpu.memory_space<vmem>>, vector<2x16x16x8xf32>
    %16 = vector.shape_cast %15 : vector<2x16x16x8xf32> to vector<512x8xf32>
    %17 = arith.truncf %16 : vector<512x8xf32> to vector<512x8xbf16>
    %c2_17 = arith.constant 2 : index
    %c0_18 = arith.constant 0 : index
    %c0_19 = arith.constant 0 : index
    %18 = vector.load %arg1[%c2_17, %c0_18, %c0_19] : memref<16x8x128xbf16, #tpu.memory_space<vmem>>, vector<1x8x128xbf16>
    %19 = vector.shape_cast %18 : vector<1x8x128xbf16> to vector<8x128xbf16>
    %cst_20 = arith.constant dense<0.000000e+00> : vector<512x128xf32>
    %20 = tpu.matmul %17, %19, %cst_20 {dimension_numbers = #tpu.dot_dimension_numbers<[1], [0], [0], [1], [0, 0, 1, 1], [], []>} : vector<512x8xbf16>, vector<8x128xbf16>, vector<512x128xf32> -> vector<512x128xf32>
    %21 = arith.addf %14, %20 : vector<512x128xf32>
    %c0_21 = arith.constant 0 : index
    %c0_22 = arith.constant 0 : index
    %c3 = arith.constant 3 : index
    %c0_23 = arith.constant 0 : index
    %22 = tpu.strided_load %arg0[%c0_21, %c0_22, %c3, %c0_23] {strides = array<i32: 1, 2, 2, 1>} : memref<2x34x34x8xf32, #tpu.memory_space<vmem>>, vector<2x16x16x8xf32>
    %23 = vector.shape_cast %22 : vector<2x16x16x8xf32> to vector<512x8xf32>
    %24 = arith.truncf %23 : vector<512x8xf32> to vector<512x8xbf16>
    %c3_24 = arith.constant 3 : index
    %c0_25 = arith.constant 0 : index
    %c0_26 = arith.constant 0 : index
    %25 = vector.load %arg1[%c3_24, %c0_25, %c0_26] : memref<16x8x128xbf16, #tpu.memory_space<vmem>>, vector<1x8x128xbf16>
    %26 = vector.shape_cast %25 : vector<1x8x128xbf16> to vector<8x128xbf16>
    %cst_27 = arith.constant dense<0.000000e+00> : vector<512x128xf32>
    %27 = tpu.matmul %24, %26, %cst_27 {dimension_numbers = #tpu.dot_dimension_numbers<[1], [0], [0], [1], [0, 0, 1, 1], [], []>} : vector<512x8xbf16>, vector<8x128xbf16>, vector<512x128xf32> -> vector<512x128xf32>
    %28 = arith.addf %21, %27 : vector<512x128xf32>
    %c0_28 = arith.constant 0 : index
    %c1_29 = arith.constant 1 : index
    %c0_30 = arith.constant 0 : index
    %c0_31 = arith.constant 0 : index
    %29 = tpu.strided_load %arg0[%c0_28, %c1_29, %c0_30, %c0_31] {strides = array<i32: 1, 2, 2, 1>} : memref<2x34x34x8xf32, #tpu.memory_space<vmem>>, vector<2x16x16x8xf32>
    %30 = vector.shape_cast %29 : vector<2x16x16x8xf32> to vector<512x8xf32>
    %31 = arith.truncf %30 : vector<512x8xf32> to vector<512x8xbf16>
    %c4 = arith.constant 4 : index
    %c0_32 = arith.constant 0 : index
    %c0_33 = arith.constant 0 : index
    %32 = vector.load %arg1[%c4, %c0_32, %c0_33] : memref<16x8x128xbf16, #tpu.memory_space<vmem>>, vector<1x8x128xbf16>
    %33 = vector.shape_cast %32 : vector<1x8x128xbf16> to vector<8x128xbf16>
    %cst_34 = arith.constant dense<0.000000e+00> : vector<512x128xf32>
    %34 = tpu.matmul %31, %33, %cst_34 {dimension_numbers = #tpu.dot_dimension_numbers<[1], [0], [0], [1], [0, 0, 1, 1], [], []>} : vector<512x8xbf16>, vector<8x128xbf16>, vector<512x128xf32> -> vector<512x128xf32>
    %35 = arith.addf %28, %34 : vector<512x128xf32>
    %c0_35 = arith.constant 0 : index
    %c1_36 = arith.constant 1 : index
    %c1_37 = arith.constant 1 : index
    %c0_38 = arith.constant 0 : index
    %36 = tpu.strided_load %arg0[%c0_35, %c1_36, %c1_37, %c0_38] {strides = array<i32: 1, 2, 2, 1>} : memref<2x34x34x8xf32, #tpu.memory_space<vmem>>, vector<2x16x16x8xf32>
    %37 = vector.shape_cast %36 : vector<2x16x16x8xf32> to vector<512x8xf32>
    %38 = arith.truncf %37 : vector<512x8xf32> to vector<512x8xbf16>
    %c5 = arith.constant 5 : index
    %c0_39 = arith.constant 0 : index
    %c0_40 = arith.constant 0 : index
    %39 = vector.load %arg1[%c5, %c0_39, %c0_40] : memref<16x8x128xbf16, #tpu.memory_space<vmem>>, vector<1x8x128xbf16>
    %40 = vector.shape_cast %39 : vector<1x8x128xbf16> to vector<8x128xbf16>
    %cst_41 = arith.constant dense<0.000000e+00> : vector<512x128xf32>
    %41 = tpu.matmul %38, %40, %cst_41 {dimension_numbers = #tpu.dot_dimension_numbers<[1], [0], [0], [1], [0, 0, 1, 1], [], []>} : vector<512x8xbf16>, vector<8x128xbf16>, vector<512x128xf32> -> vector<512x128xf32>
    %42 = arith.addf %35, %41 : vector<512x128xf32>
    %c0_42 = arith.constant 0 : index
    %c1_43 = arith.constant 1 : index
    %c2_44 = arith.constant 2 : index
    %c0_45 = arith.constant 0 : index
    %43 = tpu.strided_load %arg0[%c0_42, %c1_43, %c2_44, %c0_45] {strides = array<i32: 1, 2, 2, 1>} : memref<2x34x34x8xf32, #tpu.memory_space<vmem>>, vector<2x16x16x8xf32>
    %44 = vector.shape_cast %43 : vector<2x16x16x8xf32> to vector<512x8xf32>
    %45 = arith.truncf %44 : vector<512x8xf32> to vector<512x8xbf16>
    %c6 = arith.constant 6 : index
    %c0_46 = arith.constant 0 : index
    %c0_47 = arith.constant 0 : index
    %46 = vector.load %arg1[%c6, %c0_46, %c0_47] : memref<16x8x128xbf16, #tpu.memory_space<vmem>>, vector<1x8x128xbf16>
    %47 = vector.shape_cast %46 : vector<1x8x128xbf16> to vector<8x128xbf16>
    %cst_48 = arith.constant dense<0.000000e+00> : vector<512x128xf32>
    %48 = tpu.matmul %45, %47, %cst_48 {dimension_numbers = #tpu.dot_dimension_numbers<[1], [0], [0], [1], [0, 0, 1, 1], [], []>} : vector<512x8xbf16>, vector<8x128xbf16>, vector<512x128xf32> -> vector<512x128xf32>
    %49 = arith.addf %42, %48 : vector<512x128xf32>
    %c0_49 = arith.constant 0 : index
    %c1_50 = arith.constant 1 : index
    %c3_51 = arith.constant 3 : index
    %c0_52 = arith.constant 0 : index
    %50 = tpu.strided_load %arg0[%c0_49, %c1_50, %c3_51, %c0_52] {strides = array<i32: 1, 2, 2, 1>} : memref<2x34x34x8xf32, #tpu.memory_space<vmem>>, vector<2x16x16x8xf32>
    %51 = vector.shape_cast %50 : vector<2x16x16x8xf32> to vector<512x8xf32>
    %52 = arith.truncf %51 : vector<512x8xf32> to vector<512x8xbf16>
    %c7 = arith.constant 7 : index
    %c0_53 = arith.constant 0 : index
    %c0_54 = arith.constant 0 : index
    %53 = vector.load %arg1[%c7, %c0_53, %c0_54] : memref<16x8x128xbf16, #tpu.memory_space<vmem>>, vector<1x8x128xbf16>
    %54 = vector.shape_cast %53 : vector<1x8x128xbf16> to vector<8x128xbf16>
    %cst_55 = arith.constant dense<0.000000e+00> : vector<512x128xf32>
    %55 = tpu.matmul %52, %54, %cst_55 {dimension_numbers = #tpu.dot_dimension_numbers<[1], [0], [0], [1], [0, 0, 1, 1], [], []>} : vector<512x8xbf16>, vector<8x128xbf16>, vector<512x128xf32> -> vector<512x128xf32>
    %56 = arith.addf %49, %55 : vector<512x128xf32>
    %c0_56 = arith.constant 0 : index
    %c2_57 = arith.constant 2 : index
    %c0_58 = arith.constant 0 : index
    %c0_59 = arith.constant 0 : index
    %57 = tpu.strided_load %arg0[%c0_56, %c2_57, %c0_58, %c0_59] {strides = array<i32: 1, 2, 2, 1>} : memref<2x34x34x8xf32, #tpu.memory_space<vmem>>, vector<2x16x16x8xf32>
    %58 = vector.shape_cast %57 : vector<2x16x16x8xf32> to vector<512x8xf32>
    %59 = arith.truncf %58 : vector<512x8xf32> to vector<512x8xbf16>
    %c8 = arith.constant 8 : index
    %c0_60 = arith.constant 0 : index
    %c0_61 = arith.constant 0 : index
    %60 = vector.load %arg1[%c8, %c0_60, %c0_61] : memref<16x8x128xbf16, #tpu.memory_space<vmem>>, vector<1x8x128xbf16>
    %61 = vector.shape_cast %60 : vector<1x8x128xbf16> to vector<8x128xbf16>
    %cst_62 = arith.constant dense<0.000000e+00> : vector<512x128xf32>
    %62 = tpu.matmul %59, %61, %cst_62 {dimension_numbers = #tpu.dot_dimension_numbers<[1], [0], [0], [1], [0, 0, 1, 1], [], []>} : vector<512x8xbf16>, vector<8x128xbf16>, vector<512x128xf32> -> vector<512x128xf32>
    %63 = arith.addf %56, %62 : vector<512x128xf32>
    %c0_63 = arith.constant 0 : index
    %c2_64 = arith.constant 2 : index
    %c1_65 = arith.constant 1 : index
    %c0_66 = arith.constant 0 : index
    %64 = tpu.strided_load %arg0[%c0_63, %c2_64, %c1_65, %c0_66] {strides = array<i32: 1, 2, 2, 1>} : memref<2x34x34x8xf32, #tpu.memory_space<vmem>>, vector<2x16x16x8xf32>
    %65 = vector.shape_cast %64 : vector<2x16x16x8xf32> to vector<512x8xf32>
    %66 = arith.truncf %65 : vector<512x8xf32> to vector<512x8xbf16>
    %c9 = arith.constant 9 : index
    %c0_67 = arith.constant 0 : index
    %c0_68 = arith.constant 0 : index
    %67 = vector.load %arg1[%c9, %c0_67, %c0_68] : memref<16x8x128xbf16, #tpu.memory_space<vmem>>, vector<1x8x128xbf16>
    %68 = vector.shape_cast %67 : vector<1x8x128xbf16> to vector<8x128xbf16>
    %cst_69 = arith.constant dense<0.000000e+00> : vector<512x128xf32>
    %69 = tpu.matmul %66, %68, %cst_69 {dimension_numbers = #tpu.dot_dimension_numbers<[1], [0], [0], [1], [0, 0, 1, 1], [], []>} : vector<512x8xbf16>, vector<8x128xbf16>, vector<512x128xf32> -> vector<512x128xf32>
    %70 = arith.addf %63, %69 : vector<512x128xf32>
    %c0_70 = arith.constant 0 : index
    %c2_71 = arith.constant 2 : index
    %c2_72 = arith.constant 2 : index
    %c0_73 = arith.constant 0 : index
    %71 = tpu.strided_load %arg0[%c0_70, %c2_71, %c2_72, %c0_73] {strides = array<i32: 1, 2, 2, 1>} : memref<2x34x34x8xf32, #tpu.memory_space<vmem>>, vector<2x16x16x8xf32>
    %72 = vector.shape_cast %71 : vector<2x16x16x8xf32> to vector<512x8xf32>
    %73 = arith.truncf %72 : vector<512x8xf32> to vector<512x8xbf16>
    %c10 = arith.constant 10 : index
    %c0_74 = arith.constant 0 : index
    %c0_75 = arith.constant 0 : index
    %74 = vector.load %arg1[%c10, %c0_74, %c0_75] : memref<16x8x128xbf16, #tpu.memory_space<vmem>>, vector<1x8x128xbf16>
    %75 = vector.shape_cast %74 : vector<1x8x128xbf16> to vector<8x128xbf16>
    %cst_76 = arith.constant dense<0.000000e+00> : vector<512x128xf32>
    %76 = tpu.matmul %73, %75, %cst_76 {dimension_numbers = #tpu.dot_dimension_numbers<[1], [0], [0], [1], [0, 0, 1, 1], [], []>} : vector<512x8xbf16>, vector<8x128xbf16>, vector<512x128xf32> -> vector<512x128xf32>
    %77 = arith.addf %70, %76 : vector<512x128xf32>
    %c0_77 = arith.constant 0 : index
    %c2_78 = arith.constant 2 : index
    %c3_79 = arith.constant 3 : index
    %c0_80 = arith.constant 0 : index
    %78 = tpu.strided_load %arg0[%c0_77, %c2_78, %c3_79, %c0_80] {strides = array<i32: 1, 2, 2, 1>} : memref<2x34x34x8xf32, #tpu.memory_space<vmem>>, vector<2x16x16x8xf32>
    %79 = vector.shape_cast %78 : vector<2x16x16x8xf32> to vector<512x8xf32>
    %80 = arith.truncf %79 : vector<512x8xf32> to vector<512x8xbf16>
    %c11 = arith.constant 11 : index
    %c0_81 = arith.constant 0 : index
    %c0_82 = arith.constant 0 : index
    %81 = vector.load %arg1[%c11, %c0_81, %c0_82] : memref<16x8x128xbf16, #tpu.memory_space<vmem>>, vector<1x8x128xbf16>
    %82 = vector.shape_cast %81 : vector<1x8x128xbf16> to vector<8x128xbf16>
    %cst_83 = arith.constant dense<0.000000e+00> : vector<512x128xf32>
    %83 = tpu.matmul %80, %82, %cst_83 {dimension_numbers = #tpu.dot_dimension_numbers<[1], [0], [0], [1], [0, 0, 1, 1], [], []>} : vector<512x8xbf16>, vector<8x128xbf16>, vector<512x128xf32> -> vector<512x128xf32>
    %84 = arith.addf %77, %83 : vector<512x128xf32>
    %c0_84 = arith.constant 0 : index
    %c3_85 = arith.constant 3 : index
    %c0_86 = arith.constant 0 : index
    %c0_87 = arith.constant 0 : index
    %85 = tpu.strided_load %arg0[%c0_84, %c3_85, %c0_86, %c0_87] {strides = array<i32: 1, 2, 2, 1>} : memref<2x34x34x8xf32, #tpu.memory_space<vmem>>, vector<2x16x16x8xf32>
    %86 = vector.shape_cast %85 : vector<2x16x16x8xf32> to vector<512x8xf32>
    %87 = arith.truncf %86 : vector<512x8xf32> to vector<512x8xbf16>
    %c12 = arith.constant 12 : index
    %c0_88 = arith.constant 0 : index
    %c0_89 = arith.constant 0 : index
    %88 = vector.load %arg1[%c12, %c0_88, %c0_89] : memref<16x8x128xbf16, #tpu.memory_space<vmem>>, vector<1x8x128xbf16>
    %89 = vector.shape_cast %88 : vector<1x8x128xbf16> to vector<8x128xbf16>
    %cst_90 = arith.constant dense<0.000000e+00> : vector<512x128xf32>
    %90 = tpu.matmul %87, %89, %cst_90 {dimension_numbers = #tpu.dot_dimension_numbers<[1], [0], [0], [1], [0, 0, 1, 1], [], []>} : vector<512x8xbf16>, vector<8x128xbf16>, vector<512x128xf32> -> vector<512x128xf32>
    %91 = arith.addf %84, %90 : vector<512x128xf32>
    %c0_91 = arith.constant 0 : index
    %c3_92 = arith.constant 3 : index
    %c1_93 = arith.constant 1 : index
    %c0_94 = arith.constant 0 : index
    %92 = tpu.strided_load %arg0[%c0_91, %c3_92, %c1_93, %c0_94] {strides = array<i32: 1, 2, 2, 1>} : memref<2x34x34x8xf32, #tpu.memory_space<vmem>>, vector<2x16x16x8xf32>
    %93 = vector.shape_cast %92 : vector<2x16x16x8xf32> to vector<512x8xf32>
    %94 = arith.truncf %93 : vector<512x8xf32> to vector<512x8xbf16>
    %c13 = arith.constant 13 : index
    %c0_95 = arith.constant 0 : index
    %c0_96 = arith.constant 0 : index
    %95 = vector.load %arg1[%c13, %c0_95, %c0_96] : memref<16x8x128xbf16, #tpu.memory_space<vmem>>, vector<1x8x128xbf16>
    %96 = vector.shape_cast %95 : vector<1x8x128xbf16> to vector<8x128xbf16>
    %cst_97 = arith.constant dense<0.000000e+00> : vector<512x128xf32>
    %97 = tpu.matmul %94, %96, %cst_97 {dimension_numbers = #tpu.dot_dimension_numbers<[1], [0], [0], [1], [0, 0, 1, 1], [], []>} : vector<512x8xbf16>, vector<8x128xbf16>, vector<512x128xf32> -> vector<512x128xf32>
    %98 = arith.addf %91, %97 : vector<512x128xf32>
    %c0_98 = arith.constant 0 : index
    %c3_99 = arith.constant 3 : index
    %c2_100 = arith.constant 2 : index
    %c0_101 = arith.constant 0 : index
    %99 = tpu.strided_load %arg0[%c0_98, %c3_99, %c2_100, %c0_101] {strides = array<i32: 1, 2, 2, 1>} : memref<2x34x34x8xf32, #tpu.memory_space<vmem>>, vector<2x16x16x8xf32>
    %100 = vector.shape_cast %99 : vector<2x16x16x8xf32> to vector<512x8xf32>
    %101 = arith.truncf %100 : vector<512x8xf32> to vector<512x8xbf16>
    %c14 = arith.constant 14 : index
    %c0_102 = arith.constant 0 : index
    %c0_103 = arith.constant 0 : index
    %102 = vector.load %arg1[%c14, %c0_102, %c0_103] : memref<16x8x128xbf16, #tpu.memory_space<vmem>>, vector<1x8x128xbf16>
    %103 = vector.shape_cast %102 : vector<1x8x128xbf16> to vector<8x128xbf16>
    %cst_104 = arith.constant dense<0.000000e+00> : vector<512x128xf32>
    %104 = tpu.matmul %101, %103, %cst_104 {dimension_numbers = #tpu.dot_dimension_numbers<[1], [0], [0], [1], [0, 0, 1, 1], [], []>} : vector<512x8xbf16>, vector<8x128xbf16>, vector<512x128xf32> -> vector<512x128xf32>
    %105 = arith.addf %98, %104 : vector<512x128xf32>
    %c0_105 = arith.constant 0 : index
    %c3_106 = arith.constant 3 : index
    %c3_107 = arith.constant 3 : index
    %c0_108 = arith.constant 0 : index
    %106 = tpu.strided_load %arg0[%c0_105, %c3_106, %c3_107, %c0_108] {strides = array<i32: 1, 2, 2, 1>} : memref<2x34x34x8xf32, #tpu.memory_space<vmem>>, vector<2x16x16x8xf32>
    %107 = vector.shape_cast %106 : vector<2x16x16x8xf32> to vector<512x8xf32>
    %108 = arith.truncf %107 : vector<512x8xf32> to vector<512x8xbf16>
    %c15 = arith.constant 15 : index
    %c0_109 = arith.constant 0 : index
    %c0_110 = arith.constant 0 : index
    %109 = vector.load %arg1[%c15, %c0_109, %c0_110] : memref<16x8x128xbf16, #tpu.memory_space<vmem>>, vector<1x8x128xbf16>
    %110 = vector.shape_cast %109 : vector<1x8x128xbf16> to vector<8x128xbf16>
    %cst_111 = arith.constant dense<0.000000e+00> : vector<512x128xf32>
    %111 = tpu.matmul %108, %110, %cst_111 {dimension_numbers = #tpu.dot_dimension_numbers<[1], [0], [0], [1], [0, 0, 1, 1], [], []>} : vector<512x8xbf16>, vector<8x128xbf16>, vector<512x128xf32> -> vector<512x128xf32>
    %112 = arith.addf %105, %111 : vector<512x128xf32>
    %cst_112 = arith.constant 0.000000e+00 : f32
    %113 = vector.broadcast %cst_112 : f32 to vector<512x128xf32>
    %114 = arith.cmpf oge, %112, %113 : vector<512x128xf32>
    %cst_113 = arith.constant 2.000000e-01 : f32
    %115 = vector.broadcast %cst_113 : f32 to vector<512x128xf32>
    %116 = arith.mulf %115, %112 : vector<512x128xf32>
    %117 = arith.select %114, %112, %116 : vector<512x128xi1>, vector<512x128xf32>
    %cst_114 = arith.constant 0.000000e+00 : f32
    %118 = vector.broadcast %cst_114 : f32 to vector<2x18x18x128xf32>
    %c0_115 = arith.constant 0 : index
    %c0_116 = arith.constant 0 : index
    %c0_117 = arith.constant 0 : index
    %c0_118 = arith.constant 0 : index
    %119 = vector.load %arg7[%c0_115, %c0_116, %c0_117, %c0_118] : memref<2x18x18x128xf32, #tpu.memory_space<vmem>>, vector<2x18x18x128xf32>
    tpu.vector_store %arg7[%c0_115, %c0_116, %c0_117, %c0_118], %118 {strides = array<i32>} : memref<2x18x18x128xf32, #tpu.memory_space<vmem>>, vector<2x18x18x128xf32>,
    %120 = vector.shape_cast %117 : vector<512x128xf32> to vector<2x16x16x128xf32>
    %c0_119 = arith.constant 0 : index
    %c1_120 = arith.constant 1 : index
    %c1_121 = arith.constant 1 : index
    %c0_122 = arith.constant 0 : index
    %121 = vector.load %arg7[%c0_119, %c1_120, %c1_121, %c0_122] : memref<2x18x18x128xf32, #tpu.memory_space<vmem>>, vector<2x16x16x128xf32>
    tpu.vector_store %arg7[%c0_119, %c1_120, %c1_121, %c0_122], %120 {strides = array<i32>} : memref<2x18x18x128xf32, #tpu.memory_space<vmem>>, vector<2x16x16x128xf32>,
    %cst_123 = arith.constant 0.000000e+00 : f32
    %122 = vector.broadcast %cst_123 : f32 to vector<128x128xf32>
    %c0_124 = arith.constant 0 : index
    %c0_125 = arith.constant 0 : index
    %c0_126 = arith.constant 0 : index
    %c0_127 = arith.constant 0 : index
    %123 = tpu.strided_load %arg7[%c0_124, %c0_125, %c0_126, %c0_127] {strides = array<i32: 1, 2, 2, 1>} : memref<2x18x18x128xf32, #tpu.memory_space<vmem>>, vector<2x8x8x128xf32>
    %124 = vector.shape_cast %123 : vector<2x8x8x128xf32> to vector<128x128xf32>
    %125 = arith.truncf %124 : vector<128x128xf32> to vector<128x128xbf16>
    %c0_128 = arith.constant 0 : index
    %c0_129 = arith.constant 0 : index
    %c0_130 = arith.constant 0 : index
    %126 = vector.load %arg2[%c0_128, %c0_129, %c0_130] : memref<16x128x128xbf16, #tpu.memory_space<vmem>>, vector<1x128x128xbf16>
    %127 = vector.shape_cast %126 : vector<1x128x128xbf16> to vector<128x128xbf16>
    %cst_131 = arith.constant dense<0.000000e+00> : vector<128x128xf32>
    %128 = tpu.matmul %125, %127, %cst_131 {dimension_numbers = #tpu.dot_dimension_numbers<[1], [0], [0], [1], [0, 0, 1, 1], [], []>} : vector<128x128xbf16>, vector<128x128xbf16>, vector<128x128xf32> -> vector<128x128xf32>
    %129 = arith.addf %122, %128 : vector<128x128xf32>
    %c0_132 = arith.constant 0 : index
    %c0_133 = arith.constant 0 : index
    %c1_134 = arith.constant 1 : index
    %c0_135 = arith.constant 0 : index
    %130 = tpu.strided_load %arg7[%c0_132, %c0_133, %c1_134, %c0_135] {strides = array<i32: 1, 2, 2, 1>} : memref<2x18x18x128xf32, #tpu.memory_space<vmem>>, vector<2x8x8x128xf32>
    %131 = vector.shape_cast %130 : vector<2x8x8x128xf32> to vector<128x128xf32>
    %132 = arith.truncf %131 : vector<128x128xf32> to vector<128x128xbf16>
    %c1_136 = arith.constant 1 : index
    %c0_137 = arith.constant 0 : index
    %c0_138 = arith.constant 0 : index
    %133 = vector.load %arg2[%c1_136, %c0_137, %c0_138] : memref<16x128x128xbf16, #tpu.memory_space<vmem>>, vector<1x128x128xbf16>
    %134 = vector.shape_cast %133 : vector<1x128x128xbf16> to vector<128x128xbf16>
    %cst_139 = arith.constant dense<0.000000e+00> : vector<128x128xf32>
    %135 = tpu.matmul %132, %134, %cst_139 {dimension_numbers = #tpu.dot_dimension_numbers<[1], [0], [0], [1], [0, 0, 1, 1], [], []>} : vector<128x128xbf16>, vector<128x128xbf16>, vector<128x128xf32> -> vector<128x128xf32>
    %136 = arith.addf %129, %135 : vector<128x128xf32>
    %c0_140 = arith.constant 0 : index
    %c0_141 = arith.constant 0 : index
    %c2_142 = arith.constant 2 : index
    %c0_143 = arith.constant 0 : index
    %137 = tpu.strided_load %arg7[%c0_140, %c0_141, %c2_142, %c0_143] {strides = array<i32: 1, 2, 2, 1>} : memref<2x18x18x128xf32, #tpu.memory_space<vmem>>, vector<2x8x8x128xf32>
    %138 = vector.shape_cast %137 : vector<2x8x8x128xf32> to vector<128x128xf32>
    %139 = arith.truncf %138 : vector<128x128xf32> to vector<128x128xbf16>
    %c2_144 = arith.constant 2 : index
    %c0_145 = arith.constant 0 : index
    %c0_146 = arith.constant 0 : index
    %140 = vector.load %arg2[%c2_144, %c0_145, %c0_146] : memref<16x128x128xbf16, #tpu.memory_space<vmem>>, vector<1x128x128xbf16>
    %141 = vector.shape_cast %140 : vector<1x128x128xbf16> to vector<128x128xbf16>
    %cst_147 = arith.constant dense<0.000000e+00> : vector<128x128xf32>
    %142 = tpu.matmul %139, %141, %cst_147 {dimension_numbers = #tpu.dot_dimension_numbers<[1], [0], [0], [1], [0, 0, 1, 1], [], []>} : vector<128x128xbf16>, vector<128x128xbf16>, vector<128x128xf32> -> vector<128x128xf32>
    %143 = arith.addf %136, %142 : vector<128x128xf32>
    %c0_148 = arith.constant 0 : index
    %c0_149 = arith.constant 0 : index
    %c3_150 = arith.constant 3 : index
    %c0_151 = arith.constant 0 : index
    %144 = tpu.strided_load %arg7[%c0_148, %c0_149, %c3_150, %c0_151] {strides = array<i32: 1, 2, 2, 1>} : memref<2x18x18x128xf32, #tpu.memory_space<vmem>>, vector<2x8x8x128xf32>
    %145 = vector.shape_cast %144 : vector<2x8x8x128xf32> to vector<128x128xf32>
    %146 = arith.truncf %145 : vector<128x128xf32> to vector<128x128xbf16>
    %c3_152 = arith.constant 3 : index
    %c0_153 = arith.constant 0 : index
    %c0_154 = arith.constant 0 : index
    %147 = vector.load %arg2[%c3_152, %c0_153, %c0_154] : memref<16x128x128xbf16, #tpu.memory_space<vmem>>, vector<1x128x128xbf16>
    %148 = vector.shape_cast %147 : vector<1x128x128xbf16> to vector<128x128xbf16>
    %cst_155 = arith.constant dense<0.000000e+00> : vector<128x128xf32>
    %149 = tpu.matmul %146, %148, %cst_155 {dimension_numbers = #tpu.dot_dimension_numbers<[1], [0], [0], [1], [0, 0, 1, 1], [], []>} : vector<128x128xbf16>, vector<128x128xbf16>, vector<128x128xf32> -> vector<128x128xf32>
    %150 = arith.addf %143, %149 : vector<128x128xf32>
    %c0_156 = arith.constant 0 : index
    %c1_157 = arith.constant 1 : index
    %c0_158 = arith.constant 0 : index
    %c0_159 = arith.constant 0 : index
    %151 = tpu.strided_load %arg7[%c0_156, %c1_157, %c0_158, %c0_159] {strides = array<i32: 1, 2, 2, 1>} : memref<2x18x18x128xf32, #tpu.memory_space<vmem>>, vector<2x8x8x128xf32>
    %152 = vector.shape_cast %151 : vector<2x8x8x128xf32> to vector<128x128xf32>
    %153 = arith.truncf %152 : vector<128x128xf32> to vector<128x128xbf16>
    %c4_160 = arith.constant 4 : index
    %c0_161 = arith.constant 0 : index
    %c0_162 = arith.constant 0 : index
    %154 = vector.load %arg2[%c4_160, %c0_161, %c0_162] : memref<16x128x128xbf16, #tpu.memory_space<vmem>>, vector<1x128x128xbf16>
    %155 = vector.shape_cast %154 : vector<1x128x128xbf16> to vector<128x128xbf16>
    %cst_163 = arith.constant dense<0.000000e+00> : vector<128x128xf32>
    %156 = tpu.matmul %153, %155, %cst_163 {dimension_numbers = #tpu.dot_dimension_numbers<[1], [0], [0], [1], [0, 0, 1, 1], [], []>} : vector<128x128xbf16>, vector<128x128xbf16>, vector<128x128xf32> -> vector<128x128xf32>
    %157 = arith.addf %150, %156 : vector<128x128xf32>
    %c0_164 = arith.constant 0 : index
    %c1_165 = arith.constant 1 : index
    %c1_166 = arith.constant 1 : index
    %c0_167 = arith.constant 0 : index
    %158 = tpu.strided_load %arg7[%c0_164, %c1_165, %c1_166, %c0_167] {strides = array<i32: 1, 2, 2, 1>} : memref<2x18x18x128xf32, #tpu.memory_space<vmem>>, vector<2x8x8x128xf32>
    %159 = vector.shape_cast %158 : vector<2x8x8x128xf32> to vector<128x128xf32>
    %160 = arith.truncf %159 : vector<128x128xf32> to vector<128x128xbf16>
    %c5_168 = arith.constant 5 : index
    %c0_169 = arith.constant 0 : index
    %c0_170 = arith.constant 0 : index
    %161 = vector.load %arg2[%c5_168, %c0_169, %c0_170] : memref<16x128x128xbf16, #tpu.memory_space<vmem>>, vector<1x128x128xbf16>
    %162 = vector.shape_cast %161 : vector<1x128x128xbf16> to vector<128x128xbf16>
    %cst_171 = arith.constant dense<0.000000e+00> : vector<128x128xf32>
    %163 = tpu.matmul %160, %162, %cst_171 {dimension_numbers = #tpu.dot_dimension_numbers<[1], [0], [0], [1], [0, 0, 1, 1], [], []>} : vector<128x128xbf16>, vector<128x128xbf16>, vector<128x128xf32> -> vector<128x128xf32>
    %164 = arith.addf %157, %163 : vector<128x128xf32>
    %c0_172 = arith.constant 0 : index
    %c1_173 = arith.constant 1 : index
    %c2_174 = arith.constant 2 : index
    %c0_175 = arith.constant 0 : index
    %165 = tpu.strided_load %arg7[%c0_172, %c1_173, %c2_174, %c0_175] {strides = array<i32: 1, 2, 2, 1>} : memref<2x18x18x128xf32, #tpu.memory_space<vmem>>, vector<2x8x8x128xf32>
    %166 = vector.shape_cast %165 : vector<2x8x8x128xf32> to vector<128x128xf32>
    %167 = arith.truncf %166 : vector<128x128xf32> to vector<128x128xbf16>
    %c6_176 = arith.constant 6 : index
    %c0_177 = arith.constant 0 : index
    %c0_178 = arith.constant 0 : index
    %168 = vector.load %arg2[%c6_176, %c0_177, %c0_178] : memref<16x128x128xbf16, #tpu.memory_space<vmem>>, vector<1x128x128xbf16>
    %169 = vector.shape_cast %168 : vector<1x128x128xbf16> to vector<128x128xbf16>
    %cst_179 = arith.constant dense<0.000000e+00> : vector<128x128xf32>
    %170 = tpu.matmul %167, %169, %cst_179 {dimension_numbers = #tpu.dot_dimension_numbers<[1], [0], [0], [1], [0, 0, 1, 1], [], []>} : vector<128x128xbf16>, vector<128x128xbf16>, vector<128x128xf32> -> vector<128x128xf32>
    %171 = arith.addf %164, %170 : vector<128x128xf32>
    %c0_180 = arith.constant 0 : index
    %c1_181 = arith.constant 1 : index
    %c3_182 = arith.constant 3 : index
    %c0_183 = arith.constant 0 : index
    %172 = tpu.strided_load %arg7[%c0_180, %c1_181, %c3_182, %c0_183] {strides = array<i32: 1, 2, 2, 1>} : memref<2x18x18x128xf32, #tpu.memory_space<vmem>>, vector<2x8x8x128xf32>
    %173 = vector.shape_cast %172 : vector<2x8x8x128xf32> to vector<128x128xf32>
    %174 = arith.truncf %173 : vector<128x128xf32> to vector<128x128xbf16>
    %c7_184 = arith.constant 7 : index
    %c0_185 = arith.constant 0 : index
    %c0_186 = arith.constant 0 : index
    %175 = vector.load %arg2[%c7_184, %c0_185, %c0_186] : memref<16x128x128xbf16, #tpu.memory_space<vmem>>, vector<1x128x128xbf16>
    %176 = vector.shape_cast %175 : vector<1x128x128xbf16> to vector<128x128xbf16>
    %cst_187 = arith.constant dense<0.000000e+00> : vector<128x128xf32>
    %177 = tpu.matmul %174, %176, %cst_187 {dimension_numbers = #tpu.dot_dimension_numbers<[1], [0], [0], [1], [0, 0, 1, 1], [], []>} : vector<128x128xbf16>, vector<128x128xbf16>, vector<128x128xf32> -> vector<128x128xf32>
    %178 = arith.addf %171, %177 : vector<128x128xf32>
    %c0_188 = arith.constant 0 : index
    %c2_189 = arith.constant 2 : index
    %c0_190 = arith.constant 0 : index
    %c0_191 = arith.constant 0 : index
    %179 = tpu.strided_load %arg7[%c0_188, %c2_189, %c0_190, %c0_191] {strides = array<i32: 1, 2, 2, 1>} : memref<2x18x18x128xf32, #tpu.memory_space<vmem>>, vector<2x8x8x128xf32>
    %180 = vector.shape_cast %179 : vector<2x8x8x128xf32> to vector<128x128xf32>
    %181 = arith.truncf %180 : vector<128x128xf32> to vector<128x128xbf16>
    %c8_192 = arith.constant 8 : index
    %c0_193 = arith.constant 0 : index
    %c0_194 = arith.constant 0 : index
    %182 = vector.load %arg2[%c8_192, %c0_193, %c0_194] : memref<16x128x128xbf16, #tpu.memory_space<vmem>>, vector<1x128x128xbf16>
    %183 = vector.shape_cast %182 : vector<1x128x128xbf16> to vector<128x128xbf16>
    %cst_195 = arith.constant dense<0.000000e+00> : vector<128x128xf32>
    %184 = tpu.matmul %181, %183, %cst_195 {dimension_numbers = #tpu.dot_dimension_numbers<[1], [0], [0], [1], [0, 0, 1, 1], [], []>} : vector<128x128xbf16>, vector<128x128xbf16>, vector<128x128xf32> -> vector<128x128xf32>
    %185 = arith.addf %178, %184 : vector<128x128xf32>
    %c0_196 = arith.constant 0 : index
    %c2_197 = arith.constant 2 : index
    %c1_198 = arith.constant 1 : index
    %c0_199 = arith.constant 0 : index
    %186 = tpu.strided_load %arg7[%c0_196, %c2_197, %c1_198, %c0_199] {strides = array<i32: 1, 2, 2, 1>} : memref<2x18x18x128xf32, #tpu.memory_space<vmem>>, vector<2x8x8x128xf32>
    %187 = vector.shape_cast %186 : vector<2x8x8x128xf32> to vector<128x128xf32>
    %188 = arith.truncf %187 : vector<128x128xf32> to vector<128x128xbf16>
    %c9_200 = arith.constant 9 : index
    %c0_201 = arith.constant 0 : index
    %c0_202 = arith.constant 0 : index
    %189 = vector.load %arg2[%c9_200, %c0_201, %c0_202] : memref<16x128x128xbf16, #tpu.memory_space<vmem>>, vector<1x128x128xbf16>
    %190 = vector.shape_cast %189 : vector<1x128x128xbf16> to vector<128x128xbf16>
    %cst_203 = arith.constant dense<0.000000e+00> : vector<128x128xf32>
    %191 = tpu.matmul %188, %190, %cst_203 {dimension_numbers = #tpu.dot_dimension_numbers<[1], [0], [0], [1], [0, 0, 1, 1], [], []>} : vector<128x128xbf16>, vector<128x128xbf16>, vector<128x128xf32> -> vector<128x128xf32>
    %192 = arith.addf %185, %191 : vector<128x128xf32>
    %c0_204 = arith.constant 0 : index
    %c2_205 = arith.constant 2 : index
    %c2_206 = arith.constant 2 : index
    %c0_207 = arith.constant 0 : index
    %193 = tpu.strided_load %arg7[%c0_204, %c2_205, %c2_206, %c0_207] {strides = array<i32: 1, 2, 2, 1>} : memref<2x18x18x128xf32, #tpu.memory_space<vmem>>, vector<2x8x8x128xf32>
    %194 = vector.shape_cast %193 : vector<2x8x8x128xf32> to vector<128x128xf32>
    %195 = arith.truncf %194 : vector<128x128xf32> to vector<128x128xbf16>
    %c10_208 = arith.constant 10 : index
    %c0_209 = arith.constant 0 : index
    %c0_210 = arith.constant 0 : index
    %196 = vector.load %arg2[%c10_208, %c0_209, %c0_210] : memref<16x128x128xbf16, #tpu.memory_space<vmem>>, vector<1x128x128xbf16>
    %197 = vector.shape_cast %196 : vector<1x128x128xbf16> to vector<128x128xbf16>
    %cst_211 = arith.constant dense<0.000000e+00> : vector<128x128xf32>
    %198 = tpu.matmul %195, %197, %cst_211 {dimension_numbers = #tpu.dot_dimension_numbers<[1], [0], [0], [1], [0, 0, 1, 1], [], []>} : vector<128x128xbf16>, vector<128x128xbf16>, vector<128x128xf32> -> vector<128x128xf32>
    %199 = arith.addf %192, %198 : vector<128x128xf32>
    %c0_212 = arith.constant 0 : index
    %c2_213 = arith.constant 2 : index
    %c3_214 = arith.constant 3 : index
    %c0_215 = arith.constant 0 : index
    %200 = tpu.strided_load %arg7[%c0_212, %c2_213, %c3_214, %c0_215] {strides = array<i32: 1, 2, 2, 1>} : memref<2x18x18x128xf32, #tpu.memory_space<vmem>>, vector<2x8x8x128xf32>
    %201 = vector.shape_cast %200 : vector<2x8x8x128xf32> to vector<128x128xf32>
    %202 = arith.truncf %201 : vector<128x128xf32> to vector<128x128xbf16>
    %c11_216 = arith.constant 11 : index
    %c0_217 = arith.constant 0 : index
    %c0_218 = arith.constant 0 : index
    %203 = vector.load %arg2[%c11_216, %c0_217, %c0_218] : memref<16x128x128xbf16, #tpu.memory_space<vmem>>, vector<1x128x128xbf16>
    %204 = vector.shape_cast %203 : vector<1x128x128xbf16> to vector<128x128xbf16>
    %cst_219 = arith.constant dense<0.000000e+00> : vector<128x128xf32>
    %205 = tpu.matmul %202, %204, %cst_219 {dimension_numbers = #tpu.dot_dimension_numbers<[1], [0], [0], [1], [0, 0, 1, 1], [], []>} : vector<128x128xbf16>, vector<128x128xbf16>, vector<128x128xf32> -> vector<128x128xf32>
    %206 = arith.addf %199, %205 : vector<128x128xf32>
    %c0_220 = arith.constant 0 : index
    %c3_221 = arith.constant 3 : index
    %c0_222 = arith.constant 0 : index
    %c0_223 = arith.constant 0 : index
    %207 = tpu.strided_load %arg7[%c0_220, %c3_221, %c0_222, %c0_223] {strides = array<i32: 1, 2, 2, 1>} : memref<2x18x18x128xf32, #tpu.memory_space<vmem>>, vector<2x8x8x128xf32>
    %208 = vector.shape_cast %207 : vector<2x8x8x128xf32> to vector<128x128xf32>
    %209 = arith.truncf %208 : vector<128x128xf32> to vector<128x128xbf16>
    %c12_224 = arith.constant 12 : index
    %c0_225 = arith.constant 0 : index
    %c0_226 = arith.constant 0 : index
    %210 = vector.load %arg2[%c12_224, %c0_225, %c0_226] : memref<16x128x128xbf16, #tpu.memory_space<vmem>>, vector<1x128x128xbf16>
    %211 = vector.shape_cast %210 : vector<1x128x128xbf16> to vector<128x128xbf16>
    %cst_227 = arith.constant dense<0.000000e+00> : vector<128x128xf32>
    %212 = tpu.matmul %209, %211, %cst_227 {dimension_numbers = #tpu.dot_dimension_numbers<[1], [0], [0], [1], [0, 0, 1, 1], [], []>} : vector<128x128xbf16>, vector<128x128xbf16>, vector<128x128xf32> -> vector<128x128xf32>
    %213 = arith.addf %206, %212 : vector<128x128xf32>
    %c0_228 = arith.constant 0 : index
    %c3_229 = arith.constant 3 : index
    %c1_230 = arith.constant 1 : index
    %c0_231 = arith.constant 0 : index
    %214 = tpu.strided_load %arg7[%c0_228, %c3_229, %c1_230, %c0_231] {strides = array<i32: 1, 2, 2, 1>} : memref<2x18x18x128xf32, #tpu.memory_space<vmem>>, vector<2x8x8x128xf32>
    %215 = vector.shape_cast %214 : vector<2x8x8x128xf32> to vector<128x128xf32>
    %216 = arith.truncf %215 : vector<128x128xf32> to vector<128x128xbf16>
    %c13_232 = arith.constant 13 : index
    %c0_233 = arith.constant 0 : index
    %c0_234 = arith.constant 0 : index
    %217 = vector.load %arg2[%c13_232, %c0_233, %c0_234] : memref<16x128x128xbf16, #tpu.memory_space<vmem>>, vector<1x128x128xbf16>
    %218 = vector.shape_cast %217 : vector<1x128x128xbf16> to vector<128x128xbf16>
    %cst_235 = arith.constant dense<0.000000e+00> : vector<128x128xf32>
    %219 = tpu.matmul %216, %218, %cst_235 {dimension_numbers = #tpu.dot_dimension_numbers<[1], [0], [0], [1], [0, 0, 1, 1], [], []>} : vector<128x128xbf16>, vector<128x128xbf16>, vector<128x128xf32> -> vector<128x128xf32>
    %220 = arith.addf %213, %219 : vector<128x128xf32>
    %c0_236 = arith.constant 0 : index
    %c3_237 = arith.constant 3 : index
    %c2_238 = arith.constant 2 : index
    %c0_239 = arith.constant 0 : index
    %221 = tpu.strided_load %arg7[%c0_236, %c3_237, %c2_238, %c0_239] {strides = array<i32: 1, 2, 2, 1>} : memref<2x18x18x128xf32, #tpu.memory_space<vmem>>, vector<2x8x8x128xf32>
    %222 = vector.shape_cast %221 : vector<2x8x8x128xf32> to vector<128x128xf32>
    %223 = arith.truncf %222 : vector<128x128xf32> to vector<128x128xbf16>
    %c14_240 = arith.constant 14 : index
    %c0_241 = arith.constant 0 : index
    %c0_242 = arith.constant 0 : index
    %224 = vector.load %arg2[%c14_240, %c0_241, %c0_242] : memref<16x128x128xbf16, #tpu.memory_space<vmem>>, vector<1x128x128xbf16>
    %225 = vector.shape_cast %224 : vector<1x128x128xbf16> to vector<128x128xbf16>
    %cst_243 = arith.constant dense<0.000000e+00> : vector<128x128xf32>
    %226 = tpu.matmul %223, %225, %cst_243 {dimension_numbers = #tpu.dot_dimension_numbers<[1], [0], [0], [1], [0, 0, 1, 1], [], []>} : vector<128x128xbf16>, vector<128x128xbf16>, vector<128x128xf32> -> vector<128x128xf32>
    %227 = arith.addf %220, %226 : vector<128x128xf32>
    %c0_244 = arith.constant 0 : index
    %c3_245 = arith.constant 3 : index
    %c3_246 = arith.constant 3 : index
    %c0_247 = arith.constant 0 : index
    %228 = tpu.strided_load %arg7[%c0_244, %c3_245, %c3_246, %c0_247] {strides = array<i32: 1, 2, 2, 1>} : memref<2x18x18x128xf32, #tpu.memory_space<vmem>>, vector<2x8x8x128xf32>
    %229 = vector.shape_cast %228 : vector<2x8x8x128xf32> to vector<128x128xf32>
    %230 = arith.truncf %229 : vector<128x128xf32> to vector<128x128xbf16>
    %c15_248 = arith.constant 15 : index
    %c0_249 = arith.constant 0 : index
    %c0_250 = arith.constant 0 : index
    %231 = vector.load %arg2[%c15_248, %c0_249, %c0_250] : memref<16x128x128xbf16, #tpu.memory_space<vmem>>, vector<1x128x128xbf16>
    %232 = vector.shape_cast %231 : vector<1x128x128xbf16> to vector<128x128xbf16>
    %cst_251 = arith.constant dense<0.000000e+00> : vector<128x128xf32>
    %233 = tpu.matmul %230, %232, %cst_251 {dimension_numbers = #tpu.dot_dimension_numbers<[1], [0], [0], [1], [0, 0, 1, 1], [], []>} : vector<128x128xbf16>, vector<128x128xbf16>, vector<128x128xf32> -> vector<128x128xf32>
    %234 = arith.addf %227, %233 : vector<128x128xf32>
    %cst_252 = arith.constant dense<0.000000e+00> : vector<128xf32>
    %235 = vector.multi_reduction <add>, %234, %cst_252 [0] : vector<128x128xf32> to vector<128xf32>
    %236 = vector.shape_cast %235 : vector<128xf32> to vector<1x128xf32>
    %cst_253 = arith.constant 1.280000e+02 : f32
    %237 = vector.broadcast %cst_253 : f32 to vector<1x128xf32>
    %238 = arith.divf %236, %237 : vector<1x128xf32>
    %239 = vector.broadcast %238 : vector<1x128xf32> to vector<128x128xf32>
    %240 = arith.subf %234, %239 : vector<128x128xf32>
    %241 = arith.mulf %240, %240 : vector<128x128xf32>
    %cst_254 = arith.constant dense<0.000000e+00> : vector<128xf32>
    %242 = vector.multi_reduction <add>, %241, %cst_254 [0] : vector<128x128xf32> to vector<128xf32>
    %243 = vector.shape_cast %242 : vector<128xf32> to vector<1x128xf32>
    %cst_255 = arith.constant 1.280000e+02 : f32
    %244 = vector.broadcast %cst_255 : f32 to vector<1x128xf32>
    %245 = arith.divf %243, %244 : vector<1x128xf32>
    %246 = vector.broadcast %238 : vector<1x128xf32> to vector<128x128xf32>
    %247 = arith.subf %234, %246 : vector<128x128xf32>
    %cst_256 = arith.constant 9.99999974E-6 : f32
    %248 = vector.broadcast %cst_256 : f32 to vector<1x128xf32>
    %249 = arith.addf %245, %248 : vector<1x128xf32>
    %250 = math.rsqrt %249 : vector<1x128xf32>
    %251 = vector.broadcast %250 : vector<1x128xf32> to vector<128x128xf32>
    %252 = arith.mulf %247, %251 : vector<128x128xf32>
    %cst_257 = arith.constant 0.000000e+00 : f32
    %253 = vector.broadcast %cst_257 : f32 to vector<128x128xf32>
    %254 = arith.cmpf oge, %252, %253 : vector<128x128xf32>
    %cst_258 = arith.constant 2.000000e-01 : f32
    %255 = vector.broadcast %cst_258 : f32 to vector<128x128xf32>
    %256 = arith.mulf %255, %252 : vector<128x128xf32>
    %257 = arith.select %254, %252, %256 : vector<128x128xi1>, vector<128x128xf32>
    %cst_259 = arith.constant 0.000000e+00 : f32
    %258 = vector.broadcast %cst_259 : f32 to vector<2x10x10x128xf32>
    %c0_260 = arith.constant 0 : index
    %c0_261 = arith.constant 0 : index
    %c0_262 = arith.constant 0 : index
    %c0_263 = arith.constant 0 : index
    %259 = vector.load %arg8[%c0_260, %c0_261, %c0_262, %c0_263] : memref<2x10x10x128xf32, #tpu.memory_space<vmem>>, vector<2x10x10x128xf32>
    tpu.vector_store %arg8[%c0_260, %c0_261, %c0_262, %c0_263], %258 {strides = array<i32>} : memref<2x10x10x128xf32, #tpu.memory_space<vmem>>, vector<2x10x10x128xf32>,
    %260 = vector.shape_cast %257 : vector<128x128xf32> to vector<2x8x8x128xf32>
    %c0_264 = arith.constant 0 : index
    %c1_265 = arith.constant 1 : index
    %c1_266 = arith.constant 1 : index
    %c0_267 = arith.constant 0 : index
    %261 = vector.load %arg8[%c0_264, %c1_265, %c1_266, %c0_267] : memref<2x10x10x128xf32, #tpu.memory_space<vmem>>, vector<2x8x8x128xf32>
    tpu.vector_store %arg8[%c0_264, %c1_265, %c1_266, %c0_267], %260 {strides = array<i32>} : memref<2x10x10x128xf32, #tpu.memory_space<vmem>>, vector<2x8x8x128xf32>,
    %cst_268 = arith.constant 0.000000e+00 : f32
    %262 = vector.broadcast %cst_268 : f32 to vector<32x128xf32>
    %c0_269 = arith.constant 0 : index
    %c0_270 = arith.constant 0 : index
    %c0_271 = arith.constant 0 : index
    %c0_272 = arith.constant 0 : index
    %263 = tpu.strided_load %arg8[%c0_269, %c0_270, %c0_271, %c0_272] {strides = array<i32: 1, 2, 2, 1>} : memref<2x10x10x128xf32, #tpu.memory_space<vmem>>, vector<2x4x4x128xf32>
    %264 = vector.shape_cast %263 : vector<2x4x4x128xf32> to vector<32x128xf32>
    %265 = arith.truncf %264 : vector<32x128xf32> to vector<32x128xbf16>
    %c0_273 = arith.constant 0 : index
    %c0_274 = arith.constant 0 : index
    %c0_275 = arith.constant 0 : index
    %266 = vector.load %arg3[%c0_273, %c0_274, %c0_275] : memref<9x128x128xbf16, #tpu.memory_space<vmem>>, vector<1x128x128xbf16>
    %267 = vector.shape_cast %266 : vector<1x128x128xbf16> to vector<128x128xbf16>
    %cst_276 = arith.constant dense<0.000000e+00> : vector<32x128xf32>
    %268 = tpu.matmul %265, %267, %cst_276 {dimension_numbers = #tpu.dot_dimension_numbers<[1], [0], [0], [1], [0, 0, 1, 1], [], []>} : vector<32x128xbf16>, vector<128x128xbf16>, vector<32x128xf32> -> vector<32x128xf32>
    %269 = arith.addf %262, %268 : vector<32x128xf32>
    %c0_277 = arith.constant 0 : index
    %c0_278 = arith.constant 0 : index
    %c1_279 = arith.constant 1 : index
    %c0_280 = arith.constant 0 : index
    %270 = tpu.strided_load %arg8[%c0_277, %c0_278, %c1_279, %c0_280] {strides = array<i32: 1, 2, 2, 1>} : memref<2x10x10x128xf32, #tpu.memory_space<vmem>>, vector<2x4x4x128xf32>
    %271 = vector.shape_cast %270 : vector<2x4x4x128xf32> to vector<32x128xf32>
    %272 = arith.truncf %271 : vector<32x128xf32> to vector<32x128xbf16>
    %c1_281 = arith.constant 1 : index
    %c0_282 = arith.constant 0 : index
    %c0_283 = arith.constant 0 : index
    %273 = vector.load %arg3[%c1_281, %c0_282, %c0_283] : memref<9x128x128xbf16, #tpu.memory_space<vmem>>, vector<1x128x128xbf16>
    %274 = vector.shape_cast %273 : vector<1x128x128xbf16> to vector<128x128xbf16>
    %cst_284 = arith.constant dense<0.000000e+00> : vector<32x128xf32>
    %275 = tpu.matmul %272, %274, %cst_284 {dimension_numbers = #tpu.dot_dimension_numbers<[1], [0], [0], [1], [0, 0, 1, 1], [], []>} : vector<32x128xbf16>, vector<128x128xbf16>, vector<32x128xf32> -> vector<32x128xf32>
    %276 = arith.addf %269, %275 : vector<32x128xf32>
    %c0_285 = arith.constant 0 : index
    %c0_286 = arith.constant 0 : index
    %c2_287 = arith.constant 2 : index
    %c0_288 = arith.constant 0 : index
    %277 = tpu.strided_load %arg8[%c0_285, %c0_286, %c2_287, %c0_288] {strides = array<i32: 1, 2, 2, 1>} : memref<2x10x10x128xf32, #tpu.memory_space<vmem>>, vector<2x4x4x128xf32>
    %278 = vector.shape_cast %277 : vector<2x4x4x128xf32> to vector<32x128xf32>
    %279 = arith.truncf %278 : vector<32x128xf32> to vector<32x128xbf16>
    %c2_289 = arith.constant 2 : index
    %c0_290 = arith.constant 0 : index
    %c0_291 = arith.constant 0 : index
    %280 = vector.load %arg3[%c2_289, %c0_290, %c0_291] : memref<9x128x128xbf16, #tpu.memory_space<vmem>>, vector<1x128x128xbf16>
    %281 = vector.shape_cast %280 : vector<1x128x128xbf16> to vector<128x128xbf16>
    %cst_292 = arith.constant dense<0.000000e+00> : vector<32x128xf32>
    %282 = tpu.matmul %279, %281, %cst_292 {dimension_numbers = #tpu.dot_dimension_numbers<[1], [0], [0], [1], [0, 0, 1, 1], [], []>} : vector<32x128xbf16>, vector<128x128xbf16>, vector<32x128xf32> -> vector<32x128xf32>
    %283 = arith.addf %276, %282 : vector<32x128xf32>
    %c0_293 = arith.constant 0 : index
    %c1_294 = arith.constant 1 : index
    %c0_295 = arith.constant 0 : index
    %c0_296 = arith.constant 0 : index
    %284 = tpu.strided_load %arg8[%c0_293, %c1_294, %c0_295, %c0_296] {strides = array<i32: 1, 2, 2, 1>} : memref<2x10x10x128xf32, #tpu.memory_space<vmem>>, vector<2x4x4x128xf32>
    %285 = vector.shape_cast %284 : vector<2x4x4x128xf32> to vector<32x128xf32>
    %286 = arith.truncf %285 : vector<32x128xf32> to vector<32x128xbf16>
    %c3_297 = arith.constant 3 : index
    %c0_298 = arith.constant 0 : index
    %c0_299 = arith.constant 0 : index
    %287 = vector.load %arg3[%c3_297, %c0_298, %c0_299] : memref<9x128x128xbf16, #tpu.memory_space<vmem>>, vector<1x128x128xbf16>
    %288 = vector.shape_cast %287 : vector<1x128x128xbf16> to vector<128x128xbf16>
    %cst_300 = arith.constant dense<0.000000e+00> : vector<32x128xf32>
    %289 = tpu.matmul %286, %288, %cst_300 {dimension_numbers = #tpu.dot_dimension_numbers<[1], [0], [0], [1], [0, 0, 1, 1], [], []>} : vector<32x128xbf16>, vector<128x128xbf16>, vector<32x128xf32> -> vector<32x128xf32>
    %290 = arith.addf %283, %289 : vector<32x128xf32>
    %c0_301 = arith.constant 0 : index
    %c1_302 = arith.constant 1 : index
    %c1_303 = arith.constant 1 : index
    %c0_304 = arith.constant 0 : index
    %291 = tpu.strided_load %arg8[%c0_301, %c1_302, %c1_303, %c0_304] {strides = array<i32: 1, 2, 2, 1>} : memref<2x10x10x128xf32, #tpu.memory_space<vmem>>, vector<2x4x4x128xf32>
    %292 = vector.shape_cast %291 : vector<2x4x4x128xf32> to vector<32x128xf32>
    %293 = arith.truncf %292 : vector<32x128xf32> to vector<32x128xbf16>
    %c4_305 = arith.constant 4 : index
    %c0_306 = arith.constant 0 : index
    %c0_307 = arith.constant 0 : index
    %294 = vector.load %arg3[%c4_305, %c0_306, %c0_307] : memref<9x128x128xbf16, #tpu.memory_space<vmem>>, vector<1x128x128xbf16>
    %295 = vector.shape_cast %294 : vector<1x128x128xbf16> to vector<128x128xbf16>
    %cst_308 = arith.constant dense<0.000000e+00> : vector<32x128xf32>
    %296 = tpu.matmul %293, %295, %cst_308 {dimension_numbers = #tpu.dot_dimension_numbers<[1], [0], [0], [1], [0, 0, 1, 1], [], []>} : vector<32x128xbf16>, vector<128x128xbf16>, vector<32x128xf32> -> vector<32x128xf32>
    %297 = arith.addf %290, %296 : vector<32x128xf32>
    %c0_309 = arith.constant 0 : index
    %c1_310 = arith.constant 1 : index
    %c2_311 = arith.constant 2 : index
    %c0_312 = arith.constant 0 : index
    %298 = tpu.strided_load %arg8[%c0_309, %c1_310, %c2_311, %c0_312] {strides = array<i32: 1, 2, 2, 1>} : memref<2x10x10x128xf32, #tpu.memory_space<vmem>>, vector<2x4x4x128xf32>
    %299 = vector.shape_cast %298 : vector<2x4x4x128xf32> to vector<32x128xf32>
    %300 = arith.truncf %299 : vector<32x128xf32> to vector<32x128xbf16>
    %c5_313 = arith.constant 5 : index
    %c0_314 = arith.constant 0 : index
    %c0_315 = arith.constant 0 : index
    %301 = vector.load %arg3[%c5_313, %c0_314, %c0_315] : memref<9x128x128xbf16, #tpu.memory_space<vmem>>, vector<1x128x128xbf16>
    %302 = vector.shape_cast %301 : vector<1x128x128xbf16> to vector<128x128xbf16>
    %cst_316 = arith.constant dense<0.000000e+00> : vector<32x128xf32>
    %303 = tpu.matmul %300, %302, %cst_316 {dimension_numbers = #tpu.dot_dimension_numbers<[1], [0], [0], [1], [0, 0, 1, 1], [], []>} : vector<32x128xbf16>, vector<128x128xbf16>, vector<32x128xf32> -> vector<32x128xf32>
    %304 = arith.addf %297, %303 : vector<32x128xf32>
    %c0_317 = arith.constant 0 : index
    %c2_318 = arith.constant 2 : index
    %c0_319 = arith.constant 0 : index
    %c0_320 = arith.constant 0 : index
    %305 = tpu.strided_load %arg8[%c0_317, %c2_318, %c0_319, %c0_320] {strides = array<i32: 1, 2, 2, 1>} : memref<2x10x10x128xf32, #tpu.memory_space<vmem>>, vector<2x4x4x128xf32>
    %306 = vector.shape_cast %305 : vector<2x4x4x128xf32> to vector<32x128xf32>
    %307 = arith.truncf %306 : vector<32x128xf32> to vector<32x128xbf16>
    %c6_321 = arith.constant 6 : index
    %c0_322 = arith.constant 0 : index
    %c0_323 = arith.constant 0 : index
    %308 = vector.load %arg3[%c6_321, %c0_322, %c0_323] : memref<9x128x128xbf16, #tpu.memory_space<vmem>>, vector<1x128x128xbf16>
    %309 = vector.shape_cast %308 : vector<1x128x128xbf16> to vector<128x128xbf16>
    %cst_324 = arith.constant dense<0.000000e+00> : vector<32x128xf32>
    %310 = tpu.matmul %307, %309, %cst_324 {dimension_numbers = #tpu.dot_dimension_numbers<[1], [0], [0], [1], [0, 0, 1, 1], [], []>} : vector<32x128xbf16>, vector<128x128xbf16>, vector<32x128xf32> -> vector<32x128xf32>
    %311 = arith.addf %304, %310 : vector<32x128xf32>
    %c0_325 = arith.constant 0 : index
    %c2_326 = arith.constant 2 : index
    %c1_327 = arith.constant 1 : index
    %c0_328 = arith.constant 0 : index
    %312 = tpu.strided_load %arg8[%c0_325, %c2_326, %c1_327, %c0_328] {strides = array<i32: 1, 2, 2, 1>} : memref<2x10x10x128xf32, #tpu.memory_space<vmem>>, vector<2x4x4x128xf32>
    %313 = vector.shape_cast %312 : vector<2x4x4x128xf32> to vector<32x128xf32>
    %314 = arith.truncf %313 : vector<32x128xf32> to vector<32x128xbf16>
    %c7_329 = arith.constant 7 : index
    %c0_330 = arith.constant 0 : index
    %c0_331 = arith.constant 0 : index
    %315 = vector.load %arg3[%c7_329, %c0_330, %c0_331] : memref<9x128x128xbf16, #tpu.memory_space<vmem>>, vector<1x128x128xbf16>
    %316 = vector.shape_cast %315 : vector<1x128x128xbf16> to vector<128x128xbf16>
    %cst_332 = arith.constant dense<0.000000e+00> : vector<32x128xf32>
    %317 = tpu.matmul %314, %316, %cst_332 {dimension_numbers = #tpu.dot_dimension_numbers<[1], [0], [0], [1], [0, 0, 1, 1], [], []>} : vector<32x128xbf16>, vector<128x128xbf16>, vector<32x128xf32> -> vector<32x128xf32>
    %318 = arith.addf %311, %317 : vector<32x128xf32>
    %c0_333 = arith.constant 0 : index
    %c2_334 = arith.constant 2 : index
    %c2_335 = arith.constant 2 : index
    %c0_336 = arith.constant 0 : index
    %319 = tpu.strided_load %arg8[%c0_333, %c2_334, %c2_335, %c0_336] {strides = array<i32: 1, 2, 2, 1>} : memref<2x10x10x128xf32, #tpu.memory_space<vmem>>, vector<2x4x4x128xf32>
    %320 = vector.shape_cast %319 : vector<2x4x4x128xf32> to vector<32x128xf32>
    %321 = arith.truncf %320 : vector<32x128xf32> to vector<32x128xbf16>
    %c8_337 = arith.constant 8 : index
    %c0_338 = arith.constant 0 : index
    %c0_339 = arith.constant 0 : index
    %322 = vector.load %arg3[%c8_337, %c0_338, %c0_339] : memref<9x128x128xbf16, #tpu.memory_space<vmem>>, vector<1x128x128xbf16>
    %323 = vector.shape_cast %322 : vector<1x128x128xbf16> to vector<128x128xbf16>
    %cst_340 = arith.constant dense<0.000000e+00> : vector<32x128xf32>
    %324 = tpu.matmul %321, %323, %cst_340 {dimension_numbers = #tpu.dot_dimension_numbers<[1], [0], [0], [1], [0, 0, 1, 1], [], []>} : vector<32x128xbf16>, vector<128x128xbf16>, vector<32x128xf32> -> vector<32x128xf32>
    %325 = arith.addf %318, %324 : vector<32x128xf32>
    %cst_341 = arith.constant dense<0.000000e+00> : vector<128xf32>
    %326 = vector.multi_reduction <add>, %325, %cst_341 [0] : vector<32x128xf32> to vector<128xf32>
    %327 = vector.shape_cast %326 : vector<128xf32> to vector<1x128xf32>
    %cst_342 = arith.constant 3.200000e+01 : f32
    %328 = vector.broadcast %cst_342 : f32 to vector<1x128xf32>
    %329 = arith.divf %327, %328 : vector<1x128xf32>
    %330 = vector.broadcast %329 : vector<1x128xf32> to vector<32x128xf32>
    %331 = arith.subf %325, %330 : vector<32x128xf32>
    %332 = arith.mulf %331, %331 : vector<32x128xf32>
    %cst_343 = arith.constant dense<0.000000e+00> : vector<128xf32>
    %333 = vector.multi_reduction <add>, %332, %cst_343 [0] : vector<32x128xf32> to vector<128xf32>
    %334 = vector.shape_cast %333 : vector<128xf32> to vector<1x128xf32>
    %cst_344 = arith.constant 3.200000e+01 : f32
    %335 = vector.broadcast %cst_344 : f32 to vector<1x128xf32>
    %336 = arith.divf %334, %335 : vector<1x128xf32>
    %337 = vector.broadcast %329 : vector<1x128xf32> to vector<32x128xf32>
    %338 = arith.subf %325, %337 : vector<32x128xf32>
    %cst_345 = arith.constant 9.99999974E-6 : f32
    %339 = vector.broadcast %cst_345 : f32 to vector<1x128xf32>
    %340 = arith.addf %336, %339 : vector<1x128xf32>
    %341 = math.rsqrt %340 : vector<1x128xf32>
    %342 = vector.broadcast %341 : vector<1x128xf32> to vector<32x128xf32>
    %343 = arith.mulf %338, %342 : vector<32x128xf32>
    %cst_346 = arith.constant 0.000000e+00 : f32
    %344 = vector.broadcast %cst_346 : f32 to vector<32x128xf32>
    %345 = arith.cmpf oge, %343, %344 : vector<32x128xf32>
    %cst_347 = arith.constant 2.000000e-01 : f32
    %346 = vector.broadcast %cst_347 : f32 to vector<32x128xf32>
    %347 = arith.mulf %346, %343 : vector<32x128xf32>
    %348 = arith.select %345, %343, %347 : vector<32x128xi1>, vector<32x128xf32>
    %349 = vector.shape_cast %348 : vector<32x128xf32> to vector<2x16x128xf32>
    %c0_348 = arith.constant 0 : index
    %c0_349 = arith.constant 0 : index
    %c0_350 = arith.constant 0 : index
    %350 = vector.load %arg6[%c0_348, %c0_349, %c0_350] : memref<2x16x128xf32, #tpu.memory_space<vmem>>, vector<2x16x128xf32>
    tpu.vector_store %arg6[%c0_348, %c0_349, %c0_350], %349 {strides = array<i32>} : memref<2x16x128xf32, #tpu.memory_space<vmem>>, vector<2x16x128xf32>,
    %c0_351 = arith.constant 0 : index
    %c0_352 = arith.constant 0 : index
    %351 = vector.load %arg4[%c0_351, %c0_352] : memref<16x128xf32, #tpu.memory_space<vmem>>, vector<16x128xf32>
    %352 = vector.shape_cast %351 : vector<16x128xf32> to vector<1x16x128xf32>
    %353 = vector.broadcast %352 : vector<1x16x128xf32> to vector<2x16x128xf32>
    %354 = arith.mulf %349, %353 : vector<2x16x128xf32>
    %cst_353 = arith.constant dense<0.000000e+00> : vector<2x16xf32>
    %355 = vector.multi_reduction <add>, %354, %cst_353 [2] : vector<2x16x128xf32> to vector<2x16xf32>
    %cst_354 = arith.constant dense<0.000000e+00> : vector<2xf32>
    %356 = vector.multi_reduction <add>, %355, %cst_354 [1] : vector<2x16xf32> to vector<2xf32>
    %357 = vector.shape_cast %356 : vector<2xf32> to vector<2x1xf32>
    %358 = arith.negf %357 : vector<2x1xf32>
    %359 = math.exp %358 : vector<2x1xf32>
    %cst_355 = arith.constant 1.000000e+00 : f32
    %360 = vector.broadcast %cst_355 : f32 to vector<2x1xf32>
    %361 = arith.addf %360, %359 : vector<2x1xf32>
    %362 = arith.divf %360, %361 : vector<2x1xf32>
    %c0_356 = arith.constant 0 : index
    %c0_357 = arith.constant 0 : index
    %363 = vector.load %arg5[%c0_356, %c0_357] : memref<2x1xf32, #tpu.memory_space<vmem>>, vector<2x1xf32>
    tpu.vector_store %arg5[%c0_356, %c0_357], %362 {strides = array<i32>} : memref<2x1xf32, #tpu.memory_space<vmem>>, vector<2x1xf32>,
    return
  }
}

</mosaic_0001>

<bundles_post_ra>
// kernel: discriminator_forward.1
= control target key start
LH: loop header
LB: loop body
LE: loop exit
PB: predicated region body
PF: predicated region fallthrough
CT: control target
= control target key end

     0   :  { %vm442_vm0 = vcmask 1043456   ;;  %vm345_vm1 = vcmask 64512   ;;  %s27148_s1 = inlined_call_operand.vmem [shape: bf16[16,8,128], index: 1, kind: input, shape index: {}]   ;;  %s27149_s0 = inlined_call_operand.vmem [shape: f32[2,34,34,8], index: 0, kind: input, shape index: {}]   ;;  %s27150_s2 = inlined_call_operand.vmem [shape: bf16[16,128,128], index: 2, kind: input, shape index: {}]   ;;  %s27151_s3 = inlined_call_operand.vmem [shape: bf16[9,128,128], index: 3, kind: input, shape index: {}]   ;;  %s27152_s4 = inlined_call_operand.vmem [shape: f32[16,128], index: 4, kind: input, shape index: {}]   ;;  %s27153_s6 = inlined_call_operand.vmem [shape: f32[2,16,128], index: 6, kind: output, shape index: {1}]   ;;  %s27154_s5 = inlined_call_operand.vmem [shape: f32[2,1], index: 5, kind: output, shape index: {0}]  }
   0x1   :  { %v16755_v0 = vld [vmem:[%s27148_s1 + $0x14] sm:$0xf]  ;;  %v16692_v2 = vld [vmem:[%s27149_s0 + $0x39] ss:$2 sm:$0xff] }
   0x2   :  { %v16691_v1 = vld [vmem:[%s27149_s0 + $0x29] ss:$2 sm:$0xff]  ;;  %22186 = vmatprep.subr.msk.bf16.mxu0 %vm442_vm0, %v16755_v0  ;;  %v3224_v3 = vsel %vm442_vm0, %v16755_v0, 0  ;;  %v16693_v5 = vld [vmem:[%s27149_s0 + $0x79] ss:$2 sm:$0xff] }
   0x3   :  { %v3093_v4 = vpack.c.bf16 %v16692_v2, %v16691_v1  ;;  %v16694_v6 = vld [vmem:[%s27149_s0 + $0x89] ss:$2 sm:$0xff]  ;;  %19532 = vmatpush3.bf16.msra.mxu0 %v3224_v3  ;;  %v16852_v8 = vld [vmem:[%s27148_s1 + $0x18] sm:$0xf]  ;;  %v22516_v29 = vld [vmem:[%s27148_s1 + $0x1c] sm:$0xf] }
   0x4   :  { %v3094_v7 = vpack.c.bf16 %v16694_v6, %v16693_v5  ;;  %v16695_v9 = vld [vmem:[%s27149_s0 + $0xc9] ss:$2 sm:$0xff]  ;;  %v16696_v10 = vld [vmem:[%s27149_s0 + $0xd9] ss:$2 sm:$0xff]  ;;  %22187 = vmatprep.subr.msk.bf16.mxu0 %vm442_vm0, %v16852_v8  ;;  %v3838_v11 = vsel %vm442_vm0, %v16852_v8, 0 }
   0x5   :  { %19533 = vmatprep.mubr.msk.bf16.mxu0 %vm345_vm1, %v3093_v4  ;;  %v3095_v12 = vpack.c.bf16 %v16696_v10, %v16695_v9  ;;  %v16697_v13 = vld [vmem:[%s27149_s0 + $0x119] ss:$2 sm:$0xff]  ;;  %v16698_v14 = vld [vmem:[%s27149_s0 + $0x129] ss:$2 sm:$0xff] }
   0x6   :  { %19534 = vmatmul.mubr.msk.bf16.vlgmr.msra.gmra.mrb[0].mxu0 %vm345_vm1, %v3094_v7  ;;  %v16699_v15 = vld [vmem:[%s27149_s0 + $0x169] ss:$2 sm:$0xff]  ;;  %v16700_v16 = vld [vmem:[%s27149_s0 + $0x179] ss:$2 sm:$0xff]  ;;  %v3096_v17 = vpack.c.bf16 %v16698_v14, %v16697_v13 }
   0x7   :  { %19598 = vmatpush3.bf16.msra.mxu0 %v3838_v11  ;;  %19537 = vmatprep.mubr.msk.bf16.mxu0 %vm345_vm1, %v3095_v12  ;;  %v3097_v18 = vpack.c.bf16 %v16700_v16, %v16699_v15  ;;  %v16701_v19 = vld [vmem:[%s27149_s0 + $0x1b9] ss:$2 sm:$0xff]  ;;  %v16702_v20 = vld [vmem:[%s27149_s0 + $0x1c9] ss:$2 sm:$0xff] }
   0x8   :  { %v16703_v21 = vld [vmem:[%s27149_s0 + $0x209] ss:$2 sm:$0xff]  ;;  %v16704_v22 = vld [vmem:[%s27149_s0 + $0x219] ss:$2 sm:$0xff]  ;;  %v3098_v23 = vpack.c.bf16 %v16702_v20, %v16701_v19  ;;  %22188 = vmatprep.subr.msk.bf16.mxu0 %vm442_vm0, %v22516_v29 }
   0x9   :  { %v3099_v24 = vpack.c.bf16 %v16704_v22, %v16703_v21  ;;  %v16705_v25 = vld [vmem:[%s27149_s0 + $0x259] ss:$2 sm:$0xff]  ;;  %v16706_v26 = vld [vmem:[%s27149_s0 + $0x269] ss:$2 sm:$0xff] }
   0xa   :  { %v16707_v27 = vld [vmem:[%s27149_s0 + $0x2a9] ss:$2 sm:$0xff]  ;;  %v16708_v28 = vld [vmem:[%s27149_s0 + $0x2b9] ss:$2 sm:$0xff]  ;;  %v3100_v30 = vpack.c.bf16 %v16706_v26, %v16705_v25 }
   0xb   :  { %v3101_v31 = vpack.c.bf16 %v16708_v28, %v16707_v27  ;;  %v16709_v32 = vld [vmem:[%s27149_s0 + $0x2f9] ss:$2 sm:$0xff]  ;;  %v16710_v33 = vld [vmem:[%s27149_s0 + $0x309] ss:$2 sm:$0xff] }
   0xc   :  { %v16711_v34 = vld [vmem:[%s27149_s0 + $0x349] ss:$2 sm:$0xff]  ;;  %v16712_v35 = vld [vmem:[%s27149_s0 + $0x359] ss:$2 sm:$0xff]  ;;  %v3102_v36 = vpack.c.bf16 %v16710_v33, %v16709_v32 }
   0xd   :  { %v3103_v37 = vpack.c.bf16 %v16712_v35, %v16711_v34  ;;  %v16713_v38 = vld [vmem:[%s27149_s0 + $0x399] ss:$2 sm:$0xff]  ;;  %v16714_v39 = vld [vmem:[%s27149_s0 + $0x3a9] ss:$2 sm:$0xff] }
   0xe   :  { %19538 = vmatmul.mubr.msk.bf16.gmra.mrb[4].mxu0 %vm345_vm1, %v3096_v17  ;;  %v16715_v40 = vld [vmem:[%s27149_s0 + $0x3e9] ss:$2 sm:$0xff]  ;;  %v16716_v41 = vld [vmem:[%s27149_s0 + $0x3f9] ss:$2 sm:$0xff]  ;;  %v3104_v42 = vpack.c.bf16 %v16714_v39, %v16713_v38  ;;  %v16789_v38 = vld [vmem:[%s27149_s0 + $0x3a] ss:$2 sm:$0xff] }
   0xf   :  { %19541 = vmatprep.mubr.msk.bf16.mxu0 %vm345_vm1, %v3097_v18  ;;  %v3105_v43 = vpack.c.bf16 %v16716_v41, %v16715_v40  ;;  %v16717_v44 = vld [vmem:[%s27149_s0 + $0x439] ss:$2 sm:$0xff]  ;;  %v16718_v45 = vld [vmem:[%s27149_s0 + $0x449] ss:$2 sm:$0xff]  ;;  %v16790_v41 = vld [vmem:[%s27149_s0 + $0x7a] ss:$2 sm:$0xff] }
  0x10   :  { %v16719_v46 = vld [vmem:[%s27149_s0 + $0x489] ss:$2 sm:$0xff]  ;;  %v16720_v47 = vld [vmem:[%s27149_s0 + $0x499] ss:$2 sm:$0xff]  ;;  %v3106_v48 = vpack.c.bf16 %v16718_v45, %v16717_v44 }
  0x11   :  { %v3107_v49 = vpack.c.bf16 %v16720_v47, %v16719_v46  ;;  %v16721_v50 = vld [vmem:[%s27149_s0 + $0x4d9] ss:$2 sm:$0xff]  ;;  %v16722_v51 = vld [vmem:[%s27149_s0 + $0x4e9] ss:$2 sm:$0xff] }
  0x12   :  { %v16723_v52 = vld [vmem:[%s27149_s0 + $0x579] ss:$2 sm:$0xff]  ;;  %v16724_v53 = vld [vmem:[%s27149_s0 + $0x589] ss:$2 sm:$0xff]  ;;  %v3108_v54 = vpack.c.bf16 %v16722_v51, %v16721_v50  ;;  %v16792_v50 = vld [vmem:[%s27149_s0 + $0xca] ss:$2 sm:$0xff] }
  0x13   :  { %v3109_v55 = vpack.c.bf16 %v16724_v53, %v16723_v52  ;;  %v16725_v56 = vld [vmem:[%s27149_s0 + $0x5c9] ss:$2 sm:$0xff]  ;;  %v16726_v57 = vld [vmem:[%s27149_s0 + $0x5d9] ss:$2 sm:$0xff]  ;;  %v16793_v51 = vld [vmem:[%s27149_s0 + $0xda] ss:$2 sm:$0xff] }
  0x14   :  { %v16727_v58 = vld [vmem:[%s27149_s0 + $0x619] ss:$2 sm:$0xff]  ;;  %v16728_v59 = vld [vmem:[%s27149_s0 + $0x629] ss:$2 sm:$0xff]  ;;  %v3110_v60 = vpack.c.bf16 %v16726_v57, %v16725_v56  ;;  %v16794_v56 = vld [vmem:[%s27149_s0 + $0x11a] ss:$2 sm:$0xff] }
  0x15   :  { %v3111_v61 = vpack.c.bf16 %v16728_v59, %v16727_v58  ;;  %v16729_v62 = vld [vmem:[%s27149_s0 + $0x669] ss:$2 sm:$0xff]  ;;  %v16730_v63 = vld [vmem:[%s27149_s0 + $0x679] ss:$2 sm:$0xff]  ;;  %v16795_v57 = vld [vmem:[%s27149_s0 + $0x12a] ss:$2 sm:$0xff] }
  0x16   :  { %19542 = vmatmul.mubr.msk.bf16.gmra.mrb[8].mxu0 %vm345_vm1, %v3098_v23  ;;  %v16731_v0 = vld [vmem:[%s27149_s0 + $0x6b9] ss:$2 sm:$0xff]  ;;  %v16732_v1 = vld [vmem:[%s27149_s0 + $0x6c9] ss:$2 sm:$0xff]  ;;  %v3112_v2 = vpack.c.bf16 %v16730_v63, %v16729_v62 }
  0x17   :  { %19545 = vmatprep.mubr.msk.bf16.mxu0 %vm345_vm1, %v3099_v24  ;;  %v3113_v3 = vpack.c.bf16 %v16732_v1, %v16731_v0  ;;  %v16733_v4 = vld [vmem:[%s27149_s0 + $0x709] ss:$2 sm:$0xff]  ;;  %v16734_v5 = vld [vmem:[%s27149_s0 + $0x719] ss:$2 sm:$0xff] }
  0x18   :  { %v16735_v6 = vld [vmem:[%s27149_s0 + $0x759] ss:$2 sm:$0xff]  ;;  %v16736_v7 = vld [vmem:[%s27149_s0 + $0x769] ss:$2 sm:$0xff]  ;;  %v3114_v8 = vpack.c.bf16 %v16734_v5, %v16733_v4 }
  0x19   :  { %v3115_v9 = vpack.c.bf16 %v16736_v7, %v16735_v6  ;;  %v16737_v10 = vld [vmem:[%s27149_s0 + $0x7a9] ss:$2 sm:$0xff]  ;;  %v16738_v11 = vld [vmem:[%s27149_s0 + $0x7b9] ss:$2 sm:$0xff]  ;;  %v16798_v7 = vld [vmem:[%s27149_s0 + $0x1ba] ss:$2 sm:$0xff] }
  0x1a   :  { %v16739_v12 = vld [vmem:[%s27149_s0 + $0x7f9] ss:$2 sm:$0xff]  ;;  %v16740_v13 = vld [vmem:[%s27149_s0 + $0x809] ss:$2 sm:$0xff]  ;;  %v3116_v14 = vpack.c.bf16 %v16738_v11, %v16737_v10  ;;  %v16800_v11 = vld [vmem:[%s27149_s0 + $0x20a] ss:$2 sm:$0xff] }
  0x1b   :  { %v3117_v15 = vpack.c.bf16 %v16740_v13, %v16739_v12  ;;  %v16741_v16 = vld [vmem:[%s27149_s0 + $0x849] ss:$2 sm:$0xff]  ;;  %v16742_v17 = vld [vmem:[%s27149_s0 + $0x859] ss:$2 sm:$0xff]  ;;  %v16801_v12 = vld [vmem:[%s27149_s0 + $0x21a] ss:$2 sm:$0xff] }
  0x1c   :  { %v16743_v18 = vld [vmem:[%s27149_s0 + $0x899] ss:$2 sm:$0xff]  ;;  %v16744_v19 = vld [vmem:[%s27149_s0 + $0x8a9] ss:$2 sm:$0xff]  ;;  %v3118_v20 = vpack.c.bf16 %v16742_v17, %v16741_v16 }
  0x1d   :  { %v3119_v21 = vpack.c.bf16 %v16744_v19, %v16743_v18  ;;  %v16745_v22 = vld [vmem:[%s27149_s0 + $0x8e9] ss:$2 sm:$0xff]  ;;  %v16746_v23 = vld [vmem:[%s27149_s0 + $0x8f9] ss:$2 sm:$0xff]  ;;  %v16802_v19 = vld [vmem:[%s27149_s0 + $0x25a] ss:$2 sm:$0xff] }
  0x1e   :  { %19546 = vmatmul.mubr.msk.bf16.gmra.mrb[12].mxu0 %vm345_vm1, %v3100_v30  ;;  %v16747_v24 = vld [vmem:[%s27149_s0 + $0x939] ss:$2 sm:$0xff]  ;;  %v16748_v25 = vld [vmem:[%s27149_s0 + $0x949] ss:$2 sm:$0xff]  ;;  %v3120_v26 = vpack.c.bf16 %v16746_v23, %v16745_v22  ;;  %v16804_v23 = vld [vmem:[%s27149_s0 + $0x2aa] ss:$2 sm:$0xff] }
  0x1f   :  { %19549 = vmatprep.mubr.msk.bf16.mxu0 %vm345_vm1, %v3101_v31  ;;  %v3121_v27 = vpack.c.bf16 %v16748_v25, %v16747_v24  ;;  %v16749_v28 = vld [vmem:[%s27149_s0 + $0x989] ss:$2 sm:$0xff]  ;;  %v16750_v30 = vld [vmem:[%s27149_s0 + $0x999] ss:$2 sm:$0xff]  ;;  %v16805_v24 = vld [vmem:[%s27149_s0 + $0x2ba] ss:$2 sm:$0xff] }
  0x20   :  { %v16751_v31 = vld [vmem:[%s27149_s0 + $0x9d9] ss:$2 sm:$0xff]  ;;  %v16752_v32 = vld [vmem:[%s27149_s0 + $0x9e9] ss:$2 sm:$0xff]  ;;  %v3122_v33 = vpack.c.bf16 %v16750_v30, %v16749_v28 }
  0x21   :  { %v3123_v34 = vpack.c.bf16 %v16752_v32, %v16751_v31  ;;  %v16753_v35 = vld [vmem:[%s27149_s0 + $0xa29] ss:$2 sm:$0xff]  ;;  %v22733_v58 = vld [vmem:[%s27148_s1 + $0x20] sm:$0xf] }
  0x22   :  { %v16271_v44 = vld [vmem:[%s27149_s0 + $0x1] ss:$2 sm:$0xff]  ;;  %v16272_v45 = vld [vmem:[%s27149_s0 + $0x11] ss:$2 sm:$0xff]  ;;  %v16806_v32 = vld [vmem:[%s27149_s0 + $0x2fa] ss:$2 sm:$0xff] }
  0x23   :  { %v311_v47 = vpack.c.bf16 %v16272_v45, %v16271_v44  ;;  %v16275_v59 = vld [vmem:[%s27149_s0 + $0xa1] ss:$2 sm:$0xff]  ;;  %v16277_v63 = vld [vmem:[%s27149_s0 + $0xf1] ss:$2 sm:$0xff]  ;;  %v16810_v44 = vld [vmem:[%s27149_s0 + $0x39a] ss:$2 sm:$0xff] }
  0x24   :  { %v16278_v0 = vld [vmem:[%s27149_s0 + $0x101] ss:$2 sm:$0xff]  ;;  %v16280_v5 = vld [vmem:[%s27149_s0 + $0x151] ss:$2 sm:$0xff]  ;;  %v16811_v45 = vld [vmem:[%s27149_s0 + $0x3aa] ss:$2 sm:$0xff] }
  0x25   :  { %19203 = vmatprep.mubr.msk.bf16.mxu1 %vm345_vm1, %v311_v47  ;;  %v314_v1 = vpack.c.bf16 %v16278_v0, %v16277_v63  ;;  %v16279_v4 = vld [vmem:[%s27149_s0 + $0x141] ss:$2 sm:$0xff]  ;;  %v16281_v6 = vld [vmem:[%s27149_s0 + $0x191] ss:$2 sm:$0xff] }
  0x26   :  { %19550 = vmatmul.mubr.msk.bf16.gmra.mrb[16].mxu0 %vm345_vm1, %v3102_v36  ;;  %v16754_v36 = vld [vmem:[%s27149_s0 + $0xa39] ss:$2 sm:$0xff] }
  0x27   :  { %19553 = vmatprep.mubr.msk.bf16.mxu0 %vm345_vm1, %v3103_v37  ;;  %v16788_v37 = vld [vmem:[%s27149_s0 + $0x2a] ss:$2 sm:$0xff]  ;;  %v3124_v39 = vpack.c.bf16 %v16754_v36, %v16753_v35  ;;  %v16282_v10 = vld [vmem:[%s27149_s0 + $0x1a1] ss:$2 sm:$0xff]  ;;  %v16284_v17 = vld [vmem:[%s27149_s0 + $0x1f1] ss:$2 sm:$0xff] }
  0x28   :  { %v3707_v40 = vpack.c.bf16 %v16789_v38, %v16788_v37  ;;  %v316_v13 = vpack.c.bf16 %v16282_v10, %v16281_v6  ;;  %v16283_v16 = vld [vmem:[%s27149_s0 + $0x1e1] ss:$2 sm:$0xff]  ;;  %v16285_v18 = vld [vmem:[%s27149_s0 + $0x231] ss:$2 sm:$0xff]  ;;  %v16808_v36 = vld [vmem:[%s27149_s0 + $0x34a] ss:$2 sm:$0xff] }
  0x29   :  { %v16286_v22 = vld [vmem:[%s27149_s0 + $0x241] ss:$2 sm:$0xff]  ;;  %v16288_v30 = vld [vmem:[%s27149_s0 + $0x291] ss:$2 sm:$0xff]  ;;  %v16809_v37 = vld [vmem:[%s27149_s0 + $0x35a] ss:$2 sm:$0xff] }
  0x2a   :  { %v318_v25 = vpack.c.bf16 %v16286_v22, %v16285_v18  ;;  %v16287_v28 = vld [vmem:[%s27149_s0 + $0x281] ss:$2 sm:$0xff]  ;;  %v16289_v31 = vld [vmem:[%s27149_s0 + $0x2d1] ss:$2 sm:$0xff] }
  0x2b   :  { %v16290_v35 = vld [vmem:[%s27149_s0 + $0x2e1] ss:$2 sm:$0xff] }
  0x2c   :  { %v320_v38 = vpack.c.bf16 %v16290_v35, %v16289_v31  ;;  %v16294_v47 = vld [vmem:[%s27149_s0 + $0x381] ss:$2 sm:$0xff] }
  0x2e   :  { %19554 = vmatmul.mubr.msk.bf16.gmra.mrb[20].mxu0 %vm345_vm1, %v3104_v42  ;;  %v16791_v42 = vld [vmem:[%s27149_s0 + $0x8a] ss:$2 sm:$0xff] }
  0x2f   :  { %19557 = vmatprep.mubr.msk.bf16.mxu0 %vm345_vm1, %v3105_v43  ;;  %v16335_v43 = vld [vmem:[%s27148_s1 + $0x4] sm:$0xf]  ;;  %v3708_v53 = vpack.c.bf16 %v16791_v42, %v16790_v41  ;;  %v16292_v42 = vld [vmem:[%s27149_s0 + $0x331] ss:$2 sm:$0xff] }
  0x30   :  { %22181 = vmatprep.subr.msk.bf16.mxu1 %vm442_vm0, %v16335_v43  ;;  %v444_v46 = vsel %vm442_vm0, %v16335_v43, 0  ;;  %v16291_v41 = vld [vmem:[%s27149_s0 + $0x321] ss:$2 sm:$0xff]  ;;  %v16293_v43 = vld [vmem:[%s27149_s0 + $0x371] ss:$2 sm:$0xff] }
  0x31   :  { %19202 = vmatpush3.bf16.msra.mxu1 %v444_v46  ;;  %v321_v46 = vpack.c.bf16 %v16292_v42, %v16291_v41  ;;  %v16830_v41 = vld [vmem:[%s27149_s0 + $0x70a] ss:$2 sm:$0xff]  ;;  %v16831_v42 = vld [vmem:[%s27149_s0 + $0x71a] ss:$2 sm:$0xff] }
  0x36   :  { %19558 = vmatmul.mubr.msk.bf16.gmra.mrb[24].mxu0 %vm345_vm1, %v3106_v48  ;;  %v16273_v48 = vld [vmem:[%s27149_s0 + $0x51] ss:$2 sm:$0xff] }
  0x37   :  { %19561 = vmatprep.mubr.msk.bf16.mxu0 %vm345_vm1, %v3107_v49  ;;  %v16274_v49 = vld [vmem:[%s27149_s0 + $0x61] ss:$2 sm:$0xff] }
  0x38   :  { %v312_v52 = vpack.c.bf16 %v16274_v49, %v16273_v48  ;;  %v16812_v48 = vld [vmem:[%s27149_s0 + $0x3ea] ss:$2 sm:$0xff]  ;;  %v16813_v49 = vld [vmem:[%s27149_s0 + $0x3fa] ss:$2 sm:$0xff] }
  0x3a   :  { %19204 = vmatmul.mubr.msk.bf16.vlgmr.msra.gmra.mrb[0].mxu1 %vm345_vm1, %v312_v52  ;;  %v3719_v52 = vpack.c.bf16 %v16813_v49, %v16812_v48  ;;  %v3728_v48 = vpack.c.bf16 %v16831_v42, %v16830_v41  ;;  %v16334_v41 = vld [vmem:[%s27149_s0 + $0xa11] ss:$2 sm:$0xff] }
  0x3b   :  { %v16885_v42 = vld [vmem:[%s27149_s0 + $0x2b] ss:$2 sm:$0xff] }
  0x3e   :  { %19562 = vmatmul.mubr.msk.bf16.gmra.mrb[28].mxu0 %vm345_vm1, %v3108_v54  ;;  %v3709_v54 = vpack.c.bf16 %v16793_v51, %v16792_v50  ;;  %v322_v50 = vpack.c.bf16 %v16294_v47, %v16293_v43  ;;  %v3718_v51 = vpack.c.bf16 %v16811_v45, %v16810_v44  ;;  %v16314_v44 = vld [vmem:[%s27149_s0 + $0x6f1] ss:$2 sm:$0xff]  ;;  %v16832_v45 = vld [vmem:[%s27149_s0 + $0x75a] ss:$2 sm:$0xff] }
  0x3f   :  { %19565 = vmatprep.mubr.msk.bf16.mxu0 %vm345_vm1, %v3109_v55  ;;  %v4452_v55 = vsel %vm442_vm0, %v22516_v29, 0  ;;  %v16796_v29 = vld [vmem:[%s27149_s0 + $0x16a] ss:$2 sm:$0xff] }
  0x46   :  { %19566 = vmatmul.mubr.msk.bf16.gmra.mrb[32].mxu0 %vm345_vm1, %v3110_v60  ;;  %v16276_v60 = vld [vmem:[%s27149_s0 + $0xb1] ss:$2 sm:$0xff] }
  0x47   :  { %19569 = vmatprep.mubr.msk.bf16.mxu0 %vm345_vm1, %v3111_v61  ;;  %v16797_v61 = vld [vmem:[%s27149_s0 + $0x17a] ss:$2 sm:$0xff]  ;;  %v313_v62 = vpack.c.bf16 %v16276_v60, %v16275_v59  ;;  %v16298_v59 = vld [vmem:[%s27149_s0 + $0x421] ss:$2 sm:$0xff]  ;;  %v16816_v60 = vld [vmem:[%s27149_s0 + $0x48a] ss:$2 sm:$0xff] }
  0x49   :  { %19207 = vmatprep.mubr.msk.bf16.mxu1 %vm345_vm1, %v313_v62 }
  0x4a   :  { %19208 = vmatmul.mubr.msk.bf16.gmra.mrb[4].mxu1 %vm345_vm1, %v314_v1  ;;  %v16299_v1 = vld [vmem:[%s27149_s0 + $0x461] ss:$2 sm:$0xff] }
  0x4e   :  { %19570 = vmatmul.mubr.msk.bf16.gmra.mrb[36].mxu0 %vm345_vm1, %v3112_v2  ;;  %v3710_v2 = vpack.c.bf16 %v16795_v57, %v16794_v56  ;;  %v16814_v56 = vld [vmem:[%s27149_s0 + $0x43a] ss:$2 sm:$0xff]  ;;  %v16815_v57 = vld [vmem:[%s27149_s0 + $0x44a] ss:$2 sm:$0xff] }
  0x4f   :  { %19573 = vmatprep.mubr.msk.bf16.mxu0 %vm345_vm1, %v3113_v3  ;;  %v3711_v3 = vpack.c.bf16 %v16797_v61, %v16796_v29  ;;  %v16817_v61 = vld [vmem:[%s27149_s0 + $0x49a] ss:$2 sm:$0xff]  ;;  %v3720_v63 = vpack.c.bf16 %v16815_v57, %v16814_v56  ;;  %v16318_v56 = vld [vmem:[%s27149_s0 + $0x791] ss:$2 sm:$0xff] }
  0x50   :  { %v3721_v0 = vpack.c.bf16 %v16817_v61, %v16816_v60  ;;  %v16836_v57 = vld [vmem:[%s27149_s0 + $0x7fa] ss:$2 sm:$0xff] }
  0x56   :  { %19574 = vmatmul.mubr.msk.bf16.gmra.mrb[40].mxu0 %vm345_vm1, %v3114_v8  ;;  %v16799_v8 = vld [vmem:[%s27149_s0 + $0x1ca] ss:$2 sm:$0xff] }
  0x57   :  { %19577 = vmatprep.mubr.msk.bf16.mxu0 %vm345_vm1, %v3115_v9  ;;  %v315_v9 = vpack.c.bf16 %v16280_v5, %v16279_v4  ;;  %v16818_v4 = vld [vmem:[%s27149_s0 + $0x4da] ss:$2 sm:$0xff]  ;;  %v16819_v5 = vld [vmem:[%s27149_s0 + $0x4ea] ss:$2 sm:$0xff] }
  0x59   :  { %19211 = vmatprep.mubr.msk.bf16.mxu1 %vm345_vm1, %v315_v9  ;;  %v16821_v9 = vld [vmem:[%s27149_s0 + $0x58a] ss:$2 sm:$0xff] }
  0x5a   :  { %19212 = vmatmul.mubr.msk.bf16.gmra.mrb[8].mxu1 %vm345_vm1, %v316_v13  ;;  %v16303_v13 = vld [vmem:[%s27149_s0 + $0x551] ss:$2 sm:$0xff] }
  0x5e   :  { %19578 = vmatmul.mubr.msk.bf16.gmra.mrb[44].mxu0 %vm345_vm1, %v3116_v14  ;;  %v3712_v14 = vpack.c.bf16 %v16799_v8, %v16798_v7  ;;  %v16302_v7 = vld [vmem:[%s27149_s0 + $0x4c1] ss:$2 sm:$0xff]  ;;  %v16820_v8 = vld [vmem:[%s27149_s0 + $0x57a] ss:$2 sm:$0xff] }
  0x5f   :  { %19581 = vmatprep.mubr.msk.bf16.mxu0 %vm345_vm1, %v3117_v15  ;;  %v3713_v15 = vpack.c.bf16 %v16801_v12, %v16800_v11  ;;  %v3722_v11 = vpack.c.bf16 %v16819_v5, %v16818_v4  ;;  %v3723_v12 = vpack.c.bf16 %v16821_v9, %v16820_v8  ;;  %v16322_v4 = vld [vmem:[%s27149_s0 + $0x831] ss:$2 sm:$0xff]  ;;  %v16840_v5 = vld [vmem:[%s27149_s0 + $0x89a] ss:$2 sm:$0xff] }
  0x66   :  { %19582 = vmatmul.mubr.msk.bf16.gmra.mrb[48].mxu0 %vm345_vm1, %v3118_v20  ;;  %v16803_v20 = vld [vmem:[%s27149_s0 + $0x26a] ss:$2 sm:$0xff] }
  0x67   :  { %19585 = vmatprep.mubr.msk.bf16.mxu0 %vm345_vm1, %v3119_v21  ;;  %v317_v21 = vpack.c.bf16 %v16284_v17, %v16283_v16  ;;  %v16822_v16 = vld [vmem:[%s27149_s0 + $0x5ca] ss:$2 sm:$0xff]  ;;  %v16823_v17 = vld [vmem:[%s27149_s0 + $0x5da] ss:$2 sm:$0xff] }
  0x69   :  { %19215 = vmatprep.mubr.msk.bf16.mxu1 %vm345_vm1, %v317_v21  ;;  %v16825_v21 = vld [vmem:[%s27149_s0 + $0x62a] ss:$2 sm:$0xff] }
  0x6a   :  { %19216 = vmatmul.mubr.msk.bf16.gmra.mrb[12].mxu1 %vm345_vm1, %v318_v25  ;;  %v16307_v25 = vld [vmem:[%s27149_s0 + $0x5f1] ss:$2 sm:$0xff] }
  0x6e   :  { %19586 = vmatmul.mubr.msk.bf16.gmra.mrb[52].mxu0 %vm345_vm1, %v3120_v26  ;;  %v3714_v26 = vpack.c.bf16 %v16803_v20, %v16802_v19  ;;  %v16306_v19 = vld [vmem:[%s27149_s0 + $0x5b1] ss:$2 sm:$0xff]  ;;  %v16824_v20 = vld [vmem:[%s27149_s0 + $0x61a] ss:$2 sm:$0xff] }
  0x6f   :  { %19589 = vmatprep.mubr.msk.bf16.mxu0 %vm345_vm1, %v3121_v27  ;;  %v3715_v27 = vpack.c.bf16 %v16805_v24, %v16804_v23  ;;  %v3724_v23 = vpack.c.bf16 %v16823_v17, %v16822_v16  ;;  %v3725_v24 = vpack.c.bf16 %v16825_v21, %v16824_v20  ;;  %v16326_v16 = vld [vmem:[%s27149_s0 + $0x8d1] ss:$2 sm:$0xff]  ;;  %v16844_v17 = vld [vmem:[%s27149_s0 + $0x93a] ss:$2 sm:$0xff] }
  0x76   :  { %19590 = vmatmul.mubr.msk.bf16.gmra.mrb[56].mxu0 %vm345_vm1, %v3122_v33  ;;  %v16807_v33 = vld [vmem:[%s27149_s0 + $0x30a] ss:$2 sm:$0xff] }
  0x77   :  { %19593 = vmatprep.mubr.msk.bf16.mxu0 %vm345_vm1, %v3123_v34  ;;  %v319_v34 = vpack.c.bf16 %v16288_v30, %v16287_v28  ;;  %v16826_v28 = vld [vmem:[%s27149_s0 + $0x66a] ss:$2 sm:$0xff]  ;;  %v16827_v30 = vld [vmem:[%s27149_s0 + $0x67a] ss:$2 sm:$0xff] }
  0x79   :  { %19219 = vmatprep.mubr.msk.bf16.mxu1 %vm345_vm1, %v319_v34  ;;  %v16829_v34 = vld [vmem:[%s27149_s0 + $0x6ca] ss:$2 sm:$0xff] }
  0x7a   :  { %19220 = vmatmul.mubr.msk.bf16.gmra.mrb[16].mxu1 %vm345_vm1, %v320_v38  ;;  %v16311_v38 = vld [vmem:[%s27149_s0 + $0x691] ss:$2 sm:$0xff] }
  0x7b   :  { %19223 = vmatprep.mubr.msk.bf16.mxu1 %vm345_vm1, %v321_v46  ;;  %v16833_v46 = vld [vmem:[%s27149_s0 + $0x76a] ss:$2 sm:$0xff] }
  0x7c   :  { %v3729_v49 = vpack.c.bf16 %v16833_v46, %v16832_v45 }
  0x7e   :  { %19594 = vmatmul.mubr.msk.bf16.gmra.mrb[60].mxu0 %vm345_vm1, %v3124_v39  ;;  %v3716_v39 = vpack.c.bf16 %v16807_v33, %v16806_v32  ;;  %v16310_v32 = vld [vmem:[%s27149_s0 + $0x651] ss:$2 sm:$0xff]  ;;  %v16828_v33 = vld [vmem:[%s27149_s0 + $0x6ba] ss:$2 sm:$0xff] }
  0x7f   :  { %19599 = vmatprep.mubr.msk.bf16.mxu0 %vm345_vm1, %v3707_v40  ;;  %v3717_v40 = vpack.c.bf16 %v16809_v37, %v16808_v36  ;;  %v3726_v36 = vpack.c.bf16 %v16827_v30, %v16826_v28  ;;  %v3727_v37 = vpack.c.bf16 %v16829_v34, %v16828_v33  ;;  %v16330_v28 = vld [vmem:[%s27149_s0 + $0x971] ss:$2 sm:$0xff]  ;;  %v16848_v30 = vld [vmem:[%s27149_s0 + $0x9da] ss:$2 sm:$0xff] }
  0x82   :  { %19224 = vmatmul.mubr.msk.bf16.gmra.mrb[20].mxu1 %vm345_vm1, %v322_v50  ;;  %v16315_v50 = vld [vmem:[%s27149_s0 + $0x731] ss:$2 sm:$0xff] }
  0x86   :  { %19600 = vmatmul.mubr.msk.bf16.vlgmr.msra.gmra.mrb[0].mxu0 %vm345_vm1, %v3708_v53  ;;  %v16295_v53 = vld [vmem:[%s27149_s0 + $0x3c1] ss:$2 sm:$0xff] }
  0x87   :  { %19664 = vmatpush3.bf16.msra.mxu0 %v4452_v55  ;;  %19603 = vmatprep.mubr.msk.bf16.mxu0 %vm345_vm1, %v3709_v54  ;;  %v16296_v54 = vld [vmem:[%s27149_s0 + $0x3d1] ss:$2 sm:$0xff] }
  0x88   :  { %22189 = vmatprep.subr.msk.bf16.mxu0 %vm442_vm0, %v22733_v58  ;;  %v16297_v55 = vld [vmem:[%s27149_s0 + $0x411] ss:$2 sm:$0xff]  ;;  %v323_v29 = vpack.c.bf16 %v16296_v54, %v16295_v53  ;;  %v16834_v53 = vld [vmem:[%s27149_s0 + $0x7aa] ss:$2 sm:$0xff]  ;;  %v16835_v54 = vld [vmem:[%s27149_s0 + $0x7ba] ss:$2 sm:$0xff] }
  0x89   :  { %v324_v62 = vpack.c.bf16 %v16298_v59, %v16297_v55  ;;  %v3730_v60 = vpack.c.bf16 %v16835_v54, %v16834_v53  ;;  %v16209_v54 = vld [vmem:[%s27149_s0 + $0x50] ss:$2 sm:$0xff] }
  0x8a   :  { %19227 = vmatprep.mubr.msk.bf16.mxu1 %vm345_vm1, %v323_v29  ;;  %v16837_v29 = vld [vmem:[%s27149_s0 + $0x80a] ss:$2 sm:$0xff] }
  0x8b   :  { %19228 = vmatmul.mubr.msk.bf16.gmra.mrb[24].mxu1 %vm345_vm1, %v324_v62  ;;  %v3731_v61 = vpack.c.bf16 %v16837_v29, %v16836_v57  ;;  %v16319_v62 = vld [vmem:[%s27149_s0 + $0x7d1] ss:$2 sm:$0xff] }
  0x8c   :  { %v16890_v57 = vld [vmem:[%s27149_s0 + $0xdb] ss:$2 sm:$0xff] }
  0x8e   :  { %19604 = vmatmul.mubr.msk.bf16.gmra.mrb[4].mxu0 %vm345_vm1, %v3710_v2  ;;  %v16300_v2 = vld [vmem:[%s27149_s0 + $0x471] ss:$2 sm:$0xff] }
  0x8f   :  { %19607 = vmatprep.mubr.msk.bf16.mxu0 %vm345_vm1, %v3711_v3  ;;  %v16301_v3 = vld [vmem:[%s27149_s0 + $0x4b1] ss:$2 sm:$0xff]  ;;  %v325_v6 = vpack.c.bf16 %v16300_v2, %v16299_v1  ;;  %v16838_v1 = vld [vmem:[%s27149_s0 + $0x84a] ss:$2 sm:$0xff]  ;;  %v16839_v2 = vld [vmem:[%s27149_s0 + $0x85a] ss:$2 sm:$0xff] }
  0x90   :  { %v326_v10 = vpack.c.bf16 %v16302_v7, %v16301_v3  ;;  %v3732_v8 = vpack.c.bf16 %v16839_v2, %v16838_v1  ;;  %v16211_v1 = vld [vmem:[%s27149_s0 + $0xa0] ss:$2 sm:$0xff]  ;;  %v16212_v2 = vld [vmem:[%s27149_s0 + $0xb0] ss:$2 sm:$0xff] }
  0x91   :  { %19231 = vmatprep.mubr.msk.bf16.mxu1 %vm345_vm1, %v325_v6  ;;  %v16841_v6 = vld [vmem:[%s27149_s0 + $0x8aa] ss:$2 sm:$0xff] }
  0x92   :  { %v3733_v9 = vpack.c.bf16 %v16841_v6, %v16840_v5  ;;  %v16213_v5 = vld [vmem:[%s27149_s0 + $0xf0] ss:$2 sm:$0xff]  ;;  %v16214_v6 = vld [vmem:[%s27149_s0 + $0x100] ss:$2 sm:$0xff] }
  0x93   :  { %19232 = vmatmul.mubr.msk.bf16.gmra.mrb[28].mxu1 %vm345_vm1, %v326_v10  ;;  %v16323_v10 = vld [vmem:[%s27149_s0 + $0x871] ss:$2 sm:$0xff] }
  0x96   :  { %19608 = vmatmul.mubr.msk.bf16.gmra.mrb[8].mxu0 %vm345_vm1, %v3712_v14  ;;  %v16304_v14 = vld [vmem:[%s27149_s0 + $0x561] ss:$2 sm:$0xff] }
  0x97   :  { %19611 = vmatprep.mubr.msk.bf16.mxu0 %vm345_vm1, %v3713_v15  ;;  %v16305_v15 = vld [vmem:[%s27149_s0 + $0x5a1] ss:$2 sm:$0xff]  ;;  %v327_v18 = vpack.c.bf16 %v16304_v14, %v16303_v13  ;;  %v16842_v13 = vld [vmem:[%s27149_s0 + $0x8ea] ss:$2 sm:$0xff]  ;;  %v16843_v14 = vld [vmem:[%s27149_s0 + $0x8fa] ss:$2 sm:$0xff] }
  0x98   :  { %v328_v22 = vpack.c.bf16 %v16306_v19, %v16305_v15  ;;  %v3734_v20 = vpack.c.bf16 %v16843_v14, %v16842_v13  ;;  %v16895_v13 = vld [vmem:[%s27149_s0 + $0x1bb] ss:$2 sm:$0xff]  ;;  %v16896_v14 = vld [vmem:[%s27149_s0 + $0x1cb] ss:$2 sm:$0xff] }
  0x99   :  { %19235 = vmatprep.mubr.msk.bf16.mxu1 %vm345_vm1, %v327_v18  ;;  %v16845_v18 = vld [vmem:[%s27149_s0 + $0x94a] ss:$2 sm:$0xff] }
  0x9a   :  { %v3735_v21 = vpack.c.bf16 %v16845_v18, %v16844_v17  ;;  %v16897_v17 = vld [vmem:[%s27149_s0 + $0x20b] ss:$2 sm:$0xff]  ;;  %v16898_v18 = vld [vmem:[%s27149_s0 + $0x21b] ss:$2 sm:$0xff] }
  0x9b   :  { %19236 = vmatmul.mubr.msk.bf16.gmra.mrb[32].mxu1 %vm345_vm1, %v328_v22  ;;  %v16327_v22 = vld [vmem:[%s27149_s0 + $0x911] ss:$2 sm:$0xff] }
  0x9e   :  { %19612 = vmatmul.mubr.msk.bf16.gmra.mrb[12].mxu0 %vm345_vm1, %v3714_v26  ;;  %v16308_v26 = vld [vmem:[%s27149_s0 + $0x601] ss:$2 sm:$0xff] }
  0x9f   :  { %19615 = vmatprep.mubr.msk.bf16.mxu0 %vm345_vm1, %v3715_v27  ;;  %v16309_v27 = vld [vmem:[%s27149_s0 + $0x641] ss:$2 sm:$0xff]  ;;  %v329_v31 = vpack.c.bf16 %v16308_v26, %v16307_v25  ;;  %v16846_v25 = vld [vmem:[%s27149_s0 + $0x98a] ss:$2 sm:$0xff]  ;;  %v16847_v26 = vld [vmem:[%s27149_s0 + $0x99a] ss:$2 sm:$0xff] }
  0xa0   :  { %v330_v35 = vpack.c.bf16 %v16310_v32, %v16309_v27  ;;  %v3736_v33 = vpack.c.bf16 %v16847_v26, %v16846_v25  ;;  %v16899_v25 = vld [vmem:[%s27149_s0 + $0x25b] ss:$2 sm:$0xff]  ;;  %v16900_v26 = vld [vmem:[%s27149_s0 + $0x26b] ss:$2 sm:$0xff] }
  0xa1   :  { %19239 = vmatprep.mubr.msk.bf16.mxu1 %vm345_vm1, %v329_v31  ;;  %v16849_v31 = vld [vmem:[%s27149_s0 + $0x9ea] ss:$2 sm:$0xff] }
  0xa2   :  { %v3737_v34 = vpack.c.bf16 %v16849_v31, %v16848_v30  ;;  %v16901_v30 = vld [vmem:[%s27149_s0 + $0x2ab] ss:$2 sm:$0xff]  ;;  %v16902_v31 = vld [vmem:[%s27149_s0 + $0x2bb] ss:$2 sm:$0xff] }
  0xa3   :  { %19240 = vmatmul.mubr.msk.bf16.gmra.mrb[36].mxu1 %vm345_vm1, %v330_v35  ;;  %v16331_v35 = vld [vmem:[%s27149_s0 + $0x9b1] ss:$2 sm:$0xff] }
  0xa6   :  { %19616 = vmatmul.mubr.msk.bf16.gmra.mrb[16].mxu0 %vm345_vm1, %v3716_v39  ;;  %v16312_v39 = vld [vmem:[%s27149_s0 + $0x6a1] ss:$2 sm:$0xff] }
  0xa7   :  { %19619 = vmatprep.mubr.msk.bf16.mxu0 %vm345_vm1, %v3717_v40  ;;  %v16313_v40 = vld [vmem:[%s27149_s0 + $0x6e1] ss:$2 sm:$0xff]  ;;  %v331_v43 = vpack.c.bf16 %v16312_v39, %v16311_v38  ;;  %v16850_v38 = vld [vmem:[%s27149_s0 + $0xa2a] ss:$2 sm:$0xff]  ;;  %v16851_v39 = vld [vmem:[%s27149_s0 + $0xa3a] ss:$2 sm:$0xff] }
  0xa8   :  { %v332_v47 = vpack.c.bf16 %v16314_v44, %v16313_v40  ;;  %v3738_v45 = vpack.c.bf16 %v16851_v39, %v16850_v38  ;;  %v16903_v38 = vld [vmem:[%s27149_s0 + $0x2fb] ss:$2 sm:$0xff]  ;;  %v16904_v39 = vld [vmem:[%s27149_s0 + $0x30b] ss:$2 sm:$0xff] }
  0xa9   :  { %19243 = vmatprep.mubr.msk.bf16.mxu1 %vm345_vm1, %v331_v43  ;;  %v16886_v43 = vld [vmem:[%s27149_s0 + $0x3b] ss:$2 sm:$0xff] }
  0xaa   :  { %v4321_v46 = vpack.c.bf16 %v16886_v43, %v16885_v42  ;;  %v16905_v42 = vld [vmem:[%s27149_s0 + $0x34b] ss:$2 sm:$0xff]  ;;  %v16906_v43 = vld [vmem:[%s27149_s0 + $0x35b] ss:$2 sm:$0xff] }
  0xab   :  { %19244 = vmatmul.mubr.msk.bf16.gmra.mrb[40].mxu1 %vm345_vm1, %v332_v47  ;;  %v16887_v47 = vld [vmem:[%s27149_s0 + $0x7b] ss:$2 sm:$0xff] }
  0xae   :  { %19620 = vmatmul.mubr.msk.bf16.gmra.mrb[20].mxu0 %vm345_vm1, %v3718_v51  ;;  %v16316_v51 = vld [vmem:[%s27149_s0 + $0x741] ss:$2 sm:$0xff] }
  0xaf   :  { %19623 = vmatprep.mubr.msk.bf16.mxu0 %vm345_vm1, %v3719_v52  ;;  %v16317_v52 = vld [vmem:[%s27149_s0 + $0x781] ss:$2 sm:$0xff]  ;;  %v333_v55 = vpack.c.bf16 %v16316_v51, %v16315_v50  ;;  %v23_v50 = vld [vmem:[%s27149_s0] ss:$2 sm:$0xff]  ;;  %v16208_v51 = vld [vmem:[%s27149_s0 + $0x10] ss:$2 sm:$0xff] }
  0xb0   :  { %v334_v59 = vpack.c.bf16 %v16318_v56, %v16317_v52  ;;  %v150_v53 = vpack.c.bf16 %v16208_v51, %v23_v50  ;;  %v16889_v56 = vld [vmem:[%s27149_s0 + $0xcb] ss:$2 sm:$0xff]  ;;  %v16907_v50 = vld [vmem:[%s27149_s0 + $0x39b] ss:$2 sm:$0xff] }
  0xb1   :  { %19247 = vmatprep.mubr.msk.bf16.mxu1 %vm345_vm1, %v333_v55  ;;  %v16210_v55 = vld [vmem:[%s27149_s0 + $0x60] ss:$2 sm:$0xff]  ;;  %v16908_v51 = vld [vmem:[%s27149_s0 + $0x3ab] ss:$2 sm:$0xff] }
  0xb2   :  { %v151_v29 = vpack.c.bf16 %v16210_v55, %v16209_v54  ;;  %v16909_v54 = vld [vmem:[%s27149_s0 + $0x3eb] ss:$2 sm:$0xff]  ;;  %v16910_v55 = vld [vmem:[%s27149_s0 + $0x3fb] ss:$2 sm:$0xff] }
  0xb3   :  { %19248 = vmatmul.mubr.msk.bf16.gmra.mrb[44].mxu1 %vm345_vm1, %v334_v59 }
  0xb6   :  { %19624 = vmatmul.mubr.msk.bf16.gmra.mrb[24].mxu0 %vm345_vm1, %v3720_v63  ;;  %v16320_v63 = vld [vmem:[%s27149_s0 + $0x7e1] ss:$2 sm:$0xff] }
  0xb7   :  { %19627 = vmatprep.mubr.msk.bf16.mxu0 %vm345_vm1, %v3721_v0  ;;  %v16321_v0 = vld [vmem:[%s27149_s0 + $0x821] ss:$2 sm:$0xff]  ;;  %v335_v3 = vpack.c.bf16 %v16320_v63, %v16319_v62 }
  0xb8   :  { %v336_v7 = vpack.c.bf16 %v16322_v4, %v16321_v0  ;;  %v16891_v62 = vld [vmem:[%s27149_s0 + $0x11b] ss:$2 sm:$0xff]  ;;  %v16892_v63 = vld [vmem:[%s27149_s0 + $0x12b] ss:$2 sm:$0xff]  ;;  %v152_v4 = vpack.c.bf16 %v16212_v2, %v16211_v1  ;;  %v16234_v1 = vld [vmem:[%s27149_s0 + $0x420] ss:$2 sm:$0xff] }
  0xb9   :  { %19251 = vmatprep.mubr.msk.bf16.mxu1 %vm345_vm1, %v335_v3  ;;  %v23195_v0 = vld [vmem:[%s27148_s1 + $0x24] sm:$0xf]  ;;  %v16913_v2 = vld [vmem:[%s27149_s0 + $0x48b] ss:$2 sm:$0xff] }
  0xba   :  { %v16894_v3 = vld [vmem:[%s27149_s0 + $0x17b] ss:$2 sm:$0xff] }
  0xbb   :  { %19252 = vmatmul.mubr.msk.bf16.gmra.mrb[48].mxu1 %vm345_vm1, %v336_v7  ;;  %v153_v7 = vpack.c.bf16 %v16214_v6, %v16213_v5 }
  0xbe   :  { %19628 = vmatmul.mubr.msk.bf16.gmra.mrb[28].mxu0 %vm345_vm1, %v3722_v11  ;;  %v16324_v11 = vld [vmem:[%s27149_s0 + $0x881] ss:$2 sm:$0xff] }
  0xbf   :  { %19631 = vmatprep.mubr.msk.bf16.mxu0 %vm345_vm1, %v3723_v12  ;;  %v16325_v12 = vld [vmem:[%s27149_s0 + $0x8c1] ss:$2 sm:$0xff]  ;;  %v337_v15 = vpack.c.bf16 %v16324_v11, %v16323_v10  ;;  %v16215_v10 = vld [vmem:[%s27149_s0 + $0x140] ss:$2 sm:$0xff]  ;;  %v16216_v11 = vld [vmem:[%s27149_s0 + $0x150] ss:$2 sm:$0xff] }
  0xc0   :  { %v338_v19 = vpack.c.bf16 %v16326_v16, %v16325_v12  ;;  %v16217_v12 = vld [vmem:[%s27149_s0 + $0x190] ss:$2 sm:$0xff]  ;;  %v16218_v16 = vld [vmem:[%s27149_s0 + $0x1a0] ss:$2 sm:$0xff] }
  0xc1   :  { %19255 = vmatprep.mubr.msk.bf16.mxu1 %vm345_vm1, %v337_v15  ;;  %v154_v15 = vpack.c.bf16 %v16216_v11, %v16215_v10  ;;  %v16915_v10 = vld [vmem:[%s27149_s0 + $0x4db] ss:$2 sm:$0xff]  ;;  %v16916_v11 = vld [vmem:[%s27149_s0 + $0x4eb] ss:$2 sm:$0xff] }
  0xc3   :  { %19256 = vmatmul.mubr.msk.bf16.gmra.mrb[52].mxu1 %vm345_vm1, %v338_v19  ;;  %v155_v19 = vpack.c.bf16 %v16218_v16, %v16217_v12 }
  0xc6   :  { %19632 = vmatmul.mubr.msk.bf16.gmra.mrb[32].mxu0 %vm345_vm1, %v3724_v23  ;;  %v16328_v23 = vld [vmem:[%s27149_s0 + $0x921] ss:$2 sm:$0xff] }
  0xc7   :  { %19635 = vmatprep.mubr.msk.bf16.mxu0 %vm345_vm1, %v3725_v24  ;;  %v16329_v24 = vld [vmem:[%s27149_s0 + $0x961] ss:$2 sm:$0xff]  ;;  %v339_v27 = vpack.c.bf16 %v16328_v23, %v16327_v22  ;;  %v16219_v22 = vld [vmem:[%s27149_s0 + $0x1e0] ss:$2 sm:$0xff]  ;;  %v16220_v23 = vld [vmem:[%s27149_s0 + $0x1f0] ss:$2 sm:$0xff] }
  0xc8   :  { %v340_v32 = vpack.c.bf16 %v16330_v28, %v16329_v24  ;;  %v16221_v24 = vld [vmem:[%s27149_s0 + $0x230] ss:$2 sm:$0xff]  ;;  %v16222_v28 = vld [vmem:[%s27149_s0 + $0x240] ss:$2 sm:$0xff] }
  0xc9   :  { %19259 = vmatprep.mubr.msk.bf16.mxu1 %vm345_vm1, %v339_v27  ;;  %v156_v27 = vpack.c.bf16 %v16220_v23, %v16219_v22  ;;  %v16919_v22 = vld [vmem:[%s27149_s0 + $0x5cb] ss:$2 sm:$0xff]  ;;  %v16920_v23 = vld [vmem:[%s27149_s0 + $0x5db] ss:$2 sm:$0xff] }
  0xcb   :  { %19260 = vmatmul.mubr.msk.bf16.gmra.mrb[56].mxu1 %vm345_vm1, %v340_v32  ;;  %v157_v32 = vpack.c.bf16 %v16222_v28, %v16221_v24 }
  0xce   :  { %19636 = vmatmul.mubr.msk.bf16.gmra.mrb[36].mxu0 %vm345_vm1, %v3726_v36  ;;  %v16332_v36 = vld [vmem:[%s27149_s0 + $0x9c1] ss:$2 sm:$0xff] }
  0xcf   :  { %19639 = vmatprep.mubr.msk.bf16.mxu0 %vm345_vm1, %v3727_v37  ;;  %v16333_v37 = vld [vmem:[%s27149_s0 + $0xa01] ss:$2 sm:$0xff]  ;;  %v341_v40 = vpack.c.bf16 %v16332_v36, %v16331_v35  ;;  %v16223_v35 = vld [vmem:[%s27149_s0 + $0x280] ss:$2 sm:$0xff]  ;;  %v16224_v36 = vld [vmem:[%s27149_s0 + $0x290] ss:$2 sm:$0xff] }
  0xd0   :  { %v342_v44 = vpack.c.bf16 %v16334_v41, %v16333_v37  ;;  %v16225_v37 = vld [vmem:[%s27149_s0 + $0x2d0] ss:$2 sm:$0xff]  ;;  %v16226_v41 = vld [vmem:[%s27149_s0 + $0x2e0] ss:$2 sm:$0xff] }
  0xd1   :  { %19263 = vmatprep.mubr.msk.bf16.mxu1 %vm345_vm1, %v341_v40  ;;  %v158_v40 = vpack.c.bf16 %v16224_v36, %v16223_v35  ;;  %v16923_v35 = vld [vmem:[%s27149_s0 + $0x66b] ss:$2 sm:$0xff]  ;;  %v16924_v36 = vld [vmem:[%s27149_s0 + $0x67b] ss:$2 sm:$0xff] }
  0xd3   :  { %19264 = vmatmul.mubr.msk.bf16.gmra.mrb[60].mxu1 %vm345_vm1, %v342_v44  ;;  %v159_v44 = vpack.c.bf16 %v16226_v41, %v16225_v37 }
  0xd4   :  { %19269 = vmatprep.mubr.msk.bf16.mxu1 %vm345_vm1, %v150_v53  ;;  %v16230_v53 = vld [vmem:[%s27149_s0 + $0x380] ss:$2 sm:$0xff] }
  0xd6   :  { %19640 = vmatmul.mubr.msk.bf16.gmra.mrb[40].mxu0 %vm345_vm1, %v3728_v48  ;;  %v16888_v48 = vld [vmem:[%s27149_s0 + $0x8b] ss:$2 sm:$0xff] }
  0xd7   :  { %19643 = vmatprep.mubr.msk.bf16.mxu0 %vm345_vm1, %v3729_v49  ;;  %v182_v49 = vld [vmem:[%s27148_s1] sm:$0xf]  ;;  %v4322_v59 = vpack.c.bf16 %v16888_v48, %v16887_v47  ;;  %v16228_v48 = vld [vmem:[%s27149_s0 + $0x330] ss:$2 sm:$0xff] }
  0xd8   :  { %22182 = vmatprep.subr.msk.bf16.mxu1 %vm442_vm0, %v182_v49  ;;  %v832_v52 = vsel %vm442_vm0, %v182_v49, 0  ;;  %v16227_v47 = vld [vmem:[%s27149_s0 + $0x320] ss:$2 sm:$0xff]  ;;  %v16229_v49 = vld [vmem:[%s27149_s0 + $0x370] ss:$2 sm:$0xff] }
  0xd9   :  { %19268 = vmatpush3.bf16.msra.mxu1 %v832_v52  ;;  %v160_v52 = vpack.c.bf16 %v16228_v48, %v16227_v47  ;;  %v16927_v47 = vld [vmem:[%s27149_s0 + $0x70b] ss:$2 sm:$0xff]  ;;  %v16928_v48 = vld [vmem:[%s27149_s0 + $0x71b] ss:$2 sm:$0xff] }
  0xdc   :  { %19270 = vmatmul.mubr.msk.bf16.vlgmr.msra.gmra.mrb[0].mxu1 %vm345_vm1, %v151_v29  ;;  %v4333_v29 = vpack.c.bf16 %v16910_v55, %v16909_v54  ;;  %v4342_v54 = vpack.c.bf16 %v16928_v48, %v16927_v47  ;;  %v16270_v47 = vld [vmem:[%s27149_s0 + $0xa10] ss:$2 sm:$0xff] }
  0xdd   :  { %19273 = vmatprep.mubr.msk.bf16.mxu1 %vm345_vm1, %v152_v4  ;;  %v16982_v48 = vld [vmem:[%s27149_s0 + $0x50] ss:$2 sm:$0xff] }
  0xde   :  { %19644 = vmatmul.mubr.msk.bf16.gmra.mrb[44].mxu0 %vm345_vm1, %v3730_v60  ;;  %v4323_v60 = vpack.c.bf16 %v16890_v57, %v16889_v56  ;;  %v161_v56 = vpack.c.bf16 %v16230_v53, %v16229_v49  ;;  %v4332_v57 = vpack.c.bf16 %v16908_v51, %v16907_v50  ;;  %v16250_v50 = vld [vmem:[%s27149_s0 + $0x6f0] ss:$2 sm:$0xff]  ;;  %v16929_v51 = vld [vmem:[%s27149_s0 + $0x75b] ss:$2 sm:$0xff] }
  0xdf   :  { %19647 = vmatprep.mubr.msk.bf16.mxu0 %vm345_vm1, %v3731_v61  ;;  %v5066_v61 = vsel %vm442_vm0, %v22733_v58, 0  ;;  %v16893_v58 = vld [vmem:[%s27149_s0 + $0x16b] ss:$2 sm:$0xff] }
  0xe4   :  { %19274 = vmatmul.mubr.msk.bf16.gmra.mrb[4].mxu1 %vm345_vm1, %v153_v7  ;;  %v16235_v7 = vld [vmem:[%s27149_s0 + $0x460] ss:$2 sm:$0xff] }
  0xe5   :  { %19277 = vmatprep.mubr.msk.bf16.mxu1 %vm345_vm1, %v154_v15  ;;  %v16918_v15 = vld [vmem:[%s27149_s0 + $0x58b] ss:$2 sm:$0xff] }
  0xe6   :  { %19648 = vmatmul.mubr.msk.bf16.gmra.mrb[48].mxu0 %vm345_vm1, %v3732_v8  ;;  %v4324_v8 = vpack.c.bf16 %v16892_v63, %v16891_v62  ;;  %v16911_v62 = vld [vmem:[%s27149_s0 + $0x43b] ss:$2 sm:$0xff]  ;;  %v16912_v63 = vld [vmem:[%s27149_s0 + $0x44b] ss:$2 sm:$0xff] }
  0xe7   :  { %19651 = vmatprep.mubr.msk.bf16.mxu0 %vm345_vm1, %v3733_v9  ;;  %v4325_v9 = vpack.c.bf16 %v16894_v3, %v16893_v58  ;;  %v16914_v3 = vld [vmem:[%s27149_s0 + $0x49b] ss:$2 sm:$0xff]  ;;  %v4334_v5 = vpack.c.bf16 %v16912_v63, %v16911_v62  ;;  %v16254_v62 = vld [vmem:[%s27149_s0 + $0x790] ss:$2 sm:$0xff] }
  0xe8   :  { %v4335_v6 = vpack.c.bf16 %v16914_v3, %v16913_v2  ;;  %v16933_v63 = vld [vmem:[%s27149_s0 + $0x7fb] ss:$2 sm:$0xff] }
  0xec   :  { %19278 = vmatmul.mubr.msk.bf16.gmra.mrb[8].mxu1 %vm345_vm1, %v155_v19  ;;  %v16239_v19 = vld [vmem:[%s27149_s0 + $0x550] ss:$2 sm:$0xff] }
  0xed   :  { %19281 = vmatprep.mubr.msk.bf16.mxu1 %vm345_vm1, %v156_v27  ;;  %v16922_v27 = vld [vmem:[%s27149_s0 + $0x62b] ss:$2 sm:$0xff] }
  0xee   :  { %19652 = vmatmul.mubr.msk.bf16.gmra.mrb[52].mxu0 %vm345_vm1, %v3734_v20  ;;  %v4326_v20 = vpack.c.bf16 %v16896_v14, %v16895_v13  ;;  %v16238_v13 = vld [vmem:[%s27149_s0 + $0x4c0] ss:$2 sm:$0xff]  ;;  %v16917_v14 = vld [vmem:[%s27149_s0 + $0x57b] ss:$2 sm:$0xff] }
  0xef   :  { %19655 = vmatprep.mubr.msk.bf16.mxu0 %vm345_vm1, %v3735_v21  ;;  %v4327_v21 = vpack.c.bf16 %v16898_v18, %v16897_v17  ;;  %v4336_v17 = vpack.c.bf16 %v16916_v11, %v16915_v10  ;;  %v4337_v18 = vpack.c.bf16 %v16918_v15, %v16917_v14  ;;  %v16258_v10 = vld [vmem:[%s27149_s0 + $0x830] ss:$2 sm:$0xff]  ;;  %v16937_v11 = vld [vmem:[%s27149_s0 + $0x89b] ss:$2 sm:$0xff] }
  0xf4   :  { %19282 = vmatmul.mubr.msk.bf16.gmra.mrb[12].mxu1 %vm345_vm1, %v157_v32  ;;  %v16243_v32 = vld [vmem:[%s27149_s0 + $0x5f0] ss:$2 sm:$0xff] }
  0xf5   :  { %19285 = vmatprep.mubr.msk.bf16.mxu1 %vm345_vm1, %v158_v40  ;;  %v16926_v40 = vld [vmem:[%s27149_s0 + $0x6cb] ss:$2 sm:$0xff] }
  0xf6   :  { %19656 = vmatmul.mubr.msk.bf16.gmra.mrb[56].mxu0 %vm345_vm1, %v3736_v33  ;;  %v4328_v33 = vpack.c.bf16 %v16900_v26, %v16899_v25  ;;  %v16242_v25 = vld [vmem:[%s27149_s0 + $0x5b0] ss:$2 sm:$0xff]  ;;  %v16921_v26 = vld [vmem:[%s27149_s0 + $0x61b] ss:$2 sm:$0xff] }
  0xf7   :  { %19659 = vmatprep.mubr.msk.bf16.mxu0 %vm345_vm1, %v3737_v34  ;;  %v4329_v34 = vpack.c.bf16 %v16902_v31, %v16901_v30  ;;  %v4338_v30 = vpack.c.bf16 %v16920_v23, %v16919_v22  ;;  %v4339_v31 = vpack.c.bf16 %v16922_v27, %v16921_v26  ;;  %v16262_v22 = vld [vmem:[%s27149_s0 + $0x8d0] ss:$2 sm:$0xff]  ;;  %v16941_v23 = vld [vmem:[%s27149_s0 + $0x93b] ss:$2 sm:$0xff] }
  0xfc   :  { %19286 = vmatmul.mubr.msk.bf16.gmra.mrb[16].mxu1 %vm345_vm1, %v159_v44  ;;  %v16247_v44 = vld [vmem:[%s27149_s0 + $0x690] ss:$2 sm:$0xff] }
  0xfd   :  { %19289 = vmatprep.mubr.msk.bf16.mxu1 %vm345_vm1, %v160_v52  ;;  %v16930_v52 = vld [vmem:[%s27149_s0 + $0x76b] ss:$2 sm:$0xff] }
  0xfe   :  { %19660 = vmatmul.mubr.msk.bf16.gmra.mrb[60].mxu0 %vm345_vm1, %v3738_v45  ;;  %v4330_v45 = vpack.c.bf16 %v16904_v39, %v16903_v38  ;;  %v16246_v38 = vld [vmem:[%s27149_s0 + $0x650] ss:$2 sm:$0xff]  ;;  %v16925_v39 = vld [vmem:[%s27149_s0 + $0x6bb] ss:$2 sm:$0xff]  ;;  %v4343_v55 = vpack.c.bf16 %v16930_v52, %v16929_v51 }
  0xff   :  { %19665 = vmatprep.mubr.msk.bf16.mxu0 %vm345_vm1, %v4321_v46  ;;  %v4331_v46 = vpack.c.bf16 %v16906_v43, %v16905_v42  ;;  %v4340_v42 = vpack.c.bf16 %v16924_v36, %v16923_v35  ;;  %v4341_v43 = vpack.c.bf16 %v16926_v40, %v16925_v39  ;;  %v16266_v35 = vld [vmem:[%s27149_s0 + $0x970] ss:$2 sm:$0xff]  ;;  %v16945_v36 = vld [vmem:[%s27149_s0 + $0x9db] ss:$2 sm:$0xff] }
 0x104   :  { %19290 = vmatmul.mubr.msk.bf16.gmra.mrb[20].mxu1 %vm345_vm1, %v161_v56  ;;  %v16251_v56 = vld [vmem:[%s27149_s0 + $0x730] ss:$2 sm:$0xff] }
 0x106   :  { %19666 = vmatmul.mubr.msk.bf16.vlgmr.msra.gmra.mrb[0].mxu0 %vm345_vm1, %v4322_v59  ;;  %v16231_v59 = vld [vmem:[%s27149_s0 + $0x3c0] ss:$2 sm:$0xff] }
 0x107   :  { %19730 = vmatpush3.bf16.msra.mxu0 %v5066_v61  ;;  %19669 = vmatprep.mubr.msk.bf16.mxu0 %vm345_vm1, %v4323_v60  ;;  %v16232_v60 = vld [vmem:[%s27149_s0 + $0x3d0] ss:$2 sm:$0xff] }
 0x108   :  { %22190 = vmatprep.subr.msk.bf16.mxu0 %vm442_vm0, %v23195_v0  ;;  %v16233_v61 = vld [vmem:[%s27149_s0 + $0x410] ss:$2 sm:$0xff]  ;;  %v162_v58 = vpack.c.bf16 %v16232_v60, %v16231_v59  ;;  %v16931_v59 = vld [vmem:[%s27149_s0 + $0x7ab] ss:$2 sm:$0xff]  ;;  %v16932_v60 = vld [vmem:[%s27149_s0 + $0x7bb] ss:$2 sm:$0xff] }
 0x109   :  { %v163_v4 = vpack.c.bf16 %v16234_v1, %v16233_v61  ;;  %v4344_v2 = vpack.c.bf16 %v16932_v60, %v16931_v59  ;;  %v16402_v60 = vld [vmem:[%s27149_s0 + $0x52] ss:$2 sm:$0xff] }
 0x10a   :  { %19293 = vmatprep.mubr.msk.bf16.mxu1 %vm345_vm1, %v162_v58  ;;  %v16934_v58 = vld [vmem:[%s27149_s0 + $0x80b] ss:$2 sm:$0xff] }
 0x10b   :  { %v4345_v3 = vpack.c.bf16 %v16934_v58, %v16933_v63  ;;  %v16987_v63 = vld [vmem:[%s27149_s0 + $0x100] ss:$2 sm:$0xff] }
 0x10c   :  { %19294 = vmatmul.mubr.msk.bf16.gmra.mrb[24].mxu1 %vm345_vm1, %v163_v4  ;;  %v16255_v4 = vld [vmem:[%s27149_s0 + $0x7d0] ss:$2 sm:$0xff] }
 0x10e   :  { %19670 = vmatmul.mubr.msk.bf16.gmra.mrb[4].mxu0 %vm345_vm1, %v4324_v8  ;;  %v16236_v8 = vld [vmem:[%s27149_s0 + $0x470] ss:$2 sm:$0xff] }
 0x10f   :  { %19673 = vmatprep.mubr.msk.bf16.mxu0 %vm345_vm1, %v4325_v9  ;;  %v16237_v9 = vld [vmem:[%s27149_s0 + $0x4b0] ss:$2 sm:$0xff]  ;;  %v164_v12 = vpack.c.bf16 %v16236_v8, %v16235_v7  ;;  %v16935_v7 = vld [vmem:[%s27149_s0 + $0x84b] ss:$2 sm:$0xff]  ;;  %v16936_v8 = vld [vmem:[%s27149_s0 + $0x85b] ss:$2 sm:$0xff] }
 0x110   :  { %v165_v16 = vpack.c.bf16 %v16238_v13, %v16237_v9  ;;  %v4346_v14 = vpack.c.bf16 %v16936_v8, %v16935_v7  ;;  %v16404_v7 = vld [vmem:[%s27149_s0 + $0xa2] ss:$2 sm:$0xff]  ;;  %v16405_v8 = vld [vmem:[%s27149_s0 + $0xb2] ss:$2 sm:$0xff] }
 0x111   :  { %19297 = vmatprep.mubr.msk.bf16.mxu1 %vm345_vm1, %v164_v12  ;;  %v16938_v12 = vld [vmem:[%s27149_s0 + $0x8ab] ss:$2 sm:$0xff] }
 0x112   :  { %v4347_v15 = vpack.c.bf16 %v16938_v12, %v16937_v11  ;;  %v16406_v11 = vld [vmem:[%s27149_s0 + $0xf2] ss:$2 sm:$0xff]  ;;  %v16407_v12 = vld [vmem:[%s27149_s0 + $0x102] ss:$2 sm:$0xff] }
 0x114   :  { %19298 = vmatmul.mubr.msk.bf16.gmra.mrb[28].mxu1 %vm345_vm1, %v165_v16  ;;  %v16259_v16 = vld [vmem:[%s27149_s0 + $0x870] ss:$2 sm:$0xff] }
 0x116   :  { %19674 = vmatmul.mubr.msk.bf16.gmra.mrb[8].mxu0 %vm345_vm1, %v4326_v20  ;;  %v16240_v20 = vld [vmem:[%s27149_s0 + $0x560] ss:$2 sm:$0xff] }
 0x117   :  { %19677 = vmatprep.mubr.msk.bf16.mxu0 %vm345_vm1, %v4327_v21  ;;  %v16241_v21 = vld [vmem:[%s27149_s0 + $0x5a0] ss:$2 sm:$0xff]  ;;  %v166_v24 = vpack.c.bf16 %v16240_v20, %v16239_v19  ;;  %v16939_v19 = vld [vmem:[%s27149_s0 + $0x8eb] ss:$2 sm:$0xff]  ;;  %v16940_v20 = vld [vmem:[%s27149_s0 + $0x8fb] ss:$2 sm:$0xff] }
 0x118   :  { %v167_v28 = vpack.c.bf16 %v16242_v25, %v16241_v21  ;;  %v4348_v26 = vpack.c.bf16 %v16940_v20, %v16939_v19  ;;  %v16992_v19 = vld [vmem:[%s27149_s0 + $0x1e0] ss:$2 sm:$0xff]  ;;  %v16993_v20 = vld [vmem:[%s27149_s0 + $0x1f0] ss:$2 sm:$0xff] }
 0x119   :  { %19301 = vmatprep.mubr.msk.bf16.mxu1 %vm345_vm1, %v166_v24  ;;  %v16942_v24 = vld [vmem:[%s27149_s0 + $0x94b] ss:$2 sm:$0xff] }
 0x11a   :  { %v4349_v27 = vpack.c.bf16 %v16942_v24, %v16941_v23  ;;  %v16994_v23 = vld [vmem:[%s27149_s0 + $0x230] ss:$2 sm:$0xff]  ;;  %v16995_v24 = vld [vmem:[%s27149_s0 + $0x240] ss:$2 sm:$0xff] }
 0x11c   :  { %19302 = vmatmul.mubr.msk.bf16.gmra.mrb[32].mxu1 %vm345_vm1, %v167_v28  ;;  %v16263_v28 = vld [vmem:[%s27149_s0 + $0x910] ss:$2 sm:$0xff] }
 0x11e   :  { %19678 = vmatmul.mubr.msk.bf16.gmra.mrb[12].mxu0 %vm345_vm1, %v4328_v33  ;;  %v16244_v33 = vld [vmem:[%s27149_s0 + $0x600] ss:$2 sm:$0xff] }
 0x11f   :  { %19681 = vmatprep.mubr.msk.bf16.mxu0 %vm345_vm1, %v4329_v34  ;;  %v16245_v34 = vld [vmem:[%s27149_s0 + $0x640] ss:$2 sm:$0xff]  ;;  %v168_v37 = vpack.c.bf16 %v16244_v33, %v16243_v32  ;;  %v16943_v32 = vld [vmem:[%s27149_s0 + $0x98b] ss:$2 sm:$0xff]  ;;  %v16944_v33 = vld [vmem:[%s27149_s0 + $0x99b] ss:$2 sm:$0xff] }
 0x120   :  { %v169_v41 = vpack.c.bf16 %v16246_v38, %v16245_v34  ;;  %v4350_v39 = vpack.c.bf16 %v16944_v33, %v16943_v32  ;;  %v16996_v32 = vld [vmem:[%s27149_s0 + $0x280] ss:$2 sm:$0xff]  ;;  %v16997_v33 = vld [vmem:[%s27149_s0 + $0x290] ss:$2 sm:$0xff] }
 0x121   :  { %19305 = vmatprep.mubr.msk.bf16.mxu1 %vm345_vm1, %v168_v37  ;;  %v16946_v37 = vld [vmem:[%s27149_s0 + $0x9eb] ss:$2 sm:$0xff] }
 0x122   :  { %v4351_v40 = vpack.c.bf16 %v16946_v37, %v16945_v36  ;;  %v16998_v36 = vld [vmem:[%s27149_s0 + $0x2d0] ss:$2 sm:$0xff]  ;;  %v16999_v37 = vld [vmem:[%s27149_s0 + $0x2e0] ss:$2 sm:$0xff] }
 0x124   :  { %19306 = vmatmul.mubr.msk.bf16.gmra.mrb[36].mxu1 %vm345_vm1, %v169_v41  ;;  %v16267_v41 = vld [vmem:[%s27149_s0 + $0x9b0] ss:$2 sm:$0xff] }
 0x126   :  { %19682 = vmatmul.mubr.msk.bf16.gmra.mrb[16].mxu0 %vm345_vm1, %v4330_v45  ;;  %v16248_v45 = vld [vmem:[%s27149_s0 + $0x6a0] ss:$2 sm:$0xff] }
 0x127   :  { %19685 = vmatprep.mubr.msk.bf16.mxu0 %vm345_vm1, %v4331_v46  ;;  %v16249_v46 = vld [vmem:[%s27149_s0 + $0x6e0] ss:$2 sm:$0xff]  ;;  %v170_v49 = vpack.c.bf16 %v16248_v45, %v16247_v44  ;;  %v16947_v44 = vld [vmem:[%s27149_s0 + $0xa2b] ss:$2 sm:$0xff]  ;;  %v16948_v45 = vld [vmem:[%s27149_s0 + $0xa3b] ss:$2 sm:$0xff] }
 0x128   :  { %v171_v53 = vpack.c.bf16 %v16250_v50, %v16249_v46  ;;  %v4352_v51 = vpack.c.bf16 %v16948_v45, %v16947_v44  ;;  %v17000_v44 = vld [vmem:[%s27149_s0 + $0x320] ss:$2 sm:$0xff]  ;;  %v17001_v45 = vld [vmem:[%s27149_s0 + $0x330] ss:$2 sm:$0xff] }
 0x129   :  { %19309 = vmatprep.mubr.msk.bf16.mxu1 %vm345_vm1, %v170_v49  ;;  %v16983_v49 = vld [vmem:[%s27149_s0 + $0x60] ss:$2 sm:$0xff] }
 0x12a   :  { %v4935_v52 = vpack.c.bf16 %v16983_v49, %v16982_v48  ;;  %v17002_v48 = vld [vmem:[%s27149_s0 + $0x370] ss:$2 sm:$0xff]  ;;  %v17003_v49 = vld [vmem:[%s27149_s0 + $0x380] ss:$2 sm:$0xff] }
 0x12c   :  { %19310 = vmatmul.mubr.msk.bf16.gmra.mrb[40].mxu1 %vm345_vm1, %v171_v53  ;;  %v16984_v53 = vld [vmem:[%s27149_s0 + $0xa0] ss:$2 sm:$0xff] }
 0x12e   :  { %19686 = vmatmul.mubr.msk.bf16.gmra.mrb[20].mxu0 %vm345_vm1, %v4332_v57  ;;  %v16252_v57 = vld [vmem:[%s27149_s0 + $0x740] ss:$2 sm:$0xff] }
 0x12f   :  { %19689 = vmatprep.mubr.msk.bf16.mxu0 %vm345_vm1, %v4333_v29  ;;  %v16253_v29 = vld [vmem:[%s27149_s0 + $0x780] ss:$2 sm:$0xff]  ;;  %v172_v61 = vpack.c.bf16 %v16252_v57, %v16251_v56 }
 0x130   :  { %v173_v1 = vpack.c.bf16 %v16254_v62, %v16253_v29  ;;  %v16400_v56 = vld [vmem:[%s27149_s0 + $0x2] ss:$2 sm:$0xff]  ;;  %v16401_v57 = vld [vmem:[%s27149_s0 + $0x12] ss:$2 sm:$0xff] }
 0x131   :  { %19313 = vmatprep.mubr.msk.bf16.mxu1 %vm345_vm1, %v172_v61  ;;  %v1251_v59 = vpack.c.bf16 %v16401_v57, %v16400_v56  ;;  %v16403_v61 = vld [vmem:[%s27149_s0 + $0x62] ss:$2 sm:$0xff] }
 0x132   :  { %v16986_v62 = vld [vmem:[%s27149_s0 + $0xf0] ss:$2 sm:$0xff]  ;;  %v1252_v58 = vpack.c.bf16 %v16403_v61, %v16402_v60  ;;  %v17004_v56 = vld [vmem:[%s27149_s0 + $0x3c0] ss:$2 sm:$0xff] }
 0x133   :  { %v17005_v57 = vld [vmem:[%s27149_s0 + $0x3d0] ss:$2 sm:$0xff]  ;;  %v17007_v61 = vld [vmem:[%s27149_s0 + $0x420] ss:$2 sm:$0xff] }
 0x134   :  { %19314 = vmatmul.mubr.msk.bf16.gmra.mrb[44].mxu1 %vm345_vm1, %v173_v1  ;;  %v17006_v60 = vld [vmem:[%s27149_s0 + $0x410] ss:$2 sm:$0xff] }
 0x136   :  { %19690 = vmatmul.mubr.msk.bf16.gmra.mrb[24].mxu0 %vm345_vm1, %v4334_v5  ;;  %v16256_v5 = vld [vmem:[%s27149_s0 + $0x7e0] ss:$2 sm:$0xff] }
 0x137   :  { %19693 = vmatprep.mubr.msk.bf16.mxu0 %vm345_vm1, %v4335_v6  ;;  %v16257_v6 = vld [vmem:[%s27149_s0 + $0x820] ss:$2 sm:$0xff]  ;;  %v174_v9 = vpack.c.bf16 %v16256_v5, %v16255_v4  ;;  %v16989_v5 = vld [vmem:[%s27149_s0 + $0x150] ss:$2 sm:$0xff] }
 0x138   :  { %v175_v13 = vpack.c.bf16 %v16258_v10, %v16257_v6  ;;  %v16988_v4 = vld [vmem:[%s27149_s0 + $0x140] ss:$2 sm:$0xff]  ;;  %v1253_v10 = vpack.c.bf16 %v16405_v8, %v16404_v7  ;;  %v17010_v8 = vld [vmem:[%s27149_s0 + $0x4b0] ss:$2 sm:$0xff] }
 0x139   :  { %19317 = vmatprep.mubr.msk.bf16.mxu1 %vm345_vm1, %v174_v9  ;;  %v23657_v6 = vld [vmem:[%s27148_s1 + $0x28] sm:$0xf] }
 0x13a   :  { %v16991_v9 = vld [vmem:[%s27149_s0 + $0x1a0] ss:$2 sm:$0xff] }
 0x13b   :  { %v16427_v7 = vld [vmem:[%s27149_s0 + $0x422] ss:$2 sm:$0xff] }
 0x13c   :  { %19318 = vmatmul.mubr.msk.bf16.gmra.mrb[48].mxu1 %vm345_vm1, %v175_v13  ;;  %v1254_v13 = vpack.c.bf16 %v16407_v12, %v16406_v11 }
 0x13e   :  { %19694 = vmatmul.mubr.msk.bf16.gmra.mrb[28].mxu0 %vm345_vm1, %v4336_v17  ;;  %v16260_v17 = vld [vmem:[%s27149_s0 + $0x880] ss:$2 sm:$0xff] }
 0x13f   :  { %19697 = vmatprep.mubr.msk.bf16.mxu0 %vm345_vm1, %v4337_v18  ;;  %v16261_v18 = vld [vmem:[%s27149_s0 + $0x8c0] ss:$2 sm:$0xff]  ;;  %v176_v21 = vpack.c.bf16 %v16260_v17, %v16259_v16 }
 0x140   :  { %v177_v25 = vpack.c.bf16 %v16262_v22, %v16261_v18  ;;  %v16408_v16 = vld [vmem:[%s27149_s0 + $0x142] ss:$2 sm:$0xff]  ;;  %v16409_v17 = vld [vmem:[%s27149_s0 + $0x152] ss:$2 sm:$0xff] }
 0x141   :  { %19321 = vmatprep.mubr.msk.bf16.mxu1 %vm345_vm1, %v176_v21  ;;  %v16410_v18 = vld [vmem:[%s27149_s0 + $0x192] ss:$2 sm:$0xff]  ;;  %v1255_v21 = vpack.c.bf16 %v16409_v17, %v16408_v16  ;;  %v16411_v22 = vld [vmem:[%s27149_s0 + $0x1a2] ss:$2 sm:$0xff] }
 0x142   :  { %v17012_v16 = vld [vmem:[%s27149_s0 + $0x500] ss:$2 sm:$0xff]  ;;  %v17013_v17 = vld [vmem:[%s27149_s0 + $0x510] ss:$2 sm:$0xff] }
 0x144   :  { %19322 = vmatmul.mubr.msk.bf16.gmra.mrb[52].mxu1 %vm345_vm1, %v177_v25  ;;  %v1256_v25 = vpack.c.bf16 %v16411_v22, %v16410_v18 }
 0x146   :  { %19698 = vmatmul.mubr.msk.bf16.gmra.mrb[32].mxu0 %vm345_vm1, %v4338_v30  ;;  %v16264_v30 = vld [vmem:[%s27149_s0 + $0x920] ss:$2 sm:$0xff] }
 0x147   :  { %19701 = vmatprep.mubr.msk.bf16.mxu0 %vm345_vm1, %v4339_v31  ;;  %v16265_v31 = vld [vmem:[%s27149_s0 + $0x960] ss:$2 sm:$0xff]  ;;  %v178_v34 = vpack.c.bf16 %v16264_v30, %v16263_v28 }
 0x148   :  { %v179_v38 = vpack.c.bf16 %v16266_v35, %v16265_v31  ;;  %v16412_v28 = vld [vmem:[%s27149_s0 + $0x1e2] ss:$2 sm:$0xff]  ;;  %v16413_v30 = vld [vmem:[%s27149_s0 + $0x1f2] ss:$2 sm:$0xff] }
 0x149   :  { %19325 = vmatprep.mubr.msk.bf16.mxu1 %vm345_vm1, %v178_v34  ;;  %v16414_v31 = vld [vmem:[%s27149_s0 + $0x232] ss:$2 sm:$0xff]  ;;  %v1257_v34 = vpack.c.bf16 %v16413_v30, %v16412_v28  ;;  %v16415_v35 = vld [vmem:[%s27149_s0 + $0x242] ss:$2 sm:$0xff] }
 0x14a   :  { %v17016_v28 = vld [vmem:[%s27149_s0 + $0x5f0] ss:$2 sm:$0xff]  ;;  %v17017_v30 = vld [vmem:[%s27149_s0 + $0x600] ss:$2 sm:$0xff] }
 0x14c   :  { %19326 = vmatmul.mubr.msk.bf16.gmra.mrb[56].mxu1 %vm345_vm1, %v179_v38  ;;  %v1258_v38 = vpack.c.bf16 %v16415_v35, %v16414_v31 }
 0x14e   :  { %19702 = vmatmul.mubr.msk.bf16.gmra.mrb[36].mxu0 %vm345_vm1, %v4340_v42  ;;  %v16268_v42 = vld [vmem:[%s27149_s0 + $0x9c0] ss:$2 sm:$0xff] }
 0x14f   :  { %19705 = vmatprep.mubr.msk.bf16.mxu0 %vm345_vm1, %v4341_v43  ;;  %v16269_v43 = vld [vmem:[%s27149_s0 + $0xa00] ss:$2 sm:$0xff]  ;;  %v180_v46 = vpack.c.bf16 %v16268_v42, %v16267_v41 }
 0x150   :  { %v181_v50 = vpack.c.bf16 %v16270_v47, %v16269_v43  ;;  %v16416_v41 = vld [vmem:[%s27149_s0 + $0x282] ss:$2 sm:$0xff]  ;;  %v16417_v42 = vld [vmem:[%s27149_s0 + $0x292] ss:$2 sm:$0xff] }
 0x151   :  { %19329 = vmatprep.mubr.msk.bf16.mxu1 %vm345_vm1, %v180_v46  ;;  %v16418_v43 = vld [vmem:[%s27149_s0 + $0x2d2] ss:$2 sm:$0xff]  ;;  %v1259_v46 = vpack.c.bf16 %v16417_v42, %v16416_v41  ;;  %v16419_v47 = vld [vmem:[%s27149_s0 + $0x2e2] ss:$2 sm:$0xff] }
 0x152   :  { %v17020_v41 = vld [vmem:[%s27149_s0 + $0x690] ss:$2 sm:$0xff]  ;;  %v17021_v42 = vld [vmem:[%s27149_s0 + $0x6a0] ss:$2 sm:$0xff] }
 0x154   :  { %19330 = vmatmul.mubr.msk.bf16.gmra.mrb[60].mxu1 %vm345_vm1, %v181_v50  ;;  %v1260_v50 = vpack.c.bf16 %v16419_v47, %v16418_v43 }
 0x155   :  { %19335 = vmatprep.mubr.msk.bf16.mxu1 %vm345_vm1, %v1251_v59  ;;  %v16423_v59 = vld [vmem:[%s27149_s0 + $0x382] ss:$2 sm:$0xff] }
 0x156   :  { %19706 = vmatmul.mubr.msk.bf16.gmra.mrb[40].mxu0 %vm345_vm1, %v4342_v54  ;;  %v16985_v54 = vld [vmem:[%s27149_s0 + $0xb0] ss:$2 sm:$0xff] }
 0x157   :  { %19709 = vmatprep.mubr.msk.bf16.mxu0 %vm345_vm1, %v4343_v55  ;;  %v16464_v55 = vld [vmem:[%s27148_s1 + $0x8] sm:$0xf]  ;;  %v4936_v1 = vpack.c.bf16 %v16985_v54, %v16984_v53  ;;  %v16421_v54 = vld [vmem:[%s27149_s0 + $0x332] ss:$2 sm:$0xff] }
 0x158   :  { %22183 = vmatprep.subr.msk.bf16.mxu1 %vm442_vm0, %v16464_v55  ;;  %v1382_v29 = vsel %vm442_vm0, %v16464_v55, 0  ;;  %v16420_v53 = vld [vmem:[%s27149_s0 + $0x322] ss:$2 sm:$0xff]  ;;  %v16422_v55 = vld [vmem:[%s27149_s0 + $0x372] ss:$2 sm:$0xff] }
 0x159   :  { %19334 = vmatpush3.bf16.msra.mxu1 %v1382_v29  ;;  %v1261_v29 = vpack.c.bf16 %v16421_v54, %v16420_v53  ;;  %v17024_v53 = vld [vmem:[%s27149_s0 + $0x730] ss:$2 sm:$0xff]  ;;  %v17025_v54 = vld [vmem:[%s27149_s0 + $0x740] ss:$2 sm:$0xff] }
 0x15c   :  { %19336 = vmatmul.mubr.msk.bf16.vlgmr.msra.gmra.mrb[0].mxu1 %vm345_vm1, %v1252_v58  ;;  %v4947_v58 = vpack.c.bf16 %v17007_v61, %v17006_v60  ;;  %v4956_v60 = vpack.c.bf16 %v17025_v54, %v17024_v53  ;;  %v16463_v53 = vld [vmem:[%s27149_s0 + $0xa12] ss:$2 sm:$0xff]  ;;  %v17079_v54 = vld [vmem:[%s27149_s0 + $0x51] ss:$2 sm:$0xff] }
 0x15d   :  { %19339 = vmatprep.mubr.msk.bf16.mxu1 %vm345_vm1, %v1253_v10 }
 0x15e   :  { %19710 = vmatmul.mubr.msk.bf16.gmra.mrb[44].mxu0 %vm345_vm1, %v4344_v2  ;;  %v4937_v2 = vpack.c.bf16 %v16987_v63, %v16986_v62  ;;  %v1262_v62 = vpack.c.bf16 %v16423_v59, %v16422_v55  ;;  %v4946_v63 = vpack.c.bf16 %v17005_v57, %v17004_v56  ;;  %v16443_v56 = vld [vmem:[%s27149_s0 + $0x6f2] ss:$2 sm:$0xff] }
 0x15f   :  { %19713 = vmatprep.mubr.msk.bf16.mxu0 %vm345_vm1, %v4345_v3  ;;  %v5680_v3 = vsel %vm442_vm0, %v23195_v0, 0  ;;  %v16990_v0 = vld [vmem:[%s27149_s0 + $0x190] ss:$2 sm:$0xff]  ;;  %v17026_v57 = vld [vmem:[%s27149_s0 + $0x780] ss:$2 sm:$0xff] }
 0x164   :  { %19340 = vmatmul.mubr.msk.bf16.gmra.mrb[4].mxu1 %vm345_vm1, %v1254_v13  ;;  %v16428_v13 = vld [vmem:[%s27149_s0 + $0x462] ss:$2 sm:$0xff] }
 0x165   :  { %19343 = vmatprep.mubr.msk.bf16.mxu1 %vm345_vm1, %v1255_v21  ;;  %v17015_v21 = vld [vmem:[%s27149_s0 + $0x5b0] ss:$2 sm:$0xff] }
 0x166   :  { %19714 = vmatmul.mubr.msk.bf16.gmra.mrb[48].mxu0 %vm345_vm1, %v4346_v14  ;;  %v4938_v14 = vpack.c.bf16 %v16989_v5, %v16988_v4  ;;  %v17008_v4 = vld [vmem:[%s27149_s0 + $0x460] ss:$2 sm:$0xff]  ;;  %v17009_v5 = vld [vmem:[%s27149_s0 + $0x470] ss:$2 sm:$0xff] }
 0x167   :  { %19717 = vmatprep.mubr.msk.bf16.mxu0 %vm345_vm1, %v4347_v15  ;;  %v4939_v15 = vpack.c.bf16 %v16991_v9, %v16990_v0  ;;  %v17011_v9 = vld [vmem:[%s27149_s0 + $0x4c0] ss:$2 sm:$0xff]  ;;  %v4948_v11 = vpack.c.bf16 %v17009_v5, %v17008_v4 }
 0x168   :  { %v4949_v12 = vpack.c.bf16 %v17011_v9, %v17010_v8  ;;  %v16447_v4 = vld [vmem:[%s27149_s0 + $0x792] ss:$2 sm:$0xff] }
 0x169   :  { %v17030_v5 = vld [vmem:[%s27149_s0 + $0x820] ss:$2 sm:$0xff] }
 0x16c   :  { %19344 = vmatmul.mubr.msk.bf16.gmra.mrb[8].mxu1 %vm345_vm1, %v1256_v25  ;;  %v16432_v25 = vld [vmem:[%s27149_s0 + $0x552] ss:$2 sm:$0xff] }
 0x16d   :  { %19347 = vmatprep.mubr.msk.bf16.mxu1 %vm345_vm1, %v1257_v34  ;;  %v17019_v34 = vld [vmem:[%s27149_s0 + $0x650] ss:$2 sm:$0xff] }
 0x16e   :  { %19718 = vmatmul.mubr.msk.bf16.gmra.mrb[52].mxu0 %vm345_vm1, %v4348_v26  ;;  %v4940_v26 = vpack.c.bf16 %v16993_v20, %v16992_v19  ;;  %v16431_v19 = vld [vmem:[%s27149_s0 + $0x4c2] ss:$2 sm:$0xff] }
 0x16f   :  { %19721 = vmatprep.mubr.msk.bf16.mxu0 %vm345_vm1, %v4349_v27  ;;  %v4941_v27 = vpack.c.bf16 %v16995_v24, %v16994_v23  ;;  %v17014_v20 = vld [vmem:[%s27149_s0 + $0x5a0] ss:$2 sm:$0xff]  ;;  %v4950_v23 = vpack.c.bf16 %v17013_v17, %v17012_v16 }
 0x170   :  { %v4951_v24 = vpack.c.bf16 %v17015_v21, %v17014_v20  ;;  %v16451_v16 = vld [vmem:[%s27149_s0 + $0x832] ss:$2 sm:$0xff] }
 0x171   :  { %v17034_v17 = vld [vmem:[%s27149_s0 + $0x8c0] ss:$2 sm:$0xff] }
 0x174   :  { %19348 = vmatmul.mubr.msk.bf16.gmra.mrb[12].mxu1 %vm345_vm1, %v1258_v38  ;;  %v16436_v38 = vld [vmem:[%s27149_s0 + $0x5f2] ss:$2 sm:$0xff] }
 0x175   :  { %19351 = vmatprep.mubr.msk.bf16.mxu1 %vm345_vm1, %v1259_v46  ;;  %v17023_v46 = vld [vmem:[%s27149_s0 + $0x6f0] ss:$2 sm:$0xff] }
 0x176   :  { %19722 = vmatmul.mubr.msk.bf16.gmra.mrb[56].mxu0 %vm345_vm1, %v4350_v39  ;;  %v4942_v39 = vpack.c.bf16 %v16997_v33, %v16996_v32  ;;  %v16435_v32 = vld [vmem:[%s27149_s0 + $0x5b2] ss:$2 sm:$0xff] }
 0x177   :  { %19725 = vmatprep.mubr.msk.bf16.mxu0 %vm345_vm1, %v4351_v40  ;;  %v4943_v40 = vpack.c.bf16 %v16999_v37, %v16998_v36  ;;  %v17018_v33 = vld [vmem:[%s27149_s0 + $0x640] ss:$2 sm:$0xff]  ;;  %v4952_v36 = vpack.c.bf16 %v17017_v30, %v17016_v28 }
 0x178   :  { %v4953_v37 = vpack.c.bf16 %v17019_v34, %v17018_v33  ;;  %v16455_v28 = vld [vmem:[%s27149_s0 + $0x8d2] ss:$2 sm:$0xff] }
 0x179   :  { %v17038_v30 = vld [vmem:[%s27149_s0 + $0x960] ss:$2 sm:$0xff] }
 0x17c   :  { %19352 = vmatmul.mubr.msk.bf16.gmra.mrb[16].mxu1 %vm345_vm1, %v1260_v50  ;;  %v16440_v50 = vld [vmem:[%s27149_s0 + $0x692] ss:$2 sm:$0xff] }
 0x17d   :  { %19355 = vmatprep.mubr.msk.bf16.mxu1 %vm345_vm1, %v1261_v29  ;;  %v17027_v29 = vld [vmem:[%s27149_s0 + $0x790] ss:$2 sm:$0xff] }
 0x17e   :  { %19726 = vmatmul.mubr.msk.bf16.gmra.mrb[60].mxu0 %vm345_vm1, %v4352_v51  ;;  %v4944_v51 = vpack.c.bf16 %v17001_v45, %v17000_v44  ;;  %v16439_v44 = vld [vmem:[%s27149_s0 + $0x652] ss:$2 sm:$0xff]  ;;  %v4957_v61 = vpack.c.bf16 %v17027_v29, %v17026_v57 }
 0x17f   :  { %19731 = vmatprep.mubr.msk.bf16.mxu0 %vm345_vm1, %v4935_v52  ;;  %v4945_v52 = vpack.c.bf16 %v17003_v49, %v17002_v48  ;;  %v17022_v45 = vld [vmem:[%s27149_s0 + $0x6e0] ss:$2 sm:$0xff]  ;;  %v4954_v48 = vpack.c.bf16 %v17021_v42, %v17020_v41 }
 0x180   :  { %v4955_v49 = vpack.c.bf16 %v17023_v46, %v17022_v45  ;;  %v16459_v41 = vld [vmem:[%s27149_s0 + $0x972] ss:$2 sm:$0xff] }
 0x181   :  { %v17042_v42 = vld [vmem:[%s27149_s0 + $0xa00] ss:$2 sm:$0xff] }
 0x184   :  { %19356 = vmatmul.mubr.msk.bf16.gmra.mrb[20].mxu1 %vm345_vm1, %v1262_v62  ;;  %v16444_v62 = vld [vmem:[%s27149_s0 + $0x732] ss:$2 sm:$0xff] }
 0x186   :  { %19732 = vmatmul.mubr.msk.bf16.vlgmr.msra.gmra.mrb[0].mxu0 %vm345_vm1, %v4936_v1  ;;  %v16424_v1 = vld [vmem:[%s27149_s0 + $0x3c2] ss:$2 sm:$0xff] }
 0x187   :  { %19796 = vmatpush3.bf16.msra.mxu0 %v5680_v3  ;;  %19735 = vmatprep.mubr.msk.bf16.mxu0 %vm345_vm1, %v4937_v2  ;;  %v16425_v2 = vld [vmem:[%s27149_s0 + $0x3d2] ss:$2 sm:$0xff] }
 0x188   :  { %22191 = vmatprep.subr.msk.bf16.mxu0 %vm442_vm0, %v23657_v6  ;;  %v16426_v3 = vld [vmem:[%s27149_s0 + $0x412] ss:$2 sm:$0xff]  ;;  %v1263_v0 = vpack.c.bf16 %v16425_v2, %v16424_v1 }
 0x189   :  { %v1264_v10 = vpack.c.bf16 %v16427_v7, %v16426_v3  ;;  %v17028_v1 = vld [vmem:[%s27149_s0 + $0x7d0] ss:$2 sm:$0xff]  ;;  %v17029_v2 = vld [vmem:[%s27149_s0 + $0x7e0] ss:$2 sm:$0xff] }
 0x18a   :  { %19359 = vmatprep.mubr.msk.bf16.mxu1 %vm345_vm1, %v1263_v0  ;;  %v17031_v0 = vld [vmem:[%s27149_s0 + $0x830] ss:$2 sm:$0xff]  ;;  %v4958_v8 = vpack.c.bf16 %v17029_v2, %v17028_v1  ;;  %v16499_v2 = vld [vmem:[%s27149_s0 + $0x53] ss:$2 sm:$0xff] }
 0x18b   :  { %v4959_v9 = vpack.c.bf16 %v17031_v0, %v17030_v5  ;;  %v17084_v5 = vld [vmem:[%s27149_s0 + $0x101] ss:$2 sm:$0xff] }
 0x18c   :  { %19360 = vmatmul.mubr.msk.bf16.gmra.mrb[24].mxu1 %vm345_vm1, %v1264_v10  ;;  %v16448_v10 = vld [vmem:[%s27149_s0 + $0x7d2] ss:$2 sm:$0xff] }
 0x18e   :  { %19736 = vmatmul.mubr.msk.bf16.gmra.mrb[4].mxu0 %vm345_vm1, %v4938_v14  ;;  %v16429_v14 = vld [vmem:[%s27149_s0 + $0x472] ss:$2 sm:$0xff] }
 0x18f   :  { %19739 = vmatprep.mubr.msk.bf16.mxu0 %vm345_vm1, %v4939_v15  ;;  %v16430_v15 = vld [vmem:[%s27149_s0 + $0x4b2] ss:$2 sm:$0xff]  ;;  %v1265_v18 = vpack.c.bf16 %v16429_v14, %v16428_v13 }
 0x190   :  { %v1266_v22 = vpack.c.bf16 %v16431_v19, %v16430_v15  ;;  %v17032_v13 = vld [vmem:[%s27149_s0 + $0x870] ss:$2 sm:$0xff]  ;;  %v17033_v14 = vld [vmem:[%s27149_s0 + $0x880] ss:$2 sm:$0xff] }
 0x191   :  { %19363 = vmatprep.mubr.msk.bf16.mxu1 %vm345_vm1, %v1265_v18  ;;  %v17035_v18 = vld [vmem:[%s27149_s0 + $0x8d0] ss:$2 sm:$0xff]  ;;  %v4960_v20 = vpack.c.bf16 %v17033_v14, %v17032_v13  ;;  %v16501_v13 = vld [vmem:[%s27149_s0 + $0xa3] ss:$2 sm:$0xff]  ;;  %v16502_v14 = vld [vmem:[%s27149_s0 + $0xb3] ss:$2 sm:$0xff] }
 0x192   :  { %v4961_v21 = vpack.c.bf16 %v17035_v18, %v17034_v17  ;;  %v16503_v17 = vld [vmem:[%s27149_s0 + $0xf3] ss:$2 sm:$0xff]  ;;  %v16504_v18 = vld [vmem:[%s27149_s0 + $0x103] ss:$2 sm:$0xff] }
 0x194   :  { %19364 = vmatmul.mubr.msk.bf16.gmra.mrb[28].mxu1 %vm345_vm1, %v1266_v22  ;;  %v16452_v22 = vld [vmem:[%s27149_s0 + $0x872] ss:$2 sm:$0xff] }
 0x196   :  { %19740 = vmatmul.mubr.msk.bf16.gmra.mrb[8].mxu0 %vm345_vm1, %v4940_v26  ;;  %v16433_v26 = vld [vmem:[%s27149_s0 + $0x562] ss:$2 sm:$0xff] }
 0x197   :  { %19743 = vmatprep.mubr.msk.bf16.mxu0 %vm345_vm1, %v4941_v27  ;;  %v16434_v27 = vld [vmem:[%s27149_s0 + $0x5a2] ss:$2 sm:$0xff]  ;;  %v1267_v31 = vpack.c.bf16 %v16433_v26, %v16432_v25 }
 0x198   :  { %v1268_v35 = vpack.c.bf16 %v16435_v32, %v16434_v27  ;;  %v17036_v25 = vld [vmem:[%s27149_s0 + $0x910] ss:$2 sm:$0xff]  ;;  %v17037_v26 = vld [vmem:[%s27149_s0 + $0x920] ss:$2 sm:$0xff] }
 0x199   :  { %19367 = vmatprep.mubr.msk.bf16.mxu1 %vm345_vm1, %v1267_v31  ;;  %v17039_v31 = vld [vmem:[%s27149_s0 + $0x970] ss:$2 sm:$0xff]  ;;  %v4962_v33 = vpack.c.bf16 %v17037_v26, %v17036_v25  ;;  %v17089_v25 = vld [vmem:[%s27149_s0 + $0x1e1] ss:$2 sm:$0xff]  ;;  %v17090_v26 = vld [vmem:[%s27149_s0 + $0x1f1] ss:$2 sm:$0xff] }
 0x19a   :  { %v4963_v34 = vpack.c.bf16 %v17039_v31, %v17038_v30  ;;  %v17091_v30 = vld [vmem:[%s27149_s0 + $0x231] ss:$2 sm:$0xff]  ;;  %v17092_v31 = vld [vmem:[%s27149_s0 + $0x241] ss:$2 sm:$0xff] }
 0x19c   :  { %19368 = vmatmul.mubr.msk.bf16.gmra.mrb[32].mxu1 %vm345_vm1, %v1268_v35  ;;  %v16456_v35 = vld [vmem:[%s27149_s0 + $0x912] ss:$2 sm:$0xff] }
 0x19e   :  { %19744 = vmatmul.mubr.msk.bf16.gmra.mrb[12].mxu0 %vm345_vm1, %v4942_v39  ;;  %v16437_v39 = vld [vmem:[%s27149_s0 + $0x602] ss:$2 sm:$0xff] }
 0x19f   :  { %19747 = vmatprep.mubr.msk.bf16.mxu0 %vm345_vm1, %v4943_v40  ;;  %v16438_v40 = vld [vmem:[%s27149_s0 + $0x642] ss:$2 sm:$0xff]  ;;  %v1269_v43 = vpack.c.bf16 %v16437_v39, %v16436_v38 }
 0x1a0   :  { %v1270_v47 = vpack.c.bf16 %v16439_v44, %v16438_v40  ;;  %v17040_v38 = vld [vmem:[%s27149_s0 + $0x9b0] ss:$2 sm:$0xff]  ;;  %v17041_v39 = vld [vmem:[%s27149_s0 + $0x9c0] ss:$2 sm:$0xff] }
 0x1a1   :  { %19371 = vmatprep.mubr.msk.bf16.mxu1 %vm345_vm1, %v1269_v43  ;;  %v17043_v43 = vld [vmem:[%s27149_s0 + $0xa10] ss:$2 sm:$0xff]  ;;  %v4964_v45 = vpack.c.bf16 %v17041_v39, %v17040_v38  ;;  %v17093_v38 = vld [vmem:[%s27149_s0 + $0x281] ss:$2 sm:$0xff]  ;;  %v17094_v39 = vld [vmem:[%s27149_s0 + $0x291] ss:$2 sm:$0xff] }
 0x1a2   :  { %v4965_v46 = vpack.c.bf16 %v17043_v43, %v17042_v42  ;;  %v17095_v42 = vld [vmem:[%s27149_s0 + $0x2d1] ss:$2 sm:$0xff]  ;;  %v17096_v43 = vld [vmem:[%s27149_s0 + $0x2e1] ss:$2 sm:$0xff] }
 0x1a4   :  { %19372 = vmatmul.mubr.msk.bf16.gmra.mrb[36].mxu1 %vm345_vm1, %v1270_v47  ;;  %v16460_v47 = vld [vmem:[%s27149_s0 + $0x9b2] ss:$2 sm:$0xff] }
 0x1a6   :  { %19748 = vmatmul.mubr.msk.bf16.gmra.mrb[16].mxu0 %vm345_vm1, %v4944_v51  ;;  %v16441_v51 = vld [vmem:[%s27149_s0 + $0x6a2] ss:$2 sm:$0xff] }
 0x1a7   :  { %19751 = vmatprep.mubr.msk.bf16.mxu0 %vm345_vm1, %v4945_v52  ;;  %v16442_v52 = vld [vmem:[%s27149_s0 + $0x6e2] ss:$2 sm:$0xff]  ;;  %v1271_v55 = vpack.c.bf16 %v16441_v51, %v16440_v50 }
 0x1a8   :  { %v1272_v59 = vpack.c.bf16 %v16443_v56, %v16442_v52  ;;  %v17044_v50 = vld [vmem:[%s27149_s0 + $0xa50] ss:$2 sm:$0xff]  ;;  %v17045_v51 = vld [vmem:[%s27149_s0 + $0xa60] ss:$2 sm:$0xff] }
 0x1a9   :  { %19375 = vmatprep.mubr.msk.bf16.mxu1 %vm345_vm1, %v1271_v55  ;;  %v17080_v55 = vld [vmem:[%s27149_s0 + $0x61] ss:$2 sm:$0xff]  ;;  %v4966_v57 = vpack.c.bf16 %v17045_v51, %v17044_v50  ;;  %v17098_v51 = vld [vmem:[%s27149_s0 + $0x331] ss:$2 sm:$0xff] }
 0x1aa   :  { %v5549_v29 = vpack.c.bf16 %v17080_v55, %v17079_v54  ;;  %v17097_v50 = vld [vmem:[%s27149_s0 + $0x321] ss:$2 sm:$0xff]  ;;  %v17099_v54 = vld [vmem:[%s27149_s0 + $0x371] ss:$2 sm:$0xff] }
 0x1ab   :  { %v17100_v55 = vld [vmem:[%s27149_s0 + $0x381] ss:$2 sm:$0xff] }
 0x1ac   :  { %19376 = vmatmul.mubr.msk.bf16.gmra.mrb[40].mxu1 %vm345_vm1, %v1272_v59  ;;  %v17081_v59 = vld [vmem:[%s27149_s0 + $0xa1] ss:$2 sm:$0xff] }
 0x1ae   :  { %19752 = vmatmul.mubr.msk.bf16.gmra.mrb[20].mxu0 %vm345_vm1, %v4946_v63  ;;  %v16445_v63 = vld [vmem:[%s27149_s0 + $0x742] ss:$2 sm:$0xff] }
 0x1af   :  { %19755 = vmatprep.mubr.msk.bf16.mxu0 %vm345_vm1, %v4947_v58  ;;  %v16446_v58 = vld [vmem:[%s27149_s0 + $0x782] ss:$2 sm:$0xff]  ;;  %v1273_v3 = vpack.c.bf16 %v16445_v63, %v16444_v62  ;;  %v16497_v62 = vld [vmem:[%s27149_s0 + $0x3] ss:$2 sm:$0xff]  ;;  %v16498_v63 = vld [vmem:[%s27149_s0 + $0x13] ss:$2 sm:$0xff] }
 0x1b0   :  { %v1274_v7 = vpack.c.bf16 %v16447_v4, %v16446_v58  ;;  %v1865_v1 = vpack.c.bf16 %v16498_v63, %v16497_v62  ;;  %v17083_v4 = vld [vmem:[%s27149_s0 + $0xf1] ss:$2 sm:$0xff]  ;;  %v17101_v62 = vld [vmem:[%s27149_s0 + $0x3c1] ss:$2 sm:$0xff] }
 0x1b1   :  { %19379 = vmatprep.mubr.msk.bf16.mxu1 %vm345_vm1, %v1273_v3  ;;  %v16500_v3 = vld [vmem:[%s27149_s0 + $0x63] ss:$2 sm:$0xff] }
 0x1b2   :  { %v1866_v0 = vpack.c.bf16 %v16500_v3, %v16499_v2  ;;  %v17102_v63 = vld [vmem:[%s27149_s0 + $0x3d1] ss:$2 sm:$0xff]  ;;  %v17104_v3 = vld [vmem:[%s27149_s0 + $0x421] ss:$2 sm:$0xff] }
 0x1b3   :  { %v17103_v2 = vld [vmem:[%s27149_s0 + $0x411] ss:$2 sm:$0xff] }
 0x1b4   :  { %19380 = vmatmul.mubr.msk.bf16.gmra.mrb[44].mxu1 %vm345_vm1, %v1274_v7 }
 0x1b6   :  { %19756 = vmatmul.mubr.msk.bf16.gmra.mrb[24].mxu0 %vm345_vm1, %v4948_v11  ;;  %v16449_v11 = vld [vmem:[%s27149_s0 + $0x7e2] ss:$2 sm:$0xff] }
 0x1b7   :  { %19759 = vmatprep.mubr.msk.bf16.mxu0 %vm345_vm1, %v4949_v12  ;;  %v16450_v12 = vld [vmem:[%s27149_s0 + $0x822] ss:$2 sm:$0xff]  ;;  %v1275_v15 = vpack.c.bf16 %v16449_v11, %v16448_v10  ;;  %v17085_v10 = vld [vmem:[%s27149_s0 + $0x141] ss:$2 sm:$0xff]  ;;  %v17086_v11 = vld [vmem:[%s27149_s0 + $0x151] ss:$2 sm:$0xff] }
 0x1b8   :  { %v1276_v19 = vpack.c.bf16 %v16451_v16, %v16450_v12  ;;  %v24119_v12 = vld [vmem:[%s27148_s1 + $0x2c] sm:$0xf]  ;;  %v1867_v16 = vpack.c.bf16 %v16502_v14, %v16501_v13  ;;  %v17107_v14 = vld [vmem:[%s27149_s0 + $0x4b1] ss:$2 sm:$0xff] }
 0x1b9   :  { %19383 = vmatprep.mubr.msk.bf16.mxu1 %vm345_vm1, %v1275_v15  ;;  %v17088_v15 = vld [vmem:[%s27149_s0 + $0x1a1] ss:$2 sm:$0xff] }
 0x1ba   :  { %v16524_v13 = vld [vmem:[%s27149_s0 + $0x423] ss:$2 sm:$0xff] }
 0x1bc   :  { %19384 = vmatmul.mubr.msk.bf16.gmra.mrb[48].mxu1 %vm345_vm1, %v1276_v19  ;;  %v1868_v19 = vpack.c.bf16 %v16504_v18, %v16503_v17 }
 0x1be   :  { %19760 = vmatmul.mubr.msk.bf16.gmra.mrb[28].mxu0 %vm345_vm1, %v4950_v23  ;;  %v16453_v23 = vld [vmem:[%s27149_s0 + $0x882] ss:$2 sm:$0xff] }
 0x1bf   :  { %19763 = vmatprep.mubr.msk.bf16.mxu0 %vm345_vm1, %v4951_v24  ;;  %v16454_v24 = vld [vmem:[%s27149_s0 + $0x8c2] ss:$2 sm:$0xff]  ;;  %v1277_v27 = vpack.c.bf16 %v16453_v23, %v16452_v22  ;;  %v16505_v22 = vld [vmem:[%s27149_s0 + $0x143] ss:$2 sm:$0xff]  ;;  %v16506_v23 = vld [vmem:[%s27149_s0 + $0x153] ss:$2 sm:$0xff] }
 0x1c0   :  { %v1278_v32 = vpack.c.bf16 %v16455_v28, %v16454_v24  ;;  %v16507_v24 = vld [vmem:[%s27149_s0 + $0x193] ss:$2 sm:$0xff]  ;;  %v16508_v28 = vld [vmem:[%s27149_s0 + $0x1a3] ss:$2 sm:$0xff] }
 0x1c1   :  { %19387 = vmatprep.mubr.msk.bf16.mxu1 %vm345_vm1, %v1277_v27  ;;  %v1869_v27 = vpack.c.bf16 %v16506_v23, %v16505_v22  ;;  %v17109_v22 = vld [vmem:[%s27149_s0 + $0x501] ss:$2 sm:$0xff]  ;;  %v17110_v23 = vld [vmem:[%s27149_s0 + $0x511] ss:$2 sm:$0xff] }
 0x1c4   :  { %19388 = vmatmul.mubr.msk.bf16.gmra.mrb[52].mxu1 %vm345_vm1, %v1278_v32  ;;  %v1870_v32 = vpack.c.bf16 %v16508_v28, %v16507_v24 }
 0x1c6   :  { %19764 = vmatmul.mubr.msk.bf16.gmra.mrb[32].mxu0 %vm345_vm1, %v4952_v36  ;;  %v16457_v36 = vld [vmem:[%s27149_s0 + $0x922] ss:$2 sm:$0xff] }
 0x1c7   :  { %19767 = vmatprep.mubr.msk.bf16.mxu0 %vm345_vm1, %v4953_v37  ;;  %v16458_v37 = vld [vmem:[%s27149_s0 + $0x962] ss:$2 sm:$0xff]  ;;  %v1279_v40 = vpack.c.bf16 %v16457_v36, %v16456_v35  ;;  %v16509_v35 = vld [vmem:[%s27149_s0 + $0x1e3] ss:$2 sm:$0xff]  ;;  %v16510_v36 = vld [vmem:[%s27149_s0 + $0x1f3] ss:$2 sm:$0xff] }
 0x1c8   :  { %v1280_v44 = vpack.c.bf16 %v16459_v41, %v16458_v37  ;;  %v16511_v37 = vld [vmem:[%s27149_s0 + $0x233] ss:$2 sm:$0xff]  ;;  %v16512_v41 = vld [vmem:[%s27149_s0 + $0x243] ss:$2 sm:$0xff] }
 0x1c9   :  { %19391 = vmatprep.mubr.msk.bf16.mxu1 %vm345_vm1, %v1279_v40  ;;  %v1871_v40 = vpack.c.bf16 %v16510_v36, %v16509_v35  ;;  %v17113_v35 = vld [vmem:[%s27149_s0 + $0x5f1] ss:$2 sm:$0xff]  ;;  %v17114_v36 = vld [vmem:[%s27149_s0 + $0x601] ss:$2 sm:$0xff] }
 0x1cc   :  { %19392 = vmatmul.mubr.msk.bf16.gmra.mrb[56].mxu1 %vm345_vm1, %v1280_v44  ;;  %v1872_v44 = vpack.c.bf16 %v16512_v41, %v16511_v37 }
 0x1ce   :  { %19768 = vmatmul.mubr.msk.bf16.gmra.mrb[36].mxu0 %vm345_vm1, %v4954_v48  ;;  %v16461_v48 = vld [vmem:[%s27149_s0 + $0x9c2] ss:$2 sm:$0xff] }
 0x1cf   :  { %19771 = vmatprep.mubr.msk.bf16.mxu0 %vm345_vm1, %v4955_v49  ;;  %v16462_v49 = vld [vmem:[%s27149_s0 + $0xa02] ss:$2 sm:$0xff]  ;;  %v1281_v52 = vpack.c.bf16 %v16461_v48, %v16460_v47  ;;  %v16513_v47 = vld [vmem:[%s27149_s0 + $0x283] ss:$2 sm:$0xff]  ;;  %v16514_v48 = vld [vmem:[%s27149_s0 + $0x293] ss:$2 sm:$0xff] }
 0x1d0   :  { %v1282_v56 = vpack.c.bf16 %v16463_v53, %v16462_v49  ;;  %v16515_v49 = vld [vmem:[%s27149_s0 + $0x2d3] ss:$2 sm:$0xff]  ;;  %v16516_v53 = vld [vmem:[%s27149_s0 + $0x2e3] ss:$2 sm:$0xff] }
 0x1d1   :  { %19395 = vmatprep.mubr.msk.bf16.mxu1 %vm345_vm1, %v1281_v52  ;;  %v1873_v52 = vpack.c.bf16 %v16514_v48, %v16513_v47  ;;  %v17117_v47 = vld [vmem:[%s27149_s0 + $0x691] ss:$2 sm:$0xff]  ;;  %v17118_v48 = vld [vmem:[%s27149_s0 + $0x6a1] ss:$2 sm:$0xff] }
 0x1d4   :  { %19396 = vmatmul.mubr.msk.bf16.gmra.mrb[60].mxu1 %vm345_vm1, %v1282_v56  ;;  %v1874_v56 = vpack.c.bf16 %v16516_v53, %v16515_v49 }
 0x1d5   :  { %19401 = vmatprep.mubr.msk.bf16.mxu1 %vm345_vm1, %v1865_v1  ;;  %v16520_v1 = vld [vmem:[%s27149_s0 + $0x383] ss:$2 sm:$0xff] }
 0x1d6   :  { %19772 = vmatmul.mubr.msk.bf16.gmra.mrb[40].mxu0 %vm345_vm1, %v4956_v60  ;;  %v17082_v60 = vld [vmem:[%s27149_s0 + $0xb1] ss:$2 sm:$0xff] }
 0x1d7   :  { %19775 = vmatprep.mubr.msk.bf16.mxu0 %vm345_vm1, %v4957_v61  ;;  %v16561_v61 = vld [vmem:[%s27148_s1 + $0xc] sm:$0xf]  ;;  %v5550_v7 = vpack.c.bf16 %v17082_v60, %v17081_v59  ;;  %v16518_v60 = vld [vmem:[%s27149_s0 + $0x333] ss:$2 sm:$0xff] }
 0x1d8   :  { %22184 = vmatprep.subr.msk.bf16.mxu1 %vm442_vm0, %v16561_v61  ;;  %v1996_v58 = vsel %vm442_vm0, %v16561_v61, 0  ;;  %v16517_v59 = vld [vmem:[%s27149_s0 + $0x323] ss:$2 sm:$0xff]  ;;  %v16519_v61 = vld [vmem:[%s27149_s0 + $0x373] ss:$2 sm:$0xff] }
 0x1d9   :  { %19400 = vmatpush3.bf16.msra.mxu1 %v1996_v58  ;;  %v1875_v58 = vpack.c.bf16 %v16518_v60, %v16517_v59  ;;  %v17121_v59 = vld [vmem:[%s27149_s0 + $0x731] ss:$2 sm:$0xff]  ;;  %v17122_v60 = vld [vmem:[%s27149_s0 + $0x741] ss:$2 sm:$0xff] }
 0x1dc   :  { %19402 = vmatmul.mubr.msk.bf16.vlgmr.msra.gmra.mrb[0].mxu1 %vm345_vm1, %v1866_v0  ;;  %v5561_v0 = vpack.c.bf16 %v17104_v3, %v17103_v2  ;;  %v5570_v2 = vpack.c.bf16 %v17122_v60, %v17121_v59  ;;  %v16560_v59 = vld [vmem:[%s27149_s0 + $0xa13] ss:$2 sm:$0xff]  ;;  %v17176_v60 = vld [vmem:[%s27149_s0 + $0x52] ss:$2 sm:$0xff] }
 0x1dd   :  { %19405 = vmatprep.mubr.msk.bf16.mxu1 %vm345_vm1, %v1867_v16 }
 0x1de   :  { %19776 = vmatmul.mubr.msk.bf16.gmra.mrb[44].mxu0 %vm345_vm1, %v4958_v8  ;;  %v5551_v8 = vpack.c.bf16 %v17084_v5, %v17083_v4  ;;  %v1876_v4 = vpack.c.bf16 %v16520_v1, %v16519_v61  ;;  %v5560_v5 = vpack.c.bf16 %v17102_v63, %v17101_v62  ;;  %v16540_v62 = vld [vmem:[%s27149_s0 + $0x6f3] ss:$2 sm:$0xff] }
 0x1df   :  { %19779 = vmatprep.mubr.msk.bf16.mxu0 %vm345_vm1, %v4959_v9  ;;  %v6294_v9 = vsel %vm442_vm0, %v23657_v6, 0  ;;  %v17087_v6 = vld [vmem:[%s27149_s0 + $0x191] ss:$2 sm:$0xff]  ;;  %v17123_v63 = vld [vmem:[%s27149_s0 + $0x781] ss:$2 sm:$0xff] }
 0x1e4   :  { %19406 = vmatmul.mubr.msk.bf16.gmra.mrb[4].mxu1 %vm345_vm1, %v1868_v19  ;;  %v16525_v19 = vld [vmem:[%s27149_s0 + $0x463] ss:$2 sm:$0xff] }
 0x1e5   :  { %19409 = vmatprep.mubr.msk.bf16.mxu1 %vm345_vm1, %v1869_v27  ;;  %v17112_v27 = vld [vmem:[%s27149_s0 + $0x5b1] ss:$2 sm:$0xff] }
 0x1e6   :  { %19780 = vmatmul.mubr.msk.bf16.gmra.mrb[48].mxu0 %vm345_vm1, %v4960_v20  ;;  %v5552_v20 = vpack.c.bf16 %v17086_v11, %v17085_v10  ;;  %v17105_v10 = vld [vmem:[%s27149_s0 + $0x461] ss:$2 sm:$0xff]  ;;  %v17106_v11 = vld [vmem:[%s27149_s0 + $0x471] ss:$2 sm:$0xff] }
 0x1e7   :  { %19783 = vmatprep.mubr.msk.bf16.mxu0 %vm345_vm1, %v4961_v21  ;;  %v5553_v21 = vpack.c.bf16 %v17088_v15, %v17087_v6  ;;  %v17108_v15 = vld [vmem:[%s27149_s0 + $0x4c1] ss:$2 sm:$0xff]  ;;  %v5562_v17 = vpack.c.bf16 %v17106_v11, %v17105_v10 }
 0x1e8   :  { %v5563_v18 = vpack.c.bf16 %v17108_v15, %v17107_v14  ;;  %v16544_v10 = vld [vmem:[%s27149_s0 + $0x793] ss:$2 sm:$0xff] }
 0x1e9   :  { %v17127_v11 = vld [vmem:[%s27149_s0 + $0x821] ss:$2 sm:$0xff] }
 0x1ec   :  { %19410 = vmatmul.mubr.msk.bf16.gmra.mrb[8].mxu1 %vm345_vm1, %v1870_v32  ;;  %v16529_v32 = vld [vmem:[%s27149_s0 + $0x553] ss:$2 sm:$0xff] }
 0x1ed   :  { %19413 = vmatprep.mubr.msk.bf16.mxu1 %vm345_vm1, %v1871_v40  ;;  %v17116_v40 = vld [vmem:[%s27149_s0 + $0x651] ss:$2 sm:$0xff] }
 0x1ee   :  { %19784 = vmatmul.mubr.msk.bf16.gmra.mrb[52].mxu0 %vm345_vm1, %v4962_v33  ;;  %v5554_v33 = vpack.c.bf16 %v17090_v26, %v17089_v25  ;;  %v16528_v25 = vld [vmem:[%s27149_s0 + $0x4c3] ss:$2 sm:$0xff] }
 0x1ef   :  { %19787 = vmatprep.mubr.msk.bf16.mxu0 %vm345_vm1, %v4963_v34  ;;  %v5555_v34 = vpack.c.bf16 %v17092_v31, %v17091_v30  ;;  %v17111_v26 = vld [vmem:[%s27149_s0 + $0x5a1] ss:$2 sm:$0xff]  ;;  %v5564_v30 = vpack.c.bf16 %v17110_v23, %v17109_v22 }
 0x1f0   :  { %v5565_v31 = vpack.c.bf16 %v17112_v27, %v17111_v26  ;;  %v16548_v22 = vld [vmem:[%s27149_s0 + $0x833] ss:$2 sm:$0xff] }
 0x1f1   :  { %v17131_v23 = vld [vmem:[%s27149_s0 + $0x8c1] ss:$2 sm:$0xff] }
 0x1f4   :  { %19414 = vmatmul.mubr.msk.bf16.gmra.mrb[12].mxu1 %vm345_vm1, %v1872_v44  ;;  %v16533_v44 = vld [vmem:[%s27149_s0 + $0x5f3] ss:$2 sm:$0xff] }
 0x1f5   :  { %19417 = vmatprep.mubr.msk.bf16.mxu1 %vm345_vm1, %v1873_v52  ;;  %v17120_v52 = vld [vmem:[%s27149_s0 + $0x6f1] ss:$2 sm:$0xff] }
 0x1f6   :  { %19788 = vmatmul.mubr.msk.bf16.gmra.mrb[56].mxu0 %vm345_vm1, %v4964_v45  ;;  %v5556_v45 = vpack.c.bf16 %v17094_v39, %v17093_v38  ;;  %v16532_v38 = vld [vmem:[%s27149_s0 + $0x5b3] ss:$2 sm:$0xff] }
 0x1f7   :  { %19791 = vmatprep.mubr.msk.bf16.mxu0 %vm345_vm1, %v4965_v46  ;;  %v5557_v46 = vpack.c.bf16 %v17096_v43, %v17095_v42  ;;  %v17115_v39 = vld [vmem:[%s27149_s0 + $0x641] ss:$2 sm:$0xff]  ;;  %v5566_v42 = vpack.c.bf16 %v17114_v36, %v17113_v35 }
 0x1f8   :  { %v5567_v43 = vpack.c.bf16 %v17116_v40, %v17115_v39  ;;  %v16552_v35 = vld [vmem:[%s27149_s0 + $0x8d3] ss:$2 sm:$0xff] }
 0x1f9   :  { %v17135_v36 = vld [vmem:[%s27149_s0 + $0x961] ss:$2 sm:$0xff] }
 0x1fc   :  { %19418 = vmatmul.mubr.msk.bf16.gmra.mrb[16].mxu1 %vm345_vm1, %v1874_v56  ;;  %v16537_v56 = vld [vmem:[%s27149_s0 + $0x693] ss:$2 sm:$0xff] }
 0x1fd   :  { %19421 = vmatprep.mubr.msk.bf16.mxu1 %vm345_vm1, %v1875_v58  ;;  %v17124_v58 = vld [vmem:[%s27149_s0 + $0x791] ss:$2 sm:$0xff] }
 0x1fe   :  { %19792 = vmatmul.mubr.msk.bf16.gmra.mrb[60].mxu0 %vm345_vm1, %v4966_v57  ;;  %v5558_v57 = vpack.c.bf16 %v17098_v51, %v17097_v50  ;;  %v16536_v50 = vld [vmem:[%s27149_s0 + $0x653] ss:$2 sm:$0xff]  ;;  %v5571_v3 = vpack.c.bf16 %v17124_v58, %v17123_v63 }
 0x1ff   :  { %19797 = vmatprep.mubr.msk.bf16.mxu0 %vm345_vm1, %v5549_v29  ;;  %v5559_v29 = vpack.c.bf16 %v17100_v55, %v17099_v54  ;;  %v17119_v51 = vld [vmem:[%s27149_s0 + $0x6e1] ss:$2 sm:$0xff]  ;;  %v5568_v54 = vpack.c.bf16 %v17118_v48, %v17117_v47 }
 0x200   :  { %v5569_v55 = vpack.c.bf16 %v17120_v52, %v17119_v51  ;;  %v16556_v47 = vld [vmem:[%s27149_s0 + $0x973] ss:$2 sm:$0xff] }
 0x201   :  { %v17139_v48 = vld [vmem:[%s27149_s0 + $0xa01] ss:$2 sm:$0xff] }
 0x204   :  { %19422 = vmatmul.mubr.msk.bf16.gmra.mrb[20].mxu1 %vm345_vm1, %v1876_v4  ;;  %v16541_v4 = vld [vmem:[%s27149_s0 + $0x733] ss:$2 sm:$0xff] }
 0x206   :  { %19798 = vmatmul.mubr.msk.bf16.vlgmr.msra.gmra.mrb[0].mxu0 %vm345_vm1, %v5550_v7  ;;  %v16521_v7 = vld [vmem:[%s27149_s0 + $0x3c3] ss:$2 sm:$0xff] }
 0x207   :  { %19862 = vmatpush3.bf16.msra.mxu0 %v6294_v9  ;;  %19801 = vmatprep.mubr.msk.bf16.mxu0 %vm345_vm1, %v5551_v8  ;;  %v16522_v8 = vld [vmem:[%s27149_s0 + $0x3d3] ss:$2 sm:$0xff] }
 0x208   :  { %22192 = vmatprep.subr.msk.bf16.mxu0 %vm442_vm0, %v24119_v12  ;;  %v16523_v9 = vld [vmem:[%s27149_s0 + $0x413] ss:$2 sm:$0xff]  ;;  %v1877_v6 = vpack.c.bf16 %v16522_v8, %v16521_v7 }
 0x209   :  { %v1878_v16 = vpack.c.bf16 %v16524_v13, %v16523_v9  ;;  %v17125_v7 = vld [vmem:[%s27149_s0 + $0x7d1] ss:$2 sm:$0xff]  ;;  %v17126_v8 = vld [vmem:[%s27149_s0 + $0x7e1] ss:$2 sm:$0xff] }
 0x20a   :  { %19425 = vmatprep.mubr.msk.bf16.mxu1 %vm345_vm1, %v1877_v6  ;;  %v17128_v6 = vld [vmem:[%s27149_s0 + $0x831] ss:$2 sm:$0xff]  ;;  %v5572_v14 = vpack.c.bf16 %v17126_v8, %v17125_v7  ;;  %v16596_v8 = vld [vmem:[%s27149_s0 + $0x78] ss:$2 sm:$0xff] }
 0x20b   :  { %v5573_v15 = vpack.c.bf16 %v17128_v6, %v17127_v11  ;;  %v17181_v11 = vld [vmem:[%s27149_s0 + $0x102] ss:$2 sm:$0xff] }
 0x20c   :  { %19426 = vmatmul.mubr.msk.bf16.gmra.mrb[24].mxu1 %vm345_vm1, %v1878_v16  ;;  %v16545_v16 = vld [vmem:[%s27149_s0 + $0x7d3] ss:$2 sm:$0xff] }
 0x20e   :  { %19802 = vmatmul.mubr.msk.bf16.gmra.mrb[4].mxu0 %vm345_vm1, %v5552_v20  ;;  %v16526_v20 = vld [vmem:[%s27149_s0 + $0x473] ss:$2 sm:$0xff] }
 0x20f   :  { %19805 = vmatprep.mubr.msk.bf16.mxu0 %vm345_vm1, %v5553_v21  ;;  %v16527_v21 = vld [vmem:[%s27149_s0 + $0x4b3] ss:$2 sm:$0xff]  ;;  %v1879_v24 = vpack.c.bf16 %v16526_v20, %v16525_v19 }
 0x210   :  { %v1880_v28 = vpack.c.bf16 %v16528_v25, %v16527_v21  ;;  %v17129_v19 = vld [vmem:[%s27149_s0 + $0x871] ss:$2 sm:$0xff]  ;;  %v17130_v20 = vld [vmem:[%s27149_s0 + $0x881] ss:$2 sm:$0xff] }
 0x211   :  { %19429 = vmatprep.mubr.msk.bf16.mxu1 %vm345_vm1, %v1879_v24  ;;  %v17132_v24 = vld [vmem:[%s27149_s0 + $0x8d1] ss:$2 sm:$0xff]  ;;  %v5574_v26 = vpack.c.bf16 %v17130_v20, %v17129_v19  ;;  %v16598_v19 = vld [vmem:[%s27149_s0 + $0xc8] ss:$2 sm:$0xff]  ;;  %v16599_v20 = vld [vmem:[%s27149_s0 + $0xd8] ss:$2 sm:$0xff] }
 0x212   :  { %v5575_v27 = vpack.c.bf16 %v17132_v24, %v17131_v23  ;;  %v16600_v23 = vld [vmem:[%s27149_s0 + $0x118] ss:$2 sm:$0xff]  ;;  %v16601_v24 = vld [vmem:[%s27149_s0 + $0x128] ss:$2 sm:$0xff] }
 0x214   :  { %19430 = vmatmul.mubr.msk.bf16.gmra.mrb[28].mxu1 %vm345_vm1, %v1880_v28  ;;  %v16549_v28 = vld [vmem:[%s27149_s0 + $0x873] ss:$2 sm:$0xff] }
 0x216   :  { %19806 = vmatmul.mubr.msk.bf16.gmra.mrb[8].mxu0 %vm345_vm1, %v5554_v33  ;;  %v16530_v33 = vld [vmem:[%s27149_s0 + $0x563] ss:$2 sm:$0xff] }
 0x217   :  { %19809 = vmatprep.mubr.msk.bf16.mxu0 %vm345_vm1, %v5555_v34  ;;  %v16531_v34 = vld [vmem:[%s27149_s0 + $0x5a3] ss:$2 sm:$0xff]  ;;  %v1881_v37 = vpack.c.bf16 %v16530_v33, %v16529_v32 }
 0x218   :  { %v1882_v41 = vpack.c.bf16 %v16532_v38, %v16531_v34  ;;  %v17133_v32 = vld [vmem:[%s27149_s0 + $0x911] ss:$2 sm:$0xff]  ;;  %v17134_v33 = vld [vmem:[%s27149_s0 + $0x921] ss:$2 sm:$0xff] }
 0x219   :  { %19433 = vmatprep.mubr.msk.bf16.mxu1 %vm345_vm1, %v1881_v37  ;;  %v17136_v37 = vld [vmem:[%s27149_s0 + $0x971] ss:$2 sm:$0xff]  ;;  %v5576_v39 = vpack.c.bf16 %v17134_v33, %v17133_v32  ;;  %v17186_v32 = vld [vmem:[%s27149_s0 + $0x1e2] ss:$2 sm:$0xff]  ;;  %v17187_v33 = vld [vmem:[%s27149_s0 + $0x1f2] ss:$2 sm:$0xff] }
 0x21a   :  { %v5577_v40 = vpack.c.bf16 %v17136_v37, %v17135_v36  ;;  %v17188_v36 = vld [vmem:[%s27149_s0 + $0x232] ss:$2 sm:$0xff]  ;;  %v17189_v37 = vld [vmem:[%s27149_s0 + $0x242] ss:$2 sm:$0xff] }
 0x21c   :  { %19434 = vmatmul.mubr.msk.bf16.gmra.mrb[32].mxu1 %vm345_vm1, %v1882_v41  ;;  %v16553_v41 = vld [vmem:[%s27149_s0 + $0x913] ss:$2 sm:$0xff] }
 0x21e   :  { %19810 = vmatmul.mubr.msk.bf16.gmra.mrb[12].mxu0 %vm345_vm1, %v5556_v45  ;;  %v16534_v45 = vld [vmem:[%s27149_s0 + $0x603] ss:$2 sm:$0xff] }
 0x21f   :  { %19813 = vmatprep.mubr.msk.bf16.mxu0 %vm345_vm1, %v5557_v46  ;;  %v16535_v46 = vld [vmem:[%s27149_s0 + $0x643] ss:$2 sm:$0xff]  ;;  %v1883_v49 = vpack.c.bf16 %v16534_v45, %v16533_v44 }
 0x220   :  { %v1884_v53 = vpack.c.bf16 %v16536_v50, %v16535_v46  ;;  %v17137_v44 = vld [vmem:[%s27149_s0 + $0x9b1] ss:$2 sm:$0xff]  ;;  %v17138_v45 = vld [vmem:[%s27149_s0 + $0x9c1] ss:$2 sm:$0xff] }
 0x221   :  { %19437 = vmatprep.mubr.msk.bf16.mxu1 %vm345_vm1, %v1883_v49  ;;  %v17140_v49 = vld [vmem:[%s27149_s0 + $0xa11] ss:$2 sm:$0xff]  ;;  %v5578_v51 = vpack.c.bf16 %v17138_v45, %v17137_v44  ;;  %v17190_v44 = vld [vmem:[%s27149_s0 + $0x282] ss:$2 sm:$0xff]  ;;  %v17191_v45 = vld [vmem:[%s27149_s0 + $0x292] ss:$2 sm:$0xff] }
 0x222   :  { %v5579_v52 = vpack.c.bf16 %v17140_v49, %v17139_v48  ;;  %v17192_v48 = vld [vmem:[%s27149_s0 + $0x2d2] ss:$2 sm:$0xff]  ;;  %v17193_v49 = vld [vmem:[%s27149_s0 + $0x2e2] ss:$2 sm:$0xff] }
 0x224   :  { %19438 = vmatmul.mubr.msk.bf16.gmra.mrb[36].mxu1 %vm345_vm1, %v1884_v53  ;;  %v16557_v53 = vld [vmem:[%s27149_s0 + $0x9b3] ss:$2 sm:$0xff] }
 0x226   :  { %19814 = vmatmul.mubr.msk.bf16.gmra.mrb[16].mxu0 %vm345_vm1, %v5558_v57  ;;  %v16538_v57 = vld [vmem:[%s27149_s0 + $0x6a3] ss:$2 sm:$0xff] }
 0x227   :  { %19817 = vmatprep.mubr.msk.bf16.mxu0 %vm345_vm1, %v5559_v29  ;;  %v16539_v29 = vld [vmem:[%s27149_s0 + $0x6e3] ss:$2 sm:$0xff]  ;;  %v1885_v61 = vpack.c.bf16 %v16538_v57, %v16537_v56 }
 0x228   :  { %v1886_v1 = vpack.c.bf16 %v16540_v62, %v16539_v29  ;;  %v17141_v56 = vld [vmem:[%s27149_s0 + $0xa51] ss:$2 sm:$0xff]  ;;  %v17142_v57 = vld [vmem:[%s27149_s0 + $0xa61] ss:$2 sm:$0xff] }
 0x229   :  { %19441 = vmatprep.mubr.msk.bf16.mxu1 %vm345_vm1, %v1885_v61  ;;  %v17177_v61 = vld [vmem:[%s27149_s0 + $0x62] ss:$2 sm:$0xff]  ;;  %v5580_v63 = vpack.c.bf16 %v17142_v57, %v17141_v56  ;;  %v17195_v57 = vld [vmem:[%s27149_s0 + $0x332] ss:$2 sm:$0xff] }
 0x22a   :  { %v6163_v58 = vpack.c.bf16 %v17177_v61, %v17176_v60  ;;  %v17194_v56 = vld [vmem:[%s27149_s0 + $0x322] ss:$2 sm:$0xff]  ;;  %v17196_v60 = vld [vmem:[%s27149_s0 + $0x372] ss:$2 sm:$0xff] }
 0x22b   :  { %v17197_v61 = vld [vmem:[%s27149_s0 + $0x382] ss:$2 sm:$0xff] }
 0x22c   :  { %19442 = vmatmul.mubr.msk.bf16.gmra.mrb[40].mxu1 %vm345_vm1, %v1886_v1  ;;  %v17178_v1 = vld [vmem:[%s27149_s0 + $0xa2] ss:$2 sm:$0xff] }
 0x22e   :  { %19818 = vmatmul.mubr.msk.bf16.gmra.mrb[20].mxu0 %vm345_vm1, %v5560_v5  ;;  %v16542_v5 = vld [vmem:[%s27149_s0 + $0x743] ss:$2 sm:$0xff] }
 0x22f   :  { %19821 = vmatprep.mubr.msk.bf16.mxu0 %vm345_vm1, %v5561_v0  ;;  %v16543_v0 = vld [vmem:[%s27149_s0 + $0x783] ss:$2 sm:$0xff]  ;;  %v1887_v9 = vpack.c.bf16 %v16542_v5, %v16541_v4  ;;  %v16594_v4 = vld [vmem:[%s27149_s0 + $0x28] ss:$2 sm:$0xff]  ;;  %v16595_v5 = vld [vmem:[%s27149_s0 + $0x38] ss:$2 sm:$0xff] }
 0x230   :  { %v1888_v13 = vpack.c.bf16 %v16544_v10, %v16543_v0  ;;  %v2479_v7 = vpack.c.bf16 %v16595_v5, %v16594_v4  ;;  %v17180_v10 = vld [vmem:[%s27149_s0 + $0xf2] ss:$2 sm:$0xff]  ;;  %v17198_v4 = vld [vmem:[%s27149_s0 + $0x3c2] ss:$2 sm:$0xff] }
 0x231   :  { %19445 = vmatprep.mubr.msk.bf16.mxu1 %vm345_vm1, %v1887_v9  ;;  %v16597_v9 = vld [vmem:[%s27149_s0 + $0x88] ss:$2 sm:$0xff] }
 0x232   :  { %v2480_v6 = vpack.c.bf16 %v16597_v9, %v16596_v8  ;;  %v17199_v5 = vld [vmem:[%s27149_s0 + $0x3d2] ss:$2 sm:$0xff]  ;;  %v17201_v9 = vld [vmem:[%s27149_s0 + $0x422] ss:$2 sm:$0xff] }
 0x233   :  { %v17200_v8 = vld [vmem:[%s27149_s0 + $0x412] ss:$2 sm:$0xff] }
 0x234   :  { %19446 = vmatmul.mubr.msk.bf16.gmra.mrb[44].mxu1 %vm345_vm1, %v1888_v13 }
 0x236   :  { %19822 = vmatmul.mubr.msk.bf16.gmra.mrb[24].mxu0 %vm345_vm1, %v5562_v17  ;;  %v16546_v17 = vld [vmem:[%s27149_s0 + $0x7e3] ss:$2 sm:$0xff] }
 0x237   :  { %19825 = vmatprep.mubr.msk.bf16.mxu0 %vm345_vm1, %v5563_v18  ;;  %v16547_v18 = vld [vmem:[%s27149_s0 + $0x823] ss:$2 sm:$0xff]  ;;  %v1889_v21 = vpack.c.bf16 %v16546_v17, %v16545_v16  ;;  %v17182_v16 = vld [vmem:[%s27149_s0 + $0x142] ss:$2 sm:$0xff]  ;;  %v17183_v17 = vld [vmem:[%s27149_s0 + $0x152] ss:$2 sm:$0xff] }
 0x238   :  { %v1890_v25 = vpack.c.bf16 %v16548_v22, %v16547_v18  ;;  %v24581_v18 = vld [vmem:[%s27148_s1 + $0x30] sm:$0xf]  ;;  %v2481_v22 = vpack.c.bf16 %v16599_v20, %v16598_v19 }
 0x239   :  { %19449 = vmatprep.mubr.msk.bf16.mxu1 %vm345_vm1, %v1889_v21  ;;  %v17185_v21 = vld [vmem:[%s27149_s0 + $0x1a2] ss:$2 sm:$0xff]  ;;  %v17204_v20 = vld [vmem:[%s27149_s0 + $0x4b2] ss:$2 sm:$0xff] }
 0x23a   :  { %v16621_v19 = vld [vmem:[%s27149_s0 + $0x448] ss:$2 sm:$0xff] }
 0x23c   :  { %19450 = vmatmul.mubr.msk.bf16.gmra.mrb[48].mxu1 %vm345_vm1, %v1890_v25  ;;  %v2482_v25 = vpack.c.bf16 %v16601_v24, %v16600_v23 }
 0x23e   :  { %19826 = vmatmul.mubr.msk.bf16.gmra.mrb[28].mxu0 %vm345_vm1, %v5564_v30  ;;  %v16550_v30 = vld [vmem:[%s27149_s0 + $0x883] ss:$2 sm:$0xff] }
 0x23f   :  { %19829 = vmatprep.mubr.msk.bf16.mxu0 %vm345_vm1, %v5565_v31  ;;  %v16551_v31 = vld [vmem:[%s27149_s0 + $0x8c3] ss:$2 sm:$0xff]  ;;  %v1891_v34 = vpack.c.bf16 %v16550_v30, %v16549_v28  ;;  %v16602_v28 = vld [vmem:[%s27149_s0 + $0x168] ss:$2 sm:$0xff]  ;;  %v16603_v30 = vld [vmem:[%s27149_s0 + $0x178] ss:$2 sm:$0xff] }
 0x240   :  { %v1892_v38 = vpack.c.bf16 %v16552_v35, %v16551_v31  ;;  %v16604_v31 = vld [vmem:[%s27149_s0 + $0x1b8] ss:$2 sm:$0xff]  ;;  %v16605_v35 = vld [vmem:[%s27149_s0 + $0x1c8] ss:$2 sm:$0xff] }
 0x241   :  { %19453 = vmatprep.mubr.msk.bf16.mxu1 %vm345_vm1, %v1891_v34  ;;  %v2483_v34 = vpack.c.bf16 %v16603_v30, %v16602_v28  ;;  %v17206_v28 = vld [vmem:[%s27149_s0 + $0x502] ss:$2 sm:$0xff]  ;;  %v17207_v30 = vld [vmem:[%s27149_s0 + $0x512] ss:$2 sm:$0xff] }
 0x244   :  { %19454 = vmatmul.mubr.msk.bf16.gmra.mrb[52].mxu1 %vm345_vm1, %v1892_v38  ;;  %v2484_v38 = vpack.c.bf16 %v16605_v35, %v16604_v31 }
 0x246   :  { %19830 = vmatmul.mubr.msk.bf16.gmra.mrb[32].mxu0 %vm345_vm1, %v5566_v42  ;;  %v16554_v42 = vld [vmem:[%s27149_s0 + $0x923] ss:$2 sm:$0xff] }
 0x247   :  { %19833 = vmatprep.mubr.msk.bf16.mxu0 %vm345_vm1, %v5567_v43  ;;  %v16555_v43 = vld [vmem:[%s27149_s0 + $0x963] ss:$2 sm:$0xff]  ;;  %v1893_v46 = vpack.c.bf16 %v16554_v42, %v16553_v41  ;;  %v16606_v41 = vld [vmem:[%s27149_s0 + $0x208] ss:$2 sm:$0xff]  ;;  %v16607_v42 = vld [vmem:[%s27149_s0 + $0x218] ss:$2 sm:$0xff] }
 0x248   :  { %v1894_v50 = vpack.c.bf16 %v16556_v47, %v16555_v43  ;;  %v16608_v43 = vld [vmem:[%s27149_s0 + $0x258] ss:$2 sm:$0xff]  ;;  %v16609_v47 = vld [vmem:[%s27149_s0 + $0x268] ss:$2 sm:$0xff] }
 0x249   :  { %19457 = vmatprep.mubr.msk.bf16.mxu1 %vm345_vm1, %v1893_v46  ;;  %v2485_v46 = vpack.c.bf16 %v16607_v42, %v16606_v41  ;;  %v17210_v41 = vld [vmem:[%s27149_s0 + $0x5f2] ss:$2 sm:$0xff]  ;;  %v17211_v42 = vld [vmem:[%s27149_s0 + $0x602] ss:$2 sm:$0xff] }
 0x24c   :  { %19458 = vmatmul.mubr.msk.bf16.gmra.mrb[56].mxu1 %vm345_vm1, %v1894_v50  ;;  %v2486_v50 = vpack.c.bf16 %v16609_v47, %v16608_v43 }
 0x24e   :  { %19834 = vmatmul.mubr.msk.bf16.gmra.mrb[36].mxu0 %vm345_vm1, %v5568_v54  ;;  %v16558_v54 = vld [vmem:[%s27149_s0 + $0x9c3] ss:$2 sm:$0xff] }
 0x24f   :  { %19837 = vmatprep.mubr.msk.bf16.mxu0 %vm345_vm1, %v5569_v55  ;;  %v16559_v55 = vld [vmem:[%s27149_s0 + $0xa03] ss:$2 sm:$0xff]  ;;  %v1895_v29 = vpack.c.bf16 %v16558_v54, %v16557_v53  ;;  %v16610_v53 = vld [vmem:[%s27149_s0 + $0x2a8] ss:$2 sm:$0xff]  ;;  %v16611_v54 = vld [vmem:[%s27149_s0 + $0x2b8] ss:$2 sm:$0xff] }
 0x250   :  { %v1896_v62 = vpack.c.bf16 %v16560_v59, %v16559_v55  ;;  %v16612_v55 = vld [vmem:[%s27149_s0 + $0x2f8] ss:$2 sm:$0xff]  ;;  %v16613_v59 = vld [vmem:[%s27149_s0 + $0x308] ss:$2 sm:$0xff] }
 0x251   :  { %19461 = vmatprep.mubr.msk.bf16.mxu1 %vm345_vm1, %v1895_v29  ;;  %v2487_v29 = vpack.c.bf16 %v16611_v54, %v16610_v53  ;;  %v17214_v53 = vld [vmem:[%s27149_s0 + $0x692] ss:$2 sm:$0xff]  ;;  %v17215_v54 = vld [vmem:[%s27149_s0 + $0x6a2] ss:$2 sm:$0xff] }
 0x254   :  { %19462 = vmatmul.mubr.msk.bf16.gmra.mrb[60].mxu1 %vm345_vm1, %v1896_v62  ;;  %v2488_v62 = vpack.c.bf16 %v16613_v59, %v16612_v55 }
 0x255   :  { %19467 = vmatprep.mubr.msk.bf16.mxu1 %vm345_vm1, %v2479_v7  ;;  %v16617_v7 = vld [vmem:[%s27149_s0 + $0x3a8] ss:$2 sm:$0xff] }
 0x256   :  { %19838 = vmatmul.mubr.msk.bf16.gmra.mrb[40].mxu0 %vm345_vm1, %v5570_v2  ;;  %v17179_v2 = vld [vmem:[%s27149_s0 + $0xb2] ss:$2 sm:$0xff] }
 0x257   :  { %19841 = vmatprep.mubr.msk.bf16.mxu0 %vm345_vm1, %v5571_v3  ;;  %v16658_v3 = vld [vmem:[%s27148_s1 + $0x10] sm:$0xf]  ;;  %v6164_v13 = vpack.c.bf16 %v17179_v2, %v17178_v1  ;;  %v16615_v2 = vld [vmem:[%s27149_s0 + $0x358] ss:$2 sm:$0xff] }
 0x258   :  { %22185 = vmatprep.subr.msk.bf16.mxu1 %vm442_vm0, %v16658_v3  ;;  %v2610_v0 = vsel %vm442_vm0, %v16658_v3, 0  ;;  %v16614_v1 = vld [vmem:[%s27149_s0 + $0x348] ss:$2 sm:$0xff]  ;;  %v16616_v3 = vld [vmem:[%s27149_s0 + $0x398] ss:$2 sm:$0xff] }
 0x259   :  { %19466 = vmatpush3.bf16.msra.mxu1 %v2610_v0  ;;  %v2489_v0 = vpack.c.bf16 %v16615_v2, %v16614_v1  ;;  %v17218_v1 = vld [vmem:[%s27149_s0 + $0x732] ss:$2 sm:$0xff]  ;;  %v17219_v2 = vld [vmem:[%s27149_s0 + $0x742] ss:$2 sm:$0xff] }
 0x25c   :  { %19468 = vmatmul.mubr.msk.bf16.vlgmr.msra.gmra.mrb[0].mxu1 %vm345_vm1, %v2480_v6  ;;  %v6175_v6 = vpack.c.bf16 %v17201_v9, %v17200_v8  ;;  %v6184_v8 = vpack.c.bf16 %v17219_v2, %v17218_v1  ;;  %v16657_v1 = vld [vmem:[%s27149_s0 + $0xa38] ss:$2 sm:$0xff]  ;;  %v17273_v2 = vld [vmem:[%s27149_s0 + $0x53] ss:$2 sm:$0xff] }
 0x25d   :  { %19471 = vmatprep.mubr.msk.bf16.mxu1 %vm345_vm1, %v2481_v22 }
 0x25e   :  { %19842 = vmatmul.mubr.msk.bf16.gmra.mrb[44].mxu0 %vm345_vm1, %v5572_v14  ;;  %v6165_v14 = vpack.c.bf16 %v17181_v11, %v17180_v10  ;;  %v2490_v10 = vpack.c.bf16 %v16617_v7, %v16616_v3  ;;  %v6174_v11 = vpack.c.bf16 %v17199_v5, %v17198_v4  ;;  %v16637_v4 = vld [vmem:[%s27149_s0 + $0x718] ss:$2 sm:$0xff] }
 0x25f   :  { %19845 = vmatprep.mubr.msk.bf16.mxu0 %vm345_vm1, %v5573_v15  ;;  %v6908_v15 = vsel %vm442_vm0, %v24119_v12, 0  ;;  %v17184_v12 = vld [vmem:[%s27149_s0 + $0x192] ss:$2 sm:$0xff]  ;;  %v17220_v5 = vld [vmem:[%s27149_s0 + $0x782] ss:$2 sm:$0xff] }
 0x264   :  { %19472 = vmatmul.mubr.msk.bf16.gmra.mrb[4].mxu1 %vm345_vm1, %v2482_v25  ;;  %v16622_v25 = vld [vmem:[%s27149_s0 + $0x488] ss:$2 sm:$0xff] }
 0x265   :  { %19475 = vmatprep.mubr.msk.bf16.mxu1 %vm345_vm1, %v2483_v34  ;;  %v17209_v34 = vld [vmem:[%s27149_s0 + $0x5b2] ss:$2 sm:$0xff] }
 0x266   :  { %19846 = vmatmul.mubr.msk.bf16.gmra.mrb[48].mxu0 %vm345_vm1, %v5574_v26  ;;  %v6166_v26 = vpack.c.bf16 %v17183_v17, %v17182_v16  ;;  %v17202_v16 = vld [vmem:[%s27149_s0 + $0x462] ss:$2 sm:$0xff]  ;;  %v17203_v17 = vld [vmem:[%s27149_s0 + $0x472] ss:$2 sm:$0xff] }
 0x267   :  { %19849 = vmatprep.mubr.msk.bf16.mxu0 %vm345_vm1, %v5575_v27  ;;  %v6167_v27 = vpack.c.bf16 %v17185_v21, %v17184_v12  ;;  %v17205_v21 = vld [vmem:[%s27149_s0 + $0x4c2] ss:$2 sm:$0xff]  ;;  %v6176_v23 = vpack.c.bf16 %v17203_v17, %v17202_v16 }
 0x268   :  { %v6177_v24 = vpack.c.bf16 %v17205_v21, %v17204_v20  ;;  %v16641_v16 = vld [vmem:[%s27149_s0 + $0x7b8] ss:$2 sm:$0xff] }
 0x269   :  { %v17224_v17 = vld [vmem:[%s27149_s0 + $0x822] ss:$2 sm:$0xff] }
 0x26c   :  { %19476 = vmatmul.mubr.msk.bf16.gmra.mrb[8].mxu1 %vm345_vm1, %v2484_v38  ;;  %v16626_v38 = vld [vmem:[%s27149_s0 + $0x578] ss:$2 sm:$0xff] }
 0x26d   :  { %19479 = vmatprep.mubr.msk.bf16.mxu1 %vm345_vm1, %v2485_v46  ;;  %v17213_v46 = vld [vmem:[%s27149_s0 + $0x652] ss:$2 sm:$0xff] }
 0x26e   :  { %19850 = vmatmul.mubr.msk.bf16.gmra.mrb[52].mxu0 %vm345_vm1, %v5576_v39  ;;  %v6168_v39 = vpack.c.bf16 %v17187_v33, %v17186_v32  ;;  %v16625_v32 = vld [vmem:[%s27149_s0 + $0x4e8] ss:$2 sm:$0xff] }
 0x26f   :  { %19853 = vmatprep.mubr.msk.bf16.mxu0 %vm345_vm1, %v5577_v40  ;;  %v6169_v40 = vpack.c.bf16 %v17189_v37, %v17188_v36  ;;  %v17208_v33 = vld [vmem:[%s27149_s0 + $0x5a2] ss:$2 sm:$0xff]  ;;  %v6178_v36 = vpack.c.bf16 %v17207_v30, %v17206_v28 }
 0x270   :  { %v6179_v37 = vpack.c.bf16 %v17209_v34, %v17208_v33  ;;  %v16645_v28 = vld [vmem:[%s27149_s0 + $0x858] ss:$2 sm:$0xff] }
 0x271   :  { %v17228_v30 = vld [vmem:[%s27149_s0 + $0x8c2] ss:$2 sm:$0xff] }
 0x274   :  { %19480 = vmatmul.mubr.msk.bf16.gmra.mrb[12].mxu1 %vm345_vm1, %v2486_v50  ;;  %v16630_v50 = vld [vmem:[%s27149_s0 + $0x618] ss:$2 sm:$0xff] }
 0x275   :  { %19483 = vmatprep.mubr.msk.bf16.mxu1 %vm345_vm1, %v2487_v29  ;;  %v17217_v29 = vld [vmem:[%s27149_s0 + $0x6f2] ss:$2 sm:$0xff] }
 0x276   :  { %19854 = vmatmul.mubr.msk.bf16.gmra.mrb[56].mxu0 %vm345_vm1, %v5578_v51  ;;  %v6170_v51 = vpack.c.bf16 %v17191_v45, %v17190_v44  ;;  %v16629_v44 = vld [vmem:[%s27149_s0 + $0x5d8] ss:$2 sm:$0xff] }
 0x277   :  { %19857 = vmatprep.mubr.msk.bf16.mxu0 %vm345_vm1, %v5579_v52  ;;  %v6171_v52 = vpack.c.bf16 %v17193_v49, %v17192_v48  ;;  %v17212_v45 = vld [vmem:[%s27149_s0 + $0x642] ss:$2 sm:$0xff]  ;;  %v6180_v48 = vpack.c.bf16 %v17211_v42, %v17210_v41 }
 0x278   :  { %v6181_v49 = vpack.c.bf16 %v17213_v46, %v17212_v45  ;;  %v16649_v41 = vld [vmem:[%s27149_s0 + $0x8f8] ss:$2 sm:$0xff] }
 0x279   :  { %v17232_v42 = vld [vmem:[%s27149_s0 + $0x962] ss:$2 sm:$0xff] }
 0x27c   :  { %19484 = vmatmul.mubr.msk.bf16.gmra.mrb[16].mxu1 %vm345_vm1, %v2488_v62  ;;  %v16634_v62 = vld [vmem:[%s27149_s0 + $0x6b8] ss:$2 sm:$0xff] }
 0x27d   :  { %19487 = vmatprep.mubr.msk.bf16.mxu1 %vm345_vm1, %v2489_v0  ;;  %v17221_v0 = vld [vmem:[%s27149_s0 + $0x792] ss:$2 sm:$0xff] }
 0x27e   :  { %19858 = vmatmul.mubr.msk.bf16.gmra.mrb[60].mxu0 %vm345_vm1, %v5580_v63  ;;  %v6172_v63 = vpack.c.bf16 %v17195_v57, %v17194_v56  ;;  %v16633_v56 = vld [vmem:[%s27149_s0 + $0x678] ss:$2 sm:$0xff]  ;;  %v6185_v9 = vpack.c.bf16 %v17221_v0, %v17220_v5 }
 0x27f   :  { %19863 = vmatprep.mubr.msk.bf16.mxu0 %vm345_vm1, %v6163_v58  ;;  %v6173_v58 = vpack.c.bf16 %v17197_v61, %v17196_v60  ;;  %v17216_v57 = vld [vmem:[%s27149_s0 + $0x6e2] ss:$2 sm:$0xff]  ;;  %v6182_v60 = vpack.c.bf16 %v17215_v54, %v17214_v53 }
 0x280   :  { %v6183_v61 = vpack.c.bf16 %v17217_v29, %v17216_v57  ;;  %v16653_v53 = vld [vmem:[%s27149_s0 + $0x998] ss:$2 sm:$0xff] }
 0x281   :  { %v17236_v54 = vld [vmem:[%s27149_s0 + $0xa02] ss:$2 sm:$0xff] }
 0x284   :  { %19488 = vmatmul.mubr.msk.bf16.gmra.mrb[20].mxu1 %vm345_vm1, %v2490_v10  ;;  %v16638_v10 = vld [vmem:[%s27149_s0 + $0x758] ss:$2 sm:$0xff] }
 0x286   :  { %19864 = vmatmul.mubr.msk.bf16.vlgmr.msra.gmra.mrb[0].mxu0 %vm345_vm1, %v6164_v13  ;;  %v16618_v13 = vld [vmem:[%s27149_s0 + $0x3e8] ss:$2 sm:$0xff] }
 0x287   :  { %19928 = vmatpush3.bf16.msra.mxu0 %v6908_v15  ;;  %19867 = vmatprep.mubr.msk.bf16.mxu0 %vm345_vm1, %v6165_v14  ;;  %v16619_v14 = vld [vmem:[%s27149_s0 + $0x3f8] ss:$2 sm:$0xff] }
 0x288   :  { %22193 = vmatprep.subr.msk.bf16.mxu0 %vm442_vm0, %v24581_v18  ;;  %v16620_v15 = vld [vmem:[%s27149_s0 + $0x438] ss:$2 sm:$0xff]  ;;  %v2491_v12 = vpack.c.bf16 %v16619_v14, %v16618_v13 }
 0x289   :  { %v2492_v22 = vpack.c.bf16 %v16621_v19, %v16620_v15  ;;  %v17222_v13 = vld [vmem:[%s27149_s0 + $0x7d2] ss:$2 sm:$0xff]  ;;  %v17223_v14 = vld [vmem:[%s27149_s0 + $0x7e2] ss:$2 sm:$0xff] }
 0x28a   :  { %19491 = vmatprep.mubr.msk.bf16.mxu1 %vm345_vm1, %v2491_v12  ;;  %v17225_v12 = vld [vmem:[%s27149_s0 + $0x832] ss:$2 sm:$0xff]  ;;  %v6186_v20 = vpack.c.bf16 %v17223_v14, %v17222_v13  ;;  %v7522_v13 = vsel %vm442_vm0, %v24581_v18, 0  ;;  %v17281_v18 = vld [vmem:[%s27149_s0 + $0x193] ss:$2 sm:$0xff] }
 0x28b   :  { %v6187_v21 = vpack.c.bf16 %v17225_v12, %v17224_v17  ;;  %v25018_v14 = vld [vmem:[%s27148_s1 + $0x34] sm:$0xf]  ;;  %v17282_v17 = vld [vmem:[%s27149_s0 + $0x1a3] ss:$2 sm:$0xff] }
 0x28c   :  { %19492 = vmatmul.mubr.msk.bf16.gmra.mrb[24].mxu1 %vm345_vm1, %v2492_v22  ;;  %v16642_v22 = vld [vmem:[%s27149_s0 + $0x7f8] ss:$2 sm:$0xff] }
 0x28e   :  { %19868 = vmatmul.mubr.msk.bf16.gmra.mrb[4].mxu0 %vm345_vm1, %v6166_v26  ;;  %v16623_v26 = vld [vmem:[%s27149_s0 + $0x498] ss:$2 sm:$0xff] }
 0x28f   :  { %19871 = vmatprep.mubr.msk.bf16.mxu0 %vm345_vm1, %v6167_v27  ;;  %v16624_v27 = vld [vmem:[%s27149_s0 + $0x4d8] ss:$2 sm:$0xff]  ;;  %v2493_v31 = vpack.c.bf16 %v16623_v26, %v16622_v25 }
 0x290   :  { %v2494_v35 = vpack.c.bf16 %v16625_v32, %v16624_v27  ;;  %v17226_v25 = vld [vmem:[%s27149_s0 + $0x872] ss:$2 sm:$0xff]  ;;  %v17227_v26 = vld [vmem:[%s27149_s0 + $0x882] ss:$2 sm:$0xff] }
 0x291   :  { %19495 = vmatprep.mubr.msk.bf16.mxu1 %vm345_vm1, %v2493_v31  ;;  %v17229_v31 = vld [vmem:[%s27149_s0 + $0x8d2] ss:$2 sm:$0xff]  ;;  %v6188_v33 = vpack.c.bf16 %v17227_v26, %v17226_v25  ;;  %v17287_v26 = vld [vmem:[%s27149_s0 + $0x283] ss:$2 sm:$0xff] }
 0x292   :  { %v6189_v34 = vpack.c.bf16 %v17229_v31, %v17228_v30  ;;  %v17290_v30 = vld [vmem:[%s27149_s0 + $0x2e3] ss:$2 sm:$0xff] }
 0x294   :  { %19496 = vmatmul.mubr.msk.bf16.gmra.mrb[28].mxu1 %vm345_vm1, %v2494_v35  ;;  %v16646_v35 = vld [vmem:[%s27149_s0 + $0x898] ss:$2 sm:$0xff] }
 0x296   :  { %19872 = vmatmul.mubr.msk.bf16.gmra.mrb[8].mxu0 %vm345_vm1, %v6168_v39  ;;  %v16627_v39 = vld [vmem:[%s27149_s0 + $0x588] ss:$2 sm:$0xff] }
 0x297   :  { %19875 = vmatprep.mubr.msk.bf16.mxu0 %vm345_vm1, %v6169_v40  ;;  %v16628_v40 = vld [vmem:[%s27149_s0 + $0x5c8] ss:$2 sm:$0xff]  ;;  %v2495_v43 = vpack.c.bf16 %v16627_v39, %v16626_v38 }
 0x298   :  { %v2496_v47 = vpack.c.bf16 %v16629_v44, %v16628_v40  ;;  %v17230_v38 = vld [vmem:[%s27149_s0 + $0x912] ss:$2 sm:$0xff]  ;;  %v17231_v39 = vld [vmem:[%s27149_s0 + $0x922] ss:$2 sm:$0xff] }
 0x299   :  { %19499 = vmatprep.mubr.msk.bf16.mxu1 %vm345_vm1, %v2495_v43  ;;  %v17233_v43 = vld [vmem:[%s27149_s0 + $0x972] ss:$2 sm:$0xff]  ;;  %v6190_v45 = vpack.c.bf16 %v17231_v39, %v17230_v38  ;;  %v17295_v39 = vld [vmem:[%s27149_s0 + $0x3c3] ss:$2 sm:$0xff] }
 0x29a   :  { %v6191_v46 = vpack.c.bf16 %v17233_v43, %v17232_v42  ;;  %v17298_v42 = vld [vmem:[%s27149_s0 + $0x423] ss:$2 sm:$0xff] }
 0x29c   :  { %19500 = vmatmul.mubr.msk.bf16.gmra.mrb[32].mxu1 %vm345_vm1, %v2496_v47  ;;  %v16650_v47 = vld [vmem:[%s27149_s0 + $0x938] ss:$2 sm:$0xff] }
 0x29e   :  { %19876 = vmatmul.mubr.msk.bf16.gmra.mrb[12].mxu0 %vm345_vm1, %v6170_v51  ;;  %v16631_v51 = vld [vmem:[%s27149_s0 + $0x628] ss:$2 sm:$0xff] }
 0x29f   :  { %19879 = vmatprep.mubr.msk.bf16.mxu0 %vm345_vm1, %v6171_v52  ;;  %v16632_v52 = vld [vmem:[%s27149_s0 + $0x668] ss:$2 sm:$0xff]  ;;  %v2497_v55 = vpack.c.bf16 %v16631_v51, %v16630_v50 }
 0x2a0   :  { %v2498_v59 = vpack.c.bf16 %v16633_v56, %v16632_v52  ;;  %v17234_v50 = vld [vmem:[%s27149_s0 + $0x9b2] ss:$2 sm:$0xff]  ;;  %v17235_v51 = vld [vmem:[%s27149_s0 + $0x9c2] ss:$2 sm:$0xff] }
 0x2a1   :  { %19503 = vmatprep.mubr.msk.bf16.mxu1 %vm345_vm1, %v2497_v55  ;;  %v17237_v55 = vld [vmem:[%s27149_s0 + $0xa12] ss:$2 sm:$0xff]  ;;  %v6192_v57 = vpack.c.bf16 %v17235_v51, %v17234_v50  ;;  %v17303_v51 = vld [vmem:[%s27149_s0 + $0x503] ss:$2 sm:$0xff] }
 0x2a2   :  { %v6193_v29 = vpack.c.bf16 %v17237_v55, %v17236_v54  ;;  %v17306_v54 = vld [vmem:[%s27149_s0 + $0x5b3] ss:$2 sm:$0xff] }
 0x2a4   :  { %19504 = vmatmul.mubr.msk.bf16.gmra.mrb[36].mxu1 %vm345_vm1, %v2498_v59  ;;  %v16654_v59 = vld [vmem:[%s27149_s0 + $0x9d8] ss:$2 sm:$0xff] }
 0x2a6   :  { %19880 = vmatmul.mubr.msk.bf16.gmra.mrb[16].mxu0 %vm345_vm1, %v6172_v63  ;;  %v16635_v63 = vld [vmem:[%s27149_s0 + $0x6c8] ss:$2 sm:$0xff] }
 0x2a7   :  { %19883 = vmatprep.mubr.msk.bf16.mxu0 %vm345_vm1, %v6173_v58  ;;  %v16636_v58 = vld [vmem:[%s27149_s0 + $0x708] ss:$2 sm:$0xff]  ;;  %v2499_v3 = vpack.c.bf16 %v16635_v63, %v16634_v62 }
 0x2a8   :  { %v2500_v7 = vpack.c.bf16 %v16637_v4, %v16636_v58  ;;  %v17238_v62 = vld [vmem:[%s27149_s0 + $0xa52] ss:$2 sm:$0xff]  ;;  %v17239_v63 = vld [vmem:[%s27149_s0 + $0xa62] ss:$2 sm:$0xff] }
 0x2a9   :  { %19507 = vmatprep.mubr.msk.bf16.mxu1 %vm345_vm1, %v2499_v3  ;;  %v17274_v3 = vld [vmem:[%s27149_s0 + $0x63] ss:$2 sm:$0xff]  ;;  %v6194_v5 = vpack.c.bf16 %v17239_v63, %v17238_v62  ;;  %v17311_v63 = vld [vmem:[%s27149_s0 + $0x693] ss:$2 sm:$0xff] }
 0x2aa   :  { %v6777_v0 = vpack.c.bf16 %v17274_v3, %v17273_v2  ;;  %v17314_v2 = vld [vmem:[%s27149_s0 + $0x6f3] ss:$2 sm:$0xff] }
 0x2ac   :  { %19508 = vmatmul.mubr.msk.bf16.gmra.mrb[40].mxu1 %vm345_vm1, %v2500_v7  ;;  %v17275_v7 = vld [vmem:[%s27149_s0 + $0xa3] ss:$2 sm:$0xff] }
 0x2ae   :  { %19884 = vmatmul.mubr.msk.bf16.gmra.mrb[20].mxu0 %vm345_vm1, %v6174_v11  ;;  %v16639_v11 = vld [vmem:[%s27149_s0 + $0x768] ss:$2 sm:$0xff] }
 0x2af   :  { %19887 = vmatprep.mubr.msk.bf16.mxu0 %vm345_vm1, %v6175_v6  ;;  %v16640_v6 = vld [vmem:[%s27149_s0 + $0x7a8] ss:$2 sm:$0xff]  ;;  %v2501_v15 = vpack.c.bf16 %v16639_v11, %v16638_v10  ;;  %v17278_v10 = vld [vmem:[%s27149_s0 + $0x103] ss:$2 sm:$0xff] }
 0x2b0   :  { %v2502_v19 = vpack.c.bf16 %v16641_v16, %v16640_v6  ;;  %v17280_v16 = vld [vmem:[%s27149_s0 + $0x153] ss:$2 sm:$0xff] }
 0x2b1   :  { %19511 = vmatprep.mubr.msk.bf16.mxu1 %vm345_vm1, %v2501_v15  ;;  %v17279_v15 = vld [vmem:[%s27149_s0 + $0x143] ss:$2 sm:$0xff] }
 0x2b2   :  { %v6780_v12 = vpack.c.bf16 %v17280_v16, %v17279_v15  ;;  %v17321_v16 = vld [vmem:[%s27149_s0 + $0x823] ss:$2 sm:$0xff] }
 0x2b4   :  { %19512 = vmatmul.mubr.msk.bf16.gmra.mrb[44].mxu1 %vm345_vm1, %v2502_v19  ;;  %v6781_v19 = vpack.c.bf16 %v17282_v17, %v17281_v18  ;;  %v17322_v18 = vld [vmem:[%s27149_s0 + $0x833] ss:$2 sm:$0xff] }
 0x2b6   :  { %19888 = vmatmul.mubr.msk.bf16.gmra.mrb[24].mxu0 %vm345_vm1, %v6176_v23  ;;  %v16643_v23 = vld [vmem:[%s27149_s0 + $0x808] ss:$2 sm:$0xff] }
 0x2b7   :  { %19891 = vmatprep.mubr.msk.bf16.mxu0 %vm345_vm1, %v6177_v24  ;;  %v16644_v24 = vld [vmem:[%s27149_s0 + $0x848] ss:$2 sm:$0xff]  ;;  %v2503_v27 = vpack.c.bf16 %v16643_v23, %v16642_v22  ;;  %v17285_v22 = vld [vmem:[%s27149_s0 + $0x233] ss:$2 sm:$0xff]  ;;  %v17286_v23 = vld [vmem:[%s27149_s0 + $0x243] ss:$2 sm:$0xff] }
 0x2b8   :  { %v2504_v32 = vpack.c.bf16 %v16645_v28, %v16644_v24  ;;  %v6783_v25 = vpack.c.bf16 %v17286_v23, %v17285_v22  ;;  %v17289_v28 = vld [vmem:[%s27149_s0 + $0x2d3] ss:$2 sm:$0xff]  ;;  %v17324_v23 = vld [vmem:[%s27149_s0 + $0x883] ss:$2 sm:$0xff] }
 0x2b9   :  { %19515 = vmatprep.mubr.msk.bf16.mxu1 %vm345_vm1, %v2503_v27  ;;  %v17288_v27 = vld [vmem:[%s27149_s0 + $0x293] ss:$2 sm:$0xff] }
 0x2ba   :  { %v6784_v31 = vpack.c.bf16 %v17288_v27, %v17287_v26  ;;  %v17323_v22 = vld [vmem:[%s27149_s0 + $0x873] ss:$2 sm:$0xff] }
 0x2bb   :  { %v17326_v26 = vld [vmem:[%s27149_s0 + $0x8d3] ss:$2 sm:$0xff] }
 0x2bc   :  { %19516 = vmatmul.mubr.msk.bf16.gmra.mrb[48].mxu1 %vm345_vm1, %v2504_v32  ;;  %v6785_v32 = vpack.c.bf16 %v17290_v30, %v17289_v28  ;;  %v6802_v30 = vpack.c.bf16 %v17324_v23, %v17323_v22 }
 0x2be   :  { %19892 = vmatmul.mubr.msk.bf16.gmra.mrb[28].mxu0 %vm345_vm1, %v6178_v36  ;;  %v16647_v36 = vld [vmem:[%s27149_s0 + $0x8a8] ss:$2 sm:$0xff] }
 0x2bf   :  { %19895 = vmatprep.mubr.msk.bf16.mxu0 %vm345_vm1, %v6179_v37  ;;  %v16648_v37 = vld [vmem:[%s27149_s0 + $0x8e8] ss:$2 sm:$0xff]  ;;  %v2505_v40 = vpack.c.bf16 %v16647_v36, %v16646_v35  ;;  %v17293_v35 = vld [vmem:[%s27149_s0 + $0x373] ss:$2 sm:$0xff]  ;;  %v17294_v36 = vld [vmem:[%s27149_s0 + $0x383] ss:$2 sm:$0xff] }
 0x2c0   :  { %v2506_v44 = vpack.c.bf16 %v16649_v41, %v16648_v37  ;;  %v6787_v38 = vpack.c.bf16 %v17294_v36, %v17293_v35  ;;  %v17297_v41 = vld [vmem:[%s27149_s0 + $0x413] ss:$2 sm:$0xff]  ;;  %v17329_v36 = vld [vmem:[%s27149_s0 + $0x963] ss:$2 sm:$0xff] }
 0x2c1   :  { %19519 = vmatprep.mubr.msk.bf16.mxu1 %vm345_vm1, %v2505_v40  ;;  %v17296_v40 = vld [vmem:[%s27149_s0 + $0x3d3] ss:$2 sm:$0xff] }
 0x2c2   :  { %v6788_v43 = vpack.c.bf16 %v17296_v40, %v17295_v39 }
 0x2c4   :  { %19520 = vmatmul.mubr.msk.bf16.gmra.mrb[52].mxu1 %vm345_vm1, %v2506_v44  ;;  %v6789_v44 = vpack.c.bf16 %v17298_v42, %v17297_v41 }
 0x2c6   :  { %19896 = vmatmul.mubr.msk.bf16.gmra.mrb[32].mxu0 %vm345_vm1, %v6180_v48  ;;  %v16651_v48 = vld [vmem:[%s27149_s0 + $0x948] ss:$2 sm:$0xff] }
 0x2c7   :  { %19899 = vmatprep.mubr.msk.bf16.mxu0 %vm345_vm1, %v6181_v49  ;;  %v16652_v49 = vld [vmem:[%s27149_s0 + $0x988] ss:$2 sm:$0xff]  ;;  %v2507_v52 = vpack.c.bf16 %v16651_v48, %v16650_v47  ;;  %v17301_v47 = vld [vmem:[%s27149_s0 + $0x4b3] ss:$2 sm:$0xff]  ;;  %v17302_v48 = vld [vmem:[%s27149_s0 + $0x4c3] ss:$2 sm:$0xff] }
 0x2c8   :  { %v2508_v56 = vpack.c.bf16 %v16653_v53, %v16652_v49  ;;  %v6791_v50 = vpack.c.bf16 %v17302_v48, %v17301_v47  ;;  %v17305_v53 = vld [vmem:[%s27149_s0 + $0x5a3] ss:$2 sm:$0xff]  ;;  %v17334_v47 = vld [vmem:[%s27149_s0 + $0xa13] ss:$2 sm:$0xff] }
 0x2c9   :  { %19523 = vmatprep.mubr.msk.bf16.mxu1 %vm345_vm1, %v2507_v52  ;;  %v17304_v52 = vld [vmem:[%s27149_s0 + $0x513] ss:$2 sm:$0xff] }
 0x2ca   :  { %v6792_v55 = vpack.c.bf16 %v17304_v52, %v17303_v51 }
 0x2cc   :  { %19524 = vmatmul.mubr.msk.bf16.gmra.mrb[56].mxu1 %vm345_vm1, %v2508_v56  ;;  %v6793_v56 = vpack.c.bf16 %v17306_v54, %v17305_v53  ;;  %v17335_v53 = vld [vmem:[%s27149_s0 + $0xa53] ss:$2 sm:$0xff]  ;;  %v17336_v54 = vld [vmem:[%s27149_s0 + $0xa63] ss:$2 sm:$0xff] }
 0x2ce   :  { %19900 = vmatmul.mubr.msk.bf16.gmra.mrb[36].mxu0 %vm345_vm1, %v6182_v60  ;;  %v16655_v60 = vld [vmem:[%s27149_s0 + $0x9e8] ss:$2 sm:$0xff] }
 0x2cf   :  { %19903 = vmatprep.mubr.msk.bf16.mxu0 %vm345_vm1, %v6183_v61  ;;  %v16656_v61 = vld [vmem:[%s27149_s0 + $0xa28] ss:$2 sm:$0xff]  ;;  %v2509_v58 = vpack.c.bf16 %v16655_v60, %v16654_v59  ;;  %v17309_v59 = vld [vmem:[%s27149_s0 + $0x643] ss:$2 sm:$0xff]  ;;  %v17310_v60 = vld [vmem:[%s27149_s0 + $0x653] ss:$2 sm:$0xff] }
 0x2d0   :  { %v2510_v4 = vpack.c.bf16 %v16657_v1, %v16656_v61  ;;  %v6795_v62 = vpack.c.bf16 %v17310_v60, %v17309_v59  ;;  %v17313_v1 = vld [vmem:[%s27149_s0 + $0x6e3] ss:$2 sm:$0xff]  ;;  %v6808_v60 = vpack.c.bf16 %v17336_v54, %v17335_v53 }
 0x2d1   :  { %19527 = vmatprep.mubr.msk.bf16.mxu1 %vm345_vm1, %v2509_v58  ;;  %v17312_v58 = vld [vmem:[%s27149_s0 + $0x6a3] ss:$2 sm:$0xff] }
 0x2d2   :  { %v6796_v3 = vpack.c.bf16 %v17312_v58, %v17311_v63  ;;  %v17372_v63 = vld [vmem:[%s27149_s0 + $0xc8] ss:$2 sm:$0xff]  ;;  %v17373_v58 = vld [vmem:[%s27149_s0 + $0xd8] ss:$2 sm:$0xff] }
 0x2d4   :  { %19528 = vmatmul.mubr.msk.bf16.gmra.mrb[60].mxu1 %vm345_vm1, %v2510_v4  ;;  %v6797_v4 = vpack.c.bf16 %v17314_v2, %v17313_v1  ;;  %v17374_v2 = vld [vmem:[%s27149_s0 + $0x118] ss:$2 sm:$0xff] }
 0x2d6   :  { %19904 = vmatmul.mubr.msk.bf16.gmra.mrb[40].mxu0 %vm345_vm1, %v6184_v8  ;;  %v17276_v8 = vld [vmem:[%s27149_s0 + $0xb3] ss:$2 sm:$0xff] }
 0x2d7   :  { %19907 = vmatprep.mubr.msk.bf16.mxu0 %vm345_vm1, %v6185_v9  ;;  %v17277_v9 = vld [vmem:[%s27149_s0 + $0xf3] ss:$2 sm:$0xff]  ;;  %v6778_v11 = vpack.c.bf16 %v17276_v8, %v17275_v7  ;;  %v17317_v7 = vld [vmem:[%s27149_s0 + $0x783] ss:$2 sm:$0xff] }
 0x2d8   :  { %v6779_v6 = vpack.c.bf16 %v17278_v10, %v17277_v9  ;;  %v17318_v8 = vld [vmem:[%s27149_s0 + $0x793] ss:$2 sm:$0xff] }
 0x2d9   :  { %v6799_v10 = vpack.c.bf16 %v17318_v8, %v17317_v7  ;;  %v8136_v8 = vsel %vm442_vm0, %v25018_v14, 0 }
 0x2de   :  { %19908 = vmatmul.mubr.msk.bf16.gmra.mrb[44].mxu0 %vm345_vm1, %v6186_v20  ;;  %v17283_v20 = vld [vmem:[%s27149_s0 + $0x1e3] ss:$2 sm:$0xff] }
 0x2df   :  { %19911 = vmatprep.mubr.msk.bf16.mxu0 %vm345_vm1, %v6187_v21  ;;  %v17284_v21 = vld [vmem:[%s27149_s0 + $0x1f3] ss:$2 sm:$0xff] }
 0x2e0   :  { %v6782_v24 = vpack.c.bf16 %v17284_v21, %v17283_v20  ;;  %v6801_v20 = vpack.c.bf16 %v17322_v18, %v17321_v16  ;;  %v17378_v16 = vld [vmem:[%s27149_s0 + $0x1b8] ss:$2 sm:$0xff]  ;;  %v17379_v18 = vld [vmem:[%s27149_s0 + $0x1c8] ss:$2 sm:$0xff] }
 0x2e1   :  { %v7395_v23 = vpack.c.bf16 %v17379_v18, %v17378_v16  ;;  %v17392_v16 = vld [vmem:[%s27149_s0 + $0x3e8] ss:$2 sm:$0xff]  ;;  %v17393_v18 = vld [vmem:[%s27149_s0 + $0x3f8] ss:$2 sm:$0xff] }
 0x2e6   :  { %19912 = vmatmul.mubr.msk.bf16.gmra.mrb[48].mxu0 %vm345_vm1, %v6188_v33  ;;  %v17291_v33 = vld [vmem:[%s27149_s0 + $0x323] ss:$2 sm:$0xff] }
 0x2e7   :  { %19915 = vmatprep.mubr.msk.bf16.mxu0 %vm345_vm1, %v6189_v34  ;;  %v17292_v34 = vld [vmem:[%s27149_s0 + $0x333] ss:$2 sm:$0xff] }
 0x2e8   :  { %v6786_v37 = vpack.c.bf16 %v17292_v34, %v17291_v33  ;;  %v17327_v33 = vld [vmem:[%s27149_s0 + $0x913] ss:$2 sm:$0xff]  ;;  %v17328_v34 = vld [vmem:[%s27149_s0 + $0x923] ss:$2 sm:$0xff] }
 0x2e9   :  { %v6804_v40 = vpack.c.bf16 %v17328_v34, %v17327_v33  ;;  %v17382_v33 = vld [vmem:[%s27149_s0 + $0x258] ss:$2 sm:$0xff]  ;;  %v17383_v34 = vld [vmem:[%s27149_s0 + $0x268] ss:$2 sm:$0xff] }
 0x2ee   :  { %19916 = vmatmul.mubr.msk.bf16.gmra.mrb[52].mxu0 %vm345_vm1, %v6190_v45  ;;  %v17299_v45 = vld [vmem:[%s27149_s0 + $0x463] ss:$2 sm:$0xff] }
 0x2ef   :  { %19919 = vmatprep.mubr.msk.bf16.mxu0 %vm345_vm1, %v6191_v46  ;;  %v17300_v46 = vld [vmem:[%s27149_s0 + $0x473] ss:$2 sm:$0xff] }
 0x2f0   :  { %v6790_v49 = vpack.c.bf16 %v17300_v46, %v17299_v45  ;;  %v17333_v46 = vld [vmem:[%s27149_s0 + $0xa03] ss:$2 sm:$0xff] }
 0x2f1   :  { %v6807_v51 = vpack.c.bf16 %v17334_v47, %v17333_v46  ;;  %v17385_v46 = vld [vmem:[%s27149_s0 + $0x2b8] ss:$2 sm:$0xff] }
 0x2f6   :  { %19920 = vmatmul.mubr.msk.bf16.gmra.mrb[56].mxu0 %vm345_vm1, %v6192_v57  ;;  %v17307_v57 = vld [vmem:[%s27149_s0 + $0x5f3] ss:$2 sm:$0xff] }
 0x2f7   :  { %19923 = vmatprep.mubr.msk.bf16.mxu0 %vm345_vm1, %v6193_v29  ;;  %v17308_v29 = vld [vmem:[%s27149_s0 + $0x603] ss:$2 sm:$0xff] }
 0x2f8   :  { %v6794_v61 = vpack.c.bf16 %v17308_v29, %v17307_v57  ;;  %v17371_v57 = vld [vmem:[%s27149_s0 + $0x88] ss:$2 sm:$0xff] }
 0x2fe   :  { %19924 = vmatmul.mubr.msk.bf16.gmra.mrb[60].mxu0 %vm345_vm1, %v6194_v5  ;;  %v17315_v5 = vld [vmem:[%s27149_s0 + $0x733] ss:$2 sm:$0xff] }
 0x2ff   :  { %19929 = vmatprep.mubr.msk.bf16.mxu0 %vm345_vm1, %v6777_v0  ;;  %v17316_v0 = vld [vmem:[%s27149_s0 + $0x743] ss:$2 sm:$0xff] }
 0x300   :  { %v6798_v9 = vpack.c.bf16 %v17316_v0, %v17315_v5  ;;  %v7392_v0 = vpack.c.bf16 %v17373_v58, %v17372_v63  ;;  %v17389_v63 = vld [vmem:[%s27149_s0 + $0x358] ss:$2 sm:$0xff] }
 0x306   :  { %19930 = vmatmul.mubr.msk.bf16.vlgmr.msra.gmra.mrb[0].mxu0 %vm345_vm1, %v6778_v11 }
 0x307   :  { %19994 = vmatpush3.bf16.msra.mxu0 %v7522_v13  ;;  %19933 = vmatprep.mubr.msk.bf16.mxu0 %vm345_vm1, %v6779_v6  ;;  %v17319_v6 = vld [vmem:[%s27149_s0 + $0x7d3] ss:$2 sm:$0xff]  ;;  %v17320_v13 = vld [vmem:[%s27149_s0 + $0x7e3] ss:$2 sm:$0xff] }
 0x308   :  { %22194 = vmatprep.subr.msk.bf16.mxu0 %vm442_vm0, %v25018_v14  ;;  %v17377_v14 = vld [vmem:[%s27149_s0 + $0x178] ss:$2 sm:$0xff] }
 0x30e   :  { %19934 = vmatmul.mubr.msk.bf16.gmra.mrb[4].mxu0 %vm345_vm1, %v6780_v12 }
 0x30f   :  { %19937 = vmatprep.mubr.msk.bf16.mxu0 %vm345_vm1, %v6781_v19  ;;  %v6800_v19 = vpack.c.bf16 %v17320_v13, %v17319_v6  ;;  %v17376_v6 = vld [vmem:[%s27149_s0 + $0x168] ss:$2 sm:$0xff] }
 0x310   :  { %v7394_v22 = vpack.c.bf16 %v17377_v14, %v17376_v6 }
 0x316   :  { %19938 = vmatmul.mubr.msk.bf16.gmra.mrb[8].mxu0 %vm345_vm1, %v6782_v24 }
 0x317   :  { %19941 = vmatprep.mubr.msk.bf16.mxu0 %vm345_vm1, %v6783_v25  ;;  %v17325_v25 = vld [vmem:[%s27149_s0 + $0x8c3] ss:$2 sm:$0xff] }
 0x31e   :  { %19942 = vmatmul.mubr.msk.bf16.gmra.mrb[12].mxu0 %vm345_vm1, %v6784_v31  ;;  %v6803_v31 = vpack.c.bf16 %v17326_v26, %v17325_v25  ;;  %v17380_v26 = vld [vmem:[%s27149_s0 + $0x208] ss:$2 sm:$0xff] }
 0x31f   :  { %19945 = vmatprep.mubr.msk.bf16.mxu0 %vm345_vm1, %v6785_v32 }
 0x326   :  { %19946 = vmatmul.mubr.msk.bf16.gmra.mrb[16].mxu0 %vm345_vm1, %v6786_v37  ;;  %v17330_v37 = vld [vmem:[%s27149_s0 + $0x973] ss:$2 sm:$0xff] }
 0x327   :  { %19949 = vmatprep.mubr.msk.bf16.mxu0 %vm345_vm1, %v6787_v38  ;;  %v6805_v41 = vpack.c.bf16 %v17330_v37, %v17329_v36 }
 0x32e   :  { %19950 = vmatmul.mubr.msk.bf16.gmra.mrb[20].mxu0 %vm345_vm1, %v6788_v43  ;;  %v17331_v43 = vld [vmem:[%s27149_s0 + $0x9b3] ss:$2 sm:$0xff] }
 0x32f   :  { %19953 = vmatprep.mubr.msk.bf16.mxu0 %vm345_vm1, %v6789_v44  ;;  %v25162_v11 = vpop.f32.mrb[0].mxu1  ;;  %v17332_v44 = vld [vmem:[%s27149_s0 + $0x9c3] ss:$2 sm:$0xff] }
 0x330   :  { %v25171_v15 = vpop.f32.mrb[1].mxu1 }
 0x331   :  { %v25179_v17 = vpop.f32.mrb[2].mxu1 }
 0x332   :  { %v25181_v12 = vpop.f32.mrb[3].mxu1 }
 0x336   :  { %19954 = vmatmul.mubr.msk.bf16.gmra.mrb[24].mxu0 %vm345_vm1, %v6790_v49 }
 0x337   :  { %19957 = vmatprep.mubr.msk.bf16.mxu0 %vm345_vm1, %v6791_v50  ;;  %v25184_v21 = vpop.f32.mrb[4].mxu1  ;;  %v6806_v50 = vpack.c.bf16 %v17332_v44, %v17331_v43  ;;  %v17384_v44 = vld [vmem:[%s27149_s0 + $0x2a8] ss:$2 sm:$0xff] }
 0x338   :  { %v25193_v24 = vpop.f32.mrb[5].mxu1 }
 0x339   :  { %v25201_v27 = vpop.f32.mrb[6].mxu1 }
 0x33a   :  { %v25203_v28 = vpop.f32.mrb[7].mxu1 }
 0x33e   :  { %19958 = vmatmul.mubr.msk.bf16.gmra.mrb[28].mxu0 %vm345_vm1, %v6792_v55 }
 0x33f   :  { %19961 = vmatprep.mubr.msk.bf16.mxu0 %vm345_vm1, %v6793_v56  ;;  %v25206_v32 = vpop.f32.mrb[8].mxu1  ;;  %v17370_v56 = vld [vmem:[%s27149_s0 + $0x78] ss:$2 sm:$0xff] }
 0x340   :  { %v25215_v35 = vpop.f32.mrb[9].mxu1 }
 0x341   :  { %v25223_v38 = vpop.f32.mrb[10].mxu1 }
 0x342   :  { %v25225_v39 = vpop.f32.mrb[11].mxu1 }
 0x346   :  { %19962 = vmatmul.mubr.msk.bf16.gmra.mrb[32].mxu0 %vm345_vm1, %v6794_v61  ;;  %v7391_v61 = vpack.c.bf16 %v17371_v57, %v17370_v56  ;;  %v7398_v56 = vpack.c.bf16 %v17385_v46, %v17384_v44  ;;  %v17396_v44 = vld [vmem:[%s27149_s0 + $0x488] ss:$2 sm:$0xff]  ;;  %v17397_v46 = vld [vmem:[%s27149_s0 + $0x498] ss:$2 sm:$0xff] }
 0x347   :  { %19965 = vmatprep.mubr.msk.bf16.mxu0 %vm345_vm1, %v6795_v62  ;;  %v25228_v42 = vpop.f32.mrb[12].mxu1 }
 0x348   :  { %v25237_v45 = vpop.f32.mrb[13].mxu1 }
 0x349   :  { %v25245_v48 = vpop.f32.mrb[14].mxu1 }
 0x34a   :  { %v25247_v49 = vpop.f32.mrb[15].mxu1 }
 0x34e   :  { %19966 = vmatmul.mubr.msk.bf16.gmra.mrb[36].mxu0 %vm345_vm1, %v6796_v3  ;;  %v17375_v3 = vld [vmem:[%s27149_s0 + $0x128] ss:$2 sm:$0xff] }
 0x34f   :  { %19969 = vmatprep.mubr.msk.bf16.mxu0 %vm345_vm1, %v6797_v4  ;;  %v25250_v52 = vpop.f32.mrb[16].mxu1  ;;  %v7393_v7 = vpack.c.bf16 %v17375_v3, %v17374_v2  ;;  %v17390_v2 = vld [vmem:[%s27149_s0 + $0x398] ss:$2 sm:$0xff]  ;;  %v17391_v3 = vld [vmem:[%s27149_s0 + $0x3a8] ss:$2 sm:$0xff] }
 0x350   :  { %v25259_v55 = vpop.f32.mrb[17].mxu1  ;;  %v7401_v6 = vpack.c.bf16 %v17391_v3, %v17390_v2 }
 0x351   :  { %v25267_v29 = vpop.f32.mrb[18].mxu1 }
 0x352   :  { %v25269_v59 = vpop.f32.mrb[19].mxu1 }
 0x356   :  { %19970 = vmatmul.mubr.msk.bf16.gmra.mrb[40].mxu0 %vm345_vm1, %v6798_v9  ;;  %v25299_v9 = vld [vmem:[%s27148_s1 + $0x38] sm:$0xf] }
 0x357   :  { %19973 = vmatprep.mubr.msk.bf16.mxu0 %vm345_vm1, %v6799_v10  ;;  %v25272_v62 = vpop.f32.mrb[20].mxu1 }
 0x358   :  { %v25281_v1 = vpop.f32.mrb[21].mxu1 }
 0x359   :  { %v25289_v4 = vpop.f32.mrb[22].mxu1 }
 0x35a   :  { %v25291_v5 = vpop.f32.mrb[23].mxu1 }
 0x35e   :  { %19974 = vmatmul.mubr.msk.bf16.gmra.mrb[44].mxu0 %vm345_vm1, %v6800_v19 }
 0x35f   :  { %19977 = vmatprep.mubr.msk.bf16.mxu0 %vm345_vm1, %v6801_v20  ;;  %v25301_v10 = vpop.f32.mrb[24].mxu1 }
 0x360   :  { %v25310_v13 = vpop.f32.mrb[25].mxu1 }
 0x361   :  { %v25320_v19 = vpop.f32.mrb[26].mxu1 }
 0x362   :  { %v25322_v20 = vpop.f32.mrb[27].mxu1 }
 0x366   :  { %19978 = vmatmul.mubr.msk.bf16.gmra.mrb[48].mxu0 %vm345_vm1, %v6802_v30  ;;  %v17381_v30 = vld [vmem:[%s27149_s0 + $0x218] ss:$2 sm:$0xff] }
 0x367   :  { %19981 = vmatprep.mubr.msk.bf16.mxu0 %vm345_vm1, %v6803_v31  ;;  %v25325_v25 = vpop.f32.mrb[28].mxu1 }
 0x368   :  { %v25334_v31 = vpop.f32.mrb[29].mxu1 }
 0x369   :  { %v25342_v36 = vpop.f32.mrb[30].mxu1 }
 0x36a   :  { %v25344_v37 = vpop.f32.mrb[31].mxu1 }
 0x36e   :  { %19982 = vmatmul.mubr.msk.bf16.gmra.mrb[52].mxu0 %vm345_vm1, %v6804_v40  ;;  %v7396_v40 = vpack.c.bf16 %v17381_v30, %v17380_v26  ;;  %v17395_v26 = vld [vmem:[%s27149_s0 + $0x448] ss:$2 sm:$0xff] }
 0x36f   :  { %19985 = vmatprep.mubr.msk.bf16.mxu0 %vm345_vm1, %v6805_v41  ;;  %v7397_v41 = vpack.c.bf16 %v17383_v34, %v17382_v33  ;;  %v25347_v43 = vpop.f32.mrb[32].mxu1  ;;  %v7402_v34 = vpack.c.bf16 %v17393_v18, %v17392_v16  ;;  %v17402_v18 = vld [vmem:[%s27149_s0 + $0x5c8] ss:$2 sm:$0xff] }
 0x370   :  { %v25356_v47 = vpop.f32.mrb[33].mxu1 }
 0x371   :  { %v25364_v53 = vpop.f32.mrb[34].mxu1 }
 0x372   :  { %v25366_v54 = vpop.f32.mrb[35].mxu1 }
 0x376   :  { %19986 = vmatmul.mubr.msk.bf16.gmra.mrb[56].mxu0 %vm345_vm1, %v6806_v50  ;;  %v17386_v50 = vld [vmem:[%s27149_s0 + $0x2f8] ss:$2 sm:$0xff] }
 0x377   :  { %19989 = vmatprep.mubr.msk.bf16.mxu0 %vm345_vm1, %v6807_v51  ;;  %v17387_v51 = vld [vmem:[%s27149_s0 + $0x308] ss:$2 sm:$0xff] }
 0x378   :  { %v7399_v57 = vpack.c.bf16 %v17387_v51, %v17386_v50  ;;  %v17398_v51 = vld [vmem:[%s27149_s0 + $0x4d8] ss:$2 sm:$0xff] }
 0x37e   :  { %19990 = vmatmul.mubr.msk.bf16.gmra.mrb[60].mxu0 %vm345_vm1, %v6808_v60  ;;  %v25369_v60 = vpop.f32.mrb[36].mxu1 }
 0x37f   :  { %19995 = vmatprep.mubr.msk.bf16.mxu0 %vm345_vm1, %v7391_v61  ;;  %v17388_v61 = vld [vmem:[%s27149_s0 + $0x348] ss:$2 sm:$0xff]  ;;  %v25378_v58 = vpop.f32.mrb[37].mxu1 }
 0x386   :  { %19996 = vmatmul.mubr.msk.bf16.vlgmr.msra.gmra.mrb[0].mxu0 %vm345_vm1, %v7392_v0  ;;  %v25386_v0 = vpop.f32.mrb[38].mxu1 }
 0x387   :  { %20060 = vmatpush3.bf16.msra.mxu0 %v8136_v8  ;;  %19999 = vmatprep.mubr.msk.bf16.mxu0 %vm345_vm1, %v7393_v7  ;;  %v25388_v7 = vpop.f32.mrb[39].mxu1  ;;  %v7400_v8 = vpack.c.bf16 %v17389_v63, %v17388_v61  ;;  %v7404_v63 = vpack.c.bf16 %v17397_v46, %v17396_v44 }
 0x388   :  { %22195 = vmatprep.subr.msk.bf16.mxu0 %vm442_vm0, %v25299_v9  ;;  %v25391_v14 = vpop.f32.mrb[40].mxu1 }
 0x38e   :  { %20000 = vmatmul.mubr.msk.bf16.gmra.mrb[4].mxu0 %vm345_vm1, %v7394_v22  ;;  %v25400_v22 = vpop.f32.mrb[41].mxu1 }
 0x38f   :  { %20003 = vmatprep.mubr.msk.bf16.mxu0 %vm345_vm1, %v7395_v23  ;;  %v17394_v23 = vld [vmem:[%s27149_s0 + $0x438] ss:$2 sm:$0xff]  ;;  %v25408_v30 = vpop.f32.mrb[42].mxu1 }
 0x390   :  { %v25410_v33 = vpop.f32.mrb[43].mxu1 }
 0x396   :  { %20004 = vmatmul.mubr.msk.bf16.gmra.mrb[8].mxu0 %vm345_vm1, %v7396_v40  ;;  %v7403_v40 = vpack.c.bf16 %v17395_v26, %v17394_v23  ;;  %v17403_v23 = vld [vmem:[%s27149_s0 + $0x5d8] ss:$2 sm:$0xff] }
 0x397   :  { %20007 = vmatprep.mubr.msk.bf16.mxu0 %vm345_vm1, %v7397_v41  ;;  %v25413_v41 = vpop.f32.mrb[44].mxu1  ;;  %v7407_v44 = vpack.c.bf16 %v17403_v23, %v17402_v18 }
 0x398   :  { %v25422_v50 = vpop.f32.mrb[45].mxu1 }
 0x39e   :  { %20008 = vmatmul.mubr.msk.bf16.gmra.mrb[12].mxu0 %vm345_vm1, %v7398_v56  ;;  %v17399_v56 = vld [vmem:[%s27149_s0 + $0x4e8] ss:$2 sm:$0xff] }
 0x39f   :  { %20011 = vmatprep.mubr.msk.bf16.mxu0 %vm345_vm1, %v7399_v57  ;;  %v25430_v57 = vpop.f32.mrb[46].mxu1  ;;  %v7405_v2 = vpack.c.bf16 %v17399_v56, %v17398_v51  ;;  %v17404_v51 = vld [vmem:[%s27149_s0 + $0x618] ss:$2 sm:$0xff]  ;;  %v17405_v56 = vld [vmem:[%s27149_s0 + $0x628] ss:$2 sm:$0xff] }
 0x3a0   :  { %v25432_v61 = vpop.f32.mrb[47].mxu1  ;;  %v7408_v23 = vpack.c.bf16 %v17405_v56, %v17404_v51  ;;  %v17410_v51 = vld [vmem:[%s27149_s0 + $0x708] ss:$2 sm:$0xff]  ;;  %v17411_v56 = vld [vmem:[%s27149_s0 + $0x718] ss:$2 sm:$0xff] }
 0x3a1   :  { %v25435_v3 = vpop.f32.mrb[48].mxu1 }
 0x3a2   :  { %27155 = vst [vmem:[#allocation4_spill] sm:$0xff] %v25435_v3  ;;  %v25444_v16 = vpop.f32.mrb[49].mxu1 }
 0x3a3   :  { %27156 = vst [vmem:[#allocation5_spill] sm:$0xff] %v25444_v16  ;;  %v25452_v26 = vpop.f32.mrb[50].mxu1 }
 0x3a4   :  { %27157 = vst [vmem:[#allocation6_spill] sm:$0xff] %v25452_v26 }
 0x3a6   :  { %20012 = vmatmul.mubr.msk.bf16.gmra.mrb[16].mxu0 %vm345_vm1, %v7400_v8  ;;  %v17400_v8 = vld [vmem:[%s27149_s0 + $0x528] ss:$2 sm:$0xff] }
 0x3a7   :  { %20015 = vmatprep.mubr.msk.bf16.mxu0 %vm345_vm1, %v7401_v6  ;;  %v17401_v6 = vld [vmem:[%s27149_s0 + $0x538] ss:$2 sm:$0xff] }
 0x3ae   :  { %20016 = vmatmul.mubr.msk.bf16.gmra.mrb[20].mxu0 %vm345_vm1, %v7402_v34  ;;  %v25454_v34 = vpop.f32.mrb[51].mxu1 }
 0x3af   :  { %20019 = vmatprep.mubr.msk.bf16.mxu0 %vm345_vm1, %v7403_v40  ;;  %27158 = vst [vmem:[#allocation7_spill] sm:$0xff] %v25454_v34  ;;  %v7406_v40 = vpack.c.bf16 %v17401_v6, %v17400_v8  ;;  %v25457_v46 = vpop.f32.mrb[52].mxu1  ;;  %v17407_v8 = vld [vmem:[%s27149_s0 + $0x678] ss:$2 sm:$0xff] }
 0x3b0   :  { %27159 = vst [vmem:[#allocation8_spill] sm:$0xff] %v25457_v46  ;;  %v17409_v46 = vld [vmem:[%s27149_s0 + $0x6c8] ss:$2 sm:$0xff] }
 0x3b6   :  { %20020 = vmatmul.mubr.msk.bf16.gmra.mrb[24].mxu0 %vm345_vm1, %v7404_v63  ;;  %v25466_v63 = vpop.f32.mrb[53].mxu1 }
 0x3b7   :  { %20023 = vmatprep.mubr.msk.bf16.mxu0 %vm345_vm1, %v7405_v2  ;;  %27160 = vst [vmem:[#allocation9_spill] sm:$0xff] %v25466_v63  ;;  %v17406_v2 = vld [vmem:[%s27149_s0 + $0x668] ss:$2 sm:$0xff]  ;;  %v25474_v6 = vpop.f32.mrb[54].mxu1  ;;  %v17408_v63 = vld [vmem:[%s27149_s0 + $0x6b8] ss:$2 sm:$0xff] }
 0x3b8   :  { %27161 = vst [vmem:[#allocation10_spill] sm:$0xff] %v25474_v6  ;;  %v25476_v18 = vpop.f32.mrb[55].mxu1 }
 0x3b9   :  { %27162 = vst [vmem:[#allocation11_spill] sm:$0xff] %v25476_v18  ;;  %v17413_v18 = vld [vmem:[%s27149_s0 + $0x768] ss:$2 sm:$0xff] }
 0x3be   :  { %20024 = vmatmul.mubr.msk.bf16.gmra.mrb[28].mxu0 %vm345_vm1, %v7406_v40  ;;  %v7409_v40 = vpack.c.bf16 %v17407_v8, %v17406_v2 }
 0x3bf   :  { %20027 = vmatprep.mubr.msk.bf16.mxu0 %vm345_vm1, %v7407_v44  ;;  %v25479_v44 = vpop.f32.mrb[56].mxu1 }
 0x3c0   :  { %27163 = vst [vmem:[#allocation12_spill] sm:$0xff] %v25479_v44  ;;  %v25488_v34 = vpop.f32.mrb[57].mxu1 }
 0x3c1   :  { %27164 = vst [vmem:[#allocation13_spill] sm:$0xff] %v25488_v34  ;;  %v25496_v2 = vpop.f32.mrb[58].mxu1  ;;  %v17412_v34 = vld [vmem:[%s27149_s0 + $0x758] ss:$2 sm:$0xff] }
 0x3c2   :  { %27165 = vst [vmem:[#allocation14_spill] sm:$0xff] %v25496_v2  ;;  %v25498_v8 = vpop.f32.mrb[59].mxu1 }
 0x3c3   :  { %27166 = vst [vmem:[#allocation15_spill] sm:$0xff] %v25498_v8  ;;  %v25501_v44 = vpop.f32.mrb[60].mxu1 }
 0x3c4   :  { %27167 = vst [vmem:[#allocation16_spill] sm:$0xff] %v25501_v44  ;;  %v25510_v6 = vpop.f32.mrb[61].mxu1  ;;  %v17417_v44 = vld [vmem:[%s27149_s0 + $0x808] ss:$2 sm:$0xff] }
 0x3c5   :  { %27168 = vst [vmem:[#allocation17_spill] sm:$0xff] %v25510_v6  ;;  %v17416_v6 = vld [vmem:[%s27149_s0 + $0x7f8] ss:$2 sm:$0xff] }
 0x3c6   :  { %20028 = vmatmul.mubr.msk.bf16.gmra.mrb[32].mxu0 %vm345_vm1, %v7408_v23  ;;  %v7410_v23 = vpack.c.bf16 %v17409_v46, %v17408_v63  ;;  %v17414_v46 = vld [vmem:[%s27149_s0 + $0x7a8] ss:$2 sm:$0xff]  ;;  %v17415_v63 = vld [vmem:[%s27149_s0 + $0x7b8] ss:$2 sm:$0xff] }
 0x3c7   :  { %20031 = vmatprep.mubr.msk.bf16.mxu0 %vm345_vm1, %v7409_v40  ;;  %v7411_v40 = vpack.c.bf16 %v17411_v56, %v17410_v51  ;;  %v25518_v51 = vpop.f32.mrb[62].mxu1 }
 0x3c8   :  { %27169 = vst [vmem:[#allocation18_spill] sm:$0xff] %v25518_v51  ;;  %v25520_v56 = vpop.f32.mrb[63].mxu1  ;;  %v17418_v51 = vld [vmem:[%s27149_s0 + $0x848] ss:$2 sm:$0xff] }
 0x3c9   :  { %27170 = vst [vmem:[#allocation19_spill] sm:$0xff] %v25520_v56  ;;  %v17669_v56 = vld [vmem:[%s27149_s0 + $0x1bb] ss:$2 sm:$0xff] }
 0x3ce   :  { %20032 = vmatmul.mubr.msk.bf16.gmra.mrb[36].mxu0 %vm345_vm1, %v7410_v23  ;;  %v7412_v23 = vpack.c.bf16 %v17413_v18, %v17412_v34  ;;  %v17419_v34 = vld [vmem:[%s27149_s0 + $0x858] ss:$2 sm:$0xff]  ;;  %v7414_v18 = vpack.c.bf16 %v17417_v44, %v17416_v6 }
 0x3cf   :  { %20035 = vmatprep.mubr.msk.bf16.mxu0 %vm345_vm1, %v7411_v40  ;;  %v7413_v40 = vpack.c.bf16 %v17415_v63, %v17414_v46  ;;  %v7415_v46 = vpack.c.bf16 %v17419_v34, %v17418_v51  ;;  %v17420_v63 = vld [vmem:[%s27149_s0 + $0x898] ss:$2 sm:$0xff] }
 0x3d0   :  { %v17423_v6 = vld [vmem:[%s27149_s0 + $0x8f8] ss:$2 sm:$0xff] }
 0x3d1   :  { %v17424_v34 = vld [vmem:[%s27149_s0 + $0x938] ss:$2 sm:$0xff] }
 0x3d6   :  { %20036 = vmatmul.mubr.msk.bf16.gmra.mrb[40].mxu0 %vm345_vm1, %v7412_v23  ;;  %v17421_v23 = vld [vmem:[%s27149_s0 + $0x8a8] ss:$2 sm:$0xff] }
 0x3d7   :  { %20039 = vmatprep.mubr.msk.bf16.mxu0 %vm345_vm1, %v7413_v40  ;;  %v17422_v40 = vld [vmem:[%s27149_s0 + $0x8e8] ss:$2 sm:$0xff]  ;;  %v7416_v44 = vpack.c.bf16 %v17421_v23, %v17420_v63  ;;  %v17427_v63 = vld [vmem:[%s27149_s0 + $0x998] ss:$2 sm:$0xff] }
 0x3d8   :  { %v7417_v51 = vpack.c.bf16 %v17423_v6, %v17422_v40  ;;  %v17428_v6 = vld [vmem:[%s27149_s0 + $0x9d8] ss:$2 sm:$0xff] }
 0x3de   :  { %20040 = vmatmul.mubr.msk.bf16.gmra.mrb[44].mxu0 %vm345_vm1, %v7414_v18  ;;  %v17425_v18 = vld [vmem:[%s27149_s0 + $0x948] ss:$2 sm:$0xff] }
 0x3df   :  { %20043 = vmatprep.mubr.msk.bf16.mxu0 %vm345_vm1, %v7415_v46  ;;  %v17426_v46 = vld [vmem:[%s27149_s0 + $0x988] ss:$2 sm:$0xff]  ;;  %v7418_v23 = vpack.c.bf16 %v17425_v18, %v17424_v34  ;;  %v17431_v34 = vld [vmem:[%s27149_s0 + $0xa38] ss:$2 sm:$0xff] }
 0x3e0   :  { %v7419_v40 = vpack.c.bf16 %v17427_v63, %v17426_v46  ;;  %v17432_v63 = vld [vmem:[%s27149_s0 + $0xa78] ss:$2 sm:$0xff] }
 0x3e6   :  { %20044 = vmatmul.mubr.msk.bf16.gmra.mrb[48].mxu0 %vm345_vm1, %v7416_v44  ;;  %v17429_v44 = vld [vmem:[%s27149_s0 + $0x9e8] ss:$2 sm:$0xff] }
 0x3e7   :  { %20047 = vmatprep.mubr.msk.bf16.mxu0 %vm345_vm1, %v7417_v51  ;;  %v17430_v51 = vld [vmem:[%s27149_s0 + $0xa28] ss:$2 sm:$0xff]  ;;  %v7420_v18 = vpack.c.bf16 %v17429_v44, %v17428_v6  ;;  %v17468_v6 = vld [vmem:[%s27149_s0 + $0x89] ss:$2 sm:$0xff] }
 0x3e8   :  { %v7421_v46 = vpack.c.bf16 %v17431_v34, %v17430_v51  ;;  %v17469_v34 = vld [vmem:[%s27149_s0 + $0xc9] ss:$2 sm:$0xff] }
 0x3ee   :  { %20048 = vmatmul.mubr.msk.bf16.gmra.mrb[52].mxu0 %vm345_vm1, %v7418_v23  ;;  %v17433_v23 = vld [vmem:[%s27149_s0 + $0xa88] ss:$2 sm:$0xff] }
 0x3ef   :  { %20051 = vmatprep.mubr.msk.bf16.mxu0 %vm345_vm1, %v7419_v40  ;;  %v17467_v40 = vld [vmem:[%s27149_s0 + $0x79] ss:$2 sm:$0xff]  ;;  %v7422_v44 = vpack.c.bf16 %v17433_v23, %v17432_v63  ;;  %v17472_v63 = vld [vmem:[%s27149_s0 + $0x129] ss:$2 sm:$0xff] }
 0x3f0   :  { %v8005_v51 = vpack.c.bf16 %v17468_v6, %v17467_v40  ;;  %v8750_v6 = vsel %vm442_vm0, %v25299_v9, 0  ;;  %v17475_v9 = vld [vmem:[%s27149_s0 + $0x1b9] ss:$2 sm:$0xff] }
 0x3f6   :  { %20052 = vmatmul.mubr.msk.bf16.gmra.mrb[56].mxu0 %vm345_vm1, %v7420_v18  ;;  %v17470_v18 = vld [vmem:[%s27149_s0 + $0xd9] ss:$2 sm:$0xff] }
 0x3f7   :  { %20055 = vmatprep.mubr.msk.bf16.mxu0 %vm345_vm1, %v7421_v46  ;;  %v17471_v46 = vld [vmem:[%s27149_s0 + $0x119] ss:$2 sm:$0xff]  ;;  %v8006_v23 = vpack.c.bf16 %v17470_v18, %v17469_v34  ;;  %v17476_v18 = vld [vmem:[%s27149_s0 + $0x1c9] ss:$2 sm:$0xff] }
 0x3f8   :  { %v8007_v40 = vpack.c.bf16 %v17472_v63, %v17471_v46  ;;  %v17474_v34 = vld [vmem:[%s27149_s0 + $0x179] ss:$2 sm:$0xff]  ;;  %v8009_v63 = vpack.c.bf16 %v17476_v18, %v17475_v9  ;;  %v17481_v18 = vld [vmem:[%s27149_s0 + $0x2a9] ss:$2 sm:$0xff] }
 0x3fe   :  { %20056 = vmatmul.mubr.msk.bf16.gmra.mrb[60].mxu0 %vm345_vm1, %v7422_v44  ;;  %v25612_v44 = vld [vmem:[%s27148_s1 + $0x3c] sm:$0xf] }
 0x3ff   :  { %20061 = vmatprep.mubr.msk.bf16.mxu0 %vm345_vm1, %v8005_v51  ;;  %v17473_v51 = vld [vmem:[%s27149_s0 + $0x169] ss:$2 sm:$0xff] }
 0x400   :  { %v8008_v46 = vpack.c.bf16 %v17474_v34, %v17473_v51  ;;  %v17480_v51 = vld [vmem:[%s27149_s0 + $0x269] ss:$2 sm:$0xff] }
 0x406   :  { %20062 = vmatmul.mubr.msk.bf16.vlgmr.msra.gmra.mrb[0].mxu0 %vm345_vm1, %v8006_v23  ;;  %v17477_v23 = vld [vmem:[%s27149_s0 + $0x209] ss:$2 sm:$0xff] }
 0x407   :  { %20126 = vmatpush3.bf16.msra.mxu0 %v8750_v6  ;;  %20065 = vmatprep.mubr.msk.bf16.mxu0 %vm345_vm1, %v8007_v40  ;;  %v17478_v40 = vld [vmem:[%s27149_s0 + $0x219] ss:$2 sm:$0xff] }
 0x408   :  { %22196 = vmatprep.subr.msk.bf16.mxu0 %vm442_vm0, %v25612_v44  ;;  %v17479_v6 = vld [vmem:[%s27149_s0 + $0x259] ss:$2 sm:$0xff]  ;;  %v8010_v34 = vpack.c.bf16 %v17478_v40, %v17477_v23  ;;  %v17484_v23 = vld [vmem:[%s27149_s0 + $0x309] ss:$2 sm:$0xff] }
 0x409   :  { %v8011_v9 = vpack.c.bf16 %v17480_v51, %v17479_v6  ;;  %v17485_v51 = vld [vmem:[%s27149_s0 + $0x349] ss:$2 sm:$0xff] }
 0x40e   :  { %20066 = vmatmul.mubr.msk.bf16.gmra.mrb[4].mxu0 %vm345_vm1, %v8008_v46  ;;  %v17482_v46 = vld [vmem:[%s27149_s0 + $0x2b9] ss:$2 sm:$0xff] }
 0x40f   :  { %20069 = vmatprep.mubr.msk.bf16.mxu0 %vm345_vm1, %v8009_v63  ;;  %v17483_v63 = vld [vmem:[%s27149_s0 + $0x2f9] ss:$2 sm:$0xff]  ;;  %v8012_v40 = vpack.c.bf16 %v17482_v46, %v17481_v18  ;;  %v17488_v18 = vld [vmem:[%s27149_s0 + $0x3a9] ss:$2 sm:$0xff] }
 0x410   :  { %v8013_v6 = vpack.c.bf16 %v17484_v23, %v17483_v63  ;;  %v17489_v23 = vld [vmem:[%s27149_s0 + $0x3e9] ss:$2 sm:$0xff] }
 0x416   :  { %20070 = vmatmul.mubr.msk.bf16.gmra.mrb[8].mxu0 %vm345_vm1, %v8010_v34  ;;  %v17486_v34 = vld [vmem:[%s27149_s0 + $0x359] ss:$2 sm:$0xff] }
 0x417   :  { %20073 = vmatprep.mubr.msk.bf16.mxu0 %vm345_vm1, %v8011_v9  ;;  %v17487_v9 = vld [vmem:[%s27149_s0 + $0x399] ss:$2 sm:$0xff]  ;;  %v8014_v46 = vpack.c.bf16 %v17486_v34, %v17485_v51  ;;  %v17492_v51 = vld [vmem:[%s27149_s0 + $0x449] ss:$2 sm:$0xff] }
 0x418   :  { %v8015_v63 = vpack.c.bf16 %v17488_v18, %v17487_v9  ;;  %v17493_v18 = vld [vmem:[%s27149_s0 + $0x489] ss:$2 sm:$0xff] }
 0x41e   :  { %20074 = vmatmul.mubr.msk.bf16.gmra.mrb[12].mxu0 %vm345_vm1, %v8012_v40  ;;  %v17490_v40 = vld [vmem:[%s27149_s0 + $0x3f9] ss:$2 sm:$0xff] }
 0x41f   :  { %20077 = vmatprep.mubr.msk.bf16.mxu0 %vm345_vm1, %v8013_v6  ;;  %v17491_v6 = vld [vmem:[%s27149_s0 + $0x439] ss:$2 sm:$0xff]  ;;  %v8016_v34 = vpack.c.bf16 %v17490_v40, %v17489_v23  ;;  %v17496_v23 = vld [vmem:[%s27149_s0 + $0x4e9] ss:$2 sm:$0xff] }
 0x420   :  { %v8017_v9 = vpack.c.bf16 %v17492_v51, %v17491_v6  ;;  %v17497_v51 = vld [vmem:[%s27149_s0 + $0x529] ss:$2 sm:$0xff] }
 0x426   :  { %20078 = vmatmul.mubr.msk.bf16.gmra.mrb[16].mxu0 %vm345_vm1, %v8014_v46  ;;  %v17494_v46 = vld [vmem:[%s27149_s0 + $0x499] ss:$2 sm:$0xff] }
 0x427   :  { %20081 = vmatprep.mubr.msk.bf16.mxu0 %vm345_vm1, %v8015_v63  ;;  %v17495_v63 = vld [vmem:[%s27149_s0 + $0x4d9] ss:$2 sm:$0xff]  ;;  %v8018_v40 = vpack.c.bf16 %v17494_v46, %v17493_v18 }
 0x428   :  { %v8019_v6 = vpack.c.bf16 %v17496_v23, %v17495_v63  ;;  %v17500_v18 = vld [vmem:[%s27149_s0 + $0x5d9] ss:$2 sm:$0xff] }
 0x429   :  { %v17501_v23 = vld [vmem:[%s27149_s0 + $0x619] ss:$2 sm:$0xff] }
 0x42e   :  { %20082 = vmatmul.mubr.msk.bf16.gmra.mrb[20].mxu0 %vm345_vm1, %v8016_v34  ;;  %v17498_v34 = vld [vmem:[%s27149_s0 + $0x539] ss:$2 sm:$0xff] }
 0x42f   :  { %20085 = vmatprep.mubr.msk.bf16.mxu0 %vm345_vm1, %v8017_v9  ;;  %v17499_v9 = vld [vmem:[%s27149_s0 + $0x5c9] ss:$2 sm:$0xff]  ;;  %v8020_v46 = vpack.c.bf16 %v17498_v34, %v17497_v51  ;;  %v17504_v51 = vld [vmem:[%s27149_s0 + $0x679] ss:$2 sm:$0xff] }
 0x430   :  { %v8021_v63 = vpack.c.bf16 %v17500_v18, %v17499_v9  ;;  %v17505_v18 = vld [vmem:[%s27149_s0 + $0x6b9] ss:$2 sm:$0xff] }
 0x436   :  { %20086 = vmatmul.mubr.msk.bf16.gmra.mrb[24].mxu0 %vm345_vm1, %v8018_v40  ;;  %v17502_v40 = vld [vmem:[%s27149_s0 + $0x629] ss:$2 sm:$0xff] }
 0x437   :  { %20089 = vmatprep.mubr.msk.bf16.mxu0 %vm345_vm1, %v8019_v6  ;;  %v17503_v6 = vld [vmem:[%s27149_s0 + $0x669] ss:$2 sm:$0xff]  ;;  %v8022_v34 = vpack.c.bf16 %v17502_v40, %v17501_v23  ;;  %v17508_v23 = vld [vmem:[%s27149_s0 + $0x719] ss:$2 sm:$0xff] }
 0x438   :  { %v8023_v9 = vpack.c.bf16 %v17504_v51, %v17503_v6  ;;  %v17509_v51 = vld [vmem:[%s27149_s0 + $0x759] ss:$2 sm:$0xff] }
 0x43e   :  { %20090 = vmatmul.mubr.msk.bf16.gmra.mrb[28].mxu0 %vm345_vm1, %v8020_v46  ;;  %v17506_v46 = vld [vmem:[%s27149_s0 + $0x6c9] ss:$2 sm:$0xff] }
 0x43f   :  { %20093 = vmatprep.mubr.msk.bf16.mxu0 %vm345_vm1, %v8021_v63  ;;  %v17507_v63 = vld [vmem:[%s27149_s0 + $0x709] ss:$2 sm:$0xff]  ;;  %v8024_v40 = vpack.c.bf16 %v17506_v46, %v17505_v18  ;;  %v17512_v18 = vld [vmem:[%s27149_s0 + $0x7b9] ss:$2 sm:$0xff] }
 0x440   :  { %v8025_v6 = vpack.c.bf16 %v17508_v23, %v17507_v63  ;;  %v17513_v23 = vld [vmem:[%s27149_s0 + $0x7f9] ss:$2 sm:$0xff] }
 0x446   :  { %20094 = vmatmul.mubr.msk.bf16.gmra.mrb[32].mxu0 %vm345_vm1, %v8022_v34  ;;  %v17510_v34 = vld [vmem:[%s27149_s0 + $0x769] ss:$2 sm:$0xff] }
 0x447   :  { %20097 = vmatprep.mubr.msk.bf16.mxu0 %vm345_vm1, %v8023_v9  ;;  %v17511_v9 = vld [vmem:[%s27149_s0 + $0x7a9] ss:$2 sm:$0xff]  ;;  %v8026_v46 = vpack.c.bf16 %v17510_v34, %v17509_v51  ;;  %v17516_v51 = vld [vmem:[%s27149_s0 + $0x859] ss:$2 sm:$0xff] }
 0x448   :  { %v8027_v63 = vpack.c.bf16 %v17512_v18, %v17511_v9  ;;  %v17517_v18 = vld [vmem:[%s27149_s0 + $0x899] ss:$2 sm:$0xff] }
 0x44e   :  { %20098 = vmatmul.mubr.msk.bf16.gmra.mrb[36].mxu0 %vm345_vm1, %v8024_v40  ;;  %v17514_v40 = vld [vmem:[%s27149_s0 + $0x809] ss:$2 sm:$0xff] }
 0x44f   :  { %20101 = vmatprep.mubr.msk.bf16.mxu0 %vm345_vm1, %v8025_v6  ;;  %v17515_v6 = vld [vmem:[%s27149_s0 + $0x849] ss:$2 sm:$0xff]  ;;  %v8028_v34 = vpack.c.bf16 %v17514_v40, %v17513_v23  ;;  %v17520_v23 = vld [vmem:[%s27149_s0 + $0x8f9] ss:$2 sm:$0xff] }
 0x450   :  { %v8029_v9 = vpack.c.bf16 %v17516_v51, %v17515_v6  ;;  %v17521_v51 = vld [vmem:[%s27149_s0 + $0x939] ss:$2 sm:$0xff] }
 0x456   :  { %20102 = vmatmul.mubr.msk.bf16.gmra.mrb[40].mxu0 %vm345_vm1, %v8026_v46  ;;  %v17518_v46 = vld [vmem:[%s27149_s0 + $0x8a9] ss:$2 sm:$0xff] }
 0x457   :  { %20105 = vmatprep.mubr.msk.bf16.mxu0 %vm345_vm1, %v8027_v63  ;;  %v17519_v63 = vld [vmem:[%s27149_s0 + $0x8e9] ss:$2 sm:$0xff]  ;;  %v8030_v40 = vpack.c.bf16 %v17518_v46, %v17517_v18  ;;  %v17524_v18 = vld [vmem:[%s27149_s0 + $0x999] ss:$2 sm:$0xff] }
 0x458   :  { %v8031_v6 = vpack.c.bf16 %v17520_v23, %v17519_v63  ;;  %v17525_v23 = vld [vmem:[%s27149_s0 + $0x9d9] ss:$2 sm:$0xff] }
 0x45e   :  { %20106 = vmatmul.mubr.msk.bf16.gmra.mrb[44].mxu0 %vm345_vm1, %v8028_v34  ;;  %v17522_v34 = vld [vmem:[%s27149_s0 + $0x949] ss:$2 sm:$0xff] }
 0x45f   :  { %20109 = vmatprep.mubr.msk.bf16.mxu0 %vm345_vm1, %v8029_v9  ;;  %v17523_v9 = vld [vmem:[%s27149_s0 + $0x989] ss:$2 sm:$0xff]  ;;  %v8032_v46 = vpack.c.bf16 %v17522_v34, %v17521_v51  ;;  %v17528_v51 = vld [vmem:[%s27149_s0 + $0xa39] ss:$2 sm:$0xff] }
 0x460   :  { %v8033_v63 = vpack.c.bf16 %v17524_v18, %v17523_v9  ;;  %v17529_v18 = vld [vmem:[%s27149_s0 + $0xa79] ss:$2 sm:$0xff] }
 0x466   :  { %20110 = vmatmul.mubr.msk.bf16.gmra.mrb[48].mxu0 %vm345_vm1, %v8030_v40  ;;  %v17526_v40 = vld [vmem:[%s27149_s0 + $0x9e9] ss:$2 sm:$0xff] }
 0x467   :  { %20113 = vmatprep.mubr.msk.bf16.mxu0 %vm345_vm1, %v8031_v6  ;;  %v17527_v6 = vld [vmem:[%s27149_s0 + $0xa29] ss:$2 sm:$0xff]  ;;  %v8034_v34 = vpack.c.bf16 %v17526_v40, %v17525_v23  ;;  %v17565_v23 = vld [vmem:[%s27149_s0 + $0x8a] ss:$2 sm:$0xff] }
 0x468   :  { %v8035_v9 = vpack.c.bf16 %v17528_v51, %v17527_v6  ;;  %v17566_v51 = vld [vmem:[%s27149_s0 + $0xca] ss:$2 sm:$0xff] }
 0x46e   :  { %20114 = vmatmul.mubr.msk.bf16.gmra.mrb[52].mxu0 %vm345_vm1, %v8032_v46  ;;  %v17530_v46 = vld [vmem:[%s27149_s0 + $0xa89] ss:$2 sm:$0xff] }
 0x46f   :  { %20117 = vmatprep.mubr.msk.bf16.mxu0 %vm345_vm1, %v8033_v63  ;;  %v17564_v63 = vld [vmem:[%s27149_s0 + $0x7a] ss:$2 sm:$0xff]  ;;  %v8036_v40 = vpack.c.bf16 %v17530_v46, %v17529_v18  ;;  %v17569_v18 = vld [vmem:[%s27149_s0 + $0x12a] ss:$2 sm:$0xff] }
 0x470   :  { %v8619_v6 = vpack.c.bf16 %v17565_v23, %v17564_v63  ;;  %v9364_v23 = vsel %vm442_vm0, %v25612_v44, 0  ;;  %v17573_v44 = vld [vmem:[%s27149_s0 + $0x1ca] ss:$2 sm:$0xff] }
 0x476   :  { %20118 = vmatmul.mubr.msk.bf16.gmra.mrb[56].mxu0 %vm345_vm1, %v8034_v34  ;;  %v17567_v34 = vld [vmem:[%s27149_s0 + $0xda] ss:$2 sm:$0xff] }
 0x477   :  { %20121 = vmatprep.mubr.msk.bf16.mxu0 %vm345_vm1, %v8035_v9  ;;  %v17568_v9 = vld [vmem:[%s27149_s0 + $0x11a] ss:$2 sm:$0xff]  ;;  %v8620_v46 = vpack.c.bf16 %v17567_v34, %v17566_v51 }
 0x478   :  { %v8621_v63 = vpack.c.bf16 %v17569_v18, %v17568_v9  ;;  %v17572_v51 = vld [vmem:[%s27149_s0 + $0x1ba] ss:$2 sm:$0xff]  ;;  %v17574_v18 = vld [vmem:[%s27149_s0 + $0x20a] ss:$2 sm:$0xff] }
 0x479   :  { %v8623_v9 = vpack.c.bf16 %v17573_v44, %v17572_v51  ;;  %v17578_v51 = vld [vmem:[%s27149_s0 + $0x2aa] ss:$2 sm:$0xff]  ;;  %v17579_v44 = vld [vmem:[%s27149_s0 + $0x2ba] ss:$2 sm:$0xff] }
 0x47e   :  { %20122 = vmatmul.mubr.msk.bf16.gmra.mrb[60].mxu0 %vm345_vm1, %v8036_v40  ;;  %v17570_v40 = vld [vmem:[%s27149_s0 + $0x16a] ss:$2 sm:$0xff] }
 0x47f   :  { %20127 = vmatprep.mubr.msk.bf16.mxu0 %vm345_vm1, %v8619_v6  ;;  %v17571_v6 = vld [vmem:[%s27149_s0 + $0x17a] ss:$2 sm:$0xff] }
 0x480   :  { %v8622_v34 = vpack.c.bf16 %v17571_v6, %v17570_v40 }
 0x486   :  { %20128 = vmatmul.mubr.msk.bf16.vlgmr.msra.gmra.mrb[0].mxu0 %vm345_vm1, %v8620_v46  ;;  %v17575_v46 = vld [vmem:[%s27149_s0 + $0x21a] ss:$2 sm:$0xff] }
 0x487   :  { %20192 = vmatpush3.bf16.msra.mxu0 %v9364_v23  ;;  %20131 = vmatprep.mubr.msk.bf16.mxu0 %vm345_vm1, %v8621_v63  ;;  %v17576_v63 = vld [vmem:[%s27149_s0 + $0x25a] ss:$2 sm:$0xff]  ;;  %v17577_v23 = vld [vmem:[%s27149_s0 + $0x26a] ss:$2 sm:$0xff]  ;;  %v8624_v40 = vpack.c.bf16 %v17575_v46, %v17574_v18  ;;  %v8626_v18 = vpack.c.bf16 %v17579_v44, %v17578_v51 }
 0x488   :  { %v8625_v6 = vpack.c.bf16 %v17577_v23, %v17576_v63  ;;  %v17582_v63 = vld [vmem:[%s27149_s0 + $0x34a] ss:$2 sm:$0xff]  ;;  %v17583_v23 = vld [vmem:[%s27149_s0 + $0x35a] ss:$2 sm:$0xff] }
 0x489   :  { %v8628_v51 = vpack.c.bf16 %v17583_v23, %v17582_v63 }
 0x48e   :  { %20132 = vmatmul.mubr.msk.bf16.gmra.mrb[4].mxu0 %vm345_vm1, %v8622_v34  ;;  %v17580_v34 = vld [vmem:[%s27149_s0 + $0x2fa] ss:$2 sm:$0xff] }
 0x48f   :  { %20135 = vmatprep.mubr.msk.bf16.mxu0 %vm345_vm1, %v8623_v9  ;;  %v17581_v9 = vld [vmem:[%s27149_s0 + $0x30a] ss:$2 sm:$0xff] }
 0x490   :  { %v8627_v46 = vpack.c.bf16 %v17581_v9, %v17580_v34  ;;  %v17586_v34 = vld [vmem:[%s27149_s0 + $0x3ea] ss:$2 sm:$0xff]  ;;  %v17587_v9 = vld [vmem:[%s27149_s0 + $0x3fa] ss:$2 sm:$0xff] }
 0x491   :  { %v8630_v63 = vpack.c.bf16 %v17587_v9, %v17586_v34 }
 0x496   :  { %20136 = vmatmul.mubr.msk.bf16.gmra.mrb[8].mxu0 %vm345_vm1, %v8624_v40  ;;  %v17584_v40 = vld [vmem:[%s27149_s0 + $0x39a] ss:$2 sm:$0xff] }
 0x497   :  { %20139 = vmatprep.mubr.msk.bf16.mxu0 %vm345_vm1, %v8625_v6  ;;  %v17585_v6 = vld [vmem:[%s27149_s0 + $0x3aa] ss:$2 sm:$0xff] }
 0x498   :  { %v8629_v44 = vpack.c.bf16 %v17585_v6, %v17584_v40  ;;  %v17590_v40 = vld [vmem:[%s27149_s0 + $0x48a] ss:$2 sm:$0xff]  ;;  %v17591_v6 = vld [vmem:[%s27149_s0 + $0x49a] ss:$2 sm:$0xff] }
 0x499   :  { %v8632_v34 = vpack.c.bf16 %v17591_v6, %v17590_v40 }
 0x49e   :  { %20140 = vmatmul.mubr.msk.bf16.gmra.mrb[12].mxu0 %vm345_vm1, %v8626_v18  ;;  %v17588_v18 = vld [vmem:[%s27149_s0 + $0x43a] ss:$2 sm:$0xff] }
 0x49f   :  { %20143 = vmatprep.mubr.msk.bf16.mxu0 %vm345_vm1, %v8627_v46  ;;  %v17589_v46 = vld [vmem:[%s27149_s0 + $0x44a] ss:$2 sm:$0xff] }
 0x4a0   :  { %v8631_v23 = vpack.c.bf16 %v17589_v46, %v17588_v18  ;;  %v17594_v18 = vld [vmem:[%s27149_s0 + $0x52a] ss:$2 sm:$0xff]  ;;  %v17595_v46 = vld [vmem:[%s27149_s0 + $0x53a] ss:$2 sm:$0xff] }
 0x4a1   :  { %v8634_v40 = vpack.c.bf16 %v17595_v46, %v17594_v18 }
 0x4a6   :  { %20144 = vmatmul.mubr.msk.bf16.gmra.mrb[16].mxu0 %vm345_vm1, %v8628_v51  ;;  %v17592_v51 = vld [vmem:[%s27149_s0 + $0x4da] ss:$2 sm:$0xff] }
 0x4a7   :  { %20147 = vmatprep.mubr.msk.bf16.mxu0 %vm345_vm1, %v8629_v44  ;;  %v17593_v44 = vld [vmem:[%s27149_s0 + $0x4ea] ss:$2 sm:$0xff] }
 0x4a8   :  { %v8633_v9 = vpack.c.bf16 %v17593_v44, %v17592_v51  ;;  %v17598_v51 = vld [vmem:[%s27149_s0 + $0x61a] ss:$2 sm:$0xff]  ;;  %v17599_v44 = vld [vmem:[%s27149_s0 + $0x62a] ss:$2 sm:$0xff] }
 0x4a9   :  { %v8636_v18 = vpack.c.bf16 %v17599_v44, %v17598_v51 }
 0x4ae   :  { %20148 = vmatmul.mubr.msk.bf16.gmra.mrb[20].mxu0 %vm345_vm1, %v8630_v63  ;;  %v17596_v63 = vld [vmem:[%s27149_s0 + $0x5ca] ss:$2 sm:$0xff] }
 0x4af   :  { %20151 = vmatprep.mubr.msk.bf16.mxu0 %vm345_vm1, %v8631_v23  ;;  %v17597_v23 = vld [vmem:[%s27149_s0 + $0x5da] ss:$2 sm:$0xff] }
 0x4b0   :  { %v8635_v6 = vpack.c.bf16 %v17597_v23, %v17596_v63  ;;  %v17602_v63 = vld [vmem:[%s27149_s0 + $0x6ba] ss:$2 sm:$0xff]  ;;  %v17603_v23 = vld [vmem:[%s27149_s0 + $0x6ca] ss:$2 sm:$0xff] }
 0x4b1   :  { %v8638_v51 = vpack.c.bf16 %v17603_v23, %v17602_v63 }
 0x4b6   :  { %20152 = vmatmul.mubr.msk.bf16.gmra.mrb[24].mxu0 %vm345_vm1, %v8632_v34  ;;  %v17600_v34 = vld [vmem:[%s27149_s0 + $0x66a] ss:$2 sm:$0xff] }
 0x4b7   :  { %20155 = vmatprep.mubr.msk.bf16.mxu0 %vm345_vm1, %v8633_v9  ;;  %v17601_v9 = vld [vmem:[%s27149_s0 + $0x67a] ss:$2 sm:$0xff] }
 0x4b8   :  { %v8637_v46 = vpack.c.bf16 %v17601_v9, %v17600_v34  ;;  %v17606_v34 = vld [vmem:[%s27149_s0 + $0x75a] ss:$2 sm:$0xff]  ;;  %v17607_v9 = vld [vmem:[%s27149_s0 + $0x76a] ss:$2 sm:$0xff] }
 0x4b9   :  { %v8640_v63 = vpack.c.bf16 %v17607_v9, %v17606_v34 }
 0x4be   :  { %20156 = vmatmul.mubr.msk.bf16.gmra.mrb[28].mxu0 %vm345_vm1, %v8634_v40  ;;  %v17604_v40 = vld [vmem:[%s27149_s0 + $0x70a] ss:$2 sm:$0xff] }
 0x4bf   :  { %20159 = vmatprep.mubr.msk.bf16.mxu0 %vm345_vm1, %v8635_v6  ;;  %v17605_v6 = vld [vmem:[%s27149_s0 + $0x71a] ss:$2 sm:$0xff] }
 0x4c0   :  { %v8639_v44 = vpack.c.bf16 %v17605_v6, %v17604_v40  ;;  %v17610_v40 = vld [vmem:[%s27149_s0 + $0x7fa] ss:$2 sm:$0xff]  ;;  %v17611_v6 = vld [vmem:[%s27149_s0 + $0x80a] ss:$2 sm:$0xff] }
 0x4c1   :  { %v8642_v34 = vpack.c.bf16 %v17611_v6, %v17610_v40 }
 0x4c6   :  { %20160 = vmatmul.mubr.msk.bf16.gmra.mrb[32].mxu0 %vm345_vm1, %v8636_v18  ;;  %v17608_v18 = vld [vmem:[%s27149_s0 + $0x7aa] ss:$2 sm:$0xff] }
 0x4c7   :  { %20163 = vmatprep.mubr.msk.bf16.mxu0 %vm345_vm1, %v8637_v46  ;;  %v17609_v46 = vld [vmem:[%s27149_s0 + $0x7ba] ss:$2 sm:$0xff] }
 0x4c8   :  { %v8641_v23 = vpack.c.bf16 %v17609_v46, %v17608_v18  ;;  %v17614_v18 = vld [vmem:[%s27149_s0 + $0x89a] ss:$2 sm:$0xff]  ;;  %v17615_v46 = vld [vmem:[%s27149_s0 + $0x8aa] ss:$2 sm:$0xff] }
 0x4c9   :  { %v8644_v40 = vpack.c.bf16 %v17615_v46, %v17614_v18 }
 0x4ce   :  { %20164 = vmatmul.mubr.msk.bf16.gmra.mrb[36].mxu0 %vm345_vm1, %v8638_v51  ;;  %v17612_v51 = vld [vmem:[%s27149_s0 + $0x84a] ss:$2 sm:$0xff] }
 0x4cf   :  { %20167 = vmatprep.mubr.msk.bf16.mxu0 %vm345_vm1, %v8639_v44  ;;  %v17613_v44 = vld [vmem:[%s27149_s0 + $0x85a] ss:$2 sm:$0xff] }
 0x4d0   :  { %v8643_v9 = vpack.c.bf16 %v17613_v44, %v17612_v51  ;;  %v17618_v51 = vld [vmem:[%s27149_s0 + $0x93a] ss:$2 sm:$0xff]  ;;  %v17619_v44 = vld [vmem:[%s27149_s0 + $0x94a] ss:$2 sm:$0xff] }
 0x4d1   :  { %v8646_v18 = vpack.c.bf16 %v17619_v44, %v17618_v51 }
 0x4d6   :  { %20168 = vmatmul.mubr.msk.bf16.gmra.mrb[40].mxu0 %vm345_vm1, %v8640_v63  ;;  %v17616_v63 = vld [vmem:[%s27149_s0 + $0x8ea] ss:$2 sm:$0xff] }
 0x4d7   :  { %20171 = vmatprep.mubr.msk.bf16.mxu0 %vm345_vm1, %v8641_v23  ;;  %v17617_v23 = vld [vmem:[%s27149_s0 + $0x8fa] ss:$2 sm:$0xff] }
 0x4d8   :  { %v8645_v6 = vpack.c.bf16 %v17617_v23, %v17616_v63  ;;  %v17622_v63 = vld [vmem:[%s27149_s0 + $0x9da] ss:$2 sm:$0xff]  ;;  %v17623_v23 = vld [vmem:[%s27149_s0 + $0x9ea] ss:$2 sm:$0xff] }
 0x4d9   :  { %v8648_v51 = vpack.c.bf16 %v17623_v23, %v17622_v63 }
 0x4de   :  { %20172 = vmatmul.mubr.msk.bf16.gmra.mrb[44].mxu0 %vm345_vm1, %v8642_v34  ;;  %v17620_v34 = vld [vmem:[%s27149_s0 + $0x98a] ss:$2 sm:$0xff] }
 0x4df   :  { %20175 = vmatprep.mubr.msk.bf16.mxu0 %vm345_vm1, %v8643_v9  ;;  %v17621_v9 = vld [vmem:[%s27149_s0 + $0x99a] ss:$2 sm:$0xff] }
 0x4e0   :  { %v8647_v46 = vpack.c.bf16 %v17621_v9, %v17620_v34  ;;  %v17626_v34 = vld [vmem:[%s27149_s0 + $0xa7a] ss:$2 sm:$0xff]  ;;  %v17627_v9 = vld [vmem:[%s27149_s0 + $0xa8a] ss:$2 sm:$0xff] }
 0x4e1   :  { %v8650_v63 = vpack.c.bf16 %v17627_v9, %v17626_v34  ;;  %v22198_v34 = vld [vmem:[%s27150_s2 + $0x40] sm:$0xff]   ;;  %v22199_v9 = vld [vmem:[%s27150_s2 + $0x48] sm:$0xff]  }
 0x4e2   :  { %20257 = vmatprep.subr.bf16.mxu1 %v22198_v34 }
 0x4e3   :  { %20258 = vmatpush3.bf16.msra.mxu1 %v22198_v34  ;;  %v17672_v34 = vld [vmem:[%s27149_s0 + $0x21b] ss:$2 sm:$0xff] }
 0x4e4   :  { %20259 = vmatprep.subr.bf16.mxu1 %v22199_v9 }
 0x4e6   :  { %20176 = vmatmul.mubr.msk.bf16.gmra.mrb[48].mxu0 %vm345_vm1, %v8644_v40  ;;  %v17624_v40 = vld [vmem:[%s27149_s0 + $0xa2a] ss:$2 sm:$0xff] }
 0x4e7   :  { %20179 = vmatprep.mubr.msk.bf16.mxu0 %vm345_vm1, %v8645_v6  ;;  %v17625_v6 = vld [vmem:[%s27149_s0 + $0xa3a] ss:$2 sm:$0xff]  ;;  %20260 = vmatpush3.bf16.msra.mxu1 %v22199_v9  ;;  %v17674_v9 = vld [vmem:[%s27149_s0 + $0x26b] ss:$2 sm:$0xff] }
 0x4e8   :  { %v8649_v44 = vpack.c.bf16 %v17625_v6, %v17624_v40  ;;  %v17663_v40 = vld [vmem:[%s27149_s0 + $0xcb] ss:$2 sm:$0xff]  ;;  %v17664_v6 = vld [vmem:[%s27149_s0 + $0xdb] ss:$2 sm:$0xff] }
 0x4ee   :  { %20180 = vmatmul.mubr.msk.bf16.gmra.mrb[52].mxu0 %vm345_vm1, %v8646_v18  ;;  %v17661_v18 = vld [vmem:[%s27149_s0 + $0x7b] ss:$2 sm:$0xff] }
 0x4ef   :  { %20183 = vmatprep.mubr.msk.bf16.mxu0 %vm345_vm1, %v8647_v46  ;;  %v17662_v46 = vld [vmem:[%s27149_s0 + $0x8b] ss:$2 sm:$0xff] }
 0x4f0   :  { %v9233_v23 = vpack.c.bf16 %v17662_v46, %v17661_v18  ;;  %v9234_v18 = vpack.c.bf16 %v17664_v6, %v17663_v40  ;;  %v17670_v40 = vld [vmem:[%s27149_s0 + $0x1cb] ss:$2 sm:$0xff] }
 0x4f6   :  { %20184 = vmatmul.mubr.msk.bf16.gmra.mrb[56].mxu0 %vm345_vm1, %v8648_v51  ;;  %v17665_v51 = vld [vmem:[%s27149_s0 + $0x11b] ss:$2 sm:$0xff] }
 0x4f7   :  { %20187 = vmatprep.mubr.msk.bf16.mxu0 %vm345_vm1, %v8649_v44  ;;  %v17666_v44 = vld [vmem:[%s27149_s0 + $0x12b] ss:$2 sm:$0xff] }
 0x4f8   :  { %v9235_v46 = vpack.c.bf16 %v17666_v44, %v17665_v51  ;;  %v9237_v51 = vpack.c.bf16 %v17670_v40, %v17669_v56  ;;  %v17671_v44 = vld [vmem:[%s27149_s0 + $0x20b] ss:$2 sm:$0xff]  ;;  %v17677_v40 = vld [vmem:[%s27149_s0 + $0x2fb] ss:$2 sm:$0xff] }
 0x4f9   :  { %v9238_v56 = vpack.c.bf16 %v17672_v34, %v17671_v44  ;;  %v17679_v34 = vld [vmem:[%s27149_s0 + $0x34b] ss:$2 sm:$0xff] }
 0x4fe   :  { %20188 = vmatmul.mubr.msk.bf16.gmra.mrb[60].mxu0 %vm345_vm1, %v8650_v63  ;;  %v17667_v63 = vld [vmem:[%s27149_s0 + $0x16b] ss:$2 sm:$0xff] }
 0x4ff   :  { %20193 = vmatprep.mubr.msk.bf16.mxu0 %vm345_vm1, %v9233_v23  ;;  %v17668_v23 = vld [vmem:[%s27149_s0 + $0x17b] ss:$2 sm:$0xff] }
 0x500   :  { %v9236_v6 = vpack.c.bf16 %v17668_v23, %v17667_v63  ;;  %v17675_v63 = vld [vmem:[%s27149_s0 + $0x2ab] ss:$2 sm:$0xff]  ;;  %v17676_v23 = vld [vmem:[%s27149_s0 + $0x2bb] ss:$2 sm:$0xff] }
 0x506   :  { %20194 = vmatmul.mubr.msk.bf16.vlgmr.msra.gmra.mrb[0].mxu0 %vm345_vm1, %v9234_v18  ;;  %v17673_v18 = vld [vmem:[%s27149_s0 + $0x25b] ss:$2 sm:$0xff] }
 0x507   :  { %20197 = vmatprep.mubr.msk.bf16.mxu0 %vm345_vm1, %v9235_v46  ;;  %v9239_v46 = vpack.c.bf16 %v17674_v9, %v17673_v18  ;;  %v17680_v18 = vld [vmem:[%s27149_s0 + $0x35b] ss:$2 sm:$0xff] }
 0x508   :  { %v17681_v9 = vld [vmem:[%s27149_s0 + $0x39b] ss:$2 sm:$0xff] }
 0x50e   :  { %20198 = vmatmul.mubr.msk.bf16.gmra.mrb[4].mxu0 %vm345_vm1, %v9236_v6  ;;  %v17678_v6 = vld [vmem:[%s27149_s0 + $0x30b] ss:$2 sm:$0xff] }
 0x50f   :  { %20201 = vmatprep.mubr.msk.bf16.mxu0 %vm345_vm1, %v9237_v51  ;;  %v9240_v51 = vpack.c.bf16 %v17676_v23, %v17675_v63  ;;  %v9241_v44 = vpack.c.bf16 %v17678_v6, %v17677_v40  ;;  %v17683_v23 = vld [vmem:[%s27149_s0 + $0x3eb] ss:$2 sm:$0xff]  ;;  %v17684_v40 = vld [vmem:[%s27149_s0 + $0x3fb] ss:$2 sm:$0xff] }
 0x510   :  { %v17685_v6 = vld [vmem:[%s27149_s0 + $0x43b] ss:$2 sm:$0xff] }
 0x516   :  { %20202 = vmatmul.mubr.msk.bf16.gmra.mrb[8].mxu0 %vm345_vm1, %v9238_v56  ;;  %v17682_v56 = vld [vmem:[%s27149_s0 + $0x3ab] ss:$2 sm:$0xff] }
 0x517   :  { %20205 = vmatprep.mubr.msk.bf16.mxu0 %vm345_vm1, %v9239_v46  ;;  %v9242_v46 = vpack.c.bf16 %v17680_v18, %v17679_v34  ;;  %v9243_v63 = vpack.c.bf16 %v17682_v56, %v17681_v9  ;;  %v17687_v18 = vld [vmem:[%s27149_s0 + $0x48b] ss:$2 sm:$0xff]  ;;  %v17688_v9 = vld [vmem:[%s27149_s0 + $0x49b] ss:$2 sm:$0xff] }
 0x518   :  { %v17689_v56 = vld [vmem:[%s27149_s0 + $0x4db] ss:$2 sm:$0xff] }
 0x51e   :  { %20206 = vmatmul.mubr.msk.bf16.gmra.mrb[12].mxu0 %vm345_vm1, %v9240_v51  ;;  %v17686_v51 = vld [vmem:[%s27149_s0 + $0x44b] ss:$2 sm:$0xff] }
 0x51f   :  { %20209 = vmatprep.mubr.msk.bf16.mxu0 %vm345_vm1, %v9241_v44  ;;  %v9244_v44 = vpack.c.bf16 %v17684_v40, %v17683_v23  ;;  %v9245_v34 = vpack.c.bf16 %v17686_v51, %v17685_v6  ;;  %v17691_v40 = vld [vmem:[%s27149_s0 + $0x52b] ss:$2 sm:$0xff]  ;;  %v17692_v6 = vld [vmem:[%s27149_s0 + $0x53b] ss:$2 sm:$0xff] }
 0x520   :  { %v17693_v51 = vld [vmem:[%s27149_s0 + $0x5cb] ss:$2 sm:$0xff] }
 0x526   :  { %20210 = vmatmul.mubr.msk.bf16.gmra.mrb[16].mxu0 %vm345_vm1, %v9242_v46  ;;  %v17690_v46 = vld [vmem:[%s27149_s0 + $0x4eb] ss:$2 sm:$0xff] }
 0x527   :  { %20213 = vmatprep.mubr.msk.bf16.mxu0 %vm345_vm1, %v9243_v63  ;;  %v9246_v63 = vpack.c.bf16 %v17688_v9, %v17687_v18  ;;  %v9247_v23 = vpack.c.bf16 %v17690_v46, %v17689_v56  ;;  %v17695_v9 = vld [vmem:[%s27149_s0 + $0x61b] ss:$2 sm:$0xff]  ;;  %v17696_v56 = vld [vmem:[%s27149_s0 + $0x62b] ss:$2 sm:$0xff] }
 0x528   :  { %v17697_v46 = vld [vmem:[%s27149_s0 + $0x66b] ss:$2 sm:$0xff] }
 0x52e   :  { %20214 = vmatmul.mubr.msk.bf16.gmra.mrb[20].mxu0 %vm345_vm1, %v9244_v44  ;;  %v17694_v44 = vld [vmem:[%s27149_s0 + $0x5db] ss:$2 sm:$0xff] }
 0x52f   :  { %20217 = vmatprep.mubr.msk.bf16.mxu0 %vm345_vm1, %v9245_v34  ;;  %v9248_v34 = vpack.c.bf16 %v17692_v6, %v17691_v40  ;;  %v9249_v18 = vpack.c.bf16 %v17694_v44, %v17693_v51  ;;  %v17699_v6 = vld [vmem:[%s27149_s0 + $0x6bb] ss:$2 sm:$0xff]  ;;  %v17700_v51 = vld [vmem:[%s27149_s0 + $0x6cb] ss:$2 sm:$0xff] }
 0x530   :  { %v17701_v44 = vld [vmem:[%s27149_s0 + $0x70b] ss:$2 sm:$0xff] }
 0x536   :  { %20218 = vmatmul.mubr.msk.bf16.gmra.mrb[24].mxu0 %vm345_vm1, %v9246_v63  ;;  %v17698_v63 = vld [vmem:[%s27149_s0 + $0x67b] ss:$2 sm:$0xff] }
 0x537   :  { %20221 = vmatprep.mubr.msk.bf16.mxu0 %vm345_vm1, %v9247_v23  ;;  %v9250_v23 = vpack.c.bf16 %v17696_v56, %v17695_v9  ;;  %v9251_v40 = vpack.c.bf16 %v17698_v63, %v17697_v46  ;;  %v17703_v56 = vld [vmem:[%s27149_s0 + $0x75b] ss:$2 sm:$0xff]  ;;  %v17704_v46 = vld [vmem:[%s27149_s0 + $0x76b] ss:$2 sm:$0xff] }
 0x538   :  { %v17705_v63 = vld [vmem:[%s27149_s0 + $0x7ab] ss:$2 sm:$0xff] }
 0x53e   :  { %20222 = vmatmul.mubr.msk.bf16.gmra.mrb[28].mxu0 %vm345_vm1, %v9248_v34  ;;  %v17702_v34 = vld [vmem:[%s27149_s0 + $0x71b] ss:$2 sm:$0xff] }
 0x53f   :  { %20225 = vmatprep.mubr.msk.bf16.mxu0 %vm345_vm1, %v9249_v18  ;;  %v9252_v18 = vpack.c.bf16 %v17700_v51, %v17699_v6  ;;  %v9253_v9 = vpack.c.bf16 %v17702_v34, %v17701_v44  ;;  %v17707_v51 = vld [vmem:[%s27149_s0 + $0x7fb] ss:$2 sm:$0xff]  ;;  %v17708_v44 = vld [vmem:[%s27149_s0 + $0x80b] ss:$2 sm:$0xff] }
 0x540   :  { %v26222_v34 = vld [vmem:[%s27149_s0 + $0x84b] ss:$2 sm:$0xff] }
 0x546   :  { %20226 = vmatmul.mubr.msk.bf16.gmra.mrb[32].mxu0 %vm345_vm1, %v9250_v23  ;;  %v17706_v23 = vld [vmem:[%s27149_s0 + $0x7bb] ss:$2 sm:$0xff] }
 0x547   :  { %20229 = vmatprep.mubr.msk.bf16.mxu0 %vm345_vm1, %v9251_v40  ;;  %v9254_v40 = vpack.c.bf16 %v17704_v46, %v17703_v56  ;;  %v9255_v6 = vpack.c.bf16 %v17706_v23, %v17705_v63  ;;  %v22406_v46 = vmov 0.0   ;;  %v17711_v63 = vld [vmem:[%s27149_s0 + $0x89b] ss:$2 sm:$0xff]  ;;  %v17712_v23 = vld [vmem:[%s27149_s0 + $0x8ab] ss:$2 sm:$0xff] }
 0x548   :  { %9917 = vst [vmem:[#allocation2 + $0x30] sm:$0xff] %v22406_v46  ;;  %9918 = vst [vmem:[#allocation2 + $0x38] sm:$0xff] %v22406_v46 }
 0x549   :  { %9911 = vst [vmem:[#allocation2] sm:$0xff] %v22406_v46  ;;  %9912 = vst [vmem:[#allocation2 + $0x8] sm:$0xff] %v22406_v46 }
 0x54a   :  { %9913 = vst [vmem:[#allocation2 + $0x10] sm:$0x3] %v22406_v46  ;;  %9914 = vst [vmem:[#allocation2 + $0x18] sm:$0xff] %v22406_v46 }
 0x54b   :  { %9915 = vst [vmem:[#allocation2 + $0x20] sm:$0xff] %v22406_v46  ;;  %9916 = vst [vmem:[#allocation2 + $0x28] sm:$0x3] %v22406_v46 }
 0x54c   :  { %9919 = vst [vmem:[#allocation2 + $0x40] sm:$0x3] %v22406_v46  ;;  %9920 = vst [vmem:[#allocation2 + $0x48] sm:$0xff] %v22406_v46 }
 0x54d   :  { %9921 = vst [vmem:[#allocation2 + $0x50] sm:$0xff] %v22406_v46  ;;  %9922 = vst [vmem:[#allocation2 + $0x58] sm:$0x3] %v22406_v46 }
 0x54e   :  { %20230 = vmatmul.mubr.msk.bf16.gmra.mrb[36].mxu0 %vm345_vm1, %v9252_v18  ;;  %v26227_v18 = vld [vmem:[%s27149_s0 + $0x85b] ss:$2 sm:$0xff]  ;;  %9923 = vst [vmem:[#allocation2 + $0x60] sm:$0xff] %v22406_v46  ;;  %9924 = vst [vmem:[#allocation2 + $0x68] sm:$0xff] %v22406_v46 }
 0x54f   :  { %20233 = vmatprep.mubr.msk.bf16.mxu0 %vm345_vm1, %v9253_v9  ;;  %v9256_v9 = vpack.c.bf16 %v17708_v44, %v17707_v51  ;;  %v9257_v56 = vpack.c.bf16 %v26227_v18, %v26222_v34  ;;  %9925 = vst [vmem:[#allocation2 + $0x70] sm:$0x3] %v22406_v46  ;;  %9926 = vst [vmem:[#allocation2 + $0x78] sm:$0xff] %v22406_v46  ;;  %v22200_v51 = vld [vmem:[%s27150_s2 + $0x50] sm:$0xff]   ;;  %v9258_v44 = vpack.c.bf16 %v17712_v23, %v17711_v63  ;;  %v22201_v18 = vld [vmem:[%s27150_s2 + $0x58] sm:$0xff]  }
 0x550   :  { %9927 = vst [vmem:[#allocation2 + $0x80] sm:$0xff] %v22406_v46  ;;  %9928 = vst [vmem:[#allocation2 + $0x88] sm:$0x3] %v22406_v46  ;;  %20261 = vmatprep.subr.bf16.mxu1 %v22200_v51  ;;  %v17718_v63 = vld [vmem:[%s27149_s0 + $0x99b] ss:$2 sm:$0xff] }
 0x551   :  { %9929 = vst [vmem:[#allocation2 + $0x90] sm:$0xff] %v22406_v46  ;;  %9930 = vst [vmem:[#allocation2 + $0x98] sm:$0xff] %v22406_v46  ;;  %20262 = vmatpush3.bf16.msra.mxu1 %v22200_v51  ;;  %v22202_v23 = vld [vmem:[%s27150_s2 + $0x60] sm:$0xff]   ;;  %v22203_v51 = vld [vmem:[%s27150_s2 + $0x68] sm:$0xff]  }
 0x552   :  { %9931 = vst [vmem:[#allocation2 + $0xa0] sm:$0x3] %v22406_v46  ;;  %9932 = vst [vmem:[#allocation2 + $0xa8] sm:$0xff] %v22406_v46  ;;  %20263 = vmatprep.subr.bf16.mxu1 %v22201_v18 }
 0x553   :  { %9933 = vst [vmem:[#allocation2 + $0xb0] sm:$0xff] %v22406_v46  ;;  %9934 = vst [vmem:[#allocation2 + $0xb8] sm:$0x3] %v22406_v46 }
 0x554   :  { %9935 = vst [vmem:[#allocation2 + $0xc0] sm:$0xff] %v22406_v46  ;;  %9936 = vst [vmem:[#allocation2 + $0xc8] sm:$0xff] %v22406_v46 }
 0x555   :  { %9937 = vst [vmem:[#allocation2 + $0xd0] sm:$0x3] %v22406_v46  ;;  %9938 = vst [vmem:[#allocation2 + $0xd8] sm:$0xff] %v22406_v46  ;;  %20264 = vmatpush3.bf16.msra.mxu1 %v22201_v18  ;;  %v17721_v18 = vld [vmem:[%s27149_s0 + $0xa2b] ss:$2 sm:$0xff] }
 0x556   :  { %20234 = vmatmul.mubr.msk.bf16.gmra.mrb[40].mxu0 %vm345_vm1, %v9254_v40  ;;  %9939 = vst [vmem:[#allocation2 + $0xe0] sm:$0xff] %v22406_v46  ;;  %9940 = vst [vmem:[#allocation2 + $0xe8] sm:$0x3] %v22406_v46  ;;  %v17713_v40 = vld [vmem:[%s27149_s0 + $0x8eb] ss:$2 sm:$0xff]  ;;  %20265 = vmatprep.subr.bf16.mxu1 %v22202_v23 }
 0x557   :  { %20237 = vmatprep.mubr.msk.bf16.mxu0 %vm345_vm1, %v9255_v6  ;;  %9941 = vst [vmem:[#allocation2 + $0xf0] sm:$0xff] %v22406_v46  ;;  %9942 = vst [vmem:[#allocation2 + $0xf8] sm:$0xff] %v22406_v46  ;;  %v17714_v6 = vld [vmem:[%s27149_s0 + $0x8fb] ss:$2 sm:$0xff] }
 0x558   :  { %9943 = vst [vmem:[#allocation2 + $0x100] sm:$0x3] %v22406_v46  ;;  %9944 = vst [vmem:[#allocation2 + $0x108] sm:$0xff] %v22406_v46  ;;  %v9259_v34 = vpack.c.bf16 %v17714_v6, %v17713_v40 }
 0x559   :  { %9945 = vst [vmem:[#allocation2 + $0x110] sm:$0xff] %v22406_v46  ;;  %9946 = vst [vmem:[#allocation2 + $0x118] sm:$0x3] %v22406_v46  ;;  %20266 = vmatpush3.bf16.msra.mxu1 %v22202_v23  ;;  %v22205_v23 = vld [vmem:[%s27150_s2 + $0x78] sm:$0xff]  }
 0x55a   :  { %9947 = vst [vmem:[#allocation2 + $0x120] sm:$0xff] %v22406_v46  ;;  %9948 = vst [vmem:[#allocation2 + $0x128] sm:$0xff] %v22406_v46  ;;  %20267 = vmatprep.subr.bf16.mxu1 %v22203_v51 }
 0x55b   :  { %9949 = vst [vmem:[#allocation2 + $0x130] sm:$0x3] %v22406_v46  ;;  %9950 = vst [vmem:[#allocation2 + $0x138] sm:$0xff] %v22406_v46 }
 0x55c   :  { %9951 = vst [vmem:[#allocation2 + $0x140] sm:$0xff] %v22406_v46  ;;  %9952 = vst [vmem:[#allocation2 + $0x148] sm:$0x3] %v22406_v46 }
 0x55d   :  { %9953 = vst [vmem:[#allocation2 + $0x150] sm:$0xff] %v22406_v46  ;;  %9954 = vst [vmem:[#allocation2 + $0x158] sm:$0xff] %v22406_v46  ;;  %20268 = vmatpush3.bf16.msra.mxu1 %v22203_v51 }
 0x55e   :  { %20238 = vmatmul.mubr.msk.bf16.gmra.mrb[44].mxu0 %vm345_vm1, %v9256_v9  ;;  %9955 = vst [vmem:[#allocation2 + $0x160] sm:$0x3] %v22406_v46  ;;  %9956 = vst [vmem:[#allocation2 + $0x168] sm:$0xff] %v22406_v46  ;;  %v17715_v9 = vld [vmem:[%s27149_s0 + $0x93b] ss:$2 sm:$0xff] }
 0x55f   :  { %9957 = vst [vmem:[#allocation2 + $0x170] sm:$0xff] %v22406_v46  ;;  %9958 = vst [vmem:[#allocation2 + $0x178] sm:$0x3] %v22406_v46  ;;  %20241 = vmatprep.mubr.msk.bf16.mxu0 %vm345_vm1, %v9257_v56  ;;  %v17716_v56 = vld [vmem:[%s27149_s0 + $0x94b] ss:$2 sm:$0xff] }
 0x560   :  { %9959 = vst [vmem:[#allocation2 + $0x180] sm:$0xff] %v22406_v46  ;;  %9960 = vst [vmem:[#allocation2 + $0x188] sm:$0xff] %v22406_v46  ;;  %v9260_v40 = vpack.c.bf16 %v17716_v56, %v17715_v9  ;;  %v17722_v9 = vld [vmem:[%s27149_s0 + $0xa3b] ss:$2 sm:$0xff]  ;;  %v22204_v56 = vld [vmem:[%s27150_s2 + $0x70] sm:$0xff]  }
 0x561   :  { %9961 = vst [vmem:[#allocation2 + $0x190] sm:$0x3] %v22406_v46  ;;  %9962 = vst [vmem:[#allocation2 + $0x198] sm:$0xff] %v22406_v46  ;;  %20269 = vmatprep.subr.bf16.mxu1 %v22204_v56 }
 0x562   :  { %9963 = vst [vmem:[#allocation2 + $0x1a0] sm:$0xff] %v22406_v46  ;;  %9964 = vst [vmem:[#allocation2 + $0x1a8] sm:$0x3] %v22406_v46  ;;  %20270 = vmatpush3.bf16.msra.mxu1 %v22204_v56 }
 0x563   :  { %9965 = vst [vmem:[#allocation2 + $0x1b0] sm:$0xff] %v22406_v46  ;;  %9966 = vst [vmem:[#allocation2 + $0x1b8] sm:$0xff] %v22406_v46  ;;  %20271 = vmatprep.subr.bf16.mxu1 %v22205_v23 }
 0x564   :  { %9967 = vst [vmem:[#allocation2 + $0x1c0] sm:$0x3] %v22406_v46  ;;  %9968 = vst [vmem:[#allocation2 + $0x1c8] sm:$0xff] %v22406_v46 }
 0x565   :  { %9969 = vst [vmem:[#allocation2 + $0x1d0] sm:$0xff] %v22406_v46  ;;  %9970 = vst [vmem:[#allocation2 + $0x1d8] sm:$0x3] %v22406_v46 }
 0x566   :  { %9971 = vst [vmem:[#allocation2 + $0x1e0] sm:$0xff] %v22406_v46  ;;  %9972 = vst [vmem:[#allocation2 + $0x1e8] sm:$0xff] %v22406_v46  ;;  %20242 = vmatmul.mubr.msk.bf16.gmra.mrb[48].mxu0 %vm345_vm1, %v9258_v44  ;;  %v17719_v44 = vld [vmem:[%s27149_s0 + $0x9db] ss:$2 sm:$0xff]  ;;  %20272 = vmatpush3.bf16.msra.mxu1 %v22205_v23 }
 0x567   :  { %9973 = vst [vmem:[#allocation2 + $0x1f0] sm:$0x3] %v22406_v46  ;;  %9974 = vst [vmem:[#allocation2 + $0x1f8] sm:$0xff] %v22406_v46  ;;  %20245 = vmatprep.mubr.msk.bf16.mxu0 %vm345_vm1, %v9259_v34  ;;  %v17720_v34 = vld [vmem:[%s27149_s0 + $0x9eb] ss:$2 sm:$0xff] }
 0x568   :  { %9975 = vst [vmem:[#allocation2 + $0x200] sm:$0xff] %v22406_v46  ;;  %9976 = vst [vmem:[#allocation2 + $0x208] sm:$0x3] %v22406_v46 }
 0x569   :  { %9977 = vst [vmem:[#allocation2 + $0x210] sm:$0xff] %v22406_v46  ;;  %9978 = vst [vmem:[#allocation2 + $0x218] sm:$0xff] %v22406_v46 }
 0x56a   :  { %9979 = vst [vmem:[#allocation2 + $0x220] sm:$0x3] %v22406_v46  ;;  %9980 = vst [vmem:[#allocation2 + $0x228] sm:$0xff] %v22406_v46 }
 0x56b   :  { %9981 = vst [vmem:[#allocation2 + $0x230] sm:$0xff] %v22406_v46  ;;  %9982 = vst [vmem:[#allocation2 + $0x238] sm:$0x3] %v22406_v46 }
 0x56c   :  { %9983 = vst [vmem:[#allocation2 + $0x240] sm:$0xff] %v22406_v46  ;;  %9984 = vst [vmem:[#allocation2 + $0x248] sm:$0xff] %v22406_v46 }
 0x56d   :  { %9985 = vst [vmem:[#allocation2 + $0x250] sm:$0x3] %v22406_v46  ;;  %9986 = vst [vmem:[#allocation2 + $0x258] sm:$0xff] %v22406_v46 }
 0x56e   :  { %9987 = vst [vmem:[#allocation2 + $0x260] sm:$0xff] %v22406_v46  ;;  %9988 = vst [vmem:[#allocation2 + $0x268] sm:$0x3] %v22406_v46  ;;  %20246 = vmatmul.mubr.msk.bf16.gmra.mrb[52].mxu0 %vm345_vm1, %v9260_v40  ;;  %v17723_v40 = vld [vmem:[%s27149_s0 + $0xa7b] ss:$2 sm:$0xff] }
 0x56f   :  { %9989 = vst [vmem:[#allocation2 + $0x270] sm:$0xff] %v22406_v46  ;;  %9990 = vst [vmem:[#allocation2 + $0x278] sm:$0xff] %v22406_v46 }
 0x570   :  { %9991 = vst [vmem:[#allocation2 + $0x280] sm:$0x3] %v22406_v46  ;;  %9992 = vst [vmem:[#allocation2 + $0x288] sm:$0xff] %v22406_v46 }
 0x571   :  { %9993 = vst [vmem:[#allocation2 + $0x290] sm:$0xff] %v22406_v46  ;;  %9994 = vst [vmem:[#allocation2 + $0x298] sm:$0x3] %v22406_v46 }
 0x572   :  { %9995 = vst [vmem:[#allocation2 + $0x2a0] sm:$0xff] %v22406_v46  ;;  %9996 = vst [vmem:[#allocation2 + $0x2a8] sm:$0xff] %v22406_v46 }
 0x573   :  { %9997 = vst [vmem:[#allocation2 + $0x2b0] sm:$0x3] %v22406_v46  ;;  %9998 = vst [vmem:[#allocation2 + $0x2b8] sm:$0xff] %v22406_v46 }
 0x574   :  { %9999 = vst [vmem:[#allocation2 + $0x2c0] sm:$0xff] %v22406_v46  ;;  %10000 = vst [vmem:[#allocation2 + $0x2c8] sm:$0x3] %v22406_v46 }
 0x575   :  { %10001 = vst [vmem:[#allocation2 + $0x2d0] sm:$0xff] %v22406_v46  ;;  %10002 = vst [vmem:[#allocation2 + $0x2d8] sm:$0xff] %v22406_v46 }
 0x576   :  { %10003 = vst [vmem:[#allocation2 + $0x2e0] sm:$0x3] %v22406_v46  ;;  %10004 = vst [vmem:[#allocation2 + $0x2e8] sm:$0xff] %v22406_v46 }
 0x577   :  { %10005 = vst [vmem:[#allocation2 + $0x2f0] sm:$0xff] %v22406_v46  ;;  %10006 = vst [vmem:[#allocation2 + $0x2f8] sm:$0x3] %v22406_v46 }
 0x578   :  { %10007 = vst [vmem:[#allocation2 + $0x300] sm:$0xff] %v22406_v46  ;;  %10008 = vst [vmem:[#allocation2 + $0x308] sm:$0xff] %v22406_v46 }
 0x579   :  { %10009 = vst [vmem:[#allocation2 + $0x310] sm:$0x3] %v22406_v46  ;;  %10010 = vst [vmem:[#allocation2 + $0x318] sm:$0xff] %v22406_v46 }
 0x57a   :  { %10011 = vst [vmem:[#allocation2 + $0x320] sm:$0xff] %v22406_v46  ;;  %10012 = vst [vmem:[#allocation2 + $0x328] sm:$0x3] %v22406_v46 }
 0x57b   :  { %10013 = vst [vmem:[#allocation2 + $0x330] sm:$0xff] %v22406_v46  ;;  %10014 = vst [vmem:[#allocation2 + $0x338] sm:$0xff] %v22406_v46 }
 0x57c   :  { %10015 = vst [vmem:[#allocation2 + $0x340] sm:$0x3] %v22406_v46  ;;  %10016 = vst [vmem:[#allocation2 + $0x348] sm:$0xff] %v22406_v46 }
 0x57d   :  { %10017 = vst [vmem:[#allocation2 + $0x350] sm:$0xff] %v22406_v46  ;;  %10018 = vst [vmem:[#allocation2 + $0x358] sm:$0x3] %v22406_v46 }
 0x57e   :  { %13680 = vst [vmem:[#allocation3] sm:$0xff] %v22406_v46  ;;  %13681 = vst [vmem:[#allocation3 + $0x8] sm:$0x3] %v22406_v46 }
 0x57f   :  { %13682 = vst [vmem:[#allocation3 + $0x10] sm:$0xff] %v22406_v46  ;;  %13683 = vst [vmem:[#allocation3 + $0x18] sm:$0x3] %v22406_v46 }
 0x580   :  { %13684 = vst [vmem:[#allocation3 + $0x20] sm:$0xff] %v22406_v46  ;;  %13685 = vst [vmem:[#allocation3 + $0x28] sm:$0x3] %v22406_v46 }
 0x581   :  { %13686 = vst [vmem:[#allocation3 + $0x30] sm:$0xff] %v22406_v46  ;;  %13687 = vst [vmem:[#allocation3 + $0x38] sm:$0x3] %v22406_v46 }
 0x582   :  { %13688 = vst [vmem:[#allocation3 + $0x40] sm:$0xff] %v22406_v46  ;;  %13689 = vst [vmem:[#allocation3 + $0x48] sm:$0x3] %v22406_v46 }
 0x583   :  { %13690 = vst [vmem:[#allocation3 + $0x50] sm:$0xff] %v22406_v46  ;;  %13691 = vst [vmem:[#allocation3 + $0x58] sm:$0x3] %v22406_v46 }
 0x584   :  { %13692 = vst [vmem:[#allocation3 + $0x60] sm:$0xff] %v22406_v46  ;;  %13693 = vst [vmem:[#allocation3 + $0x68] sm:$0x3] %v22406_v46 }
 0x585   :  { %13694 = vst [vmem:[#allocation3 + $0x70] sm:$0xff] %v22406_v46  ;;  %13695 = vst [vmem:[#allocation3 + $0x78] sm:$0x3] %v22406_v46 }
 0x586   :  { %13696 = vst [vmem:[#allocation3 + $0x80] sm:$0xff] %v22406_v46  ;;  %13697 = vst [vmem:[#allocation3 + $0x88] sm:$0x3] %v22406_v46 }
 0x587   :  { %13700 = vst [vmem:[#allocation3 + $0xa0] sm:$0xff] %v22406_v46  ;;  %13701 = vst [vmem:[#allocation3 + $0xa8] sm:$0x3] %v22406_v46 }
 0x588   :  { %13702 = vst [vmem:[#allocation3 + $0xb0] sm:$0xff] %v22406_v46  ;;  %13703 = vst [vmem:[#allocation3 + $0xb8] sm:$0x3] %v22406_v46 }
 0x589   :  { %13704 = vst [vmem:[#allocation3 + $0xc0] sm:$0xff] %v22406_v46  ;;  %13705 = vst [vmem:[#allocation3 + $0xc8] sm:$0x3] %v22406_v46 }
 0x58a   :  { %13706 = vst [vmem:[#allocation3 + $0xd0] sm:$0xff] %v22406_v46  ;;  %13707 = vst [vmem:[#allocation3 + $0xd8] sm:$0x3] %v22406_v46 }
 0x58b   :  { %13708 = vst [vmem:[#allocation3 + $0xe0] sm:$0xff] %v22406_v46  ;;  %13709 = vst [vmem:[#allocation3 + $0xe8] sm:$0x3] %v22406_v46 }
 0x58c   :  { %13710 = vst [vmem:[#allocation3 + $0xf0] sm:$0xff] %v22406_v46  ;;  %13711 = vst [vmem:[#allocation3 + $0xf8] sm:$0x3] %v22406_v46 }
 0x58d   :  { %13712 = vst [vmem:[#allocation3 + $0x100] sm:$0xff] %v22406_v46  ;;  %13713 = vst [vmem:[#allocation3 + $0x108] sm:$0x3] %v22406_v46 }
 0x58e   :  { %13714 = vst [vmem:[#allocation3 + $0x110] sm:$0xff] %v22406_v46  ;;  %13715 = vst [vmem:[#allocation3 + $0x118] sm:$0x3] %v22406_v46 }
 0x58f   :  { %13716 = vst [vmem:[#allocation3 + $0x120] sm:$0xff] %v22406_v46  ;;  %13717 = vst [vmem:[#allocation3 + $0x128] sm:$0x3] %v22406_v46  ;;  %v17717_v46 = vld [vmem:[%s27149_s0 + $0x98b] ss:$2 sm:$0xff] }
 0x590   :  { %v9261_v6 = vpack.c.bf16 %v17718_v63, %v17717_v46  ;;  %v9262_v46 = vpack.c.bf16 %v17720_v34, %v17719_v44  ;;  %v9263_v63 = vpack.c.bf16 %v17722_v9, %v17721_v18  ;;  %v26450_v44 = vld [vmem:[%s27150_s2] sm:$0xff]  }
 0x591   :  { %20289 = vmatprep.subr.bf16.mxu1 %v26450_v44 }
 0x592   :  { %20249 = vmatprep.mubr.msk.bf16.mxu0 %vm345_vm1, %v9261_v6  ;;  %v17724_v6 = vld [vmem:[%s27149_s0 + $0xa8b] ss:$2 sm:$0xff] }
 0x593   :  { %20250 = vmatmul.mubr.msk.bf16.gmra.mrb[56].mxu0 %vm345_vm1, %v9262_v46  ;;  %v9264_v51 = vpack.c.bf16 %v17724_v6, %v17723_v40 }
 0x594   :  { %20253 = vmatprep.mubr.msk.bf16.mxu0 %vm345_vm1, %v9263_v63 }
 0x59b   :  { %20254 = vmatmul.mubr.msk.bf16.gmra.mrb[60].mxu0 %vm345_vm1, %v9264_v51 }
 0x5d9   :  { %v20195_v34 = vpop.f32.mrb[0].mxu0 }
 0x5da   :  { %v20949_v18 = vadd.f32 %v20195_v34, %v25162_v11  ;;  %v9400_v9 = vpop.f32.mrb[1].mxu0 }
 0x5db   :  { %v20950_v56 = vadd.f32 %v9400_v9, %v25171_v15  ;;  %v20196_v46 = vpop.f32.mrb[2].mxu0 }
 0x5dc   :  { %vm9721_vm2 = vcmp.ge.f32.partialorder %v20949_v18, 0.0  ;;  %v9785_v63 = vmul.f32 0.2, %v20949_v18  ;;  %v20951_v23 = vadd.f32 %v20196_v46, %v25179_v17  ;;  %v9403_v40 = vpop.f32.mrb[3].mxu0 }
 0x5dd   :  { %vm9719_vm3 = vcmp.ge.f32.partialorder %v20950_v56, 0.0  ;;  %v9783_v6 = vmul.f32 0.2, %v20950_v56  ;;  %v20952_v51 = vadd.f32 %v9403_v40, %v25181_v12 }
 0x5de   :  { %v9849_v8 = vsel %vm9721_vm2, %v20949_v18, %v9785_v63  ;;  %vm9722_vm4 = vcmp.ge.f32.partialorder %v20951_v23, 0.0  ;;  %v9786_v2 = vmul.f32 0.2, %v20951_v23 }
 0x5df   :  { %10022 = vst [vmem:[#allocation2 + $0x31] sm:$0xff] %v9849_v8  ;;  %v9847_v26 = vsel %vm9719_vm3, %v20950_v56, %v9783_v6  ;;  %vm9720_vm5 = vcmp.ge.f32.partialorder %v20952_v51, 0.0  ;;  %v9784_v11 = vmul.f32 0.2, %v20952_v51 }
 0x5e0   :  { %10020 = vst [vmem:[#allocation2 + $0x19] sm:$0xff] %v9847_v26  ;;  %v9850_v34 = vsel %vm9722_vm4, %v20951_v23, %v9786_v2  ;;  %v10140_v23 = vld [vmem:[#allocation2 + $0x1] ss:$2 sm:$0xff] }
 0x5e1   :  { %10023 = vst [vmem:[#allocation2 + $0x39] sm:$0xff] %v9850_v34  ;;  %v9848_v15 = vsel %vm9720_vm5, %v20952_v51, %v9784_v11  ;;  %v20199_v9 = vpop.f32.mrb[4].mxu0 }
 0x5e2   :  { %10021 = vst [vmem:[#allocation2 + $0x21] sm:$0xff] %v9848_v15  ;;  %v20953_v17 = vadd.f32 %v20199_v9, %v25184_v21  ;;  %v9416_v46 = vpop.f32.mrb[5].mxu0 }
 0x5e3   :  { %v20954_v16 = vadd.f32 %v9416_v46, %v25193_v24  ;;  %v20200_v3 = vpop.f32.mrb[6].mxu0 }
 0x5e4   :  { %vm9725_vm6 = vcmp.ge.f32.partialorder %v20953_v17, 0.0  ;;  %v9789_v12 = vmul.f32 0.2, %v20953_v17  ;;  %v20955_v18 = vadd.f32 %v20200_v3, %v25201_v27  ;;  %v9419_v8 = vpop.f32.mrb[7].mxu0 }
 0x5e5   :  { %vm9723_vm7 = vcmp.ge.f32.partialorder %v20954_v16, 0.0  ;;  %v9787_v56 = vmul.f32 0.2, %v20954_v16  ;;  %v20956_v26 = vadd.f32 %v9419_v8, %v25203_v28 }
 0x5e6   :  { %v9853_v2 = vsel %vm9725_vm6, %v20953_v17, %v9789_v12  ;;  %vm9726_vm8 = vcmp.ge.f32.partialorder %v20955_v18, 0.0  ;;  %v9790_v63 = vmul.f32 0.2, %v20955_v18 }
 0x5e7   :  { %10026 = vst [vmem:[#allocation2 + $0x61] sm:$0xff] %v9853_v2  ;;  %v9851_v40 = vsel %vm9723_vm7, %v20954_v16, %v9787_v56  ;;  %vm9724_vm9 = vcmp.ge.f32.partialorder %v20956_v26, 0.0  ;;  %v9788_v21 = vmul.f32 0.2, %v20956_v26 }
 0x5e8   :  { %10024 = vst [vmem:[#allocation2 + $0x49] sm:$0xff] %v9851_v40  ;;  %v9854_v24 = vsel %vm9726_vm8, %v20955_v18, %v9790_v63  ;;  %v10142_v6 = vld [vmem:[#allocation2 + $0x31] ss:$2 sm:$0xff] }
 0x5e9   :  { %10027 = vst [vmem:[#allocation2 + $0x69] sm:$0xff] %v9854_v24  ;;  %v9852_v51 = vsel %vm9724_vm9, %v20956_v26, %v9788_v21  ;;  %v20203_v11 = vpop.f32.mrb[8].mxu0  ;;  %v10171_v27 = vpack.c.bf16 %v10142_v6, %v10140_v23 }
 0x5ea   :  { %10025 = vst [vmem:[#allocation2 + $0x51] sm:$0xff] %v9852_v51  ;;  %v20957_v3 = vadd.f32 %v20203_v11, %v25206_v32  ;;  %v9432_v34 = vpop.f32.mrb[9].mxu0 }
 0x5eb   :  { %v20958_v28 = vadd.f32 %v9432_v34, %v25215_v35  ;;  %v20204_v15 = vpop.f32.mrb[10].mxu0  ;;  %20273 = vmatprep.mubr.bf16.mxu1 %v10171_v27 }
 0x5ec   :  { %vm9729_vm10 = vcmp.ge.f32.partialorder %v20957_v3, 0.0  ;;  %v9793_v9 = vmul.f32 0.2, %v20957_v3  ;;  %v20959_v16 = vadd.f32 %v20204_v15, %v25223_v38  ;;  %v9435_v17 = vpop.f32.mrb[11].mxu0 }
 0x5ed   :  { %vm9727_vm11 = vcmp.ge.f32.partialorder %v20958_v28, 0.0  ;;  %v9791_v46 = vmul.f32 0.2, %v20958_v28  ;;  %v20960_v12 = vadd.f32 %v9435_v17, %v25225_v39 }
 0x5ee   :  { %v9857_v18 = vsel %vm9729_vm10, %v20957_v3, %v9793_v9  ;;  %vm9730_vm12 = vcmp.ge.f32.partialorder %v20959_v16, 0.0  ;;  %v9794_v8 = vmul.f32 0.2, %v20959_v16 }
 0x5ef   :  { %10030 = vst [vmem:[#allocation2 + $0x91] sm:$0xff] %v9857_v18  ;;  %v9855_v56 = vsel %vm9727_vm11, %v20958_v28, %v9791_v46  ;;  %vm9728_vm13 = vcmp.ge.f32.partialorder %v20960_v12, 0.0  ;;  %v9792_v32 = vmul.f32 0.2, %v20960_v12 }
 0x5f0   :  { %10028 = vst [vmem:[#allocation2 + $0x79] sm:$0xff] %v9855_v56  ;;  %v9858_v35 = vsel %vm9730_vm12, %v20959_v16, %v9794_v8  ;;  %v22207_v16 = vld [vmem:[%s27150_s2 + $0x8] sm:$0xff]  }
 0x5f1   :  { %10031 = vst [vmem:[#allocation2 + $0x99] sm:$0xff] %v9858_v35  ;;  %v9856_v26 = vsel %vm9728_vm13, %v20960_v12, %v9792_v32  ;;  %v20207_v2 = vpop.f32.mrb[12].mxu0 }
 0x5f2   :  { %10029 = vst [vmem:[#allocation2 + $0x81] sm:$0xff] %v9856_v26  ;;  %v20961_v38 = vadd.f32 %v20207_v2, %v25228_v42  ;;  %v9448_v63 = vpop.f32.mrb[13].mxu0 }
 0x5f3   :  { %v20962_v23 = vadd.f32 %v9448_v63, %v25237_v45  ;;  %v20208_v40 = vpop.f32.mrb[14].mxu0  ;;  %v10144_v45 = vld [vmem:[#allocation2 + $0x61] ss:$2 sm:$0xff] }
 0x5f4   :  { %vm9733_vm14 = vcmp.ge.f32.partialorder %v20961_v38, 0.0  ;;  %v9797_v39 = vmul.f32 0.2, %v20961_v38  ;;  %v20963_v21 = vadd.f32 %v20208_v40, %v25245_v48  ;;  %v9451_v24 = vpop.f32.mrb[15].mxu0 }
 0x5f5   :  { %vm9731_vm15 = vcmp.ge.f32.partialorder %v20962_v23, 0.0  ;;  %v9795_v6 = vmul.f32 0.2, %v20962_v23  ;;  %v20964_v51 = vadd.f32 %v9451_v24, %v25247_v49 }
 0x5f6   :  { %v9861_v11 = vsel %vm9733_vm14, %v20961_v38, %v9797_v39  ;;  %vm9734_vm0 = vcmp.ge.f32.partialorder %v20963_v21, 0.0  ;;  %v9798_v27 = vmul.f32 0.2, %v20963_v21 }
 0x5f7   :  { %10034 = vst [vmem:[#allocation2 + $0xc1] sm:$0xff] %v9861_v11  ;;  %v9859_v3 = vsel %vm9731_vm15, %v20962_v23, %v9795_v6  ;;  %vm9732_vm1 = vcmp.ge.f32.partialorder %v20964_v51, 0.0  ;;  %v9796_v42 = vmul.f32 0.2, %v20964_v51 }
 0x5f8   :  { %10032 = vst [vmem:[#allocation2 + $0xa9] sm:$0xff] %v9859_v3  ;;  %v9862_v34 = vsel %vm9734_vm0, %v20963_v21, %v9798_v27  ;;  %v10146_v28 = vld [vmem:[#allocation2 + $0x91] ss:$2 sm:$0xff]  ;;  %v22210_v3 = vld [vmem:[%s27150_s2 + $0x20] sm:$0xff]  }
 0x5f9   :  { %10035 = vst [vmem:[#allocation2 + $0xc9] sm:$0xff] %v9862_v34  ;;  %v9860_v15 = vsel %vm9732_vm1, %v20964_v51, %v9796_v42  ;;  %v20211_v9 = vpop.f32.mrb[16].mxu0  ;;  %v10172_v48 = vpack.c.bf16 %v10146_v28, %v10144_v45 }
 0x5fa   :  { %10033 = vst [vmem:[#allocation2 + $0xb1] sm:$0xff] %v9860_v15  ;;  %v20965_v49 = vadd.f32 %v20211_v9, %v25250_v52  ;;  %v9464_v17 = vpop.f32.mrb[17].mxu0  ;;  %v22208_v52 = vld [vmem:[%s27150_s2 + $0x10] sm:$0xff]  }
 0x5fb   :  { %v20966_v46 = vadd.f32 %v9464_v17, %v25259_v55  ;;  %v20212_v12 = vpop.f32.mrb[18].mxu0  ;;  %20274 = vmatmul.mubr.bf16.vlgmr.msra.gmra.mrb[64].mxu1 %v10172_v48  ;;  %v22211_v48 = vld [vmem:[%s27150_s2 + $0x28] sm:$0xff]  }
 0x5fc   :  { %vm9737_vm2 = vcmp.ge.f32.partialorder %v20965_v49, 0.0  ;;  %v9801_v18 = vmul.f32 0.2, %v20965_v49  ;;  %v20967_v8 = vadd.f32 %v20212_v12, %v25267_v29  ;;  %v9467_v56 = vpop.f32.mrb[19].mxu0  ;;  %20290 = vmatpush3.bf16.msra.mxu1 %v26450_v44 }
 0x5fd   :  { %vm9735_vm3 = vcmp.ge.f32.partialorder %v20966_v46, 0.0  ;;  %v9799_v32 = vmul.f32 0.2, %v20966_v46  ;;  %v20968_v35 = vadd.f32 %v9467_v56, %v25269_v59  ;;  %20291 = vmatprep.subr.bf16.mxu1 %v22207_v16  ;;  %v22209_v59 = vld [vmem:[%s27150_s2 + $0x18] sm:$0xff]  }
 0x5fe   :  { %v9865_v26 = vsel %vm9737_vm2, %v20965_v49, %v9801_v18  ;;  %vm9738_vm4 = vcmp.ge.f32.partialorder %v20967_v8, 0.0  ;;  %v9802_v55 = vmul.f32 0.2, %v20967_v8 }
 0x5ff   :  { %10038 = vst [vmem:[#allocation2 + $0xf1] sm:$0xff] %v9865_v26  ;;  %v9863_v2 = vsel %vm9735_vm3, %v20966_v46, %v9799_v32  ;;  %vm9736_vm5 = vcmp.ge.f32.partialorder %v20968_v35, 0.0  ;;  %v9800_v38 = vmul.f32 0.2, %v20968_v35 }
 0x600   :  { %10036 = vst [vmem:[#allocation2 + $0xd9] sm:$0xff] %v9863_v2  ;;  %v9866_v29 = vsel %vm9738_vm4, %v20967_v8, %v9802_v55  ;;  %20292 = vmatpush3.bf16.msra.mxu1 %v22207_v16  ;;  %v10148_v45 = vld [vmem:[#allocation2 + $0xc1] ss:$2 sm:$0xff] }
 0x601   :  { %10039 = vst [vmem:[#allocation2 + $0xf9] sm:$0xff] %v9866_v29  ;;  %v9864_v44 = vsel %vm9736_vm5, %v20968_v35, %v9800_v38  ;;  %v20215_v63 = vpop.f32.mrb[20].mxu0  ;;  %20293 = vmatprep.subr.bf16.mxu1 %v22208_v52 }
 0x602   :  { %10037 = vst [vmem:[#allocation2 + $0xe1] sm:$0xff] %v9864_v44  ;;  %v20969_v23 = vadd.f32 %v20215_v63, %v25272_v62  ;;  %v9480_v40 = vpop.f32.mrb[21].mxu0 }
 0x603   :  { %v20970_v39 = vadd.f32 %v9480_v40, %v25281_v1  ;;  %v20216_v21 = vpop.f32.mrb[22].mxu0 }
 0x604   :  { %vm9741_vm6 = vcmp.ge.f32.partialorder %v20969_v23, 0.0  ;;  %v9805_v24 = vmul.f32 0.2, %v20969_v23  ;;  %v20971_v6 = vadd.f32 %v20216_v21, %v25289_v4  ;;  %v9483_v51 = vpop.f32.mrb[23].mxu0  ;;  %20294 = vmatpush3.bf16.msra.mxu1 %v22208_v52 }
 0x605   :  { %vm9739_vm7 = vcmp.ge.f32.partialorder %v20970_v39, 0.0  ;;  %v9803_v11 = vmul.f32 0.2, %v20970_v39  ;;  %v20972_v27 = vadd.f32 %v9483_v51, %v25291_v5  ;;  %20295 = vmatprep.subr.bf16.mxu1 %v22209_v59 }
 0x606   :  { %v9869_v62 = vsel %vm9741_vm6, %v20969_v23, %v9805_v24  ;;  %vm9742_vm8 = vcmp.ge.f32.partialorder %v20971_v6, 0.0  ;;  %v9806_v42 = vmul.f32 0.2, %v20971_v6  ;;  %v26510_v24 = vld [vmem:[%s27150_s2 + $0x80] sm:$0xff]  }
 0x607   :  { %10042 = vst [vmem:[#allocation2 + $0x121] sm:$0xff] %v9869_v62  ;;  %v9867_v1 = vsel %vm9739_vm7, %v20970_v39, %v9803_v11  ;;  %vm9740_vm9 = vcmp.ge.f32.partialorder %v20972_v27, 0.0  ;;  %v9804_v34 = vmul.f32 0.2, %v20972_v27 }
 0x608   :  { %10040 = vst [vmem:[#allocation2 + $0x109] sm:$0xff] %v9867_v1  ;;  %v9870_v4 = vsel %vm9742_vm8, %v20971_v6, %v9806_v42  ;;  %v10150_v28 = vld [vmem:[#allocation2 + $0xf1] ss:$2 sm:$0xff]  ;;  %20296 = vmatpush3.bf16.msra.mxu1 %v22209_v59 }
 0x609   :  { %10043 = vst [vmem:[#allocation2 + $0x129] sm:$0xff] %v9870_v4  ;;  %v9868_v15 = vsel %vm9740_vm9, %v20972_v27, %v9804_v34  ;;  %v20219_v5 = vpop.f32.mrb[24].mxu0  ;;  %v10173_v9 = vpack.c.bf16 %v10150_v28, %v10148_v45  ;;  %20297 = vmatprep.subr.bf16.mxu1 %v22210_v3 }
 0x60a   :  { %10041 = vst [vmem:[#allocation2 + $0x111] sm:$0xff] %v9868_v15  ;;  %v20973_v16 = vadd.f32 %v20219_v5, %v25301_v10  ;;  %v9496_v49 = vpop.f32.mrb[25].mxu0  ;;  %v22212_v10 = vld [vmem:[%s27150_s2 + $0x30] sm:$0xff]  }
 0x60b   :  { %v20974_v17 = vadd.f32 %v9496_v49, %v25310_v13  ;;  %v20220_v46 = vpop.f32.mrb[26].mxu0  ;;  %20277 = vmatprep.mubr.bf16.mxu1 %v10173_v9 }
 0x60c   :  { %vm9745_vm10 = vcmp.ge.f32.partialorder %v20973_v16, 0.0  ;;  %v9809_v12 = vmul.f32 0.2, %v20973_v16  ;;  %v20975_v18 = vadd.f32 %v20220_v46, %v25320_v19  ;;  %v9499_v8 = vpop.f32.mrb[27].mxu0  ;;  %20298 = vmatpush3.bf16.msra.mxu1 %v22210_v3 }
 0x60d   :  { %vm9743_vm11 = vcmp.ge.f32.partialorder %v20974_v17, 0.0  ;;  %v9807_v56 = vmul.f32 0.2, %v20974_v17  ;;  %v20976_v32 = vadd.f32 %v9499_v8, %v25322_v20  ;;  %20299 = vmatprep.subr.bf16.mxu1 %v22211_v48  ;;  %v22213_v20 = vld [vmem:[%s27150_s2 + $0x38] sm:$0xff]  }
 0x60e   :  { %v9873_v35 = vsel %vm9745_vm10, %v20973_v16, %v9809_v12  ;;  %vm9746_vm12 = vcmp.ge.f32.partialorder %v20975_v18, 0.0  ;;  %v9810_v13 = vmul.f32 0.2, %v20975_v18 }
 0x60f   :  { %10046 = vst [vmem:[#allocation2 + $0x151] sm:$0xff] %v9873_v35  ;;  %v9871_v52 = vsel %vm9743_vm11, %v20974_v17, %v9807_v56  ;;  %vm9744_vm13 = vcmp.ge.f32.partialorder %v20976_v32, 0.0  ;;  %v9808_v26 = vmul.f32 0.2, %v20976_v32 }
 0x610   :  { %10044 = vst [vmem:[#allocation2 + $0x139] sm:$0xff] %v9871_v52  ;;  %v9874_v19 = vsel %vm9746_vm12, %v20975_v18, %v9810_v13  ;;  %20300 = vmatpush3.bf16.msra.mxu1 %v22211_v48  ;;  %v10152_v11 = vld [vmem:[#allocation2 + $0x121] ss:$2 sm:$0xff] }
 0x611   :  { %10047 = vst [vmem:[#allocation2 + $0x159] sm:$0xff] %v9874_v19  ;;  %v9872_v55 = vsel %vm9744_vm13, %v20976_v32, %v9808_v26  ;;  %v20223_v2 = vpop.f32.mrb[28].mxu0  ;;  %20301 = vmatprep.subr.bf16.mxu1 %v22212_v10  ;;  %v10156_v26 = vld [vmem:[#allocation2 + $0x1b1] ss:$2 sm:$0xff] }
 0x612   :  { %10045 = vst [vmem:[#allocation2 + $0x141] sm:$0xff] %v9872_v55  ;;  %v20977_v38 = vadd.f32 %v20223_v2, %v25325_v25  ;;  %v9512_v29 = vpop.f32.mrb[29].mxu0 }
 0x613   :  { %v20978_v44 = vadd.f32 %v9512_v29, %v25334_v31  ;;  %v20224_v63 = vpop.f32.mrb[30].mxu0 }
 0x614   :  { %vm9749_vm14 = vcmp.ge.f32.partialorder %v20977_v38, 0.0  ;;  %v9813_v59 = vmul.f32 0.2, %v20977_v38  ;;  %v20979_v23 = vadd.f32 %v20224_v63, %v25342_v36  ;;  %v9515_v40 = vpop.f32.mrb[31].mxu0  ;;  %20302 = vmatpush3.bf16.msra.mxu1 %v22212_v10 }
 0x615   :  { %vm9747_vm15 = vcmp.ge.f32.partialorder %v20978_v44, 0.0  ;;  %v9811_v39 = vmul.f32 0.2, %v20978_v44  ;;  %v20980_v21 = vadd.f32 %v9515_v40, %v25344_v37  ;;  %20303 = vmatprep.subr.bf16.mxu1 %v22213_v20 }
 0x616   :  { %v9877_v25 = vsel %vm9749_vm14, %v20977_v38, %v9813_v59  ;;  %vm9750_vm0 = vcmp.ge.f32.partialorder %v20979_v23, 0.0  ;;  %v9814_v31 = vmul.f32 0.2, %v20979_v23 }
 0x617   :  { %10050 = vst [vmem:[#allocation2 + $0x181] sm:$0xff] %v9877_v25  ;;  %v9875_v6 = vsel %vm9747_vm15, %v20978_v44, %v9811_v39  ;;  %vm9748_vm1 = vcmp.ge.f32.partialorder %v20980_v21, 0.0  ;;  %v9812_v51 = vmul.f32 0.2, %v20980_v21 }
 0x618   :  { %10048 = vst [vmem:[#allocation2 + $0x169] sm:$0xff] %v9875_v6  ;;  %v9878_v36 = vsel %vm9750_vm0, %v20979_v23, %v9814_v31  ;;  %v10154_v27 = vld [vmem:[#allocation2 + $0x151] ss:$2 sm:$0xff]  ;;  %20304 = vmatpush3.bf16.msra.mxu1 %v22213_v20 }
 0x619   :  { %10051 = vst [vmem:[#allocation2 + $0x189] sm:$0xff] %v9878_v36  ;;  %v9876_v37 = vsel %vm9748_vm1, %v20980_v21, %v9812_v51  ;;  %v20227_v3 = vpop.f32.mrb[32].mxu0  ;;  %v10174_v62 = vpack.c.bf16 %v10154_v27, %v10152_v11  ;;  %20321 = vmatprep.subr.bf16.mxu1 %v26510_v24 }
 0x61a   :  { %10049 = vst [vmem:[#allocation2 + $0x171] sm:$0xff] %v9876_v37  ;;  %v20981_v42 = vadd.f32 %v20227_v3, %v25347_v43  ;;  %v9528_v1 = vpop.f32.mrb[33].mxu0 }
 0x61b   :  { %v20982_v34 = vadd.f32 %v9528_v1, %v25356_v47  ;;  %v20228_v4 = vpop.f32.mrb[34].mxu0  ;;  %20278 = vmatmul.mubr.bf16.gmra.mrb[68].mxu1 %v10174_v62 }
 0x61c   :  { %vm9753_vm2 = vcmp.ge.f32.partialorder %v20981_v42, 0.0  ;;  %v9817_v45 = vmul.f32 0.2, %v20981_v42  ;;  %v20983_v28 = vadd.f32 %v20228_v4, %v25364_v53  ;;  %v9531_v15 = vpop.f32.mrb[35].mxu0 }
 0x61d   :  { %vm9751_vm3 = vcmp.ge.f32.partialorder %v20982_v34, 0.0  ;;  %v9815_v5 = vmul.f32 0.2, %v20982_v34  ;;  %v20984_v9 = vadd.f32 %v9531_v15, %v25366_v54 }
 0x61e   :  { %v9881_v48 = vsel %vm9753_vm2, %v20981_v42, %v9817_v45  ;;  %vm9754_vm4 = vcmp.ge.f32.partialorder %v20983_v28, 0.0  ;;  %v9818_v16 = vmul.f32 0.2, %v20983_v28 }
 0x61f   :  { %10054 = vst [vmem:[#allocation2 + $0x1e1] sm:$0xff] %v9881_v48  ;;  %v9879_v49 = vsel %vm9751_vm3, %v20982_v34, %v9815_v5  ;;  %vm9752_vm5 = vcmp.ge.f32.partialorder %v20984_v9, 0.0  ;;  %v9816_v43 = vmul.f32 0.2, %v20984_v9 }
 0x620   :  { %10052 = vst [vmem:[#allocation2 + $0x1c9] sm:$0xff] %v9879_v49  ;;  %v9882_v47 = vsel %vm9754_vm4, %v20983_v28, %v9818_v16 }
 0x621   :  { %10055 = vst [vmem:[#allocation2 + $0x1e9] sm:$0xff] %v9882_v47  ;;  %v9880_v17 = vsel %vm9752_vm5, %v20984_v9, %v9816_v43  ;;  %v20231_v46 = vpop.f32.mrb[36].mxu0  ;;  %v27171_v9 = vld [vmem:[#allocation4_spill] sm:$0xff] }
 0x622   :  { %10053 = vst [vmem:[#allocation2 + $0x1d1] sm:$0xff] %v9880_v17  ;;  %v20985_v53 = vadd.f32 %v20231_v46, %v25369_v60  ;;  %v9544_v12 = vpop.f32.mrb[37].mxu0  ;;  %v27173_v17 = vld [vmem:[#allocation6_spill] sm:$0xff] }
 0x623   :  { %v20986_v18 = vadd.f32 %v9544_v12, %v25378_v58  ;;  %v20232_v8 = vpop.f32.mrb[38].mxu0 }
 0x624   :  { %vm9757_vm6 = vcmp.ge.f32.partialorder %v20985_v53, 0.0  ;;  %v9821_v54 = vmul.f32 0.2, %v20985_v53  ;;  %v20987_v56 = vadd.f32 %v20232_v8, %v25386_v0  ;;  %v9547_v32 = vpop.f32.mrb[39].mxu0 }
 0x625   :  { %vm9755_vm7 = vcmp.ge.f32.partialorder %v20986_v18, 0.0  ;;  %v9819_v10 = vmul.f32 0.2, %v20986_v18  ;;  %v20988_v35 = vadd.f32 %v9547_v32, %v25388_v7 }
 0x626   :  { %v9885_v13 = vsel %vm9757_vm6, %v20985_v53, %v9821_v54  ;;  %vm9758_vm8 = vcmp.ge.f32.partialorder %v20987_v56, 0.0  ;;  %v9822_v52 = vmul.f32 0.2, %v20987_v56 }
 0x627   :  { %10058 = vst [vmem:[#allocation2 + $0x211] sm:$0xff] %v9885_v13  ;;  %v9883_v19 = vsel %vm9755_vm7, %v20986_v18, %v9819_v10  ;;  %vm9756_vm9 = vcmp.ge.f32.partialorder %v20988_v35, 0.0  ;;  %v9820_v60 = vmul.f32 0.2, %v20988_v35  ;;  %v27174_v18 = vld [vmem:[#allocation7_spill] sm:$0xff] }
 0x628   :  { %10056 = vst [vmem:[#allocation2 + $0x1f9] sm:$0xff] %v9883_v19  ;;  %v9886_v58 = vsel %vm9758_vm8, %v20987_v56, %v9822_v52  ;;  %v10158_v55 = vld [vmem:[#allocation2 + $0x1e1] ss:$2 sm:$0xff] }
 0x629   :  { %10059 = vst [vmem:[#allocation2 + $0x219] sm:$0xff] %v9886_v58  ;;  %v9884_v2 = vsel %vm9756_vm9, %v20988_v35, %v9820_v60  ;;  %v20235_v20 = vpop.f32.mrb[40].mxu0  ;;  %v10175_v0 = vpack.c.bf16 %v10158_v55, %v10156_v26  ;;  %v27175_v26 = vld [vmem:[#allocation8_spill] sm:$0xff]  ;;  %v27176_v58 = vld [vmem:[#allocation9_spill] sm:$0xff] }
 0x62a   :  { %10057 = vst [vmem:[#allocation2 + $0x201] sm:$0xff] %v9884_v2  ;;  %v20989_v38 = vadd.f32 %v20235_v20, %v25391_v14  ;;  %v9560_v29 = vpop.f32.mrb[41].mxu0 }
 0x62b   :  { %v20990_v7 = vadd.f32 %v9560_v29, %v25400_v22  ;;  %v20236_v44 = vpop.f32.mrb[42].mxu0  ;;  %20281 = vmatprep.mubr.bf16.mxu1 %v10175_v0  ;;  %v27177_v0 = vld [vmem:[#allocation10_spill] sm:$0xff] }
 0x62c   :  { %vm9761_vm10 = vcmp.ge.f32.partialorder %v20989_v38, 0.0  ;;  %v9825_v63 = vmul.f32 0.2, %v20989_v38  ;;  %v20991_v59 = vadd.f32 %v20236_v44, %v25408_v30  ;;  %v9563_v23 = vpop.f32.mrb[43].mxu0  ;;  %v27178_v44 = vld [vmem:[#allocation11_spill] sm:$0xff] }
 0x62d   :  { %vm9759_vm11 = vcmp.ge.f32.partialorder %v20990_v7, 0.0  ;;  %v9823_v40 = vmul.f32 0.2, %v20990_v7  ;;  %v20992_v39 = vadd.f32 %v9563_v23, %v25410_v33 }
 0x62e   :  { %v9889_v21 = vsel %vm9761_vm10, %v20989_v38, %v9825_v63  ;;  %vm9762_vm12 = vcmp.ge.f32.partialorder %v20991_v59, 0.0  ;;  %v9826_v25 = vmul.f32 0.2, %v20991_v59 }
 0x62f   :  { %10062 = vst [vmem:[#allocation2 + $0x241] sm:$0xff] %v9889_v21  ;;  %v9887_v31 = vsel %vm9759_vm11, %v20990_v7, %v9823_v40  ;;  %vm9760_vm13 = vcmp.ge.f32.partialorder %v20992_v39, 0.0  ;;  %v9824_v14 = vmul.f32 0.2, %v20992_v39 }
 0x630   :  { %10060 = vst [vmem:[#allocation2 + $0x229] sm:$0xff] %v9887_v31  ;;  %v9890_v22 = vsel %vm9762_vm12, %v20991_v59, %v9826_v25 }
 0x631   :  { %10063 = vst [vmem:[#allocation2 + $0x249] sm:$0xff] %v9890_v22  ;;  %v9888_v6 = vsel %vm9760_vm13, %v20992_v39, %v9824_v14  ;;  %v20239_v51 = vpop.f32.mrb[44].mxu0 }
 0x632   :  { %10061 = vst [vmem:[#allocation2 + $0x231] sm:$0xff] %v9888_v6  ;;  %v20993_v30 = vadd.f32 %v20239_v51, %v25413_v41  ;;  %v9576_v36 = vpop.f32.mrb[45].mxu0  ;;  %v27179_v51 = vld [vmem:[#allocation12_spill] sm:$0xff] }
 0x633   :  { %v20994_v11 = vadd.f32 %v9576_v36, %v25422_v50  ;;  %v20240_v27 = vpop.f32.mrb[46].mxu0  ;;  %v10160_v50 = vld [vmem:[#allocation2 + $0x211] ss:$2 sm:$0xff] }
 0x634   :  { %vm9765_vm14 = vcmp.ge.f32.partialorder %v20993_v30, 0.0  ;;  %v9829_v33 = vmul.f32 0.2, %v20993_v30  ;;  %v20995_v37 = vadd.f32 %v20240_v27, %v25430_v57  ;;  %v9579_v3 = vpop.f32.mrb[47].mxu0 }
 0x635   :  { %vm9763_vm15 = vcmp.ge.f32.partialorder %v20994_v11, 0.0  ;;  %v9827_v62 = vmul.f32 0.2, %v20994_v11  ;;  %v20996_v42 = vadd.f32 %v9579_v3, %v25432_v61  ;;  %v27172_v61 = vld [vmem:[#allocation5_spill] sm:$0xff]  ;;  %v27181_v3 = vld [vmem:[#allocation14_spill] sm:$0xff] }
 0x636   :  { %v9893_v1 = vsel %vm9765_vm14, %v20993_v30, %v9829_v33  ;;  %vm9766_vm0 = vcmp.ge.f32.partialorder %v20995_v37, 0.0  ;;  %v9830_v34 = vmul.f32 0.2, %v20995_v37 }
 0x637   :  { %10066 = vst [vmem:[#allocation2 + $0x271] sm:$0xff] %v9893_v1  ;;  %v9891_v4 = vsel %vm9763_vm15, %v20994_v11, %v9827_v62  ;;  %vm9764_vm1 = vcmp.ge.f32.partialorder %v20996_v42, 0.0  ;;  %v9828_v41 = vmul.f32 0.2, %v20996_v42  ;;  %v27180_v11 = vld [vmem:[#allocation13_spill] sm:$0xff] }
 0x638   :  { %10064 = vst [vmem:[#allocation2 + $0x259] sm:$0xff] %v9891_v4  ;;  %v9894_v45 = vsel %vm9766_vm0, %v20995_v37, %v9830_v34  ;;  %v10162_v28 = vld [vmem:[#allocation2 + $0x241] ss:$2 sm:$0xff]  ;;  %v27182_v34 = vld [vmem:[#allocation15_spill] sm:$0xff] }
 0x639   :  { %10067 = vst [vmem:[#allocation2 + $0x279] sm:$0xff] %v9894_v45  ;;  %v9892_v15 = vsel %vm9764_vm1, %v20996_v42, %v9828_v41  ;;  %v20243_v5 = vpop.f32.mrb[48].mxu0  ;;  %v10176_v57 = vpack.c.bf16 %v10162_v28, %v10160_v50 }
 0x63a   :  { %10065 = vst [vmem:[#allocation2 + $0x261] sm:$0xff] %v9892_v15  ;;  %v20997_v48 = vadd.f32 %v20243_v5, %v27171_v9  ;;  %v9592_v16 = vpop.f32.mrb[49].mxu0  ;;  %v27183_v9 = vld [vmem:[#allocation16_spill] sm:$0xff] }
 0x63b   :  { %v20998_v49 = vadd.f32 %v9592_v16, %v27172_v61  ;;  %v20244_v43 = vpop.f32.mrb[50].mxu0  ;;  %20282 = vmatmul.mubr.bf16.gmra.mrb[72].mxu1 %v10176_v57  ;;  %v27184_v61 = vld [vmem:[#allocation17_spill] sm:$0xff] }
 0x63c   :  { %vm9769_vm2 = vcmp.ge.f32.partialorder %v20997_v48, 0.0  ;;  %v9833_v47 = vmul.f32 0.2, %v20997_v48  ;;  %v20999_v46 = vadd.f32 %v20244_v43, %v27173_v17  ;;  %v9595_v53 = vpop.f32.mrb[51].mxu0  ;;  %v27185_v17 = vld [vmem:[#allocation18_spill] sm:$0xff] }
 0x63d   :  { %vm9767_vm3 = vcmp.ge.f32.partialorder %v20998_v49, 0.0  ;;  %v9831_v12 = vmul.f32 0.2, %v20998_v49  ;;  %v21000_v8 = vadd.f32 %v9595_v53, %v27174_v18  ;;  %v27186_v18 = vld [vmem:[#allocation19_spill] sm:$0xff] }
 0x63e   :  { %v9897_v54 = vsel %vm9769_vm2, %v20997_v48, %v9833_v47  ;;  %vm9770_vm4 = vcmp.ge.f32.partialorder %v20999_v46, 0.0  ;;  %v9834_v56 = vmul.f32 0.2, %v20999_v46 }
 0x63f   :  { %10070 = vst [vmem:[#allocation2 + $0x2a1] sm:$0xff] %v9897_v54  ;;  %v9895_v32 = vsel %vm9767_vm3, %v20998_v49, %v9831_v12  ;;  %vm9768_vm5 = vcmp.ge.f32.partialorder %v21000_v8, 0.0  ;;  %v9832_v10 = vmul.f32 0.2, %v21000_v8 }
 0x640   :  { %10068 = vst [vmem:[#allocation2 + $0x289] sm:$0xff] %v9895_v32  ;;  %v9898_v35 = vsel %vm9770_vm4, %v20999_v46, %v9834_v56  ;;  %v10164_v25 = vld [vmem:[#allocation2 + $0x271] ss:$2 sm:$0xff]  ;;  %v10084_v32 = vld [vmem:[#allocation2] ss:$2 sm:$0xff] }
 0x641   :  { %10071 = vst [vmem:[#allocation2 + $0x2a9] sm:$0xff] %v9898_v35  ;;  %v9896_v13 = vsel %vm9768_vm5, %v21000_v8, %v9832_v10  ;;  %v20247_v52 = vpop.f32.mrb[52].mxu0 }
 0x642   :  { %10069 = vst [vmem:[#allocation2 + $0x291] sm:$0xff] %v9896_v13  ;;  %v21001_v19 = vadd.f32 %v20247_v52, %v27175_v26  ;;  %v9608_v60 = vpop.f32.mrb[53].mxu0  ;;  %v10086_v13 = vld [vmem:[#allocation2 + $0x30] ss:$2 sm:$0xff] }
 0x643   :  { %v21002_v55 = vadd.f32 %v9608_v60, %v27176_v58  ;;  %v20248_v2 = vpop.f32.mrb[54].mxu0 }
 0x644   :  { %vm9773_vm6 = vcmp.ge.f32.partialorder %v21001_v19, 0.0  ;;  %v9837_v20 = vmul.f32 0.2, %v21001_v19  ;;  %v21003_v38 = vadd.f32 %v20248_v2, %v27177_v0  ;;  %v9611_v29 = vpop.f32.mrb[55].mxu0  ;;  %v10090_v2 = vld [vmem:[#allocation2 + $0x90] ss:$2 sm:$0xff] }
 0x645   :  { %vm9771_vm7 = vcmp.ge.f32.partialorder %v21002_v55, 0.0  ;;  %v9835_v7 = vmul.f32 0.2, %v21002_v55  ;;  %v21004_v63 = vadd.f32 %v9611_v29, %v27178_v44  ;;  %v10088_v0 = vld [vmem:[#allocation2 + $0x60] ss:$2 sm:$0xff] }
 0x646   :  { %v9901_v59 = vsel %vm9773_vm6, %v21001_v19, %v9837_v20  ;;  %vm9774_vm8 = vcmp.ge.f32.partialorder %v21003_v38, 0.0  ;;  %v9838_v23 = vmul.f32 0.2, %v21003_v38  ;;  %v10094_v20 = vld [vmem:[#allocation2 + $0xf0] ss:$2 sm:$0xff] }
 0x647   :  { %10074 = vst [vmem:[#allocation2 + $0x2d1] sm:$0xff] %v9901_v59  ;;  %v9899_v40 = vsel %vm9771_vm7, %v21002_v55, %v9835_v7  ;;  %vm9772_vm9 = vcmp.ge.f32.partialorder %v21004_v63, 0.0  ;;  %v9836_v39 = vmul.f32 0.2, %v21004_v63  ;;  %v10115_v55 = vpack.c.bf16 %v10086_v13, %v10084_v32  ;;  %v10092_v29 = vld [vmem:[#allocation2 + $0xc0] ss:$2 sm:$0xff] }
 0x648   :  { %10072 = vst [vmem:[#allocation2 + $0x2b9] sm:$0xff] %v9899_v40  ;;  %v9902_v21 = vsel %vm9774_vm8, %v21003_v38, %v9838_v23  ;;  %v10166_v31 = vld [vmem:[#allocation2 + $0x2a1] ss:$2 sm:$0xff]  ;;  %v10116_v38 = vpack.c.bf16 %v10090_v2, %v10088_v0  ;;  %v10117_v44 = vpack.c.bf16 %v10094_v20, %v10092_v29  ;;  %v10098_v59 = vld [vmem:[#allocation2 + $0x150] ss:$2 sm:$0xff] }
 0x649   :  { %10075 = vst [vmem:[#allocation2 + $0x2d9] sm:$0xff] %v9902_v21  ;;  %v9900_v14 = vsel %vm9772_vm9, %v21004_v63, %v9836_v39  ;;  %v10177_v6 = vpack.c.bf16 %v10166_v31, %v10164_v25  ;;  %v22215_v7 = vld [vmem:[%s27150_s2 + $0x88] sm:$0xff]   ;;  %v22216_v63 = vld [vmem:[%s27150_s2 + $0x90] sm:$0xff]   ;;  %v22217_v25 = vld [vmem:[%s27150_s2 + $0x98] sm:$0xff]  }
 0x64a   :  { %10073 = vst [vmem:[#allocation2 + $0x2c1] sm:$0xff] %v9900_v14  ;;  %v10100_v23 = vld [vmem:[#allocation2 + $0x1b0] ss:$2 sm:$0xff]  ;;  %v10102_v40 = vld [vmem:[#allocation2 + $0x1e0] ss:$2 sm:$0xff] }
 0x64b   :  { %20285 = vmatprep.mubr.bf16.mxu1 %v10177_v6  ;;  %v10096_v39 = vld [vmem:[#allocation2 + $0x120] ss:$2 sm:$0xff]  ;;  %v10119_v31 = vpack.c.bf16 %v10102_v40, %v10100_v23  ;;  %v10104_v6 = vld [vmem:[#allocation2 + $0x210] ss:$2 sm:$0xff]  ;;  %v10705_v13 = vld [vmem:[#allocation2 + $0x3] ss:$2 sm:$0xff] }
 0x64c   :  { %v10118_v21 = vpack.c.bf16 %v10098_v59, %v10096_v39  ;;  %v10106_v14 = vld [vmem:[#allocation2 + $0x240] ss:$2 sm:$0xff]  ;;  %v10711_v2 = vld [vmem:[#allocation2 + $0x93] ss:$2 sm:$0xff]  ;;  %v10709_v0 = vld [vmem:[#allocation2 + $0x63] ss:$2 sm:$0xff] }
 0x64d   :  { %v10715_v20 = vld [vmem:[#allocation2 + $0xf3] ss:$2 sm:$0xff]  ;;  %v10713_v29 = vld [vmem:[#allocation2 + $0xc3] ss:$2 sm:$0xff] }
 0x64e   :  { %v10719_v59 = vld [vmem:[#allocation2 + $0x153] ss:$2 sm:$0xff]  ;;  %v10723_v40 = vld [vmem:[#allocation2 + $0x1e3] ss:$2 sm:$0xff] }
 0x64f   :  { %v10721_v23 = vld [vmem:[#allocation2 + $0x1b3] ss:$2 sm:$0xff]  ;;  %v10717_v39 = vld [vmem:[#allocation2 + $0x123] ss:$2 sm:$0xff] }
 0x650   :  { %v10168_v26 = vld [vmem:[#allocation2 + $0x2d1] ss:$2 sm:$0xff] }
 0x666   :  { %v20251_v22 = vpop.f32.mrb[56].mxu0 }
 0x667   :  { %v21005_v30 = vadd.f32 %v20251_v22, %v27179_v51  ;;  %v9624_v36 = vpop.f32.mrb[57].mxu0  ;;  %v10110_v22 = vld [vmem:[#allocation2 + $0x2a0] ss:$2 sm:$0xff]  ;;  %v10120_v51 = vpack.c.bf16 %v10106_v14, %v10104_v6  ;;  %v10727_v14 = vld [vmem:[#allocation2 + $0x243] ss:$2 sm:$0xff] }
 0x668   :  { %v21006_v27 = vadd.f32 %v9624_v36, %v27180_v11  ;;  %v20252_v33 = vpop.f32.mrb[58].mxu0  ;;  %v22219_v36 = vld [vmem:[%s27150_s2 + $0xa8] sm:$0xff]   ;;  %v10725_v6 = vld [vmem:[#allocation2 + $0x213] ss:$2 sm:$0xff] }
 0x669   :  { %vm9777_vm10 = vcmp.ge.f32.partialorder %v21005_v30, 0.0  ;;  %v9841_v37 = vmul.f32 0.2, %v21005_v30  ;;  %v21007_v62 = vadd.f32 %v20252_v33, %v27181_v3  ;;  %v9627_v42 = vpop.f32.mrb[59].mxu0  ;;  %v10489_v3 = vld [vmem:[#allocation2 + $0x32] ss:$2 sm:$0xff] }
 0x66a   :  { %vm9775_vm11 = vcmp.ge.f32.partialorder %v21006_v27, 0.0  ;;  %v9839_v1 = vmul.f32 0.2, %v21006_v27  ;;  %v21008_v4 = vadd.f32 %v9627_v42, %v27182_v34 }
 0x66b   :  { %v9905_v41 = vsel %vm9777_vm10, %v21005_v30, %v9841_v37  ;;  %vm9778_vm12 = vcmp.ge.f32.partialorder %v21007_v62, 0.0  ;;  %v9842_v45 = vmul.f32 0.2, %v21007_v62  ;;  %v10108_v30 = vld [vmem:[#allocation2 + $0x270] ss:$2 sm:$0xff] }
 0x66c   :  { %10078 = vst [vmem:[#allocation2 + $0x301] sm:$0xff] %v9905_v41  ;;  %v9903_v50 = vsel %vm9775_vm11, %v21006_v27, %v9839_v1  ;;  %vm9776_vm13 = vcmp.ge.f32.partialorder %v21008_v4, 0.0  ;;  %v9840_v28 = vmul.f32 0.2, %v21008_v4  ;;  %v10121_v11 = vpack.c.bf16 %v10110_v22, %v10108_v30  ;;  %v22220_v27 = vld [vmem:[%s27150_s2 + $0xb0] sm:$0xff]   ;;  %v22221_v1 = vld [vmem:[%s27150_s2 + $0xb8] sm:$0xff]  }
 0x66d   :  { %10076 = vst [vmem:[#allocation2 + $0x2e9] sm:$0xff] %v9903_v50  ;;  %v9906_v15 = vsel %vm9778_vm12, %v21007_v62, %v9842_v45  ;;  %v10487_v37 = vld [vmem:[#allocation2 + $0x2] ss:$2 sm:$0xff]  ;;  %v10493_v41 = vld [vmem:[#allocation2 + $0x92] ss:$2 sm:$0xff] }
 0x66e   :  { %10079 = vst [vmem:[#allocation2 + $0x309] sm:$0xff] %v9906_v15  ;;  %v9904_v5 = vsel %vm9776_vm13, %v21008_v4, %v9840_v28  ;;  %v20255_v57 = vpop.f32.mrb[60].mxu0  ;;  %v10112_v62 = vld [vmem:[#allocation2 + $0x2d0] ss:$2 sm:$0xff]  ;;  %v10518_v34 = vpack.c.bf16 %v10489_v3, %v10487_v37  ;;  %v22222_v4 = vld [vmem:[%s27150_s2 + $0xc0] sm:$0xff]  }
 0x66f   :  { %10077 = vst [vmem:[#allocation2 + $0x2f1] sm:$0xff] %v9904_v5  ;;  %v21009_v48 = vadd.f32 %v20255_v57, %v27183_v9  ;;  %v9640_v16 = vpop.f32.mrb[61].mxu0  ;;  %v10497_v45 = vld [vmem:[#allocation2 + $0xf2] ss:$2 sm:$0xff]  ;;  %v10491_v50 = vld [vmem:[#allocation2 + $0x62] ss:$2 sm:$0xff] }
 0x670   :  { %v21010_v49 = vadd.f32 %v9640_v16, %v27184_v61  ;;  %v20256_v43 = vpop.f32.mrb[62].mxu0  ;;  %v10519_v28 = vpack.c.bf16 %v10493_v41, %v10491_v50  ;;  %v10495_v15 = vld [vmem:[#allocation2 + $0xc2] ss:$2 sm:$0xff]  ;;  %v10503_v16 = vld [vmem:[#allocation2 + $0x1b2] ss:$2 sm:$0xff] }
 0x671   :  { %vm9781_vm14 = vcmp.ge.f32.partialorder %v21009_v48, 0.0  ;;  %v9845_v47 = vmul.f32 0.2, %v21009_v48  ;;  %v21011_v46 = vadd.f32 %v20256_v43, %v27185_v17  ;;  %v9643_v53 = vpop.f32.mrb[63].mxu0  ;;  %v22223_v5 = vld [vmem:[%s27150_s2 + $0xc8] sm:$0xff]   ;;  %v10520_v57 = vpack.c.bf16 %v10497_v45, %v10495_v15  ;;  %v22224_v9 = vld [vmem:[%s27150_s2 + $0xd0] sm:$0xff]  }
 0x672   :  { %vm9779_vm15 = vcmp.ge.f32.partialorder %v21010_v49, 0.0  ;;  %v9843_v12 = vmul.f32 0.2, %v21010_v49  ;;  %v21012_v8 = vadd.f32 %v9643_v53, %v27186_v18  ;;  %v10505_v61 = vld [vmem:[#allocation2 + $0x1e2] ss:$2 sm:$0xff] }
 0x673   :  { %v9909_v54 = vsel %vm9781_vm14, %v21009_v48, %v9845_v47  ;;  %vm9782_vm0 = vcmp.ge.f32.partialorder %v21011_v46, 0.0  ;;  %v9846_v56 = vmul.f32 0.2, %v21011_v46  ;;  %v10501_v48 = vld [vmem:[#allocation2 + $0x152] ss:$2 sm:$0xff]  ;;  %v10522_v17 = vpack.c.bf16 %v10505_v61, %v10503_v16 }
 0x674   :  { %10082 = vst [vmem:[#allocation2 + $0x331] sm:$0xff] %v9909_v54  ;;  %v9907_v10 = vsel %vm9779_vm15, %v21010_v49, %v9843_v12  ;;  %vm9780_vm1 = vcmp.ge.f32.partialorder %v21012_v8, 0.0  ;;  %v9844_v35 = vmul.f32 0.2, %v21012_v8  ;;  %v10499_v49 = vld [vmem:[#allocation2 + $0x122] ss:$2 sm:$0xff] }
 0x675   :  { %10080 = vst [vmem:[#allocation2 + $0x319] sm:$0xff] %v9907_v10  ;;  %v9910_v52 = vsel %vm9782_vm0, %v21011_v46, %v9846_v56  ;;  %v10170_v19 = vld [vmem:[#allocation2 + $0x301] ss:$2 sm:$0xff]  ;;  %v10114_v33 = vld [vmem:[#allocation2 + $0x300] ss:$2 sm:$0xff]  ;;  %v10521_v43 = vpack.c.bf16 %v10501_v48, %v10499_v49  ;;  %v22225_v47 = vld [vmem:[%s27150_s2 + $0xd8] sm:$0xff]  }
 0x676   :  { %10083 = vst [vmem:[#allocation2 + $0x339] sm:$0xff] %v9910_v52  ;;  %v9908_v60 = vsel %vm9780_vm1, %v21012_v8, %v9844_v35  ;;  %v10178_v58 = vpack.c.bf16 %v10170_v19, %v10168_v26  ;;  %v10122_v42 = vpack.c.bf16 %v10114_v33, %v10112_v62  ;;  %v22226_v46 = vld [vmem:[%s27150_s2 + $0xe0] sm:$0xff]   ;;  %v22227_v56 = vld [vmem:[%s27150_s2 + $0xe8] sm:$0xff]   ;;  %v22228_v10 = vld [vmem:[%s27150_s2 + $0xf0] sm:$0xff]  }
 0x677   :  { %10081 = vst [vmem:[#allocation2 + $0x321] sm:$0xff] %v9908_v60  ;;  %v10509_v53 = vld [vmem:[#allocation2 + $0x242] ss:$2 sm:$0xff]  ;;  %v10507_v18 = vld [vmem:[#allocation2 + $0x212] ss:$2 sm:$0xff] }
 0x678   :  { %20286 = vmatmul.mubr.bf16.gmra.mrb[76].mxu1 %v10178_v58  ;;  %v10513_v12 = vld [vmem:[#allocation2 + $0x2a2] ss:$2 sm:$0xff]  ;;  %v10523_v8 = vpack.c.bf16 %v10509_v53, %v10507_v18  ;;  %v10511_v54 = vld [vmem:[#allocation2 + $0x272] ss:$2 sm:$0xff]  ;;  %v10707_v52 = vld [vmem:[#allocation2 + $0x33] ss:$2 sm:$0xff] }
 0x679   :  { %20305 = vmatprep.mubr.bf16.mxu1 %v10115_v55  ;;  %v10524_v32 = vpack.c.bf16 %v10513_v12, %v10511_v54  ;;  %v10517_v35 = vld [vmem:[#allocation2 + $0x302] ss:$2 sm:$0xff]  ;;  %v10515_v26 = vld [vmem:[#allocation2 + $0x2d2] ss:$2 sm:$0xff]  ;;  %v10736_v58 = vpack.c.bf16 %v10707_v52, %v10705_v13  ;;  %v10731_v22 = vld [vmem:[#allocation2 + $0x2a3] ss:$2 sm:$0xff] }
 0x67a   :  { %v10525_v19 = vpack.c.bf16 %v10517_v35, %v10515_v26  ;;  %v22229_v60 = vld [vmem:[%s27150_s2 + $0xf8] sm:$0xff]   ;;  %v22230_v55 = vld [vmem:[%s27150_s2 + $0x100] sm:$0xff]   ;;  %v10924_v37 = vld [vmem:[#allocation2 + $0x48] ss:$2 sm:$0xff] }
 0x67b   :  { %v10729_v30 = vld [vmem:[#allocation2 + $0x273] ss:$2 sm:$0xff]  ;;  %v10735_v33 = vld [vmem:[#allocation2 + $0x303] ss:$2 sm:$0xff]  ;;  %v10928_v41 = vld [vmem:[#allocation2 + $0xa8] ss:$2 sm:$0xff] }
 0x67c   :  { %v10733_v3 = vld [vmem:[#allocation2 + $0x2d3] ss:$2 sm:$0xff]  ;;  %v10932_v45 = vld [vmem:[#allocation2 + $0x108] ss:$2 sm:$0xff]  ;;  %v10926_v50 = vld [vmem:[#allocation2 + $0x78] ss:$2 sm:$0xff] }
 0x67d   :  { %v10743_v62 = vpack.c.bf16 %v10735_v33, %v10733_v3  ;;  %v10930_v15 = vld [vmem:[#allocation2 + $0xd8] ss:$2 sm:$0xff]  ;;  %v10936_v48 = vld [vmem:[#allocation2 + $0x168] ss:$2 sm:$0xff]  ;;  %v11142_v13 = vld [vmem:[#allocation2 + $0x49] ss:$2 sm:$0xff] }
 0x67e   :  { %v10940_v16 = vld [vmem:[#allocation2 + $0x1f8] ss:$2 sm:$0xff]  ;;  %v10942_v18 = vld [vmem:[#allocation2 + $0x228] ss:$2 sm:$0xff]  ;;  %v11170_v33 = vld [vmem:[#allocation2 + $0x319] ss:$2 sm:$0xff] }
 0x67f   :  { %v10934_v61 = vld [vmem:[#allocation2 + $0x138] ss:$2 sm:$0xff]  ;;  %v10946_v54 = vld [vmem:[#allocation2 + $0x288] ss:$2 sm:$0xff]  ;;  %v11168_v3 = vld [vmem:[#allocation2 + $0x2e9] ss:$2 sm:$0xff] }
 0x680   :  { %20306 = vmatmul.mubr.bf16.vlgmr.msra.gmra.mrb[64].mxu1 %v10116_v38  ;;  %v10737_v38 = vpack.c.bf16 %v10711_v2, %v10709_v0  ;;  %v10956_v49 = vpack.c.bf16 %v10936_v48, %v10934_v61  ;;  %v10944_v53 = vld [vmem:[#allocation2 + $0x258] ss:$2 sm:$0xff]  ;;  %v10950_v52 = vld [vmem:[#allocation2 + $0x2e8] ss:$2 sm:$0xff]  ;;  %v11146_v2 = vld [vmem:[#allocation2 + $0xa9] ss:$2 sm:$0xff] }
 0x681   :  { %20309 = vmatprep.mubr.bf16.mxu1 %v10117_v44  ;;  %20322 = vmatpush3.bf16.msra.mxu1 %v26510_v24  ;;  %v22218_v24 = vld [vmem:[%s27150_s2 + $0xa0] sm:$0xff]   ;;  %v10738_v44 = vpack.c.bf16 %v10715_v20, %v10713_v29  ;;  %v11150_v20 = vld [vmem:[#allocation2 + $0x109] ss:$2 sm:$0xff]  ;;  %v11372_v48 = vld [vmem:[#allocation2 + $0x16a] ss:$2 sm:$0xff] }
 0x682   :  { %20323 = vmatprep.subr.bf16.mxu1 %v22215_v7  ;;  %v10948_v12 = vld [vmem:[#allocation2 + $0x2b8] ss:$2 sm:$0xff]  ;;  %v11144_v0 = vld [vmem:[#allocation2 + $0x79] ss:$2 sm:$0xff] }
 0x683   :  { %v10952_v35 = vld [vmem:[#allocation2 + $0x318] ss:$2 sm:$0xff]  ;;  %v11148_v29 = vld [vmem:[#allocation2 + $0xd9] ss:$2 sm:$0xff] }
 0x684   :  { %v10960_v26 = vpack.c.bf16 %v10952_v35, %v10950_v52  ;;  %v11370_v61 = vld [vmem:[#allocation2 + $0x13a] ss:$2 sm:$0xff]  ;;  %v11386_v52 = vld [vmem:[#allocation2 + $0x2ea] ss:$2 sm:$0xff] }
 0x685   :  { %20324 = vmatpush3.bf16.msra.mxu1 %v22215_v7  ;;  %v22231_v7 = vld [vmem:[%s27150_s2 + $0x108] sm:$0xff]  }
 0x686   :  { %20325 = vmatprep.subr.bf16.mxu1 %v22216_v63  ;;  %v11388_v35 = vld [vmem:[#allocation2 + $0x31a] ss:$2 sm:$0xff] }
 0x688   :  { %20310 = vmatmul.mubr.bf16.gmra.mrb[68].mxu1 %v10118_v21  ;;  %v10739_v21 = vpack.c.bf16 %v10719_v59, %v10717_v39  ;;  %v11154_v59 = vld [vmem:[#allocation2 + $0x169] ss:$2 sm:$0xff] }
 0x689   :  { %20313 = vmatprep.mubr.bf16.mxu1 %v10119_v31  ;;  %20326 = vmatpush3.bf16.msra.mxu1 %v22216_v63  ;;  %v22232_v63 = vld [vmem:[%s27150_s2 + $0x110] sm:$0xff]   ;;  %v10740_v31 = vpack.c.bf16 %v10723_v40, %v10721_v23  ;;  %v11158_v23 = vld [vmem:[#allocation2 + $0x1f9] ss:$2 sm:$0xff] }
 0x68a   :  { %20327 = vmatprep.subr.bf16.mxu1 %v22217_v25  ;;  %v11152_v40 = vld [vmem:[#allocation2 + $0x139] ss:$2 sm:$0xff] }
 0x68b   :  { %v11174_v39 = vpack.c.bf16 %v11154_v59, %v11152_v40  ;;  %v11590_v59 = vld [vmem:[#allocation2 + $0x16b] ss:$2 sm:$0xff]  ;;  %v11588_v40 = vld [vmem:[#allocation2 + $0x13b] ss:$2 sm:$0xff] }
 0x68d   :  { %20328 = vmatpush3.bf16.msra.mxu1 %v22217_v25  ;;  %v22233_v25 = vld [vmem:[%s27150_s2 + $0x118] sm:$0xff]  }
 0x68e   :  { %20329 = vmatprep.subr.bf16.mxu1 %v22218_v24 }
 0x690   :  { %20314 = vmatmul.mubr.bf16.gmra.mrb[72].mxu1 %v10120_v51  ;;  %v10741_v51 = vpack.c.bf16 %v10727_v14, %v10725_v6  ;;  %v11162_v14 = vld [vmem:[#allocation2 + $0x259] ss:$2 sm:$0xff]  ;;  %v11160_v6 = vld [vmem:[#allocation2 + $0x229] ss:$2 sm:$0xff] }
 0x691   :  { %20317 = vmatprep.mubr.bf16.mxu1 %v10121_v11  ;;  %20330 = vmatpush3.bf16.msra.mxu1 %v22218_v24  ;;  %v22234_v24 = vld [vmem:[%s27150_s2 + $0x120] sm:$0xff]   ;;  %v10742_v11 = vpack.c.bf16 %v10731_v22, %v10729_v30  ;;  %v11164_v30 = vld [vmem:[#allocation2 + $0x289] ss:$2 sm:$0xff] }
 0x692   :  { %20331 = vmatprep.subr.bf16.mxu1 %v22219_v36  ;;  %v11166_v22 = vld [vmem:[#allocation2 + $0x2b9] ss:$2 sm:$0xff] }
 0x695   :  { %20332 = vmatpush3.bf16.msra.mxu1 %v22219_v36  ;;  %v22235_v36 = vld [vmem:[%s27150_s2 + $0x128] sm:$0xff]  }
 0x696   :  { %20333 = vmatprep.subr.bf16.mxu1 %v22220_v27 }
 0x698   :  { %20318 = vmatmul.mubr.bf16.gmra.mrb[76].mxu1 %v10122_v42  ;;  %v10922_v42 = vld [vmem:[#allocation2 + $0x18] ss:$2 sm:$0xff] }
 0x699   :  { %20334 = vmatpush3.bf16.msra.mxu1 %v22220_v27  ;;  %20337 = vmatprep.mubr.bf16.mxu1 %v10518_v34  ;;  %v22236_v27 = vld [vmem:[%s27150_s2 + $0x130] sm:$0xff]   ;;  %v10953_v34 = vpack.c.bf16 %v10924_v37, %v10922_v42  ;;  %v11358_v42 = vld [vmem:[#allocation2 + $0x1a] ss:$2 sm:$0xff] }
 0x69a   :  { %20335 = vmatprep.subr.bf16.mxu1 %v22221_v1  ;;  %v11360_v37 = vld [vmem:[#allocation2 + $0x4a] ss:$2 sm:$0xff] }
 0x69d   :  { %20336 = vmatpush3.bf16.msra.mxu1 %v22221_v1  ;;  %v22237_v1 = vld [vmem:[%s27150_s2 + $0x138] sm:$0xff]  }
 0x69e   :  { %20353 = vmatprep.subr.bf16.mxu1 %v22222_v4 }
 0x6a0   :  { %20338 = vmatmul.mubr.bf16.vlgmr.msra.gmra.mrb[64].mxu1 %v10519_v28  ;;  %v10954_v28 = vpack.c.bf16 %v10928_v41, %v10926_v50  ;;  %v11364_v41 = vld [vmem:[#allocation2 + $0xaa] ss:$2 sm:$0xff]  ;;  %v11362_v50 = vld [vmem:[#allocation2 + $0x7a] ss:$2 sm:$0xff] }
 0x6a1   :  { %20341 = vmatprep.mubr.bf16.mxu1 %v10520_v57  ;;  %20354 = vmatpush3.bf16.msra.mxu1 %v22222_v4  ;;  %v22238_v4 = vld [vmem:[%s27150_s2 + $0x140] sm:$0xff]   ;;  %v10955_v57 = vpack.c.bf16 %v10932_v45, %v10930_v15  ;;  %v11368_v45 = vld [vmem:[#allocation2 + $0x10a] ss:$2 sm:$0xff] }
 0x6a2   :  { %20355 = vmatprep.subr.bf16.mxu1 %v22223_v5  ;;  %v11366_v15 = vld [vmem:[#allocation2 + $0xda] ss:$2 sm:$0xff] }
 0x6a5   :  { %20356 = vmatpush3.bf16.msra.mxu1 %v22223_v5  ;;  %v22239_v5 = vld [vmem:[%s27150_s2 + $0x148] sm:$0xff]  }
 0x6a6   :  { %20357 = vmatprep.subr.bf16.mxu1 %v22224_v9 }
 0x6a8   :  { %20342 = vmatmul.mubr.bf16.gmra.mrb[68].mxu1 %v10521_v43  ;;  %v10938_v43 = vld [vmem:[#allocation2 + $0x1c8] ss:$2 sm:$0xff] }
 0x6a9   :  { %20345 = vmatprep.mubr.bf16.mxu1 %v10522_v17  ;;  %20358 = vmatpush3.bf16.msra.mxu1 %v22224_v9  ;;  %v22240_v9 = vld [vmem:[%s27150_s2 + $0x150] sm:$0xff]   ;;  %v10957_v17 = vpack.c.bf16 %v10940_v16, %v10938_v43  ;;  %v11376_v16 = vld [vmem:[#allocation2 + $0x1fa] ss:$2 sm:$0xff] }
 0x6aa   :  { %20359 = vmatprep.subr.bf16.mxu1 %v22225_v47  ;;  %v11374_v43 = vld [vmem:[#allocation2 + $0x1ca] ss:$2 sm:$0xff] }
 0x6ad   :  { %20360 = vmatpush3.bf16.msra.mxu1 %v22225_v47  ;;  %v22241_v47 = vld [vmem:[%s27150_s2 + $0x158] sm:$0xff]  }
 0x6ae   :  { %20361 = vmatprep.subr.bf16.mxu1 %v22226_v46 }
 0x6b0   :  { %20346 = vmatmul.mubr.bf16.gmra.mrb[72].mxu1 %v10523_v8  ;;  %v10958_v8 = vpack.c.bf16 %v10944_v53, %v10942_v18  ;;  %v11380_v53 = vld [vmem:[#allocation2 + $0x25a] ss:$2 sm:$0xff]  ;;  %v11378_v18 = vld [vmem:[#allocation2 + $0x22a] ss:$2 sm:$0xff] }
 0x6b1   :  { %20349 = vmatprep.mubr.bf16.mxu1 %v10524_v32  ;;  %20362 = vmatpush3.bf16.msra.mxu1 %v22226_v46  ;;  %v22242_v46 = vld [vmem:[%s27150_s2 + $0x160] sm:$0xff]   ;;  %v10959_v32 = vpack.c.bf16 %v10948_v12, %v10946_v54  ;;  %v11382_v54 = vld [vmem:[#allocation2 + $0x28a] ss:$2 sm:$0xff] }
 0x6b2   :  { %20363 = vmatprep.subr.bf16.mxu1 %v22227_v56  ;;  %v11384_v12 = vld [vmem:[#allocation2 + $0x2ba] ss:$2 sm:$0xff] }
 0x6b5   :  { %20364 = vmatpush3.bf16.msra.mxu1 %v22227_v56  ;;  %v22243_v56 = vld [vmem:[%s27150_s2 + $0x168] sm:$0xff]  }
 0x6b6   :  { %20365 = vmatprep.subr.bf16.mxu1 %v22228_v10 }
 0x6b8   :  { %20350 = vmatmul.mubr.bf16.gmra.mrb[76].mxu1 %v10525_v19  ;;  %v11140_v19 = vld [vmem:[#allocation2 + $0x19] ss:$2 sm:$0xff] }
 0x6b9   :  { %20366 = vmatpush3.bf16.msra.mxu1 %v22228_v10  ;;  %20369 = vmatprep.mubr.bf16.mxu1 %v10736_v58  ;;  %v22244_v10 = vld [vmem:[%s27150_s2 + $0x170] sm:$0xff]   ;;  %v11171_v58 = vpack.c.bf16 %v11142_v13, %v11140_v19  ;;  %v11576_v19 = vld [vmem:[#allocation2 + $0x1b] ss:$2 sm:$0xff] }
 0x6ba   :  { %20367 = vmatprep.subr.bf16.mxu1 %v22229_v60  ;;  %v11578_v13 = vld [vmem:[#allocation2 + $0x4b] ss:$2 sm:$0xff] }
 0x6bd   :  { %20368 = vmatpush3.bf16.msra.mxu1 %v22229_v60  ;;  %v22245_v60 = vld [vmem:[%s27150_s2 + $0x178] sm:$0xff]  }
 0x6be   :  { %20385 = vmatprep.subr.bf16.mxu1 %v22230_v55 }
 0x6c0   :  { %20370 = vmatmul.mubr.bf16.vlgmr.msra.gmra.mrb[64].mxu1 %v10737_v38  ;;  %v11172_v38 = vpack.c.bf16 %v11146_v2, %v11144_v0  ;;  %v11582_v2 = vld [vmem:[#allocation2 + $0xab] ss:$2 sm:$0xff]  ;;  %v11580_v0 = vld [vmem:[#allocation2 + $0x7b] ss:$2 sm:$0xff] }
 0x6c1   :  { %20373 = vmatprep.mubr.bf16.mxu1 %v10738_v44  ;;  %20386 = vmatpush3.bf16.msra.mxu1 %v22230_v55  ;;  %v22246_v55 = vld [vmem:[%s27150_s2 + $0x180] sm:$0xff]   ;;  %v11173_v44 = vpack.c.bf16 %v11150_v20, %v11148_v29  ;;  %v11586_v20 = vld [vmem:[#allocation2 + $0x10b] ss:$2 sm:$0xff] }
 0x6c2   :  { %20387 = vmatprep.subr.bf16.mxu1 %v22231_v7  ;;  %v11584_v29 = vld [vmem:[#allocation2 + $0xdb] ss:$2 sm:$0xff] }
 0x6c5   :  { %20388 = vmatpush3.bf16.msra.mxu1 %v22231_v7  ;;  %v22247_v7 = vld [vmem:[%s27150_s2 + $0x188] sm:$0xff]  }
 0x6c6   :  { %20389 = vmatprep.subr.bf16.mxu1 %v22232_v63 }
 0x6c8   :  { %20374 = vmatmul.mubr.bf16.gmra.mrb[68].mxu1 %v10739_v21  ;;  %v11156_v21 = vld [vmem:[#allocation2 + $0x1c9] ss:$2 sm:$0xff] }
 0x6c9   :  { %20377 = vmatprep.mubr.bf16.mxu1 %v10740_v31  ;;  %20390 = vmatpush3.bf16.msra.mxu1 %v22232_v63  ;;  %v22248_v63 = vld [vmem:[%s27150_s2 + $0x190] sm:$0xff]   ;;  %v11175_v31 = vpack.c.bf16 %v11158_v23, %v11156_v21  ;;  %v11594_v23 = vld [vmem:[#allocation2 + $0x1fb] ss:$2 sm:$0xff] }
 0x6ca   :  { %20391 = vmatprep.subr.bf16.mxu1 %v22233_v25  ;;  %v11592_v21 = vld [vmem:[#allocation2 + $0x1cb] ss:$2 sm:$0xff] }
 0x6cd   :  { %20392 = vmatpush3.bf16.msra.mxu1 %v22233_v25  ;;  %v22249_v25 = vld [vmem:[%s27150_s2 + $0x198] sm:$0xff]  }
 0x6ce   :  { %20393 = vmatprep.subr.bf16.mxu1 %v22234_v24 }
 0x6d0   :  { %20378 = vmatmul.mubr.bf16.gmra.mrb[72].mxu1 %v10741_v51  ;;  %v11176_v51 = vpack.c.bf16 %v11162_v14, %v11160_v6  ;;  %v11598_v14 = vld [vmem:[#allocation2 + $0x25b] ss:$2 sm:$0xff]  ;;  %v11596_v6 = vld [vmem:[#allocation2 + $0x22b] ss:$2 sm:$0xff] }
 0x6d1   :  { %20381 = vmatprep.mubr.bf16.mxu1 %v10742_v11  ;;  %20394 = vmatpush3.bf16.msra.mxu1 %v22234_v24  ;;  %v22250_v24 = vld [vmem:[%s27150_s2 + $0x1a0] sm:$0xff]   ;;  %v11177_v11 = vpack.c.bf16 %v11166_v22, %v11164_v30  ;;  %v11600_v30 = vld [vmem:[#allocation2 + $0x28b] ss:$2 sm:$0xff] }
 0x6d2   :  { %20395 = vmatprep.subr.bf16.mxu1 %v22235_v36  ;;  %v11602_v22 = vld [vmem:[#allocation2 + $0x2bb] ss:$2 sm:$0xff] }
 0x6d5   :  { %20396 = vmatpush3.bf16.msra.mxu1 %v22235_v36  ;;  %v22251_v36 = vld [vmem:[%s27150_s2 + $0x1a8] sm:$0xff]  }
 0x6d6   :  { %20397 = vmatprep.subr.bf16.mxu1 %v22236_v27 }
 0x6d8   :  { %20382 = vmatmul.mubr.bf16.gmra.mrb[76].mxu1 %v10743_v62  ;;  %v11178_v62 = vpack.c.bf16 %v11170_v33, %v11168_v3  ;;  %v11606_v33 = vld [vmem:[#allocation2 + $0x31b] ss:$2 sm:$0xff]  ;;  %v11604_v3 = vld [vmem:[#allocation2 + $0x2eb] ss:$2 sm:$0xff] }
 0x6d9   :  { %20398 = vmatpush3.bf16.msra.mxu1 %v22236_v27  ;;  %20401 = vmatprep.mubr.bf16.mxu1 %v10953_v34  ;;  %v22252_v27 = vld [vmem:[%s27150_s2 + $0x1b0] sm:$0xff]   ;;  %v11389_v34 = vpack.c.bf16 %v11360_v37, %v11358_v42  ;;  %v11796_v37 = vld [vmem:[#allocation2 + $0x60] ss:$2 sm:$0xff] }
 0x6da   :  { %20399 = vmatprep.subr.bf16.mxu1 %v22237_v1  ;;  %v11794_v42 = vld [vmem:[#allocation2 + $0x30] ss:$2 sm:$0xff] }
 0x6dd   :  { %20400 = vmatpush3.bf16.msra.mxu1 %v22237_v1  ;;  %v22253_v1 = vld [vmem:[%s27150_s2 + $0x1b8] sm:$0xff]  }
 0x6de   :  { %20417 = vmatprep.subr.bf16.mxu1 %v22238_v4 }
 0x6e0   :  { %20402 = vmatmul.mubr.bf16.vlgmr.msra.gmra.mrb[64].mxu1 %v10954_v28  ;;  %v11390_v28 = vpack.c.bf16 %v11364_v41, %v11362_v50  ;;  %v11800_v41 = vld [vmem:[#allocation2 + $0xc0] ss:$2 sm:$0xff]  ;;  %v11798_v50 = vld [vmem:[#allocation2 + $0x90] ss:$2 sm:$0xff] }
 0x6e1   :  { %20405 = vmatprep.mubr.bf16.mxu1 %v10955_v57  ;;  %20418 = vmatpush3.bf16.msra.mxu1 %v22238_v4  ;;  %v22254_v4 = vld [vmem:[%s27150_s2 + $0x1c0] sm:$0xff]   ;;  %v11391_v57 = vpack.c.bf16 %v11368_v45, %v11366_v15  ;;  %v11802_v15 = vld [vmem:[#allocation2 + $0xf0] ss:$2 sm:$0xff] }
 0x6e2   :  { %20419 = vmatprep.subr.bf16.mxu1 %v22239_v5  ;;  %v11804_v45 = vld [vmem:[#allocation2 + $0x120] ss:$2 sm:$0xff] }
 0x6e5   :  { %20420 = vmatpush3.bf16.msra.mxu1 %v22239_v5  ;;  %v22255_v5 = vld [vmem:[%s27150_s2 + $0x1c8] sm:$0xff]  }
 0x6e6   :  { %20421 = vmatprep.subr.bf16.mxu1 %v22240_v9 }
 0x6e8   :  { %20406 = vmatmul.mubr.bf16.gmra.mrb[68].mxu1 %v10956_v49  ;;  %v11392_v49 = vpack.c.bf16 %v11372_v48, %v11370_v61  ;;  %v11808_v48 = vld [vmem:[#allocation2 + $0x180] ss:$2 sm:$0xff]  ;;  %v11806_v61 = vld [vmem:[#allocation2 + $0x150] ss:$2 sm:$0xff] }
 0x6e9   :  { %20409 = vmatprep.mubr.bf16.mxu1 %v10957_v17  ;;  %20422 = vmatpush3.bf16.msra.mxu1 %v22240_v9  ;;  %v22256_v9 = vld [vmem:[%s27150_s2 + $0x1d0] sm:$0xff]   ;;  %v11393_v17 = vpack.c.bf16 %v11376_v16, %v11374_v43  ;;  %v11810_v43 = vld [vmem:[#allocation2 + $0x1e0] ss:$2 sm:$0xff] }
 0x6ea   :  { %20423 = vmatprep.subr.bf16.mxu1 %v22241_v47  ;;  %v11812_v16 = vld [vmem:[#allocation2 + $0x210] ss:$2 sm:$0xff] }
 0x6ed   :  { %20424 = vmatpush3.bf16.msra.mxu1 %v22241_v47  ;;  %v22257_v47 = vld [vmem:[%s27150_s2 + $0x1d8] sm:$0xff]  }
 0x6ee   :  { %20425 = vmatprep.subr.bf16.mxu1 %v22242_v46 }
 0x6f0   :  { %20410 = vmatmul.mubr.bf16.gmra.mrb[72].mxu1 %v10958_v8  ;;  %v11394_v8 = vpack.c.bf16 %v11380_v53, %v11378_v18  ;;  %v11816_v53 = vld [vmem:[#allocation2 + $0x270] ss:$2 sm:$0xff]  ;;  %v11814_v18 = vld [vmem:[#allocation2 + $0x240] ss:$2 sm:$0xff] }
 0x6f1   :  { %20413 = vmatprep.mubr.bf16.mxu1 %v10959_v32  ;;  %20426 = vmatpush3.bf16.msra.mxu1 %v22242_v46  ;;  %v22258_v46 = vld [vmem:[%s27150_s2 + $0x1e0] sm:$0xff]   ;;  %v11395_v32 = vpack.c.bf16 %v11384_v12, %v11382_v54  ;;  %v11820_v12 = vld [vmem:[#allocation2 + $0x2d0] ss:$2 sm:$0xff] }
 0x6f2   :  { %20427 = vmatprep.subr.bf16.mxu1 %v22243_v56  ;;  %v11818_v54 = vld [vmem:[#allocation2 + $0x2a0] ss:$2 sm:$0xff] }
 0x6f5   :  { %20428 = vmatpush3.bf16.msra.mxu1 %v22243_v56  ;;  %v22259_v56 = vld [vmem:[%s27150_s2 + $0x1e8] sm:$0xff]  }
 0x6f6   :  { %20429 = vmatprep.subr.bf16.mxu1 %v22244_v10 }
 0x6f8   :  { %20414 = vmatmul.mubr.bf16.gmra.mrb[76].mxu1 %v10960_v26  ;;  %v11396_v26 = vpack.c.bf16 %v11388_v35, %v11386_v52  ;;  %v11824_v35 = vld [vmem:[#allocation2 + $0x330] ss:$2 sm:$0xff]  ;;  %v11822_v52 = vld [vmem:[#allocation2 + $0x300] ss:$2 sm:$0xff] }
 0x6f9   :  { %20430 = vmatpush3.bf16.msra.mxu1 %v22244_v10  ;;  %20433 = vmatprep.mubr.bf16.mxu1 %v11171_v58  ;;  %v22260_v10 = vld [vmem:[%s27150_s2 + $0x1f0] sm:$0xff]   ;;  %v11607_v58 = vpack.c.bf16 %v11578_v13, %v11576_v19  ;;  %v12014_v13 = vld [vmem:[#allocation2 + $0x61] ss:$2 sm:$0xff] }
 0x6fa   :  { %20431 = vmatprep.subr.bf16.mxu1 %v22245_v60  ;;  %v12012_v19 = vld [vmem:[#allocation2 + $0x31] ss:$2 sm:$0xff] }
 0x6fd   :  { %20432 = vmatpush3.bf16.msra.mxu1 %v22245_v60  ;;  %v22261_v60 = vld [vmem:[%s27150_s2 + $0x1f8] sm:$0xff]  }
 0x6fe   :  { %20449 = vmatprep.subr.bf16.mxu1 %v22246_v55 }
 0x700   :  { %20434 = vmatmul.mubr.bf16.vlgmr.msra.gmra.mrb[64].mxu1 %v11172_v38  ;;  %v11608_v38 = vpack.c.bf16 %v11582_v2, %v11580_v0  ;;  %v12018_v2 = vld [vmem:[#allocation2 + $0xc1] ss:$2 sm:$0xff]  ;;  %v12016_v0 = vld [vmem:[#allocation2 + $0x91] ss:$2 sm:$0xff] }
 0x701   :  { %20437 = vmatprep.mubr.bf16.mxu1 %v11173_v44  ;;  %20450 = vmatpush3.bf16.msra.mxu1 %v22246_v55  ;;  %v22262_v55 = vld [vmem:[%s27150_s2 + $0x200] sm:$0xff]   ;;  %v11609_v44 = vpack.c.bf16 %v11586_v20, %v11584_v29  ;;  %v12020_v29 = vld [vmem:[#allocation2 + $0xf1] ss:$2 sm:$0xff] }
 0x702   :  { %20451 = vmatprep.subr.bf16.mxu1 %v22247_v7  ;;  %v12022_v20 = vld [vmem:[#allocation2 + $0x121] ss:$2 sm:$0xff] }
 0x705   :  { %20452 = vmatpush3.bf16.msra.mxu1 %v22247_v7  ;;  %v22263_v7 = vld [vmem:[%s27150_s2 + $0x208] sm:$0xff]  }
 0x706   :  { %20453 = vmatprep.subr.bf16.mxu1 %v22248_v63 }
 0x708   :  { %20438 = vmatmul.mubr.bf16.gmra.mrb[68].mxu1 %v11174_v39  ;;  %v11610_v39 = vpack.c.bf16 %v11590_v59, %v11588_v40  ;;  %v12026_v59 = vld [vmem:[#allocation2 + $0x181] ss:$2 sm:$0xff]  ;;  %v12024_v40 = vld [vmem:[#allocation2 + $0x151] ss:$2 sm:$0xff] }
 0x709   :  { %20441 = vmatprep.mubr.bf16.mxu1 %v11175_v31  ;;  %20454 = vmatpush3.bf16.msra.mxu1 %v22248_v63  ;;  %v22264_v63 = vld [vmem:[%s27150_s2 + $0x210] sm:$0xff]   ;;  %v11611_v31 = vpack.c.bf16 %v11594_v23, %v11592_v21  ;;  %v12028_v21 = vld [vmem:[#allocation2 + $0x1e1] ss:$2 sm:$0xff] }
 0x70a   :  { %20455 = vmatprep.subr.bf16.mxu1 %v22249_v25  ;;  %v12030_v23 = vld [vmem:[#allocation2 + $0x211] ss:$2 sm:$0xff] }
 0x70d   :  { %20456 = vmatpush3.bf16.msra.mxu1 %v22249_v25  ;;  %v22265_v25 = vld [vmem:[%s27150_s2 + $0x218] sm:$0xff]  }
 0x70e   :  { %20457 = vmatprep.subr.bf16.mxu1 %v22250_v24 }
 0x710   :  { %20442 = vmatmul.mubr.bf16.gmra.mrb[72].mxu1 %v11176_v51  ;;  %v11612_v51 = vpack.c.bf16 %v11598_v14, %v11596_v6  ;;  %v12034_v14 = vld [vmem:[#allocation2 + $0x271] ss:$2 sm:$0xff]  ;;  %v12032_v6 = vld [vmem:[#allocation2 + $0x241] ss:$2 sm:$0xff] }
 0x711   :  { %20445 = vmatprep.mubr.bf16.mxu1 %v11177_v11  ;;  %20458 = vmatpush3.bf16.msra.mxu1 %v22250_v24  ;;  %v22266_v24 = vld [vmem:[%s27150_s2 + $0x220] sm:$0xff]   ;;  %v11613_v11 = vpack.c.bf16 %v11602_v22, %v11600_v30  ;;  %v12038_v22 = vld [vmem:[#allocation2 + $0x2d1] ss:$2 sm:$0xff] }
 0x712   :  { %20459 = vmatprep.subr.bf16.mxu1 %v22251_v36  ;;  %v12036_v30 = vld [vmem:[#allocation2 + $0x2a1] ss:$2 sm:$0xff] }
 0x715   :  { %20460 = vmatpush3.bf16.msra.mxu1 %v22251_v36  ;;  %v22267_v36 = vld [vmem:[%s27150_s2 + $0x228] sm:$0xff]  }
 0x716   :  { %20461 = vmatprep.subr.bf16.mxu1 %v22252_v27 }
 0x718   :  { %20446 = vmatmul.mubr.bf16.gmra.mrb[76].mxu1 %v11178_v62  ;;  %v11614_v62 = vpack.c.bf16 %v11606_v33, %v11604_v3  ;;  %v12042_v33 = vld [vmem:[#allocation2 + $0x331] ss:$2 sm:$0xff]  ;;  %v12040_v3 = vld [vmem:[#allocation2 + $0x301] ss:$2 sm:$0xff] }
 0x719   :  { %20462 = vmatpush3.bf16.msra.mxu1 %v22252_v27  ;;  %20465 = vmatprep.mubr.bf16.mxu1 %v11389_v34  ;;  %v22268_v27 = vld [vmem:[%s27150_s2 + $0x230] sm:$0xff]   ;;  %v11825_v34 = vpack.c.bf16 %v11796_v37, %v11794_v42 }
 0x71a   :  { %20463 = vmatprep.subr.bf16.mxu1 %v22253_v1  ;;  %v12232_v37 = vld [vmem:[#allocation2 + $0x62] ss:$2 sm:$0xff]  ;;  %v12230_v42 = vld [vmem:[#allocation2 + $0x32] ss:$2 sm:$0xff] }
 0x71d   :  { %20464 = vmatpush3.bf16.msra.mxu1 %v22253_v1  ;;  %v22269_v1 = vld [vmem:[%s27150_s2 + $0x238] sm:$0xff]  }
 0x71e   :  { %20481 = vmatprep.subr.bf16.mxu1 %v22254_v4 }
 0x720   :  { %20466 = vmatmul.mubr.bf16.vlgmr.msra.gmra.mrb[64].mxu1 %v11390_v28  ;;  %v11826_v28 = vpack.c.bf16 %v11800_v41, %v11798_v50  ;;  %v12236_v41 = vld [vmem:[#allocation2 + $0xc2] ss:$2 sm:$0xff]  ;;  %v12234_v50 = vld [vmem:[#allocation2 + $0x92] ss:$2 sm:$0xff] }
 0x721   :  { %20469 = vmatprep.mubr.bf16.mxu1 %v11391_v57  ;;  %20482 = vmatpush3.bf16.msra.mxu1 %v22254_v4  ;;  %v22270_v4 = vld [vmem:[%s27150_s2 + $0x240] sm:$0xff]   ;;  %v11827_v57 = vpack.c.bf16 %v11804_v45, %v11802_v15 }
 0x722   :  { %20483 = vmatprep.subr.bf16.mxu1 %v22255_v5  ;;  %v12240_v45 = vld [vmem:[#allocation2 + $0x122] ss:$2 sm:$0xff]  ;;  %v12238_v15 = vld [vmem:[#allocation2 + $0xf2] ss:$2 sm:$0xff] }
 0x725   :  { %20484 = vmatpush3.bf16.msra.mxu1 %v22255_v5  ;;  %v22271_v5 = vld [vmem:[%s27150_s2 + $0x248] sm:$0xff]  }
 0x726   :  { %20485 = vmatprep.subr.bf16.mxu1 %v22256_v9 }
 0x728   :  { %20470 = vmatmul.mubr.bf16.gmra.mrb[68].mxu1 %v11392_v49  ;;  %v11828_v49 = vpack.c.bf16 %v11808_v48, %v11806_v61  ;;  %v12244_v48 = vld [vmem:[#allocation2 + $0x182] ss:$2 sm:$0xff]  ;;  %v12242_v61 = vld [vmem:[#allocation2 + $0x152] ss:$2 sm:$0xff] }
 0x729   :  { %20473 = vmatprep.mubr.bf16.mxu1 %v11393_v17  ;;  %20486 = vmatpush3.bf16.msra.mxu1 %v22256_v9  ;;  %v22272_v9 = vld [vmem:[%s27150_s2 + $0x250] sm:$0xff]   ;;  %v11829_v17 = vpack.c.bf16 %v11812_v16, %v11810_v43 }
 0x72a   :  { %20487 = vmatprep.subr.bf16.mxu1 %v22257_v47  ;;  %v12248_v16 = vld [vmem:[#allocation2 + $0x212] ss:$2 sm:$0xff]  ;;  %v12246_v43 = vld [vmem:[#allocation2 + $0x1e2] ss:$2 sm:$0xff] }
 0x72d   :  { %20488 = vmatpush3.bf16.msra.mxu1 %v22257_v47  ;;  %v22273_v47 = vld [vmem:[%s27150_s2 + $0x258] sm:$0xff]  }
 0x72e   :  { %20489 = vmatprep.subr.bf16.mxu1 %v22258_v46 }
 0x730   :  { %20474 = vmatmul.mubr.bf16.gmra.mrb[72].mxu1 %v11394_v8  ;;  %v11830_v8 = vpack.c.bf16 %v11816_v53, %v11814_v18  ;;  %v12252_v53 = vld [vmem:[#allocation2 + $0x272] ss:$2 sm:$0xff]  ;;  %v12250_v18 = vld [vmem:[#allocation2 + $0x242] ss:$2 sm:$0xff] }
 0x731   :  { %20477 = vmatprep.mubr.bf16.mxu1 %v11395_v32  ;;  %20490 = vmatpush3.bf16.msra.mxu1 %v22258_v46  ;;  %v22274_v46 = vld [vmem:[%s27150_s2 + $0x260] sm:$0xff]   ;;  %v11831_v32 = vpack.c.bf16 %v11820_v12, %v11818_v54 }
 0x732   :  { %20491 = vmatprep.subr.bf16.mxu1 %v22259_v56  ;;  %v12256_v12 = vld [vmem:[#allocation2 + $0x2d2] ss:$2 sm:$0xff]  ;;  %v12254_v54 = vld [vmem:[#allocation2 + $0x2a2] ss:$2 sm:$0xff] }
 0x735   :  { %20492 = vmatpush3.bf16.msra.mxu1 %v22259_v56  ;;  %v22275_v56 = vld [vmem:[%s27150_s2 + $0x268] sm:$0xff]  }
 0x736   :  { %20493 = vmatprep.subr.bf16.mxu1 %v22260_v10 }
 0x738   :  { %20478 = vmatmul.mubr.bf16.gmra.mrb[76].mxu1 %v11396_v26  ;;  %v11832_v26 = vpack.c.bf16 %v11824_v35, %v11822_v52  ;;  %v12260_v35 = vld [vmem:[#allocation2 + $0x332] ss:$2 sm:$0xff]  ;;  %v12258_v52 = vld [vmem:[#allocation2 + $0x302] ss:$2 sm:$0xff] }
 0x739   :  { %20494 = vmatpush3.bf16.msra.mxu1 %v22260_v10  ;;  %20497 = vmatprep.mubr.bf16.mxu1 %v11607_v58  ;;  %v22276_v10 = vld [vmem:[%s27150_s2 + $0x270] sm:$0xff]   ;;  %v12043_v58 = vpack.c.bf16 %v12014_v13, %v12012_v19 }
 0x73a   :  { %20495 = vmatprep.subr.bf16.mxu1 %v22261_v60  ;;  %v12450_v13 = vld [vmem:[#allocation2 + $0x63] ss:$2 sm:$0xff]  ;;  %v12448_v19 = vld [vmem:[#allocation2 + $0x33] ss:$2 sm:$0xff] }
 0x73d   :  { %20496 = vmatpush3.bf16.msra.mxu1 %v22261_v60  ;;  %v22277_v60 = vld [vmem:[%s27150_s2 + $0x278] sm:$0xff]  }
 0x73e   :  { %20513 = vmatprep.subr.bf16.mxu1 %v22262_v55 }
 0x740   :  { %20498 = vmatmul.mubr.bf16.vlgmr.msra.gmra.mrb[64].mxu1 %v11608_v38  ;;  %v12044_v38 = vpack.c.bf16 %v12018_v2, %v12016_v0  ;;  %v12454_v2 = vld [vmem:[#allocation2 + $0xc3] ss:$2 sm:$0xff]  ;;  %v12452_v0 = vld [vmem:[#allocation2 + $0x93] ss:$2 sm:$0xff] }
 0x741   :  { %20501 = vmatprep.mubr.bf16.mxu1 %v11609_v44  ;;  %20514 = vmatpush3.bf16.msra.mxu1 %v22262_v55  ;;  %v22278_v55 = vld [vmem:[%s27150_s2 + $0x280] sm:$0xff]   ;;  %v12045_v44 = vpack.c.bf16 %v12022_v20, %v12020_v29 }
 0x742   :  { %20515 = vmatprep.subr.bf16.mxu1 %v22263_v7  ;;  %v12458_v20 = vld [vmem:[#allocation2 + $0x123] ss:$2 sm:$0xff]  ;;  %v12456_v29 = vld [vmem:[#allocation2 + $0xf3] ss:$2 sm:$0xff] }
 0x745   :  { %20516 = vmatpush3.bf16.msra.mxu1 %v22263_v7  ;;  %v22279_v7 = vld [vmem:[%s27150_s2 + $0x288] sm:$0xff]  }
 0x746   :  { %20517 = vmatprep.subr.bf16.mxu1 %v22264_v63 }
 0x748   :  { %20502 = vmatmul.mubr.bf16.gmra.mrb[68].mxu1 %v11610_v39  ;;  %v12046_v39 = vpack.c.bf16 %v12026_v59, %v12024_v40  ;;  %v12462_v59 = vld [vmem:[#allocation2 + $0x183] ss:$2 sm:$0xff]  ;;  %v12460_v40 = vld [vmem:[#allocation2 + $0x153] ss:$2 sm:$0xff] }
 0x749   :  { %20505 = vmatprep.mubr.bf16.mxu1 %v11611_v31  ;;  %20518 = vmatpush3.bf16.msra.mxu1 %v22264_v63  ;;  %v22280_v63 = vld [vmem:[%s27150_s2 + $0x290] sm:$0xff]   ;;  %v12047_v31 = vpack.c.bf16 %v12030_v23, %v12028_v21 }
 0x74a   :  { %20519 = vmatprep.subr.bf16.mxu1 %v22265_v25  ;;  %v12466_v23 = vld [vmem:[#allocation2 + $0x213] ss:$2 sm:$0xff]  ;;  %v12464_v21 = vld [vmem:[#allocation2 + $0x1e3] ss:$2 sm:$0xff] }
 0x74d   :  { %20520 = vmatpush3.bf16.msra.mxu1 %v22265_v25  ;;  %v22281_v25 = vld [vmem:[%s27150_s2 + $0x298] sm:$0xff]  }
 0x74e   :  { %20521 = vmatprep.subr.bf16.mxu1 %v22266_v24 }
 0x750   :  { %20506 = vmatmul.mubr.bf16.gmra.mrb[72].mxu1 %v11612_v51  ;;  %v12048_v51 = vpack.c.bf16 %v12034_v14, %v12032_v6  ;;  %v12470_v14 = vld [vmem:[#allocation2 + $0x273] ss:$2 sm:$0xff]  ;;  %v12468_v6 = vld [vmem:[#allocation2 + $0x243] ss:$2 sm:$0xff] }
 0x751   :  { %20509 = vmatprep.mubr.bf16.mxu1 %v11613_v11  ;;  %20522 = vmatpush3.bf16.msra.mxu1 %v22266_v24  ;;  %v22282_v24 = vld [vmem:[%s27150_s2 + $0x2a0] sm:$0xff]   ;;  %v12049_v11 = vpack.c.bf16 %v12038_v22, %v12036_v30 }
 0x752   :  { %20523 = vmatprep.subr.bf16.mxu1 %v22267_v36  ;;  %v12474_v22 = vld [vmem:[#allocation2 + $0x2d3] ss:$2 sm:$0xff]  ;;  %v12472_v30 = vld [vmem:[#allocation2 + $0x2a3] ss:$2 sm:$0xff] }
 0x755   :  { %20524 = vmatpush3.bf16.msra.mxu1 %v22267_v36  ;;  %v22283_v36 = vld [vmem:[%s27150_s2 + $0x2a8] sm:$0xff]  }
 0x756   :  { %20525 = vmatprep.subr.bf16.mxu1 %v22268_v27 }
 0x758   :  { %20510 = vmatmul.mubr.bf16.gmra.mrb[76].mxu1 %v11614_v62  ;;  %v12050_v62 = vpack.c.bf16 %v12042_v33, %v12040_v3  ;;  %v12478_v33 = vld [vmem:[#allocation2 + $0x333] ss:$2 sm:$0xff]  ;;  %v12476_v3 = vld [vmem:[#allocation2 + $0x303] ss:$2 sm:$0xff] }
 0x759   :  { %20526 = vmatpush3.bf16.msra.mxu1 %v22268_v27  ;;  %20529 = vmatprep.mubr.bf16.mxu1 %v11825_v34  ;;  %v22284_v27 = vld [vmem:[%s27150_s2 + $0x2b0] sm:$0xff]   ;;  %v12261_v34 = vpack.c.bf16 %v12232_v37, %v12230_v42  ;;  %v12668_v37 = vld [vmem:[#allocation2 + $0x78] ss:$2 sm:$0xff] }
 0x75a   :  { %20527 = vmatprep.subr.bf16.mxu1 %v22269_v1  ;;  %v12666_v42 = vld [vmem:[#allocation2 + $0x48] ss:$2 sm:$0xff] }
 0x75d   :  { %20528 = vmatpush3.bf16.msra.mxu1 %v22269_v1  ;;  %v22285_v1 = vld [vmem:[%s27150_s2 + $0x2b8] sm:$0xff]  }
 0x75e   :  { %20545 = vmatprep.subr.bf16.mxu1 %v22270_v4 }
 0x760   :  { %20530 = vmatmul.mubr.bf16.vlgmr.msra.gmra.mrb[64].mxu1 %v11826_v28  ;;  %v12262_v28 = vpack.c.bf16 %v12236_v41, %v12234_v50  ;;  %v12672_v41 = vld [vmem:[#allocation2 + $0xd8] ss:$2 sm:$0xff]  ;;  %v12670_v50 = vld [vmem:[#allocation2 + $0xa8] ss:$2 sm:$0xff] }
 0x761   :  { %20533 = vmatprep.mubr.bf16.mxu1 %v11827_v57  ;;  %20546 = vmatpush3.bf16.msra.mxu1 %v22270_v4  ;;  %v22286_v4 = vld [vmem:[%s27150_s2 + $0x2c0] sm:$0xff]   ;;  %v12263_v57 = vpack.c.bf16 %v12240_v45, %v12238_v15  ;;  %v12674_v15 = vld [vmem:[#allocation2 + $0x108] ss:$2 sm:$0xff] }
 0x762   :  { %20547 = vmatprep.subr.bf16.mxu1 %v22271_v5  ;;  %v12676_v45 = vld [vmem:[#allocation2 + $0x138] ss:$2 sm:$0xff] }
 0x765   :  { %20548 = vmatpush3.bf16.msra.mxu1 %v22271_v5  ;;  %v22287_v5 = vld [vmem:[%s27150_s2 + $0x2c8] sm:$0xff]  }
 0x766   :  { %20549 = vmatprep.subr.bf16.mxu1 %v22272_v9 }
 0x768   :  { %20534 = vmatmul.mubr.bf16.gmra.mrb[68].mxu1 %v11828_v49  ;;  %v12264_v49 = vpack.c.bf16 %v12244_v48, %v12242_v61  ;;  %v12678_v48 = vld [vmem:[#allocation2 + $0x168] ss:$2 sm:$0xff] }
 0x769   :  { %20537 = vmatprep.mubr.bf16.mxu1 %v11829_v17  ;;  %20550 = vmatpush3.bf16.msra.mxu1 %v22272_v9  ;;  %v22288_v9 = vld [vmem:[%s27150_s2 + $0x2d0] sm:$0xff]   ;;  %v12265_v17 = vpack.c.bf16 %v12248_v16, %v12246_v43  ;;  %v12680_v16 = vld [vmem:[#allocation2 + $0x198] ss:$2 sm:$0xff] }
 0x76a   :  { %20551 = vmatprep.subr.bf16.mxu1 %v22273_v47  ;;  %v12684_v61 = vld [vmem:[#allocation2 + $0x228] ss:$2 sm:$0xff]  ;;  %v12682_v43 = vld [vmem:[#allocation2 + $0x1f8] ss:$2 sm:$0xff] }
 0x76d   :  { %20552 = vmatpush3.bf16.msra.mxu1 %v22273_v47  ;;  %v22289_v47 = vld [vmem:[%s27150_s2 + $0x2d8] sm:$0xff]  }
 0x76e   :  { %20553 = vmatprep.subr.bf16.mxu1 %v22274_v46 }
 0x770   :  { %20538 = vmatmul.mubr.bf16.gmra.mrb[72].mxu1 %v11830_v8  ;;  %v12266_v8 = vpack.c.bf16 %v12252_v53, %v12250_v18  ;;  %v12688_v53 = vld [vmem:[#allocation2 + $0x288] ss:$2 sm:$0xff]  ;;  %v12686_v18 = vld [vmem:[#allocation2 + $0x258] ss:$2 sm:$0xff] }
 0x771   :  { %20541 = vmatprep.mubr.bf16.mxu1 %v11831_v32  ;;  %20554 = vmatpush3.bf16.msra.mxu1 %v22274_v46  ;;  %v22290_v46 = vld [vmem:[%s27150_s2 + $0x2e0] sm:$0xff]   ;;  %v12267_v32 = vpack.c.bf16 %v12256_v12, %v12254_v54  ;;  %v12692_v12 = vld [vmem:[#allocation2 + $0x2e8] ss:$2 sm:$0xff] }
 0x772   :  { %20555 = vmatprep.subr.bf16.mxu1 %v22275_v56  ;;  %v12690_v54 = vld [vmem:[#allocation2 + $0x2b8] ss:$2 sm:$0xff] }
 0x775   :  { %20556 = vmatpush3.bf16.msra.mxu1 %v22275_v56  ;;  %v22291_v56 = vld [vmem:[%s27150_s2 + $0x2e8] sm:$0xff]  }
 0x776   :  { %20557 = vmatprep.subr.bf16.mxu1 %v22276_v10 }
 0x778   :  { %20542 = vmatmul.mubr.bf16.gmra.mrb[76].mxu1 %v11832_v26  ;;  %v12268_v26 = vpack.c.bf16 %v12260_v35, %v12258_v52  ;;  %v12694_v35 = vld [vmem:[#allocation2 + $0x318] ss:$2 sm:$0xff]  ;;  %v12886_v52 = vld [vmem:[#allocation2 + $0x79] ss:$2 sm:$0xff] }
 0x779   :  { %20558 = vmatpush3.bf16.msra.mxu1 %v22276_v10  ;;  %20561 = vmatprep.mubr.bf16.mxu1 %v12043_v58  ;;  %v22292_v10 = vld [vmem:[%s27150_s2 + $0x2f0] sm:$0xff]   ;;  %v12479_v58 = vpack.c.bf16 %v12450_v13, %v12448_v19 }
 0x77a   :  { %20559 = vmatprep.subr.bf16.mxu1 %v22277_v60  ;;  %v12696_v13 = vld [vmem:[#allocation2 + $0x348] ss:$2 sm:$0xff]  ;;  %v12884_v19 = vld [vmem:[#allocation2 + $0x49] ss:$2 sm:$0xff] }
 0x77d   :  { %20560 = vmatpush3.bf16.msra.mxu1 %v22277_v60  ;;  %v22293_v60 = vld [vmem:[%s27150_s2 + $0x2f8] sm:$0xff]  }
 0x77e   :  { %20577 = vmatprep.subr.bf16.mxu1 %v22278_v55 }
 0x780   :  { %20562 = vmatmul.mubr.bf16.vlgmr.msra.gmra.mrb[64].mxu1 %v12044_v38  ;;  %v12480_v38 = vpack.c.bf16 %v12454_v2, %v12452_v0  ;;  %v12890_v2 = vld [vmem:[#allocation2 + $0xd9] ss:$2 sm:$0xff]  ;;  %v12888_v0 = vld [vmem:[#allocation2 + $0xa9] ss:$2 sm:$0xff] }
 0x781   :  { %20565 = vmatprep.mubr.bf16.mxu1 %v12045_v44  ;;  %20578 = vmatpush3.bf16.msra.mxu1 %v22278_v55  ;;  %v22294_v55 = vld [vmem:[%s27150_s2 + $0x300] sm:$0xff]   ;;  %v12481_v44 = vpack.c.bf16 %v12458_v20, %v12456_v29  ;;  %v12892_v29 = vld [vmem:[#allocation2 + $0x109] ss:$2 sm:$0xff] }
 0x782   :  { %20579 = vmatprep.subr.bf16.mxu1 %v22279_v7  ;;  %v12894_v20 = vld [vmem:[#allocation2 + $0x139] ss:$2 sm:$0xff] }
 0x785   :  { %20580 = vmatpush3.bf16.msra.mxu1 %v22279_v7  ;;  %v22295_v7 = vld [vmem:[%s27150_s2 + $0x308] sm:$0xff]  }
 0x786   :  { %20581 = vmatprep.subr.bf16.mxu1 %v22280_v63 }
 0x788   :  { %20566 = vmatmul.mubr.bf16.gmra.mrb[68].mxu1 %v12046_v39  ;;  %v12482_v39 = vpack.c.bf16 %v12462_v59, %v12460_v40  ;;  %v12896_v59 = vld [vmem:[#allocation2 + $0x169] ss:$2 sm:$0xff] }
 0x789   :  { %20569 = vmatprep.mubr.bf16.mxu1 %v12047_v31  ;;  %20582 = vmatpush3.bf16.msra.mxu1 %v22280_v63  ;;  %v22296_v63 = vld [vmem:[%s27150_s2 + $0x310] sm:$0xff]   ;;  %v12483_v31 = vpack.c.bf16 %v12466_v23, %v12464_v21  ;;  %v12898_v23 = vld [vmem:[#allocation2 + $0x199] ss:$2 sm:$0xff] }
 0x78a   :  { %20583 = vmatprep.subr.bf16.mxu1 %v22281_v25  ;;  %v12902_v40 = vld [vmem:[#allocation2 + $0x229] ss:$2 sm:$0xff]  ;;  %v12900_v21 = vld [vmem:[#allocation2 + $0x1f9] ss:$2 sm:$0xff] }
 0x78d   :  { %20584 = vmatpush3.bf16.msra.mxu1 %v22281_v25  ;;  %v22297_v25 = vld [vmem:[%s27150_s2 + $0x318] sm:$0xff]  }
 0x78e   :  { %20585 = vmatprep.subr.bf16.mxu1 %v22282_v24 }
 0x790   :  { %20570 = vmatmul.mubr.bf16.gmra.mrb[72].mxu1 %v12048_v51  ;;  %v12484_v51 = vpack.c.bf16 %v12470_v14, %v12468_v6  ;;  %v12906_v14 = vld [vmem:[#allocation2 + $0x289] ss:$2 sm:$0xff]  ;;  %v12904_v6 = vld [vmem:[#allocation2 + $0x259] ss:$2 sm:$0xff] }
 0x791   :  { %20573 = vmatprep.mubr.bf16.mxu1 %v12049_v11  ;;  %20586 = vmatpush3.bf16.msra.mxu1 %v22282_v24  ;;  %v22298_v24 = vld [vmem:[%s27150_s2 + $0x320] sm:$0xff]   ;;  %v12485_v11 = vpack.c.bf16 %v12474_v22, %v12472_v30  ;;  %v12910_v22 = vld [vmem:[#allocation2 + $0x2e9] ss:$2 sm:$0xff] }
 0x792   :  { %20587 = vmatprep.subr.bf16.mxu1 %v22283_v36  ;;  %v12908_v30 = vld [vmem:[#allocation2 + $0x2b9] ss:$2 sm:$0xff] }
 0x795   :  { %20588 = vmatpush3.bf16.msra.mxu1 %v22283_v36  ;;  %v22299_v36 = vld [vmem:[%s27150_s2 + $0x328] sm:$0xff]  }
 0x796   :  { %20589 = vmatprep.subr.bf16.mxu1 %v22284_v27 }
 0x798   :  { %20574 = vmatmul.mubr.bf16.gmra.mrb[76].mxu1 %v12050_v62  ;;  %v12486_v62 = vpack.c.bf16 %v12478_v33, %v12476_v3  ;;  %v12912_v33 = vld [vmem:[#allocation2 + $0x319] ss:$2 sm:$0xff]  ;;  %v13104_v3 = vld [vmem:[#allocation2 + $0x7a] ss:$2 sm:$0xff] }
 0x799   :  { %20590 = vmatpush3.bf16.msra.mxu1 %v22284_v27  ;;  %20593 = vmatprep.mubr.bf16.mxu1 %v12261_v34  ;;  %v22300_v27 = vld [vmem:[%s27150_s2 + $0x330] sm:$0xff]   ;;  %v12697_v34 = vpack.c.bf16 %v12668_v37, %v12666_v42 }
 0x79a   :  { %20591 = vmatprep.subr.bf16.mxu1 %v22285_v1  ;;  %v12914_v37 = vld [vmem:[#allocation2 + $0x349] ss:$2 sm:$0xff]  ;;  %v13102_v42 = vld [vmem:[#allocation2 + $0x4a] ss:$2 sm:$0xff] }
 0x79d   :  { %20592 = vmatpush3.bf16.msra.mxu1 %v22285_v1  ;;  %v22301_v1 = vld [vmem:[%s27150_s2 + $0x338] sm:$0xff]  }
 0x79e   :  { %20609 = vmatprep.subr.bf16.mxu1 %v22286_v4 }
 0x7a0   :  { %20594 = vmatmul.mubr.bf16.vlgmr.msra.gmra.mrb[64].mxu1 %v12262_v28  ;;  %v12698_v28 = vpack.c.bf16 %v12672_v41, %v12670_v50  ;;  %v13108_v41 = vld [vmem:[#allocation2 + $0xda] ss:$2 sm:$0xff]  ;;  %v13106_v50 = vld [vmem:[#allocation2 + $0xaa] ss:$2 sm:$0xff] }
 0x7a1   :  { %20597 = vmatprep.mubr.bf16.mxu1 %v12263_v57  ;;  %20610 = vmatpush3.bf16.msra.mxu1 %v22286_v4  ;;  %v22302_v4 = vld [vmem:[%s27150_s2 + $0x340] sm:$0xff]   ;;  %v12699_v57 = vpack.c.bf16 %v12676_v45, %v12674_v15  ;;  %v13110_v15 = vld [vmem:[#allocation2 + $0x10a] ss:$2 sm:$0xff] }
 0x7a2   :  { %20611 = vmatprep.subr.bf16.mxu1 %v22287_v5  ;;  %v13112_v45 = vld [vmem:[#allocation2 + $0x13a] ss:$2 sm:$0xff] }
 0x7a5   :  { %20612 = vmatpush3.bf16.msra.mxu1 %v22287_v5  ;;  %v22303_v5 = vld [vmem:[%s27150_s2 + $0x348] sm:$0xff]  }
 0x7a6   :  { %20613 = vmatprep.subr.bf16.mxu1 %v22288_v9 }
 0x7a8   :  { %20598 = vmatmul.mubr.bf16.gmra.mrb[68].mxu1 %v12264_v49  ;;  %v12700_v49 = vpack.c.bf16 %v12680_v16, %v12678_v48  ;;  %v13114_v48 = vld [vmem:[#allocation2 + $0x16a] ss:$2 sm:$0xff]  ;;  %v13116_v16 = vld [vmem:[#allocation2 + $0x19a] ss:$2 sm:$0xff] }
 0x7a9   :  { %20601 = vmatprep.mubr.bf16.mxu1 %v12265_v17  ;;  %20614 = vmatpush3.bf16.msra.mxu1 %v22288_v9  ;;  %v22304_v9 = vld [vmem:[%s27150_s2 + $0x350] sm:$0xff]   ;;  %v12701_v17 = vpack.c.bf16 %v12684_v61, %v12682_v43  ;;  %v13118_v43 = vld [vmem:[#allocation2 + $0x1fa] ss:$2 sm:$0xff] }
 0x7aa   :  { %20615 = vmatprep.subr.bf16.mxu1 %v22289_v47  ;;  %v13120_v61 = vld [vmem:[#allocation2 + $0x22a] ss:$2 sm:$0xff] }
 0x7ad   :  { %20616 = vmatpush3.bf16.msra.mxu1 %v22289_v47  ;;  %v22305_v47 = vld [vmem:[%s27150_s2 + $0x358] sm:$0xff]  }
 0x7ae   :  { %20617 = vmatprep.subr.bf16.mxu1 %v22290_v46 }
 0x7b0   :  { %20602 = vmatmul.mubr.bf16.gmra.mrb[72].mxu1 %v12266_v8  ;;  %v12702_v8 = vpack.c.bf16 %v12688_v53, %v12686_v18  ;;  %v13124_v53 = vld [vmem:[#allocation2 + $0x28a] ss:$2 sm:$0xff]  ;;  %v13122_v18 = vld [vmem:[#allocation2 + $0x25a] ss:$2 sm:$0xff] }
 0x7b1   :  { %20605 = vmatprep.mubr.bf16.mxu1 %v12267_v32  ;;  %20618 = vmatpush3.bf16.msra.mxu1 %v22290_v46  ;;  %v22306_v46 = vld [vmem:[%s27150_s2 + $0x360] sm:$0xff]   ;;  %v12703_v32 = vpack.c.bf16 %v12692_v12, %v12690_v54  ;;  %v13128_v12 = vld [vmem:[#allocation2 + $0x2ea] ss:$2 sm:$0xff] }
 0x7b2   :  { %20619 = vmatprep.subr.bf16.mxu1 %v22291_v56  ;;  %v13126_v54 = vld [vmem:[#allocation2 + $0x2ba] ss:$2 sm:$0xff] }
 0x7b5   :  { %20620 = vmatpush3.bf16.msra.mxu1 %v22291_v56  ;;  %v22307_v56 = vld [vmem:[%s27150_s2 + $0x368] sm:$0xff]  }
 0x7b6   :  { %20621 = vmatprep.subr.bf16.mxu1 %v22292_v10 }
 0x7b8   :  { %20606 = vmatmul.mubr.bf16.gmra.mrb[76].mxu1 %v12268_v26  ;;  %v12704_v26 = vpack.c.bf16 %v12696_v13, %v12694_v35  ;;  %v13130_v35 = vld [vmem:[#allocation2 + $0x31a] ss:$2 sm:$0xff]  ;;  %v13132_v13 = vld [vmem:[#allocation2 + $0x34a] ss:$2 sm:$0xff] }
 0x7b9   :  { %20622 = vmatpush3.bf16.msra.mxu1 %v22292_v10  ;;  %20625 = vmatprep.mubr.bf16.mxu1 %v12479_v58  ;;  %v22308_v10 = vld [vmem:[%s27150_s2 + $0x370] sm:$0xff]   ;;  %v12915_v58 = vpack.c.bf16 %v12886_v52, %v12884_v19  ;;  %v13322_v52 = vld [vmem:[#allocation2 + $0x7b] ss:$2 sm:$0xff] }
 0x7ba   :  { %20623 = vmatprep.subr.bf16.mxu1 %v22293_v60  ;;  %v13320_v19 = vld [vmem:[#allocation2 + $0x4b] ss:$2 sm:$0xff] }
 0x7bd   :  { %20624 = vmatpush3.bf16.msra.mxu1 %v22293_v60  ;;  %v22309_v60 = vld [vmem:[%s27150_s2 + $0x378] sm:$0xff]  }
 0x7be   :  { %20641 = vmatprep.subr.bf16.mxu1 %v22294_v55 }
 0x7c0   :  { %20626 = vmatmul.mubr.bf16.vlgmr.msra.gmra.mrb[64].mxu1 %v12480_v38  ;;  %v12916_v38 = vpack.c.bf16 %v12890_v2, %v12888_v0  ;;  %v13330_v2 = vld [vmem:[#allocation2 + $0x13b] ss:$2 sm:$0xff] }
 0x7c1   :  { %20629 = vmatprep.mubr.bf16.mxu1 %v12481_v44  ;;  %20642 = vmatpush3.bf16.msra.mxu1 %v22294_v55  ;;  %v22310_v55 = vld [vmem:[%s27150_s2 + $0x380] sm:$0xff]   ;;  %v12917_v44 = vpack.c.bf16 %v12894_v20, %v12892_v29  ;;  %v13324_v20 = vld [vmem:[#allocation2 + $0xab] ss:$2 sm:$0xff] }
 0x7c2   :  { %20643 = vmatprep.subr.bf16.mxu1 %v22295_v7 }
 0x7c5   :  { %20644 = vmatpush3.bf16.msra.mxu1 %v22295_v7  ;;  %v22311_v7 = vld [vmem:[%s27150_s2 + $0x388] sm:$0xff]  }
 0x7c6   :  { %20645 = vmatprep.subr.bf16.mxu1 %v22296_v63 }
 0x7c8   :  { %20630 = vmatmul.mubr.bf16.gmra.mrb[68].mxu1 %v12482_v39  ;;  %v12918_v39 = vpack.c.bf16 %v12898_v23, %v12896_v59  ;;  %v13336_v23 = vld [vmem:[#allocation2 + $0x1fb] ss:$2 sm:$0xff] }
 0x7c9   :  { %20633 = vmatprep.mubr.bf16.mxu1 %v12483_v31  ;;  %20646 = vmatpush3.bf16.msra.mxu1 %v22296_v63  ;;  %v22312_v63 = vld [vmem:[%s27150_s2 + $0x390] sm:$0xff]   ;;  %v12919_v31 = vpack.c.bf16 %v12902_v40, %v12900_v21 }
 0x7ca   :  { %20647 = vmatprep.subr.bf16.mxu1 %v22297_v25  ;;  %v13346_v21 = vld [vmem:[#allocation2 + $0x2eb] ss:$2 sm:$0xff] }
 0x7cd   :  { %20648 = vmatpush3.bf16.msra.mxu1 %v22297_v25  ;;  %v22313_v25 = vld [vmem:[%s27150_s2 + $0x398] sm:$0xff]  }
 0x7ce   :  { %20649 = vmatprep.subr.bf16.mxu1 %v22298_v24 }
 0x7d0   :  { %20634 = vmatmul.mubr.bf16.gmra.mrb[72].mxu1 %v12484_v51  ;;  %v12920_v51 = vpack.c.bf16 %v12906_v14, %v12904_v6  ;;  %v13350_v6 = vld [vmem:[#allocation2 + $0x34b] ss:$2 sm:$0xff] }
 0x7d1   :  { %20637 = vmatprep.mubr.bf16.mxu1 %v12485_v11  ;;  %20650 = vmatpush3.bf16.msra.mxu1 %v22298_v24  ;;  %v22314_v24 = vld [vmem:[%s27150_s2 + $0x3a0] sm:$0xff]   ;;  %v12921_v11 = vpack.c.bf16 %v12910_v22, %v12908_v30 }
 0x7d2   :  { %20651 = vmatprep.subr.bf16.mxu1 %v22299_v36  ;;  %v13348_v22 = vld [vmem:[#allocation2 + $0x31b] ss:$2 sm:$0xff] }
 0x7d5   :  { %20652 = vmatpush3.bf16.msra.mxu1 %v22299_v36  ;;  %v22315_v36 = vld [vmem:[%s27150_s2 + $0x3a8] sm:$0xff]  }
 0x7d6   :  { %20653 = vmatprep.subr.bf16.mxu1 %v22300_v27 }
 0x7d8   :  { %20638 = vmatmul.mubr.bf16.gmra.mrb[76].mxu1 %v12486_v62  ;;  %v12922_v62 = vpack.c.bf16 %v12914_v37, %v12912_v33  ;;  %v22326_v33 = vld [vmem:[%s27151_s3 + $0x40] sm:$0xff]  }
 0x7d9   :  { %20654 = vmatpush3.bf16.msra.mxu1 %v22300_v27  ;;  %20657 = vmatprep.mubr.bf16.mxu1 %v12697_v34  ;;  %v22316_v27 = vld [vmem:[%s27150_s2 + $0x3b0] sm:$0xff]   ;;  %v13133_v34 = vpack.c.bf16 %v13104_v3, %v13102_v42  ;;  %v22327_v3 = vld [vmem:[%s27151_s3 + $0x48] sm:$0xff]  }
 0x7da   :  { %20655 = vmatprep.subr.bf16.mxu1 %v22301_v1  ;;  %v22328_v42 = vld [vmem:[%s27151_s3 + $0x50] sm:$0xff]  }
 0x7dd   :  { %20656 = vmatpush3.bf16.msra.mxu1 %v22301_v1  ;;  %v22317_v1 = vld [vmem:[%s27150_s2 + $0x3b8] sm:$0xff]  }
 0x7de   :  { %20673 = vmatprep.subr.bf16.mxu1 %v22302_v4 }
 0x7e0   :  { %20658 = vmatmul.mubr.bf16.vlgmr.msra.gmra.mrb[64].mxu1 %v12698_v28  ;;  %v13134_v28 = vpack.c.bf16 %v13108_v41, %v13106_v50 }
 0x7e1   :  { %20661 = vmatprep.mubr.bf16.mxu1 %v12699_v57  ;;  %20674 = vmatpush3.bf16.msra.mxu1 %v22302_v4  ;;  %v22318_v4 = vld [vmem:[%s27150_s2 + $0x3c0] sm:$0xff]   ;;  %v13135_v57 = vpack.c.bf16 %v13112_v45, %v13110_v15 }
 0x7e2   :  { %20675 = vmatprep.subr.bf16.mxu1 %v22303_v5 }
 0x7e5   :  { %20676 = vmatpush3.bf16.msra.mxu1 %v22303_v5  ;;  %v22319_v5 = vld [vmem:[%s27150_s2 + $0x3c8] sm:$0xff]  }
 0x7e6   :  { %20677 = vmatprep.subr.bf16.mxu1 %v22304_v9 }
 0x7e8   :  { %20662 = vmatmul.mubr.bf16.gmra.mrb[68].mxu1 %v12700_v49  ;;  %v13136_v49 = vpack.c.bf16 %v13116_v16, %v13114_v48 }
 0x7e9   :  { %20665 = vmatprep.mubr.bf16.mxu1 %v12701_v17  ;;  %20678 = vmatpush3.bf16.msra.mxu1 %v22304_v9  ;;  %v22320_v9 = vld [vmem:[%s27150_s2 + $0x3d0] sm:$0xff]   ;;  %v13137_v17 = vpack.c.bf16 %v13120_v61, %v13118_v43 }
 0x7ea   :  { %20679 = vmatprep.subr.bf16.mxu1 %v22305_v47 }
 0x7ed   :  { %20680 = vmatpush3.bf16.msra.mxu1 %v22305_v47  ;;  %v22321_v47 = vld [vmem:[%s27150_s2 + $0x3d8] sm:$0xff]  }
 0x7ee   :  { %20681 = vmatprep.subr.bf16.mxu1 %v22306_v46 }
 0x7f0   :  { %20666 = vmatmul.mubr.bf16.gmra.mrb[72].mxu1 %v12702_v8  ;;  %v13138_v8 = vpack.c.bf16 %v13124_v53, %v13122_v18  ;;  %v22332_v53 = vld [vmem:[%s27151_s3 + $0x70] sm:$0xff]  }
 0x7f1   :  { %20669 = vmatprep.mubr.bf16.mxu1 %v12703_v32  ;;  %20682 = vmatpush3.bf16.msra.mxu1 %v22306_v46  ;;  %v22322_v46 = vld [vmem:[%s27150_s2 + $0x3e0] sm:$0xff]   ;;  %v13139_v32 = vpack.c.bf16 %v13128_v12, %v13126_v54 }
 0x7f2   :  { %20683 = vmatprep.subr.bf16.mxu1 %v22307_v56 }
 0x7f5   :  { %20684 = vmatpush3.bf16.msra.mxu1 %v22307_v56  ;;  %v22323_v56 = vld [vmem:[%s27150_s2 + $0x3e8] sm:$0xff]  }
 0x7f6   :  { %20685 = vmatprep.subr.bf16.mxu1 %v22308_v10 }
 0x7f8   :  { %20670 = vmatmul.mubr.bf16.gmra.mrb[76].mxu1 %v12704_v26  ;;  %v13140_v26 = vpack.c.bf16 %v13132_v13, %v13130_v35 }
 0x7f9   :  { %20686 = vmatpush3.bf16.msra.mxu1 %v22308_v10  ;;  %20689 = vmatprep.mubr.bf16.mxu1 %v12915_v58  ;;  %v22324_v10 = vld [vmem:[%s27150_s2 + $0x3f0] sm:$0xff]   ;;  %v13351_v58 = vpack.c.bf16 %v13322_v52, %v13320_v19  ;;  %v26915_v52 = vld [vmem:[%s27151_s3] sm:$0xff]  }
 0x7fa   :  { %20687 = vmatprep.subr.bf16.mxu1 %v22309_v60 }
 0x7fd   :  { %20688 = vmatpush3.bf16.msra.mxu1 %v22309_v60  ;;  %v22325_v60 = vld [vmem:[%s27150_s2 + $0x3f8] sm:$0xff]  }
 0x7fe   :  { %20705 = vmatprep.subr.bf16.mxu1 %v22310_v55 }
 0x800   :  { %20690 = vmatmul.mubr.bf16.vlgmr.msra.gmra.mrb[64].mxu1 %v12916_v38  ;;  %v13328_v38 = vld [vmem:[#allocation2 + $0x10b] ss:$2 sm:$0xff] }
 0x801   :  { %20693 = vmatprep.mubr.bf16.mxu1 %v12917_v44  ;;  %20706 = vmatpush3.bf16.msra.mxu1 %v22310_v55  ;;  %v13326_v55 = vld [vmem:[#allocation2 + $0xdb] ss:$2 sm:$0xff]  ;;  %v13353_v29 = vpack.c.bf16 %v13330_v2, %v13328_v38 }
 0x802   :  { %20707 = vmatprep.subr.bf16.mxu1 %v22311_v7  ;;  %v13352_v0 = vpack.c.bf16 %v13326_v55, %v13324_v20  ;;  %v13334_v44 = vld [vmem:[#allocation2 + $0x19b] ss:$2 sm:$0xff] }
 0x805   :  { %20708 = vmatpush3.bf16.msra.mxu1 %v22311_v7  ;;  %v13332_v7 = vld [vmem:[#allocation2 + $0x16b] ss:$2 sm:$0xff] }
 0x806   :  { %20709 = vmatprep.subr.bf16.mxu1 %v22312_v63  ;;  %v13354_v59 = vpack.c.bf16 %v13334_v44, %v13332_v7 }
 0x808   :  { %20694 = vmatmul.mubr.bf16.gmra.mrb[68].mxu1 %v12918_v39  ;;  %v13342_v39 = vld [vmem:[#allocation2 + $0x28b] ss:$2 sm:$0xff] }
 0x809   :  { %20697 = vmatprep.mubr.bf16.mxu1 %v12919_v31  ;;  %20710 = vmatpush3.bf16.msra.mxu1 %v22312_v63  ;;  %v13338_v63 = vld [vmem:[#allocation2 + $0x22b] ss:$2 sm:$0xff] }
 0x80a   :  { %20711 = vmatprep.subr.bf16.mxu1 %v22313_v25  ;;  %v13355_v40 = vpack.c.bf16 %v13338_v63, %v13336_v23 }
 0x80d   :  { %20712 = vmatpush3.bf16.msra.mxu1 %v22313_v25  ;;  %v13340_v25 = vld [vmem:[#allocation2 + $0x25b] ss:$2 sm:$0xff] }
 0x80e   :  { %20713 = vmatprep.subr.bf16.mxu1 %v22314_v24  ;;  %v13356_v31 = vpack.c.bf16 %v13342_v39, %v13340_v25 }
 0x810   :  { %20698 = vmatmul.mubr.bf16.gmra.mrb[72].mxu1 %v12920_v51  ;;  %v13358_v51 = vpack.c.bf16 %v13350_v6, %v13348_v22 }
 0x811   :  { %20701 = vmatprep.mubr.bf16.mxu1 %v12921_v11  ;;  %20714 = vmatpush3.bf16.msra.mxu1 %v22314_v24  ;;  %v13344_v24 = vld [vmem:[#allocation2 + $0x2bb] ss:$2 sm:$0xff] }
 0x812   :  { %20715 = vmatprep.subr.bf16.mxu1 %v22315_v36  ;;  %v13357_v14 = vpack.c.bf16 %v13346_v21, %v13344_v24 }
 0x815   :  { %20716 = vmatpush3.bf16.msra.mxu1 %v22315_v36 }
 0x816   :  { %20717 = vmatprep.subr.bf16.mxu1 %v22316_v27 }
 0x818   :  { %20702 = vmatmul.mubr.bf16.gmra.mrb[76].mxu1 %v12922_v62 }
 0x819   :  { %20718 = vmatpush3.bf16.msra.mxu1 %v22316_v27  ;;  %20721 = vmatprep.mubr.bf16.mxu1 %v13133_v34 }
 0x81a   :  { %20719 = vmatprep.subr.bf16.mxu1 %v22317_v1 }
 0x81d   :  { %20720 = vmatpush3.bf16.msra.mxu1 %v22317_v1 }
 0x81e   :  { %20737 = vmatprep.subr.bf16.mxu1 %v22318_v4 }
 0x820   :  { %20722 = vmatmul.mubr.bf16.vlgmr.msra.gmra.mrb[64].mxu1 %v13134_v28  ;;  %v22329_v28 = vld [vmem:[%s27151_s3 + $0x58] sm:$0xff]  }
 0x821   :  { %20725 = vmatprep.mubr.bf16.mxu1 %v13135_v57  ;;  %20738 = vmatpush3.bf16.msra.mxu1 %v22318_v4  ;;  %v22330_v57 = vld [vmem:[%s27151_s3 + $0x60] sm:$0xff]  }
 0x822   :  { %20739 = vmatprep.subr.bf16.mxu1 %v22319_v5 }
 0x825   :  { %20740 = vmatpush3.bf16.msra.mxu1 %v22319_v5 }
 0x826   :  { %20741 = vmatprep.subr.bf16.mxu1 %v22320_v9 }
 0x828   :  { %20726 = vmatmul.mubr.bf16.gmra.mrb[68].mxu1 %v13136_v49 }
 0x829   :  { %20729 = vmatprep.mubr.bf16.mxu1 %v13137_v17  ;;  %20742 = vmatpush3.bf16.msra.mxu1 %v22320_v9 }
 0x82a   :  { %20743 = vmatprep.subr.bf16.mxu1 %v22321_v47 }
 0x82d   :  { %20744 = vmatpush3.bf16.msra.mxu1 %v22321_v47  ;;  %v22331_v47 = vld [vmem:[%s27151_s3 + $0x68] sm:$0xff]  }
 0x82e   :  { %20745 = vmatprep.subr.bf16.mxu1 %v22322_v46 }
 0x830   :  { %20730 = vmatmul.mubr.bf16.gmra.mrb[72].mxu1 %v13138_v8 }
 0x831   :  { %20733 = vmatprep.mubr.bf16.mxu1 %v13139_v32  ;;  %20746 = vmatpush3.bf16.msra.mxu1 %v22322_v46 }
 0x832   :  { %20747 = vmatprep.subr.bf16.mxu1 %v22323_v56 }
 0x835   :  { %20748 = vmatpush3.bf16.msra.mxu1 %v22323_v56 }
 0x836   :  { %20749 = vmatprep.subr.bf16.mxu1 %v22324_v10 }
 0x838   :  { %20734 = vmatmul.mubr.bf16.gmra.mrb[76].mxu1 %v13140_v26 }
 0x839   :  { %20750 = vmatpush3.bf16.msra.mxu1 %v22324_v10  ;;  %20753 = vmatprep.mubr.bf16.mxu1 %v13351_v58  ;;  %v22333_v10 = vld [vmem:[%s27151_s3 + $0x78] sm:$0xff]  }
 0x83a   :  { %20751 = vmatprep.subr.bf16.mxu1 %v22325_v60 }
 0x83d   :  { %20752 = vmatpush3.bf16.msra.mxu1 %v22325_v60 }
 0x83e   :  { %20769 = vmatprep.subr.bf16.mxu1 %v22326_v33 }
 0x840   :  { %20754 = vmatmul.mubr.bf16.vlgmr.msra.gmra.mrb[64].mxu1 %v13352_v0 }
 0x841   :  { %20757 = vmatprep.mubr.bf16.mxu1 %v13353_v29  ;;  %20770 = vmatpush3.bf16.msra.mxu1 %v22326_v33 }
 0x842   :  { %20771 = vmatprep.subr.bf16.mxu1 %v22327_v3 }
 0x845   :  { %20772 = vmatpush3.bf16.msra.mxu1 %v22327_v3 }
 0x846   :  { %20773 = vmatprep.subr.bf16.mxu1 %v22328_v42 }
 0x848   :  { %20758 = vmatmul.mubr.bf16.gmra.mrb[68].mxu1 %v13354_v59 }
 0x849   :  { %20761 = vmatprep.mubr.bf16.mxu1 %v13355_v40  ;;  %20774 = vmatpush3.bf16.msra.mxu1 %v22328_v42 }
 0x84a   :  { %20775 = vmatprep.subr.bf16.mxu1 %v22329_v28 }
 0x84d   :  { %20776 = vmatpush3.bf16.msra.mxu1 %v22329_v28 }
 0x84e   :  { %20777 = vmatprep.subr.bf16.mxu1 %v22330_v57 }
 0x850   :  { %20762 = vmatmul.mubr.bf16.gmra.mrb[72].mxu1 %v13356_v31 }
 0x851   :  { %20765 = vmatprep.mubr.bf16.mxu1 %v13357_v14  ;;  %20778 = vmatpush3.bf16.msra.mxu1 %v22330_v57 }
 0x852   :  { %20779 = vmatprep.subr.bf16.mxu1 %v22331_v47 }
 0x855   :  { %20780 = vmatpush3.bf16.msra.mxu1 %v22331_v47 }
 0x856   :  { %20781 = vmatprep.subr.bf16.mxu1 %v22332_v53 }
 0x858   :  { %20766 = vmatmul.mubr.bf16.gmra.mrb[76].mxu1 %v13358_v51 }
 0x859   :  { %20782 = vmatpush3.bf16.msra.mxu1 %v22332_v53 }
 0x85a   :  { %20783 = vmatprep.subr.bf16.mxu1 %v22333_v10 }
 0x85d   :  { %20784 = vmatpush3.bf16.msra.mxu1 %v22333_v10 }
 0x85e   :  { %20789 = vmatprep.subr.bf16.mxu1 %v26915_v52 }
 0x913   :  { %v26879_v30 = vpop.f32.mrb[64].mxu1 }
 0x914   :  { %v26881_v36 = vpop.f32.mrb[65].mxu1 }
 0x915   :  { %v26883_v11 = vpop.f32.mrb[66].mxu1 }
 0x916   :  { %v13461_v27 = vpop.f32.mrb[67].mxu1 }
 0x917   :  { %v13537_v37 = vadd.f32 %v13461_v27, %v26881_v36 }
 0x919   :  { %v13538_v62 = vadd.f32 %v26879_v30, %v13537_v37 }
 0x91b   :  { %v20759_v1 = vpop.f32.mrb[68].mxu1  ;;  %v13539_v34 = vadd.f32 %v26883_v11, %v13538_v62 }
 0x91c   :  { %v13474_v4 = vpop.f32.mrb[69].mxu1 }
 0x91d   :  { %v13540_v41 = vadd.f32 %v13539_v34, %v13474_v4  ;;  %v20760_v45 = vpop.f32.mrb[70].mxu1 }
 0x91e   :  { %v13477_v50 = vpop.f32.mrb[71].mxu1 }
 0x91f   :  { %v13541_v15 = vadd.f32 %v13540_v41, %v13477_v50 }
 0x921   :  { %v13542_v5 = vadd.f32 %v20759_v1, %v13541_v15 }
 0x923   :  { %v20763_v9 = vpop.f32.mrb[72].mxu1  ;;  %v13543_v48 = vadd.f32 %v20760_v45, %v13542_v5 }
 0x924   :  { %v13490_v16 = vpop.f32.mrb[73].mxu1 }
 0x925   :  { %v13544_v61 = vadd.f32 %v13543_v48, %v13490_v16  ;;  %v20764_v49 = vpop.f32.mrb[74].mxu1 }
 0x926   :  { %v13493_v43 = vpop.f32.mrb[75].mxu1 }
 0x927   :  { %v13545_v17 = vadd.f32 %v13544_v61, %v13493_v43 }
 0x929   :  { %v13546_v46 = vadd.f32 %v20763_v9, %v13545_v17 }
 0x92b   :  { %v20767_v12 = vpop.f32.mrb[76].mxu1  ;;  %v13547_v18 = vadd.f32 %v20764_v49, %v13546_v46 }
 0x92c   :  { %v13506_v8 = vpop.f32.mrb[77].mxu1 }
 0x92d   :  { %v13548_v54 = vadd.f32 %v13547_v18, %v13506_v8  ;;  %v20768_v56 = vpop.f32.mrb[78].mxu1 }
 0x92e   :  { %v13509_v32 = vpop.f32.mrb[79].mxu1 }
 0x92f   :  { %v13549_v35 = vadd.f32 %v13548_v54, %v13509_v32 }
 0x931   :  { %v13550_v13 = vadd.f32 %v20767_v12, %v13549_v35 }
 0x933   :  { %v13551_v26 = vadd.f32 %v20768_v56, %v13550_v13 }
 0x935   :  { %v13552_v19 = vrot.slane %v13551_v26, 4 }
 0x937   :  { %v13553_v60 = vadd.f32 %v13552_v19, %v13551_v26 }
 0x939   :  { %v13554_v58 = vrot.slane %v13553_v60, 2 }
 0x93b   :  { %v13555_v55 = vadd.f32 %v13554_v58, %v13553_v60 }
 0x93d   :  { %v13556_v2 = vrot.slane %v13555_v55, 1 }
 0x93f   :  { %v13557_v20 = vadd.f32 %v13556_v2, %v13555_v55 }
 0x941   :  { %v13559_v0 = vmul.f32 0.0078125, %v13557_v20 }
 0x943   :  { %v13560_v38 = vsub.f32 %v26881_v36, %v13559_v0  ;;  %v13561_v29 = vsub.f32 %v13461_v27, %v13559_v0  ;;  %v13562_v7 = vsub.f32 %v26879_v30, %v13559_v0  ;;  %v13563_v44 = vsub.f32 %v26883_v11, %v13559_v0 }
 0x944   :  { %v13564_v63 = vsub.f32 %v13474_v4, %v13559_v0  ;;  %v13565_v59 = vsub.f32 %v13477_v50, %v13559_v0  ;;  %v13566_v23 = vsub.f32 %v20759_v1, %v13559_v0  ;;  %v13567_v40 = vsub.f32 %v20760_v45, %v13559_v0 }
 0x945   :  { %v13568_v39 = vsub.f32 %v13490_v16, %v13559_v0  ;;  %v13569_v21 = vsub.f32 %v13493_v43, %v13559_v0  ;;  %v13570_v25 = vsub.f32 %v20763_v9, %v13559_v0  ;;  %v13571_v31 = vsub.f32 %v20764_v49, %v13559_v0 }
 0x946   :  { %v13572_v24 = vsub.f32 %v13506_v8, %v13559_v0  ;;  %v13573_v14 = vsub.f32 %v13509_v32, %v13559_v0  ;;  %v13574_v22 = vsub.f32 %v20767_v12, %v13559_v0  ;;  %v13575_v6 = vsub.f32 %v20768_v56, %v13559_v0 }
 0x947   :  { %v13576_v51 = vmul.f32 %v13560_v38, %v13560_v38  ;;  %v13577_v33 = vmul.f32 %v13561_v29, %v13561_v29  ;;  %v13578_v36 = vmul.f32 %v13562_v7, %v13562_v7  ;;  %v13579_v37 = vmul.f32 %v13563_v44, %v13563_v44 }
 0x948   :  { %v13580_v3 = vmul.f32 %v13564_v63, %v13564_v63  ;;  %v13581_v62 = vmul.f32 %v13565_v59, %v13565_v59  ;;  %v13582_v1 = vmul.f32 %v13566_v23, %v13566_v23  ;;  %v13583_v4 = vmul.f32 %v13567_v40, %v13567_v40 }
 0x949   :  { %v13592_v27 = vadd.f32 %v13577_v33, %v13576_v51  ;;  %v13584_v45 = vmul.f32 %v13568_v39, %v13568_v39  ;;  %v13585_v28 = vmul.f32 %v13569_v21, %v13569_v21  ;;  %v13586_v5 = vmul.f32 %v13570_v25, %v13570_v25 }
 0x94a   :  { %v13587_v9 = vmul.f32 %v13571_v31, %v13571_v31  ;;  %v13588_v16 = vmul.f32 %v13572_v24, %v13572_v24  ;;  %v13589_v49 = vmul.f32 %v13573_v14, %v13573_v14  ;;  %v13590_v47 = vmul.f32 %v13574_v22, %v13574_v22 }
 0x94b   :  { %v13593_v30 = vadd.f32 %v13592_v27, %v13578_v36  ;;  %v13591_v46 = vmul.f32 %v13575_v6, %v13575_v6 }
 0x94d   :  { %v13594_v11 = vadd.f32 %v13593_v30, %v13579_v37 }
 0x94f   :  { %v13595_v42 = vadd.f32 %v13594_v11, %v13580_v3 }
 0x951   :  { %v13596_v34 = vadd.f32 %v13595_v42, %v13581_v62 }
 0x953   :  { %v13597_v41 = vadd.f32 %v13596_v34, %v13582_v1 }
 0x955   :  { %v13598_v50 = vadd.f32 %v13597_v41, %v13583_v4 }
 0x957   :  { %v13599_v15 = vadd.f32 %v13598_v50, %v13584_v45 }
 0x959   :  { %v13600_v57 = vadd.f32 %v13599_v15, %v13585_v28 }
 0x95b   :  { %v13601_v48 = vadd.f32 %v13600_v57, %v13586_v5 }
 0x95d   :  { %v13602_v61 = vadd.f32 %v13601_v48, %v13587_v9 }
 0x95f   :  { %v13603_v43 = vadd.f32 %v13602_v61, %v13588_v16 }
 0x961   :  { %v13604_v17 = vadd.f32 %v13603_v43, %v13589_v49  ;;  %v13787_v43 = vld [vmem:[#allocation3 + $0x1] ss:$2 sm:$0xf] }
 0x963   :  { %v13605_v53 = vadd.f32 %v13604_v17, %v13590_v47  ;;  %v13795_v17 = vld [vmem:[#allocation3 + $0xa1] ss:$2 sm:$0xf] }
 0x965   :  { %v13606_v12 = vadd.f32 %v13605_v53, %v13591_v46  ;;  %v13737_v53 = vld [vmem:[#allocation3] ss:$2 sm:$0xf] }
 0x967   :  { %v13607_v18 = vrot.slane %v13606_v12, 4 }
 0x969   :  { %v13608_v8 = vadd.f32 %v13607_v18, %v13606_v12 }
 0x96b   :  { %v13609_v54 = vrot.slane %v13608_v8, 2 }
 0x96d   :  { %v13610_v56 = vadd.f32 %v13609_v54, %v13608_v8 }
 0x96f   :  { %v13611_v32 = vrot.slane %v13610_v56, 1 }
 0x971   :  { %v13612_v10 = vadd.f32 %v13611_v32, %v13610_v56 }
 0x973   :  { %v13613_v35 = vmul.f32 0.0078125, %v13612_v10 }
 0x975   :  { %v13614_v13 = vadd.f32 1e-05, %v13613_v35 }
 0x977   :  { %22398 = vrsqrt.f32 %v13614_v13 }
 0x981   :  { %v22399_v26 = vpop.eup %22398 }
 0x982   :  { %v13616_v19 = vmul.f32 %v22399_v26, %v13560_v38  ;;  %v13617_v60 = vmul.f32 %v22399_v26, %v13561_v29  ;;  %v13618_v58 = vmul.f32 %v22399_v26, %v13562_v7  ;;  %v13619_v55 = vmul.f32 %v22399_v26, %v13563_v44 }
 0x983   :  { %v13620_v2 = vmul.f32 %v22399_v26, %v13564_v63  ;;  %v13621_v20 = vmul.f32 %v22399_v26, %v13565_v59  ;;  %v13622_v0 = vmul.f32 %v22399_v26, %v13566_v23  ;;  %v13623_v51 = vmul.f32 %v22399_v26, %v13567_v40 }
 0x984   :  { %v13624_v33 = vmul.f32 %v22399_v26, %v13568_v39  ;;  %v13625_v36 = vmul.f32 %v22399_v26, %v13569_v21  ;;  %v13626_v27 = vmul.f32 %v22399_v26, %v13570_v25  ;;  %v13627_v37 = vmul.f32 %v22399_v26, %v13571_v31 }
 0x985   :  { %v13628_v30 = vmul.f32 %v22399_v26, %v13572_v24  ;;  %v13629_v3 = vmul.f32 %v22399_v26, %v13573_v14  ;;  %v13630_v11 = vmul.f32 %v22399_v26, %v13574_v22  ;;  %v13631_v62 = vmul.f32 %v22399_v26, %v13575_v6 }
 0x986   :  { %vm13632_vm2 = vcmp.ge.f32.partialorder %v13616_v19, 0.0  ;;  %vm13633_vm3 = vcmp.ge.f32.partialorder %v13617_v60, 0.0  ;;  %vm13634_vm4 = vcmp.ge.f32.partialorder %v13618_v58, 0.0  ;;  %vm13635_vm5 = vcmp.ge.f32.partialorder %v13619_v55, 0.0 }
 0x987   :  { %vm13636_vm6 = vcmp.ge.f32.partialorder %v13620_v2, 0.0  ;;  %vm13637_vm7 = vcmp.ge.f32.partialorder %v13621_v20, 0.0  ;;  %vm13638_vm8 = vcmp.ge.f32.partialorder %v13622_v0, 0.0  ;;  %vm13639_vm9 = vcmp.ge.f32.partialorder %v13623_v51, 0.0 }
 0x988   :  { %vm13640_vm10 = vcmp.ge.f32.partialorder %v13624_v33, 0.0  ;;  %vm13641_vm11 = vcmp.ge.f32.partialorder %v13625_v36, 0.0  ;;  %vm13642_vm12 = vcmp.ge.f32.partialorder %v13626_v27, 0.0  ;;  %vm13643_vm13 = vcmp.ge.f32.partialorder %v13627_v37, 0.0 }
 0x989   :  { %vm13644_vm14 = vcmp.ge.f32.partialorder %v13628_v30, 0.0  ;;  %vm13645_vm15 = vcmp.ge.f32.partialorder %v13629_v3, 0.0  ;;  %vm13646_vm0 = vcmp.ge.f32.partialorder %v13630_v11, 0.0  ;;  %vm13647_vm1 = vcmp.ge.f32.partialorder %v13631_v62, 0.0 }
 0x98a   :  { %v13648_v38 = vmul.f32 0.2, %v13616_v19  ;;  %v13649_v29 = vmul.f32 0.2, %v13617_v60  ;;  %v13650_v7 = vmul.f32 0.2, %v13618_v58 }
 0x98b   :  { %v13651_v44 = vmul.f32 0.2, %v13619_v55  ;;  %v13652_v63 = vmul.f32 0.2, %v13620_v2  ;;  %v13653_v59 = vmul.f32 0.2, %v13621_v20 }
 0x98c   :  { %v13654_v23 = vmul.f32 0.2, %v13622_v0  ;;  %v13655_v40 = vmul.f32 0.2, %v13623_v51  ;;  %v13656_v39 = vmul.f32 0.2, %v13624_v33  ;;  %v13664_v21 = vsel %vm13632_vm2, %v13616_v19, %v13648_v38 }
 0x98d   :  { %v13657_v25 = vmul.f32 0.2, %v13625_v36  ;;  %v13658_v31 = vmul.f32 0.2, %v13626_v27  ;;  %v13659_v24 = vmul.f32 0.2, %v13627_v37  ;;  %v13665_v14 = vsel %vm13633_vm3, %v13617_v60, %v13649_v29 }
 0x98e   :  { %13721 = vst [vmem:[#allocation3 + $0x11] sm:$0xff] %v13664_v21  ;;  %v13660_v22 = vmul.f32 0.2, %v13628_v30  ;;  %v13661_v6 = vmul.f32 0.2, %v13629_v3  ;;  %v13666_v1 = vsel %vm13634_vm4, %v13618_v58, %v13650_v7  ;;  %13722 = vst [vmem:[#allocation3 + $0x21] sm:$0xff] %v13665_v14  ;;  %v13667_v4 = vsel %vm13635_vm5, %v13619_v55, %v13651_v44 }
 0x98f   :  { %v13662_v42 = vmul.f32 0.2, %v13630_v11  ;;  %v13663_v34 = vmul.f32 0.2, %v13631_v62  ;;  %v13668_v41 = vsel %vm13636_vm6, %v13620_v2, %v13652_v63  ;;  %v13669_v45 = vsel %vm13637_vm7, %v13621_v20, %v13653_v59  ;;  %13723 = vst [vmem:[#allocation3 + $0x31] sm:$0xff] %v13666_v1  ;;  %13724 = vst [vmem:[#allocation3 + $0x41] sm:$0xff] %v13667_v4 }
 0x990   :  { %v13670_v50 = vsel %vm13638_vm8, %v13622_v0, %v13654_v23  ;;  %v13671_v28 = vsel %vm13639_vm9, %v13623_v51, %v13655_v40  ;;  %v13672_v15 = vsel %vm13640_vm10, %v13624_v33, %v13656_v39  ;;  %v13673_v5 = vsel %vm13641_vm11, %v13625_v36, %v13657_v25  ;;  %13725 = vst [vmem:[#allocation3 + $0x51] sm:$0xff] %v13668_v41  ;;  %v22335_v20 = vld [vmem:[%s27151_s3 + $0x8] sm:$0xff]   ;;  %v22336_v51 = vld [vmem:[%s27151_s3 + $0x10] sm:$0xff]   ;;  %v22337_v33 = vld [vmem:[%s27151_s3 + $0x18] sm:$0xff]  }
 0x991   :  { %13726 = vst [vmem:[#allocation3 + $0x61] sm:$0xff] %v13669_v45  ;;  %v13674_v57 = vsel %vm13642_vm12, %v13626_v27, %v13658_v31  ;;  %v13675_v9 = vsel %vm13643_vm13, %v13627_v37, %v13659_v24  ;;  %v13676_v48 = vsel %vm13644_vm14, %v13628_v30, %v13660_v22  ;;  %v13677_v16 = vsel %vm13645_vm15, %v13629_v3, %v13661_v6  ;;  %v22338_v36 = vld [vmem:[%s27151_s3 + $0x20] sm:$0xff]   ;;  %v22340_v27 = vld [vmem:[%s27151_s3 + $0x30] sm:$0xff]   ;;  %v22341_v37 = vld [vmem:[%s27151_s3 + $0x38] sm:$0xff]  }
 0x992   :  { %13727 = vst [vmem:[#allocation3 + $0x71] sm:$0xff] %v13670_v50  ;;  %13728 = vst [vmem:[#allocation3 + $0x81] sm:$0xff] %v13671_v28  ;;  %v13678_v61 = vsel %vm13646_vm0, %v13630_v11, %v13662_v42  ;;  %v13679_v49 = vsel %vm13647_vm1, %v13631_v62, %v13663_v34  ;;  %v13745_v30 = vld [vmem:[#allocation3 + $0xa0] ss:$2 sm:$0xf]  ;;  %v22343_v25 = vld [vmem:[%s27151_s3 + $0x88] sm:$0xff]  }
 0x993   :  { %13729 = vst [vmem:[#allocation3 + $0xb1] sm:$0xff] %v13672_v15  ;;  %13730 = vst [vmem:[#allocation3 + $0xc1] sm:$0xff] %v13673_v5  ;;  %v14032_v11 = vld [vmem:[#allocation3 + $0x2] ss:$2 sm:$0xf]  ;;  %v22344_v24 = vld [vmem:[%s27151_s3 + $0x90] sm:$0xff]  }
 0x994   :  { %13731 = vst [vmem:[#allocation3 + $0xd1] sm:$0xff] %v13674_v57  ;;  %13732 = vst [vmem:[#allocation3 + $0xe1] sm:$0xff] %v13675_v9  ;;  %v22342_v23 = vld [vmem:[%s27151_s3 + $0x80] sm:$0xff]   ;;  %v22345_v14 = vld [vmem:[%s27151_s3 + $0x98] sm:$0xff]   ;;  %vm15174_vm6 = vcmask 130112   ;;  %vm15185_vm7 = vcmask 1041409  }
 0x995   :  { %13733 = vst [vmem:[#allocation3 + $0xf1] sm:$0xff] %v13676_v48  ;;  %13734 = vst [vmem:[#allocation3 + $0x101] sm:$0xff] %v13677_v16  ;;  %v13789_v47 = vld [vmem:[#allocation3 + $0x21] ss:$2 sm:$0xf]  ;;  %v22347_v6 = vld [vmem:[%s27151_s3 + $0xa8] sm:$0xff]  }
 0x996   :  { %13735 = vst [vmem:[#allocation3 + $0x111] sm:$0xff] %v13678_v61  ;;  %13736 = vst [vmem:[#allocation3 + $0x121] sm:$0xff] %v13679_v49  ;;  %v13810_v46 = vcombine.low %v13787_v43, %v13789_v47  ;;  %v13739_v12 = vld [vmem:[#allocation3 + $0x20] ss:$2 sm:$0xf]  ;;  %v22348_v42 = vld [vmem:[%s27151_s3 + $0xb0] sm:$0xff]  }
 0x997   :  { %v13791_v18 = vld [vmem:[#allocation3 + $0x41] ss:$2 sm:$0xf]  ;;  %v13741_v32 = vld [vmem:[#allocation3 + $0x40] ss:$2 sm:$0xf]  ;;  %v13760_v26 = vcombine.low %v13737_v53, %v13739_v12 }
 0x998   :  { %v13793_v8 = vld [vmem:[#allocation3 + $0x61] ss:$2 sm:$0xf]  ;;  %v13743_v58 = vld [vmem:[#allocation3 + $0x60] ss:$2 sm:$0xf] }
 0x999   :  { %v13811_v54 = vcombine.low %v13791_v18, %v13793_v8  ;;  %v13761_v55 = vcombine.low %v13741_v32, %v13743_v58  ;;  %v14034_v62 = vld [vmem:[#allocation3 + $0x22] ss:$2 sm:$0xf]  ;;  %v22349_v1 = vld [vmem:[%s27151_s3 + $0xb8] sm:$0xff]   ;;  %v22356_v18 = vld [vmem:[%s27151_s3 + $0xf0] sm:$0xff]   ;;  %vm15188_vm8 = vcmask 123904  }
 0x99a   :  { %v13797_v56 = vld [vmem:[#allocation3 + $0xc1] ss:$2 sm:$0xf]  ;;  %v13747_v3 = vld [vmem:[#allocation3 + $0xc0] ss:$2 sm:$0xf]  ;;  %v14055_v40 = vcombine.low %v14032_v11, %v14034_v62 }
 0x99b   :  { %v13799_v10 = vld [vmem:[#allocation3 + $0xe1] ss:$2 sm:$0xf]  ;;  %v13812_v13 = vcombine.low %v13795_v17, %v13797_v56  ;;  %v13818_v19 = vpack.c.bf16 %v13811_v54, %v13810_v46  ;;  %v13768_v0 = vpack.c.bf16 %v13761_v55, %v13760_v26  ;;  %v13749_v38 = vld [vmem:[#allocation3 + $0xe0] ss:$2 sm:$0xf]  ;;  %v13762_v63 = vcombine.low %v13745_v30, %v13747_v3 }
 0x99c   :  { %v13801_v35 = vld [vmem:[#allocation3 + $0x101] ss:$2 sm:$0xf]  ;;  %v13751_v29 = vld [vmem:[#allocation3 + $0x100] ss:$2 sm:$0xf] }
 0x99d   :  { %v13813_v60 = vcombine.low %v13799_v10, %v13801_v35  ;;  %20785 = vmatprep.mubr.bf16.mxu1 %v13818_v19  ;;  %v14036_v7 = vld [vmem:[#allocation3 + $0x42] ss:$2 sm:$0xf]  ;;  %v13763_v59 = vcombine.low %v13749_v38, %v13751_v29  ;;  %v14183_v41 = vld [vmem:[#allocation3 + $0x10] ss:$2 sm:$0xf] }
 0x99e   :  { %v14038_v44 = vld [vmem:[#allocation3 + $0x62] ss:$2 sm:$0xf]  ;;  %v14185_v45 = vld [vmem:[#allocation3 + $0x30] ss:$2 sm:$0xf] }
 0x99f   :  { %v13819_v2 = vpack.c.bf16 %v13813_v60, %v13812_v13  ;;  %v14056_v39 = vcombine.low %v14036_v7, %v14038_v44  ;;  %v13769_v21 = vpack.c.bf16 %v13763_v59, %v13762_v63  ;;  %v22346_v22 = vld [vmem:[%s27151_s3 + $0xa0] sm:$0xff]   ;;  %v14187_v15 = vld [vmem:[#allocation3 + $0x50] ss:$2 sm:$0xf]  ;;  %v14206_v16 = vcombine.low %v14183_v41, %v14185_v45  ;;  %v22351_v43 = vld [vmem:[%s27151_s3 + $0xc8] sm:$0xff]  }
 0x9a0   :  { %v14040_v34 = vld [vmem:[#allocation3 + $0xa2] ss:$2 sm:$0xf]  ;;  %v14189_v5 = vld [vmem:[#allocation3 + $0x70] ss:$2 sm:$0xf] }
 0x9a1   :  { %20786 = vmatmul.mubr.bf16.vlgmr.msra.gmra.mrb[80].mxu1 %v13819_v2  ;;  %v14063_v31 = vpack.c.bf16 %v14056_v39, %v14055_v40  ;;  %v14042_v4 = vld [vmem:[#allocation3 + $0xc2] ss:$2 sm:$0xf]  ;;  %v14207_v61 = vcombine.low %v14187_v15, %v14189_v5  ;;  %v22352_v17 = vld [vmem:[%s27151_s3 + $0xd0] sm:$0xff]   ;;  %v22353_v46 = vld [vmem:[%s27151_s3 + $0xd8] sm:$0xff]   ;;  %vm15198_vm9 = vcmask 1024  }
 0x9a2   :  { %20790 = vmatpush3.bf16.msra.mxu1 %v26915_v52  ;;  %20805 = vmatprep.mubr.bf16.mxu1 %v13768_v0  ;;  %v22339_v52 = vld [vmem:[%s27151_s3 + $0x28] sm:$0xff]   ;;  %v14057_v57 = vcombine.low %v14040_v34, %v14042_v4  ;;  %v22350_v48 = vld [vmem:[%s27151_s3 + $0xc0] sm:$0xff]   ;;  %v22357_v8 = vld [vmem:[%s27151_s3 + $0xf8] sm:$0xff]  }
 0x9a3   :  { %20791 = vmatprep.subr.bf16.mxu1 %v22335_v20  ;;  %v14044_v50 = vld [vmem:[#allocation3 + $0xe2] ss:$2 sm:$0xf]  ;;  %v14214_v47 = vpack.c.bf16 %v14207_v61, %v14206_v16  ;;  %v14191_v54 = vld [vmem:[#allocation3 + $0xb0] ss:$2 sm:$0xf] }
 0x9a4   :  { %v14046_v28 = vld [vmem:[#allocation3 + $0x102] ss:$2 sm:$0xf]  ;;  %v14193_v56 = vld [vmem:[#allocation3 + $0xd0] ss:$2 sm:$0xf] }
 0x9a5   :  { %v14058_v9 = vcombine.low %v14044_v50, %v14046_v28  ;;  %v22354_v53 = vld [vmem:[%s27151_s3 + $0xe0] sm:$0xff]   ;;  %v22355_v12 = vld [vmem:[%s27151_s3 + $0xe8] sm:$0xff]   ;;  %v14195_v32 = vld [vmem:[#allocation3 + $0xf0] ss:$2 sm:$0xf]  ;;  %v14208_v60 = vcombine.low %v14191_v54, %v14193_v56 }
 0x9a6   :  { %20792 = vmatpush3.bf16.msra.mxu1 %v22335_v20  ;;  %v14335_v10 = vld [vmem:[#allocation3 + $0x11] ss:$2 sm:$0xf]  ;;  %v14197_v35 = vld [vmem:[#allocation3 + $0x110] ss:$2 sm:$0xf] }
 0x9a7   :  { %20793 = vmatprep.subr.bf16.mxu1 %v22336_v51  ;;  %v14064_v49 = vpack.c.bf16 %v14058_v9, %v14057_v57  ;;  %v14337_v13 = vld [vmem:[#allocation3 + $0x31] ss:$2 sm:$0xf]  ;;  %v14209_v58 = vcombine.low %v14195_v32, %v14197_v35  ;;  %v22358_v55 = vld [vmem:[%s27151_s3 + $0x100] sm:$0xff]   ;;  %v22365_v3 = vld [vmem:[%s27151_s3 + $0x138] sm:$0xff]  }
 0x9a8   :  { %v14339_v26 = vld [vmem:[#allocation3 + $0x51] ss:$2 sm:$0xf]  ;;  %v14358_v2 = vcombine.low %v14335_v10, %v14337_v13  ;;  %v14487_v7 = vld [vmem:[#allocation3 + $0x12] ss:$2 sm:$0xf] }
 0x9a9   :  { %v14341_v19 = vld [vmem:[#allocation3 + $0x71] ss:$2 sm:$0xf]  ;;  %v14215_v0 = vpack.c.bf16 %v14209_v58, %v14208_v60  ;;  %v14489_v44 = vld [vmem:[#allocation3 + $0x32] ss:$2 sm:$0xf] }
 0x9aa   :  { %20794 = vmatpush3.bf16.msra.mxu1 %v22336_v51  ;;  %v14359_v20 = vcombine.low %v14339_v26, %v14341_v19  ;;  %v22359_v51 = vld [vmem:[%s27151_s3 + $0x108] sm:$0xff]   ;;  %v22364_v30 = vld [vmem:[%s27151_s3 + $0x130] sm:$0xff]   ;;  %v22366_v39 = vld [vmem:[%s27151_s3 + $0x140] sm:$0xff]  }
 0x9ab   :  { %20795 = vmatprep.subr.bf16.mxu1 %v22337_v33  ;;  %v14343_v11 = vld [vmem:[#allocation3 + $0xb1] ss:$2 sm:$0xf]  ;;  %v14491_v63 = vld [vmem:[#allocation3 + $0x52] ss:$2 sm:$0xf] }
 0x9ac   :  { %v14345_v62 = vld [vmem:[#allocation3 + $0xd1] ss:$2 sm:$0xf]  ;;  %v14493_v59 = vld [vmem:[#allocation3 + $0x72] ss:$2 sm:$0xf] }
 0x9ad   :  { %v14347_v38 = vld [vmem:[#allocation3 + $0xf1] ss:$2 sm:$0xf]  ;;  %v14495_v4 = vld [vmem:[#allocation3 + $0xb2] ss:$2 sm:$0xf] }
 0x9ae   :  { %20796 = vmatpush3.bf16.msra.mxu1 %v22337_v33  ;;  %v14366_v33 = vpack.c.bf16 %v14359_v20, %v14358_v2  ;;  %v14349_v29 = vld [vmem:[#allocation3 + $0x111] ss:$2 sm:$0xf]  ;;  %v14497_v41 = vld [vmem:[#allocation3 + $0xd2] ss:$2 sm:$0xf] }
 0x9af   :  { %20797 = vmatprep.subr.bf16.mxu1 %v22338_v36  ;;  %v14361_v40 = vcombine.low %v14347_v38, %v14349_v29  ;;  %v22372_v34 = vld [vmem:[%s27151_s3 + $0x170] sm:$0xff]   ;;  %v22373_v50 = vld [vmem:[%s27151_s3 + $0x178] sm:$0xff]   ;;  %v14639_v15 = vld [vmem:[#allocation3 + $0x20] ss:$2 sm:$0xf] }
 0x9b0   :  { %v14499_v45 = vld [vmem:[#allocation3 + $0xf2] ss:$2 sm:$0xf]  ;;  %v14641_v5 = vld [vmem:[#allocation3 + $0x40] ss:$2 sm:$0xf] }
 0x9b1   :  { %v14501_v28 = vld [vmem:[#allocation3 + $0x112] ss:$2 sm:$0xf]  ;;  %v14643_v57 = vld [vmem:[#allocation3 + $0x60] ss:$2 sm:$0xf] }
 0x9b2   :  { %20798 = vmatpush3.bf16.msra.mxu1 %v22338_v36  ;;  %v22360_v36 = vld [vmem:[%s27151_s3 + $0x110] sm:$0xff]   ;;  %v14645_v9 = vld [vmem:[#allocation3 + $0x80] ss:$2 sm:$0xf]  ;;  %v14513_v16 = vcombine.low %v14499_v45, %v14501_v28  ;;  %v22381_v35 = vld [vmem:[%s27151_s3 + $0x1b8] sm:$0xff]  }
 0x9b3   :  { %20799 = vmatprep.subr.bf16.mxu1 %v22339_v52  ;;  %v22374_v61 = vld [vmem:[%s27151_s3 + $0x180] sm:$0xff]   ;;  %v22380_v54 = vld [vmem:[%s27151_s3 + $0x1b0] sm:$0xff]  }
 0x9b4   :  { %v14647_v56 = vld [vmem:[#allocation3 + $0xc0] ss:$2 sm:$0xf]  ;;  %v14791_v26 = vld [vmem:[#allocation3 + $0x21] ss:$2 sm:$0xf] }
 0x9b5   :  { %v14649_v32 = vld [vmem:[#allocation3 + $0xe0] ss:$2 sm:$0xf]  ;;  %v14793_v19 = vld [vmem:[#allocation3 + $0x41] ss:$2 sm:$0xf] }
 0x9b6   :  { %20800 = vmatpush3.bf16.msra.mxu1 %v22339_v52  ;;  %v22361_v52 = vld [vmem:[%s27151_s3 + $0x118] sm:$0xff]   ;;  %v14651_v10 = vld [vmem:[#allocation3 + $0x100] ss:$2 sm:$0xf] }
 0x9b7   :  { %20801 = vmatprep.subr.bf16.mxu1 %v22340_v27  ;;  %v14653_v13 = vld [vmem:[#allocation3 + $0x120] ss:$2 sm:$0xf]  ;;  %v14795_v60 = vld [vmem:[#allocation3 + $0x61] ss:$2 sm:$0xf] }
 0x9b8   :  { %v14797_v58 = vld [vmem:[#allocation3 + $0x81] ss:$2 sm:$0xf]  ;;  %v14665_v2 = vcombine.low %v14651_v10, %v14653_v13  ;;  %v14951_v45 = vld [vmem:[#allocation3 + $0xc2] ss:$2 sm:$0xf] }
 0x9b9   :  { %v22382_v20 = vld [vmem:[%s27151_s3 + $0x1c0] sm:$0xff]  }
 0x9ba   :  { %20802 = vmatpush3.bf16.msra.mxu1 %v22340_v27  ;;  %v22362_v27 = vld [vmem:[%s27151_s3 + $0x120] sm:$0xff]  }
 0x9bb   :  { %20803 = vmatprep.subr.bf16.mxu1 %v22341_v37  ;;  %v14801_v38 = vld [vmem:[#allocation3 + $0xe1] ss:$2 sm:$0xf]  ;;  %v14953_v28 = vld [vmem:[#allocation3 + $0xe2] ss:$2 sm:$0xf] }
 0x9bc   :  { %v14803_v29 = vld [vmem:[#allocation3 + $0x101] ss:$2 sm:$0xf] }
 0x9be   :  { %20804 = vmatpush3.bf16.msra.mxu1 %v22341_v37  ;;  %v22363_v37 = vld [vmem:[%s27151_s3 + $0x128] sm:$0xff]  }
 0x9bf   :  { %20809 = vmatprep.subr.bf16.mxu1 %v22342_v23 }
 0x9c1   :  { %20806 = vmatmul.mubr.bf16.vlgmr.msra.gmra.mrb[80].mxu1 %v13769_v21  ;;  %v14510_v21 = vcombine.low %v14487_v7, %v14489_v44  ;;  %v22389_v7 = vld [vmem:[%s27151_s3 + $0x1f8] sm:$0xff]   ;;  %v14805_v44 = vld [vmem:[#allocation3 + $0x121] ss:$2 sm:$0xf] }
 0x9c2   :  { %20810 = vmatpush3.bf16.msra.mxu1 %v22342_v23  ;;  %20825 = vmatprep.mubr.bf16.mxu1 %v14063_v31  ;;  %v14360_v23 = vcombine.low %v14343_v11, %v14345_v62  ;;  %v22388_v11 = vld [vmem:[%s27151_s3 + $0x1f0] sm:$0xff]   ;;  %v14799_v62 = vld [vmem:[#allocation3 + $0xc1] ss:$2 sm:$0xf] }
 0x9c3   :  { %20811 = vmatprep.subr.bf16.mxu1 %v22343_v25 }
 0x9c4   :  { %v14367_v31 = vpack.c.bf16 %v14361_v40, %v14360_v23  ;;  %v14947_v23 = vld [vmem:[#allocation3 + $0x62] ss:$2 sm:$0xf] }
 0x9c5   :  { %v14949_v40 = vld [vmem:[#allocation3 + $0x82] ss:$2 sm:$0xf] }
 0x9c6   :  { %20812 = vmatpush3.bf16.msra.mxu1 %v22343_v25  ;;  %v14511_v25 = vcombine.low %v14491_v63, %v14493_v59  ;;  %v14943_v63 = vld [vmem:[#allocation3 + $0x22] ss:$2 sm:$0xf] }
 0x9c7   :  { %20813 = vmatprep.subr.bf16.mxu1 %v22344_v24  ;;  %v14945_v59 = vld [vmem:[#allocation3 + $0x42] ss:$2 sm:$0xf] }
 0x9ca   :  { %20814 = vmatpush3.bf16.msra.mxu1 %v22344_v24  ;;  %v22367_v24 = vld [vmem:[%s27151_s3 + $0x148] sm:$0xff]  }
 0x9cb   :  { %20815 = vmatprep.subr.bf16.mxu1 %v22345_v14 }
 0x9ce   :  { %20816 = vmatpush3.bf16.msra.mxu1 %v22345_v14  ;;  %v14518_v14 = vpack.c.bf16 %v14511_v25, %v14510_v21  ;;  %v14817_v21 = vcombine.low %v14803_v29, %v14805_v44  ;;  %v22390_v25 = vld [vmem:[%s27151_s3 + $0x200] sm:$0xff]  }
 0x9cf   :  { %20817 = vmatprep.subr.bf16.mxu1 %v22346_v22  ;;  %v15145_v44 = vld [vmem:[%s27152_s4] sm:$0xff] }
 0x9d2   :  { %20818 = vmatpush3.bf16.msra.mxu1 %v22346_v22  ;;  %v22368_v22 = vld [vmem:[%s27151_s3 + $0x150] sm:$0xff]  }
 0x9d3   :  { %20819 = vmatprep.subr.bf16.mxu1 %v22347_v6 }
 0x9d6   :  { %20820 = vmatpush3.bf16.msra.mxu1 %v22347_v6  ;;  %v22369_v6 = vld [vmem:[%s27151_s3 + $0x158] sm:$0xff]  }
 0x9d7   :  { %20821 = vmatprep.subr.bf16.mxu1 %v22348_v42 }
 0x9da   :  { %20822 = vmatpush3.bf16.msra.mxu1 %v22348_v42  ;;  %v22370_v42 = vld [vmem:[%s27151_s3 + $0x160] sm:$0xff]  }
 0x9db   :  { %20823 = vmatprep.subr.bf16.mxu1 %v22349_v1 }
 0x9de   :  { %20824 = vmatpush3.bf16.msra.mxu1 %v22349_v1  ;;  %v22371_v1 = vld [vmem:[%s27151_s3 + $0x168] sm:$0xff]  }
 0x9df   :  { %20829 = vmatprep.subr.bf16.mxu1 %v22350_v48 }
 0x9e1   :  { %20826 = vmatmul.mubr.bf16.vlgmr.msra.gmra.mrb[80].mxu1 %v14064_v49  ;;  %v14662_v49 = vcombine.low %v14639_v15, %v14641_v5  ;;  %v14955_v15 = vld [vmem:[#allocation3 + $0x102] ss:$2 sm:$0xf] }
 0x9e2   :  { %20830 = vmatpush3.bf16.msra.mxu1 %v22350_v48  ;;  %20845 = vmatprep.mubr.bf16.mxu1 %v14214_v47  ;;  %v14512_v48 = vcombine.low %v14495_v4, %v14497_v41  ;;  %v22395_v4 = vld [vmem:[%s27151_s3 + $0x228] sm:$0xff]   ;;  %v22396_v41 = vld [vmem:[%s27151_s3 + $0x230] sm:$0xff]  }
 0x9e3   :  { %20831 = vmatprep.subr.bf16.mxu1 %v22351_v43  ;;  %v14957_v5 = vld [vmem:[#allocation3 + $0x122] ss:$2 sm:$0xf] }
 0x9e4   :  { %v14519_v47 = vpack.c.bf16 %v14513_v16, %v14512_v48 }
 0x9e6   :  { %20832 = vmatpush3.bf16.msra.mxu1 %v22351_v43  ;;  %v14663_v43 = vcombine.low %v14643_v57, %v14645_v9  ;;  %v14968_v57 = vcombine.low %v14951_v45, %v14953_v28  ;;  %v14969_v9 = vcombine.low %v14955_v15, %v14957_v5 }
 0x9e7   :  { %20833 = vmatprep.subr.bf16.mxu1 %v22352_v17 }
 0x9e8   :  { %v14975_v48 = vpack.c.bf16 %v14969_v9, %v14968_v57 }
 0x9ea   :  { %20834 = vmatpush3.bf16.msra.mxu1 %v22352_v17  ;;  %v22375_v17 = vld [vmem:[%s27151_s3 + $0x188] sm:$0xff]  }
 0x9eb   :  { %20835 = vmatprep.subr.bf16.mxu1 %v22353_v46 }
 0x9ee   :  { %20836 = vmatpush3.bf16.msra.mxu1 %v22353_v46  ;;  %v14670_v46 = vpack.c.bf16 %v14663_v43, %v14662_v49 }
 0x9ef   :  { %20837 = vmatprep.subr.bf16.mxu1 %v22354_v53 }
 0x9f2   :  { %20838 = vmatpush3.bf16.msra.mxu1 %v22354_v53  ;;  %v22376_v53 = vld [vmem:[%s27151_s3 + $0x190] sm:$0xff]  }
 0x9f3   :  { %20839 = vmatprep.subr.bf16.mxu1 %v22355_v12 }
 0x9f6   :  { %20840 = vmatpush3.bf16.msra.mxu1 %v22355_v12  ;;  %v22377_v12 = vld [vmem:[%s27151_s3 + $0x198] sm:$0xff]  }
 0x9f7   :  { %20841 = vmatprep.subr.bf16.mxu1 %v22356_v18 }
 0x9fa   :  { %20842 = vmatpush3.bf16.msra.mxu1 %v22356_v18  ;;  %v22378_v18 = vld [vmem:[%s27151_s3 + $0x1a0] sm:$0xff]  }
 0x9fb   :  { %20843 = vmatprep.subr.bf16.mxu1 %v22357_v8 }
 0x9fe   :  { %20844 = vmatpush3.bf16.msra.mxu1 %v22357_v8  ;;  %v22379_v8 = vld [vmem:[%s27151_s3 + $0x1a8] sm:$0xff]  }
 0x9ff   :  { %20849 = vmatprep.subr.bf16.mxu1 %v22358_v55 }
 0xa01   :  { %20846 = vmatmul.mubr.bf16.vlgmr.msra.gmra.mrb[80].mxu1 %v14215_v0  ;;  %v14814_v0 = vcombine.low %v14791_v26, %v14793_v19 }
 0xa02   :  { %20850 = vmatpush3.bf16.msra.mxu1 %v22358_v55  ;;  %20865 = vmatprep.mubr.bf16.mxu1 %v14366_v33  ;;  %v14664_v55 = vcombine.low %v14647_v56, %v14649_v32 }
 0xa03   :  { %20851 = vmatprep.subr.bf16.mxu1 %v22359_v51 }
 0xa04   :  { %v14671_v33 = vpack.c.bf16 %v14665_v2, %v14664_v55 }
 0xa06   :  { %20852 = vmatpush3.bf16.msra.mxu1 %v22359_v51  ;;  %v14815_v51 = vcombine.low %v14795_v60, %v14797_v58 }
 0xa07   :  { %20853 = vmatprep.subr.bf16.mxu1 %v22360_v36 }
 0xa0a   :  { %20854 = vmatpush3.bf16.msra.mxu1 %v22360_v36  ;;  %v22383_v36 = vld [vmem:[%s27151_s3 + $0x1c8] sm:$0xff]  }
 0xa0b   :  { %20855 = vmatprep.subr.bf16.mxu1 %v22361_v52 }
 0xa0e   :  { %20856 = vmatpush3.bf16.msra.mxu1 %v22361_v52  ;;  %v14822_v52 = vpack.c.bf16 %v14815_v51, %v14814_v0 }
 0xa0f   :  { %20857 = vmatprep.subr.bf16.mxu1 %v22362_v27 }
 0xa12   :  { %20858 = vmatpush3.bf16.msra.mxu1 %v22362_v27  ;;  %v22384_v27 = vld [vmem:[%s27151_s3 + $0x1d0] sm:$0xff]  }
 0xa13   :  { %20859 = vmatprep.subr.bf16.mxu1 %v22363_v37 }
 0xa16   :  { %20860 = vmatpush3.bf16.msra.mxu1 %v22363_v37  ;;  %v22385_v37 = vld [vmem:[%s27151_s3 + $0x1d8] sm:$0xff]  }
 0xa17   :  { %20861 = vmatprep.subr.bf16.mxu1 %v22364_v30 }
 0xa1a   :  { %20862 = vmatpush3.bf16.msra.mxu1 %v22364_v30  ;;  %v22386_v30 = vld [vmem:[%s27151_s3 + $0x1e0] sm:$0xff]  }
 0xa1b   :  { %20863 = vmatprep.subr.bf16.mxu1 %v22365_v3 }
 0xa1e   :  { %20864 = vmatpush3.bf16.msra.mxu1 %v22365_v3  ;;  %v22387_v3 = vld [vmem:[%s27151_s3 + $0x1e8] sm:$0xff]  }
 0xa1f   :  { %20869 = vmatprep.subr.bf16.mxu1 %v22366_v39 }
 0xa21   :  { %20866 = vmatmul.mubr.bf16.vlgmr.msra.gmra.mrb[80].mxu1 %v14367_v31  ;;  %v14966_v31 = vcombine.low %v14943_v63, %v14945_v59 }
 0xa22   :  { %20870 = vmatpush3.bf16.msra.mxu1 %v22366_v39  ;;  %20885 = vmatprep.mubr.bf16.mxu1 %v14518_v14  ;;  %v14816_v39 = vcombine.low %v14799_v62, %v14801_v38 }
 0xa23   :  { %20871 = vmatprep.subr.bf16.mxu1 %v22367_v24 }
 0xa24   :  { %v14823_v14 = vpack.c.bf16 %v14817_v21, %v14816_v39 }
 0xa26   :  { %20872 = vmatpush3.bf16.msra.mxu1 %v22367_v24  ;;  %v14967_v24 = vcombine.low %v14947_v23, %v14949_v40 }
 0xa27   :  { %20873 = vmatprep.subr.bf16.mxu1 %v22368_v22 }
 0xa2a   :  { %20874 = vmatpush3.bf16.msra.mxu1 %v22368_v22  ;;  %v22391_v22 = vld [vmem:[%s27151_s3 + $0x208] sm:$0xff]  }
 0xa2b   :  { %20875 = vmatprep.subr.bf16.mxu1 %v22369_v6 }
 0xa2e   :  { %20876 = vmatpush3.bf16.msra.mxu1 %v22369_v6  ;;  %v14974_v6 = vpack.c.bf16 %v14967_v24, %v14966_v31 }
 0xa2f   :  { %20877 = vmatprep.subr.bf16.mxu1 %v22370_v42 }
 0xa32   :  { %20878 = vmatpush3.bf16.msra.mxu1 %v22370_v42  ;;  %v22392_v42 = vld [vmem:[%s27151_s3 + $0x210] sm:$0xff]  }
 0xa33   :  { %20879 = vmatprep.subr.bf16.mxu1 %v22371_v1 }
 0xa36   :  { %20880 = vmatpush3.bf16.msra.mxu1 %v22371_v1  ;;  %v22393_v1 = vld [vmem:[%s27151_s3 + $0x218] sm:$0xff]  }
 0xa37   :  { %20881 = vmatprep.subr.bf16.mxu1 %v22372_v34 }
 0xa3a   :  { %20882 = vmatpush3.bf16.msra.mxu1 %v22372_v34  ;;  %v22394_v34 = vld [vmem:[%s27151_s3 + $0x220] sm:$0xff]  }
 0xa3b   :  { %20883 = vmatprep.subr.bf16.mxu1 %v22373_v50 }
 0xa3e   :  { %20884 = vmatpush3.bf16.msra.mxu1 %v22373_v50  ;;  %v22397_v50 = vld [vmem:[%s27151_s3 + $0x238] sm:$0xff]  }
 0xa3f   :  { %20889 = vmatprep.subr.bf16.mxu1 %v22374_v61 }
 0xa41   :  { %20886 = vmatmul.mubr.bf16.vlgmr.msra.gmra.mrb[80].mxu1 %v14519_v47 }
 0xa42   :  { %20890 = vmatpush3.bf16.msra.mxu1 %v22374_v61  ;;  %20905 = vmatprep.mubr.bf16.mxu1 %v14670_v46 }
 0xa43   :  { %20891 = vmatprep.subr.bf16.mxu1 %v22375_v17 }
 0xa46   :  { %20892 = vmatpush3.bf16.msra.mxu1 %v22375_v17 }
 0xa47   :  { %20893 = vmatprep.subr.bf16.mxu1 %v22376_v53 }
 0xa4a   :  { %20894 = vmatpush3.bf16.msra.mxu1 %v22376_v53 }
 0xa4b   :  { %20895 = vmatprep.subr.bf16.mxu1 %v22377_v12 }
 0xa4e   :  { %20896 = vmatpush3.bf16.msra.mxu1 %v22377_v12 }
 0xa4f   :  { %20897 = vmatprep.subr.bf16.mxu1 %v22378_v18 }
 0xa52   :  { %20898 = vmatpush3.bf16.msra.mxu1 %v22378_v18 }
 0xa53   :  { %20899 = vmatprep.subr.bf16.mxu1 %v22379_v8 }
 0xa56   :  { %20900 = vmatpush3.bf16.msra.mxu1 %v22379_v8 }
 0xa57   :  { %20901 = vmatprep.subr.bf16.mxu1 %v22380_v54 }
 0xa5a   :  { %20902 = vmatpush3.bf16.msra.mxu1 %v22380_v54 }
 0xa5b   :  { %20903 = vmatprep.subr.bf16.mxu1 %v22381_v35 }
 0xa5e   :  { %20904 = vmatpush3.bf16.msra.mxu1 %v22381_v35 }
 0xa5f   :  { %20909 = vmatprep.subr.bf16.mxu1 %v22382_v20 }
 0xa61   :  { %20906 = vmatmul.mubr.bf16.vlgmr.msra.gmra.mrb[80].mxu1 %v14671_v33 }
 0xa62   :  { %20910 = vmatpush3.bf16.msra.mxu1 %v22382_v20  ;;  %20925 = vmatprep.mubr.bf16.mxu1 %v14822_v52 }
 0xa63   :  { %20911 = vmatprep.subr.bf16.mxu1 %v22383_v36 }
 0xa66   :  { %20912 = vmatpush3.bf16.msra.mxu1 %v22383_v36 }
 0xa67   :  { %20913 = vmatprep.subr.bf16.mxu1 %v22384_v27 }
 0xa6a   :  { %20914 = vmatpush3.bf16.msra.mxu1 %v22384_v27 }
 0xa6b   :  { %20915 = vmatprep.subr.bf16.mxu1 %v22385_v37 }
 0xa6e   :  { %20916 = vmatpush3.bf16.msra.mxu1 %v22385_v37 }
 0xa6f   :  { %20917 = vmatprep.subr.bf16.mxu1 %v22386_v30 }
 0xa72   :  { %20918 = vmatpush3.bf16.msra.mxu1 %v22386_v30 }
 0xa73   :  { %20919 = vmatprep.subr.bf16.mxu1 %v22387_v3 }
 0xa76   :  { %20920 = vmatpush3.bf16.msra.mxu1 %v22387_v3 }
 0xa77   :  { %20921 = vmatprep.subr.bf16.mxu1 %v22388_v11 }
 0xa7a   :  { %20922 = vmatpush3.bf16.msra.mxu1 %v22388_v11 }
 0xa7b   :  { %20923 = vmatprep.subr.bf16.mxu1 %v22389_v7 }
 0xa7e   :  { %20924 = vmatpush3.bf16.msra.mxu1 %v22389_v7 }
 0xa7f   :  { %20929 = vmatprep.subr.bf16.mxu1 %v22390_v25 }
 0xa81   :  { %20926 = vmatmul.mubr.bf16.vlgmr.msra.gmra.mrb[80].mxu1 %v14823_v14 }
 0xa82   :  { %20930 = vmatpush3.bf16.msra.mxu1 %v22390_v25  ;;  %20945 = vmatprep.mubr.bf16.mxu1 %v14974_v6 }
 0xa83   :  { %20931 = vmatprep.subr.bf16.mxu1 %v22391_v22 }
 0xa86   :  { %20932 = vmatpush3.bf16.msra.mxu1 %v22391_v22  ;;  %v15146_v22 = vld [vmem:[%s27152_s4 + $0x8] sm:$0xff] }
 0xa87   :  { %20933 = vmatprep.subr.bf16.mxu1 %v22392_v42 }
 0xa8a   :  { %20934 = vmatpush3.bf16.msra.mxu1 %v22392_v42 }
 0xa8b   :  { %20935 = vmatprep.subr.bf16.mxu1 %v22393_v1 }
 0xa8e   :  { %20936 = vmatpush3.bf16.msra.mxu1 %v22393_v1  ;;  %v15163_v1 = vlaneseq }
 0xa8f   :  { %20937 = vmatprep.subr.bf16.mxu1 %v22394_v34 }
 0xa92   :  { %20938 = vmatpush3.bf16.msra.mxu1 %v22394_v34  ;;  %v15164_v34 = vand.u32 127, %v15163_v1 }
 0xa93   :  { %20939 = vmatprep.subr.bf16.mxu1 %v22395_v4 }
 0xa96   :  { %20940 = vmatpush3.bf16.msra.mxu1 %v22395_v4  ;;  %v15166_v4 = vshrl.u32 %v15163_v1, 7 }
 0xa97   :  { %20941 = vmatprep.subr.bf16.mxu1 %v22396_v41 }
 0xa98   :  { %v15167_v28 = vsub.s32 %v15164_v34, %v15166_v4 }
 0xa9a   :  { %20942 = vmatpush3.bf16.msra.mxu1 %v22396_v41  ;;  %v15169_v41 = vadd.s32 4294967288, %v15164_v34 }
 0xa9b   :  { %20943 = vmatprep.subr.bf16.mxu1 %v22397_v50 }
 0xa9c   :  { %v15172_v15 = vsub.s32 %v15169_v41, %v15166_v4 }
 0xa9e   :  { %20944 = vmatpush3.bf16.msra.mxu1 %v22397_v50 }
 0xaa1   :  { %20946 = vmatmul.mubr.bf16.vlgmr.msra.gmra.mrb[80].mxu1 %v14975_v48 }
 0xb74   :  { %v20947_v16 = vpop.f32.mrb[80].mxu1 }
 0xb75   :  { %v15075_v61 = vpop.f32.mrb[81].mxu1 }
 0xb76   :  { %v20948_v49 = vpop.f32.mrb[82].mxu1 }
 0xb77   :  { %v15078_v43 = vpop.f32.mrb[83].mxu1 }
 0xb78   :  { %v15094_v47 = vadd.f32 %v15078_v43, %v15075_v61 }
 0xb7a   :  { %v15095_v17 = vadd.f32 %v20947_v16, %v15094_v47 }
 0xb7c   :  { %v15096_v46 = vadd.f32 %v20948_v49, %v15095_v17 }
 0xb7e   :  { %v15097_v53 = vrot.slane %v15096_v46, 4 }
 0xb80   :  { %v15098_v12 = vadd.f32 %v15097_v53, %v15096_v46 }
 0xb82   :  { %v15099_v18 = vrot.slane %v15098_v12, 2 }
 0xb84   :  { %v15100_v8 = vadd.f32 %v15099_v18, %v15098_v12 }
 0xb86   :  { %v15101_v54 = vrot.slane %v15100_v8, 1 }
 0xb88   :  { %v15102_v56 = vadd.f32 %v15101_v54, %v15100_v8 }
 0xb8a   :  { %v15104_v32 = vmul.f32 0.03125, %v15102_v56 }
 0xb8c   :  { %v15105_v10 = vsub.f32 %v15075_v61, %v15104_v32  ;;  %v15106_v35 = vsub.f32 %v15078_v43, %v15104_v32  ;;  %v15107_v13 = vsub.f32 %v20947_v16, %v15104_v32  ;;  %v15108_v26 = vsub.f32 %v20948_v49, %v15104_v32 }
 0xb8e   :  { %v15109_v19 = vmul.f32 %v15105_v10, %v15105_v10  ;;  %v15110_v60 = vmul.f32 %v15106_v35, %v15106_v35  ;;  %v15111_v58 = vmul.f32 %v15107_v13, %v15107_v13  ;;  %v15112_v2 = vmul.f32 %v15108_v26, %v15108_v26 }
 0xb90   :  { %v15113_v55 = vadd.f32 %v15110_v60, %v15109_v19 }
 0xb92   :  { %v15114_v20 = vadd.f32 %v15113_v55, %v15111_v58 }
 0xb94   :  { %v15115_v0 = vadd.f32 %v15114_v20, %v15112_v2 }
 0xb96   :  { %v15116_v51 = vrot.slane %v15115_v0, 4 }
 0xb98   :  { %v15117_v33 = vadd.f32 %v15116_v51, %v15115_v0 }
 0xb9a   :  { %v15118_v36 = vrot.slane %v15117_v33, 2 }
 0xb9c   :  { %v15119_v52 = vadd.f32 %v15118_v36, %v15117_v33 }
 0xb9e   :  { %v15120_v27 = vrot.slane %v15119_v52, 1 }
 0xba0   :  { %v15121_v37 = vadd.f32 %v15120_v27, %v15119_v52 }
 0xba2   :  { %v15122_v30 = vmul.f32 0.03125, %v15121_v37 }
 0xba4   :  { %v15123_v3 = vadd.f32 1e-05, %v15122_v30 }
 0xba6   :  { %22400 = vrsqrt.f32 %v15123_v3 }
 0xbb0   :  { %v22401_v11 = vpop.eup %22400 }
 0xbb1   :  { %v15126_v62 = vmul.f32 %v22401_v11, %v15106_v35  ;;  %v15127_v38 = vmul.f32 %v22401_v11, %v15107_v13  ;;  %v15125_v29 = vmul.f32 %v22401_v11, %v15105_v10  ;;  %v15128_v7 = vmul.f32 %v22401_v11, %v15108_v26 }
 0xbb3   :  { %vm15131_vm2 = vcmp.ge.f32.partialorder %v15127_v38, 0.0  ;;  %v15135_v63 = vmul.f32 0.2, %v15127_v38  ;;  %vm15129_vm3 = vcmp.ge.f32.partialorder %v15125_v29, 0.0  ;;  %v15133_v59 = vmul.f32 0.2, %v15125_v29 }
 0xbb4   :  { %vm15132_vm4 = vcmp.ge.f32.partialorder %v15128_v7, 0.0  ;;  %v15136_v23 = vmul.f32 0.2, %v15128_v7  ;;  %vm15130_vm5 = vcmp.ge.f32.partialorder %v15126_v62, 0.0  ;;  %v15134_v40 = vmul.f32 0.2, %v15126_v62 }
 0xbb5   :  { %v15139_v39 = vsel %vm15131_vm2, %v15127_v38, %v15135_v63  ;;  %v15137_v21 = vsel %vm15129_vm3, %v15125_v29, %v15133_v59 }
 0xbb6   :  { %v15149_v25 = vmul.f32 %v15145_v44, %v15139_v39  ;;  %15143 = vst [vmem:[%s27153_s6 + $0x10] sm:$0xff] %v15139_v39  ;;  %v15147_v31 = vmul.f32 %v15145_v44, %v15137_v21  ;;  %15141 = vst [vmem:[%s27153_s6] sm:$0xff] %v15137_v21  ;;  %v15140_v24 = vsel %vm15132_vm4, %v15128_v7, %v15136_v23 }
 0xbb7   :  { %v15138_v14 = vsel %vm15130_vm5, %v15126_v62, %v15134_v40  ;;  %15144 = vst [vmem:[%s27153_s6 + $0x18] sm:$0xff] %v15140_v24  ;;  %v15150_v6 = vmul.f32 %v15146_v22, %v15140_v24 }
 0xbb8   :  { %15142 = vst [vmem:[%s27153_s6 + $0x8] sm:$0xff] %v15138_v14  ;;  %15155 = vadd.xlane.f32.xlu1 %v15149_v25  ;;  %15151 = vadd.xlane.f32.xlu0 %v15147_v31  ;;  %v15148_v42 = vmul.f32 %v15146_v22, %v15138_v14 }
 0xbbc   :  { %15157 = vadd.xlane.f32.xlu1 %v15150_v6  ;;  %15153 = vadd.xlane.f32.xlu0 %v15148_v42 }
 0xc45   :  { %v15156_v45 = vpop.xlane.xlu1 %15155  ;;  %v15152_v50 = vpop.xlane.xlu0 %15151 }
 0xc46   :  { %v15179_v9 = vrot.slane %v15156_v45, %v15167_v28  ;;  %v15168_v48 = vrot.slane %v15152_v50, %v15167_v28 }
 0xc49   :  { %v15158_v5 = vpop.xlane.xlu1 %15157  ;;  %v15154_v57 = vpop.xlane.xlu0 %15153 }
 0xc4a   :  { %v15183_v16 = vrot.slane %v15158_v5, %v15172_v15  ;;  %v15173_v61 = vrot.slane %v15154_v57, %v15172_v15 }
 0xc4c   :  { %v15175_v49 = vsel %vm15174_vm6, %v15173_v61, %v15168_v48  ;;  %v15184_v43 = vsel %vm15174_vm6, %v15183_v16, %v15179_v9 }
 0xc4d   :  { %v15186_v47 = vsel %vm15185_vm7, %v15184_v43, %v15175_v49 }
 0xc4e   :  { %v15189_v17 = vsel %vm15188_vm8, %v15186_v47, 0.0 }
 0xc4f   :  { %15190 = vadd.xlane.f32.xlu0 %v15189_v17 }
 0xcdc   :  { %v15191_v46 = vpop.xlane.xlu0 %15190 }
 0xcdd   :  { %v18326_v53 = vmul.f32 -1.442695, %v15191_v46 }
 0xcdf   :  { %22402 = vpow2.f32 %v18326_v53 }
 0xce9   :  { %v22403_v12 = vpop.eup %22402 }
 0xcea   :  { %v15195_v18 = vadd.f32 1.0, %v22403_v12 }
 0xcec   :  { %22404 = vrcp.f32 %v15195_v18 }
 0xcf6   :  { %v22405_v8 = vpop.eup %22404 }
 0xcf7   :  { %15199 = vst.msk [vmem:[%s27154_s5] sm:$0x3] %vm15198_vm9, %v22405_v8 }

</bundles_post_ra>
